<compile_context>
chip_gen: v7x
topology: tpu7x:2x2x1
jax: 0.10.0
libtpu: 0.0.40
codegen_flags: <defaults>
</compile_context>

<pallas_src>
import numpy as np
import jax
import jax.numpy as jnp
from jax.experimental import pallas as pl
from jax.experimental.pallas import tpu as pltpu

BB = 32                               # images per grid step (multiple of 16 for bf16 tiles)
BF16 = jnp.bfloat16
EXACT = jax.lax.Precision.HIGHEST     # only for tiny trace-time weight re-layout


def _dot(a, b):
    # bf16 x bf16 MXU matmul with f32 accumulation.
    return jnp.dot(a, b, preferred_element_type=jnp.float32)


# -----------------------------------------------------------------------------
# Fused kernel: conv1+ReLU+pool -> conv2+ReLU+pool -> flatten -> linear
# -----------------------------------------------------------------------------
def cnn_kernel(x_ref, w1f_ref, b1_ref, w2t_ref, b2_ref,
               r1e_ref, r1o_ref, r2e_ref, r2o_ref, w3_ref, b3_ref,
               feat_ref, logits_ref,
               hp1_s, p1p_s, hp2_s):
    """One grid step = BB images.  Activation rows are h-major / batch-minor
    (row = h*BB + b); activation cols are w-major / channel-minor (w*C + c).

    x_ref     : (28*BB, 160) bf16  kh-expanded padded input, col = kh*32 + wp
    w1f_ref   : (160, 448)   bf16  conv1 Toeplitz weight, row = kh*32+wp, col = w*16+co
    b1_ref    : (1, 448)     f32
    w2t_ref   : (5, 224, 448) bf16 conv2 Toeplitz per kh, row = wi*16+ci, col = w*32+co
    b2_ref    : (1, 448)     f32
    r1e/r1o   : (448, 224)   bf16  0/1 selection of even / odd w-groups (layer 1, C=16)
    r2e/r2o   : (448, 224)   bf16  0/1 selection of even / odd w-groups (layer 2, C=32)
    w3_ref    : (1568, 128)  bf16  linear weight in kernel feature order, N padded to 128
    b3_ref    : (1, 128)     f32
    feat_ref  : (BB, 1568)   f32   flattened pooled features, col = 224*i + 32*j + co
    logits_ref: (BB, 128)    f32   logits (cols 10..127 are zero padding)
    hp1_s     : (14*BB, 448) bf16  scratch: H-pooled conv1 activations
    p1p_s     : (18*BB, 224) bf16  scratch: pooled layer-1 map with conv2 H-padding
    hp2_s     : (7*BB, 448)  bf16  scratch: H-pooled conv2 activations
    """
    # ----- conv1: single kh-fused Toeplitz matmul + bias + ReLU (f32) ---------
    y1 = _dot(x_ref[...], w1f_ref[...])                       # (28*BB, 448) f32
    y1 = jnp.maximum(y1 + b1_ref[...], 0.0)

    # ----- maxpool #1, H direction: pair-max -> aligned bf16 scratch stores ---
    for i in range(14):
        hp1_s[i * BB:(i + 1) * BB, :] = jnp.maximum(
            y1[2 * i * BB:(2 * i + 1) * BB, :],
            y1[(2 * i + 1) * BB:(2 * i + 2) * BB, :]).astype(BF16)
    hp1 = hp1_s[...]                                          # (14*BB, 448) bf16

    # ----- maxpool #1, W direction: max of even/odd 0/1-selection matmuls -----
    p1 = jnp.maximum(_dot(hp1, r1e_ref[...]),
                     _dot(hp1, r1o_ref[...]))                 # (14*BB, 224) f32

    # ----- conv2 staging: zero H-pad rows + pooled rows, all bf16 -------------
    p1p_s[0:2 * BB, :] = jnp.zeros((2 * BB, 224), BF16)
    p1p_s[16 * BB:18 * BB, :] = jnp.zeros((2 * BB, 224), BF16)
    p1p_s[2 * BB:16 * BB, :] = p1.astype(BF16)

    # ----- conv2: 5 kh-tap Toeplitz matmuls (K=224 each) + bias + ReLU --------
    acc2 = _dot(p1p_s[0:14 * BB, :], w2t_ref[0])
    for kh in range(1, 5):
        acc2 = acc2 + _dot(p1p_s[kh * BB:(kh + 14) * BB, :], w2t_ref[kh])
    y2 = jnp.maximum(acc2 + b2_ref[...], 0.0)                 # (14*BB, 448) f32

    # ----- maxpool #2, H then W (same scheme as layer 1) ----------------------
    for i in range(7):
        hp2_s[i * BB:(i + 1) * BB, :] = jnp.maximum(
            y2[2 * i * BB:(2 * i + 1) * BB, :],
            y2[(2 * i + 1) * BB:(2 * i + 2) * BB, :]).astype(BF16)
    hp2 = hp2_s[...]                                          # (7*BB, 448) bf16
    p2 = jnp.maximum(_dot(hp2, r2e_ref[...]),
                     _dot(hp2, r2o_ref[...]))                 # (7*BB, 224) f32

    # ----- flatten (lane-dense (BB,1568)) + fused Linear(1568 -> 10) ----------
    q = jnp.concatenate([p2[i * BB:(i + 1) * BB, :] for i in range(7)], axis=1)
    feat_ref[...] = q                                         # (BB, 1568) f32
    logits_ref[...] = _dot(q.astype(BF16), w3_ref[...]) + b3_ref[...]


# -----------------------------------------------------------------------------
# Weight / constant re-layout helpers (trace time, exact math)
# -----------------------------------------------------------------------------
def _toeplitz_w1(w1):
    # w1: (16, 1, 5, 5) OIHW.  Result[kh, wp, w*16+co] = w1[co,0,kh,wp-w], 0<=wp-w<=4.
    T = np.zeros((5, 32, 28), np.float32)
    for kw in range(5):
        T[kw, np.arange(28) + kw, np.arange(28)] = 1.0
    w1t = jnp.einsum('qpw,chq->hpwc', jnp.asarray(T), w1[:, 0], precision=EXACT)
    return w1t.reshape(5, 32, 28 * 16)


def _toeplitz_w2(w2):
    # w2: (32, 16, 5, 5).  Result[kh, wi*16+ci, w*32+co] = w2[co,ci,kh,wi+2-w] (valid taps).
    T = np.zeros((5, 14, 14), np.float32)
    for kw in range(5):
        for w in range(14):
            wi = w + kw - 2
            if 0 <= wi < 14:
                T[kw, wi, w] = 1.0
    w2t = jnp.einsum('qvw,cdhq->hvdwc', jnp.asarray(T), w2, precision=EXACT)
    return w2t.reshape(5, 14 * 16, 14 * 32)


def _colsel_pair(W, C):
    # 0/1 matrices (2*W*C, W*C) selecting even-w / odd-w channel groups.
    Se = np.zeros((2 * W * C, W * C), np.float32)
    So = np.zeros((2 * W * C, W * C), np.float32)
    j = np.repeat(np.arange(W), C)
    c = np.tile(np.arange(C), W)
    Se[(2 * j) * C + c, j * C + c] = 1.0
    So[(2 * j + 1) * C + c, j * C + c] = 1.0
    return Se, So


# -----------------------------------------------------------------------------
# Forward wrapper
# -----------------------------------------------------------------------------
@jax.jit
def cnn_forward(x, params):
    """x: (B, 1, 28, 28) float32 NCHW.  Returns (logits (B,10), flat (B,1568))."""
    w1, b1, w2, b2, w3, b3 = params
    B = x.shape[0]
    Bp = ((B + BB - 1) // BB) * BB
    nb = Bp // BB

    # Input packing: pad spatially, im2col over kh (K = 5*32 = 160), then pack
    # rows h-major / batch-minor and cast to bf16 for the MXU + cheap DMA.
    xs = x.astype(jnp.float32)[:, 0]                                  # (B, 28, 28)
    xs = jnp.pad(xs, ((0, Bp - B), (2, 2), (2, 2)))                   # (Bp, 32, 32)
    xkh = jnp.stack([xs[:, kh:kh + 28, :] for kh in range(5)], axis=2)  # (Bp,28,5,32)
    xkh = xkh.reshape(Bp, 28, 160)
    xin = (xkh.reshape(nb, BB, 28, 160).transpose(0, 2, 1, 3)
              .reshape(nb, 28 * BB, 160).astype(BF16))

    # Weight re-layout (bf16 for every matmul operand; biases stay f32).
    w1f = _toeplitz_w1(w1.astype(jnp.float32)).reshape(160, 448).astype(BF16)
    w2t = _toeplitz_w2(w2.astype(jnp.float32)).astype(BF16)            # (5, 224, 448)
    b1row = jnp.tile(b1.astype(jnp.float32), 28)[None, :]              # (1, 448)
    b2row = jnp.tile(b2.astype(jnp.float32), 14)[None, :]              # (1, 448)
    r1e_np, r1o_np = _colsel_pair(14, 16)                              # (448, 224) x2
    r2e_np, r2o_np = _colsel_pair(7, 32)                               # (448, 224) x2
    r1e, r1o = jnp.asarray(r1e_np, BF16), jnp.asarray(r1o_np, BF16)
    r2e, r2o = jnp.asarray(r2e_np, BF16), jnp.asarray(r2o_np, BF16)
    # Linear weight permuted to kernel feature order (224*i + 32*j + co), N padded to 128.
    w3p = (w3.astype(jnp.float32).reshape(10, 32, 7, 7)
             .transpose(2, 3, 1, 0).reshape(1568, 10))
    w3p = jnp.pad(w3p, ((0, 0), (0, 118))).astype(BF16)                # (1568, 128)
    b3row = jnp.pad(b3.astype(jnp.float32), (0, 118))[None, :]         # (1, 128)

    feat_q, logits_p = pl.pallas_call(
        cnn_kernel,
        out_shape=(jax.ShapeDtypeStruct((Bp, 1568), jnp.float32),
                   jax.ShapeDtypeStruct((Bp, 128), jnp.float32)),
        grid=(nb,),
        in_specs=[
            pl.BlockSpec((None, 28 * BB, 160), lambda i: (i, 0, 0)),   # kh-expanded input
            pl.BlockSpec((160, 448), lambda i: (0, 0)),                # w1f (resident)
            pl.BlockSpec((1, 448), lambda i: (0, 0)),                  # b1
            pl.BlockSpec((5, 224, 448), lambda i: (0, 0, 0)),          # w2t (resident)
            pl.BlockSpec((1, 448), lambda i: (0, 0)),                  # b2
            pl.BlockSpec((448, 224), lambda i: (0, 0)),                # r1 even
            pl.BlockSpec((448, 224), lambda i: (0, 0)),                # r1 odd
            pl.BlockSpec((448, 224), lambda i: (0, 0)),                # r2 even
            pl.BlockSpec((448, 224), lambda i: (0, 0)),                # r2 odd
            pl.BlockSpec((1568, 128), lambda i: (0, 0)),               # w3 (fused linear)
            pl.BlockSpec((1, 128), lambda i: (0, 0)),                  # b3
        ],
        out_specs=(
            pl.BlockSpec((BB, 1568), lambda i: (i, 0)),                # lane-dense features
            pl.BlockSpec((BB, 128), lambda i: (i, 0)),                 # padded logits
        ),
        scratch_shapes=[
            pltpu.VMEM((14 * BB, 448), BF16),                          # hp1_s
            pltpu.VMEM((18 * BB, 224), BF16),                          # p1p_s (H-padded)
            pltpu.VMEM((7 * BB, 448), BF16),                           # hp2_s
        ],
        compiler_params=pltpu.CompilerParams(
            dimension_semantics=("parallel",),
            vmem_limit_bytes=48 * 1024 * 1024),
    )(xin, w1f, b1row, w2t, b2row, r1e, r1o, r2e, r2o, w3p, b3row)

    # PyTorch's x.view(B,-1) flattens NCHW: f = co*49 + 7*i + j.  The kernel emits
    # col = 224*i + 32*j + co, so a tiny (B,1568) reshape/transpose maps it back.
    q = feat_q[:B]
    x_flat = q.reshape(B, 7, 7, 32).transpose(0, 3, 1, 2).reshape(B, 32 * 7 * 7)
    logits = logits_p[:B, :10]
    return logits, x_flat


# -----------------------------------------------------------------------------
# Pure-JAX reference (standard XLA ops) for correctness checking.
# -----------------------------------------------------------------------------
def ref_forward(x, w1, b1, w2, b2, w3, b3):
    HI = jax.lax.Precision.HIGHEST
    dn = ('NCHW', 'OIHW', 'NCHW')
    y = jax.lax.conv_general_dilated(x, w1, (1, 1), ((2, 2), (2, 2)),
                                     dimension_numbers=dn, precision=HI)
    y = jnp.maximum(y + b1.reshape(1, -1, 1, 1), 0.0)
    y = jax.lax.reduce_window(y, -jnp.inf, jax.lax.max,
                              (1, 1, 2, 2), (1, 1, 2, 2), 'VALID')
    y = jax.lax.conv_general_dilated(y, w2, (1, 1), ((2, 2), (2, 2)),
                                     dimension_numbers=dn, precision=HI)
    y = jnp.maximum(y + b2.reshape(1, -1, 1, 1), 0.0)
    y = jax.lax.reduce_window(y, -jnp.inf, jax.lax.max,
                              (1, 1, 2, 2), (1, 1, 2, 2), 'VALID')
    flat = y.reshape(y.shape[0], -1)
    logits = jnp.dot(flat, w3.T, precision=HI) + b3
    return logits, flat


def init_params(key):
    ks = jax.random.split(key, 6)
    w1 = jax.random.normal(ks[0], (16, 1, 5, 5), jnp.float32) * 0.15
    b1 = jax.random.normal(ks[1], (16,), jnp.float32) * 0.10
    w2 = jax.random.normal(ks[2], (32, 16, 5, 5), jnp.float32) * 0.04
    b2 = jax.random.normal(ks[3], (32,), jnp.float32) * 0.10
    w3 = jax.random.normal(ks[4], (10, 32 * 7 * 7), jnp.float32) * 0.02
    b3 = jax.random.normal(ks[5], (10,), jnp.float32) * 0.10
    return (w1, b1, w2, b2, w3, b3)


if __name__ == "__main__":
    key = jax.random.PRNGKey(0)
    pkey, xkey = jax.random.split(key)
    params = init_params(pkey)
    # MNIST-shaped input (spatial size fixed by Linear(32*7*7, 10)); B=2 also
    # exercises the batch-padding path (2 -> 32).
    x = jax.random.normal(xkey, (2, 1, 28, 28), jnp.float32)          # NCHW

    logits, x_flat = cnn_forward(x, params)
    jax.block_until_ready((logits, x_flat))

    assert logits.shape == (2, 10) and x_flat.shape == (2, 32 * 7 * 7)
    ref_logits, ref_flat = ref_forward(x, *params)
    # bf16 MXU passes with f32 accumulation: ~0.5% relative error budget.
    np.testing.assert_allclose(np.asarray(x_flat), np.asarray(ref_flat),
                               rtol=2e-2, atol=2e-2)
    np.testing.assert_allclose(np.asarray(logits), np.asarray(ref_logits),
                               rtol=2e-2, atol=2e-2)
    print("KERNEL_OK")
</pallas_src>

<mosaic_0001>
module attributes {stable_mosaic.version = 11 : i64} {
  func.func @cnn_kernel(%arg0: i32, %arg1: memref<1x896x160xbf16, #tpu.memory_space<vmem>>, %arg2: memref<160x448xbf16, #tpu.memory_space<vmem>>, %arg3: memref<1x448xf32, #tpu.memory_space<vmem>>, %arg4: memref<5x224x448xbf16, #tpu.memory_space<vmem>>, %arg5: memref<1x448xf32, #tpu.memory_space<vmem>>, %arg6: memref<448x224xbf16, #tpu.memory_space<vmem>>, %arg7: memref<448x224xbf16, #tpu.memory_space<vmem>>, %arg8: memref<448x224xbf16, #tpu.memory_space<vmem>>, %arg9: memref<448x224xbf16, #tpu.memory_space<vmem>>, %arg10: memref<1568x128xbf16, #tpu.memory_space<vmem>>, %arg11: memref<1x128xf32, #tpu.memory_space<vmem>>, %arg12: memref<32x1568xf32, #tpu.memory_space<vmem>>, %arg13: memref<32x128xf32, #tpu.memory_space<vmem>>, %arg14: memref<448x448xbf16, #tpu.memory_space<vmem>>, %arg15: memref<576x224xbf16, #tpu.memory_space<vmem>>, %arg16: memref<224x448xbf16, #tpu.memory_space<vmem>>) attributes {dimension_semantics = [#tpu.dimension_semantics<parallel>], iteration_bounds = array<i64: 1>, scalar_prefetch = 0 : i64, scratch_operands = 3 : i64, tpu.core_type = #tpu.core_type<tc>, window_params = [{transform_indices = @transform_0, window_bounds = array<i64: 1, 896, 160>}, {pipeline_mode = #tpu.pipeline_mode<synchronous>, transform_indices = @transform_1, window_bounds = array<i64: 160, 448>}, {pipeline_mode = #tpu.pipeline_mode<synchronous>, transform_indices = @transform_2, window_bounds = array<i64: 1, 448>}, {pipeline_mode = #tpu.pipeline_mode<synchronous>, transform_indices = @transform_3, window_bounds = array<i64: 5, 224, 448>}, {pipeline_mode = #tpu.pipeline_mode<synchronous>, transform_indices = @transform_4, window_bounds = array<i64: 1, 448>}, {pipeline_mode = #tpu.pipeline_mode<synchronous>, transform_indices = @transform_5, window_bounds = array<i64: 448, 224>}, {pipeline_mode = #tpu.pipeline_mode<synchronous>, transform_indices = @transform_6, window_bounds = array<i64: 448, 224>}, {pipeline_mode = #tpu.pipeline_mode<synchronous>, transform_indices = @transform_7, window_bounds = array<i64: 448, 224>}, {pipeline_mode = #tpu.pipeline_mode<synchronous>, transform_indices = @transform_8, window_bounds = array<i64: 448, 224>}, {pipeline_mode = #tpu.pipeline_mode<synchronous>, transform_indices = @transform_9, window_bounds = array<i64: 1568, 128>}, {pipeline_mode = #tpu.pipeline_mode<synchronous>, transform_indices = @transform_10, window_bounds = array<i64: 1, 128>}, {transform_indices = @transform_11, window_bounds = array<i64: 32, 1568>}, {transform_indices = @transform_12, window_bounds = array<i64: 32, 128>}]} {
    %c0 = arith.constant 0 : index
    %c0_0 = arith.constant 0 : index
    %c0_1 = arith.constant 0 : index
    %0 = vector.load %arg1[%c0, %c0_0, %c0_1] : memref<1x896x160xbf16, #tpu.memory_space<vmem>>, vector<1x896x160xbf16>
    %1 = vector.shape_cast %0 : vector<1x896x160xbf16> to vector<896x160xbf16>
    %c0_2 = arith.constant 0 : index
    %c0_3 = arith.constant 0 : index
    %2 = vector.load %arg2[%c0_2, %c0_3] : memref<160x448xbf16, #tpu.memory_space<vmem>>, vector<160x448xbf16>
    %cst = arith.constant dense<0.000000e+00> : vector<896x448xf32>
    %3 = tpu.matmul %1, %2, %cst {dimension_numbers = #tpu.dot_dimension_numbers<[1], [0], [0], [1], [0, 0, 1, 1], [], []>} : vector<896x160xbf16>, vector<160x448xbf16>, vector<896x448xf32> -> vector<896x448xf32>
    %c0_4 = arith.constant 0 : index
    %c0_5 = arith.constant 0 : index
    %4 = vector.load %arg3[%c0_4, %c0_5] : memref<1x448xf32, #tpu.memory_space<vmem>>, vector<1x448xf32>
    %5 = vector.broadcast %4 : vector<1x448xf32> to vector<896x448xf32>
    %6 = arith.addf %3, %5 : vector<896x448xf32>
    %cst_6 = arith.constant 0.000000e+00 : f32
    %7 = vector.broadcast %cst_6 : f32 to vector<896x448xf32>
    %8 = arith.maximumf %6, %7 : vector<896x448xf32>
    %9 = vector.extract_strided_slice %8 {offsets = [0, 0], sizes = [32, 448], strides = [1, 1]} : vector<896x448xf32> to vector<32x448xf32>
    %10 = vector.extract_strided_slice %8 {offsets = [32, 0], sizes = [32, 448], strides = [1, 1]} : vector<896x448xf32> to vector<32x448xf32>
    %11 = arith.maximumf %9, %10 : vector<32x448xf32>
    %12 = arith.truncf %11 : vector<32x448xf32> to vector<32x448xbf16>
    %c0_7 = arith.constant 0 : index
    %c0_8 = arith.constant 0 : index
    %13 = vector.load %arg14[%c0_7, %c0_8] : memref<448x448xbf16, #tpu.memory_space<vmem>>, vector<32x448xbf16>
    tpu.vector_store %arg14[%c0_7, %c0_8], %12 {strides = array<i32>} : memref<448x448xbf16, #tpu.memory_space<vmem>>, vector<32x448xbf16>,
    %14 = vector.extract_strided_slice %8 {offsets = [64, 0], sizes = [32, 448], strides = [1, 1]} : vector<896x448xf32> to vector<32x448xf32>
    %15 = vector.extract_strided_slice %8 {offsets = [96, 0], sizes = [32, 448], strides = [1, 1]} : vector<896x448xf32> to vector<32x448xf32>
    %16 = arith.maximumf %14, %15 : vector<32x448xf32>
    %17 = arith.truncf %16 : vector<32x448xf32> to vector<32x448xbf16>
    %c32 = arith.constant 32 : index
    %c0_9 = arith.constant 0 : index
    %18 = vector.load %arg14[%c32, %c0_9] : memref<448x448xbf16, #tpu.memory_space<vmem>>, vector<32x448xbf16>
    tpu.vector_store %arg14[%c32, %c0_9], %17 {strides = array<i32>} : memref<448x448xbf16, #tpu.memory_space<vmem>>, vector<32x448xbf16>,
    %19 = vector.extract_strided_slice %8 {offsets = [128, 0], sizes = [32, 448], strides = [1, 1]} : vector<896x448xf32> to vector<32x448xf32>
    %20 = vector.extract_strided_slice %8 {offsets = [160, 0], sizes = [32, 448], strides = [1, 1]} : vector<896x448xf32> to vector<32x448xf32>
    %21 = arith.maximumf %19, %20 : vector<32x448xf32>
    %22 = arith.truncf %21 : vector<32x448xf32> to vector<32x448xbf16>
    %c64 = arith.constant 64 : index
    %c0_10 = arith.constant 0 : index
    %23 = vector.load %arg14[%c64, %c0_10] : memref<448x448xbf16, #tpu.memory_space<vmem>>, vector<32x448xbf16>
    tpu.vector_store %arg14[%c64, %c0_10], %22 {strides = array<i32>} : memref<448x448xbf16, #tpu.memory_space<vmem>>, vector<32x448xbf16>,
    %24 = vector.extract_strided_slice %8 {offsets = [192, 0], sizes = [32, 448], strides = [1, 1]} : vector<896x448xf32> to vector<32x448xf32>
    %25 = vector.extract_strided_slice %8 {offsets = [224, 0], sizes = [32, 448], strides = [1, 1]} : vector<896x448xf32> to vector<32x448xf32>
    %26 = arith.maximumf %24, %25 : vector<32x448xf32>
    %27 = arith.truncf %26 : vector<32x448xf32> to vector<32x448xbf16>
    %c96 = arith.constant 96 : index
    %c0_11 = arith.constant 0 : index
    %28 = vector.load %arg14[%c96, %c0_11] : memref<448x448xbf16, #tpu.memory_space<vmem>>, vector<32x448xbf16>
    tpu.vector_store %arg14[%c96, %c0_11], %27 {strides = array<i32>} : memref<448x448xbf16, #tpu.memory_space<vmem>>, vector<32x448xbf16>,
    %29 = vector.extract_strided_slice %8 {offsets = [256, 0], sizes = [32, 448], strides = [1, 1]} : vector<896x448xf32> to vector<32x448xf32>
    %30 = vector.extract_strided_slice %8 {offsets = [288, 0], sizes = [32, 448], strides = [1, 1]} : vector<896x448xf32> to vector<32x448xf32>
    %31 = arith.maximumf %29, %30 : vector<32x448xf32>
    %32 = arith.truncf %31 : vector<32x448xf32> to vector<32x448xbf16>
    %c128 = arith.constant 128 : index
    %c0_12 = arith.constant 0 : index
    %33 = vector.load %arg14[%c128, %c0_12] : memref<448x448xbf16, #tpu.memory_space<vmem>>, vector<32x448xbf16>
    tpu.vector_store %arg14[%c128, %c0_12], %32 {strides = array<i32>} : memref<448x448xbf16, #tpu.memory_space<vmem>>, vector<32x448xbf16>,
    %34 = vector.extract_strided_slice %8 {offsets = [320, 0], sizes = [32, 448], strides = [1, 1]} : vector<896x448xf32> to vector<32x448xf32>
    %35 = vector.extract_strided_slice %8 {offsets = [352, 0], sizes = [32, 448], strides = [1, 1]} : vector<896x448xf32> to vector<32x448xf32>
    %36 = arith.maximumf %34, %35 : vector<32x448xf32>
    %37 = arith.truncf %36 : vector<32x448xf32> to vector<32x448xbf16>
    %c160 = arith.constant 160 : index
    %c0_13 = arith.constant 0 : index
    %38 = vector.load %arg14[%c160, %c0_13] : memref<448x448xbf16, #tpu.memory_space<vmem>>, vector<32x448xbf16>
    tpu.vector_store %arg14[%c160, %c0_13], %37 {strides = array<i32>} : memref<448x448xbf16, #tpu.memory_space<vmem>>, vector<32x448xbf16>,
    %39 = vector.extract_strided_slice %8 {offsets = [384, 0], sizes = [32, 448], strides = [1, 1]} : vector<896x448xf32> to vector<32x448xf32>
    %40 = vector.extract_strided_slice %8 {offsets = [416, 0], sizes = [32, 448], strides = [1, 1]} : vector<896x448xf32> to vector<32x448xf32>
    %41 = arith.maximumf %39, %40 : vector<32x448xf32>
    %42 = arith.truncf %41 : vector<32x448xf32> to vector<32x448xbf16>
    %c192 = arith.constant 192 : index
    %c0_14 = arith.constant 0 : index
    %43 = vector.load %arg14[%c192, %c0_14] : memref<448x448xbf16, #tpu.memory_space<vmem>>, vector<32x448xbf16>
    tpu.vector_store %arg14[%c192, %c0_14], %42 {strides = array<i32>} : memref<448x448xbf16, #tpu.memory_space<vmem>>, vector<32x448xbf16>,
    %44 = vector.extract_strided_slice %8 {offsets = [448, 0], sizes = [32, 448], strides = [1, 1]} : vector<896x448xf32> to vector<32x448xf32>
    %45 = vector.extract_strided_slice %8 {offsets = [480, 0], sizes = [32, 448], strides = [1, 1]} : vector<896x448xf32> to vector<32x448xf32>
    %46 = arith.maximumf %44, %45 : vector<32x448xf32>
    %47 = arith.truncf %46 : vector<32x448xf32> to vector<32x448xbf16>
    %c224 = arith.constant 224 : index
    %c0_15 = arith.constant 0 : index
    %48 = vector.load %arg14[%c224, %c0_15] : memref<448x448xbf16, #tpu.memory_space<vmem>>, vector<32x448xbf16>
    tpu.vector_store %arg14[%c224, %c0_15], %47 {strides = array<i32>} : memref<448x448xbf16, #tpu.memory_space<vmem>>, vector<32x448xbf16>,
    %49 = vector.extract_strided_slice %8 {offsets = [512, 0], sizes = [32, 448], strides = [1, 1]} : vector<896x448xf32> to vector<32x448xf32>
    %50 = vector.extract_strided_slice %8 {offsets = [544, 0], sizes = [32, 448], strides = [1, 1]} : vector<896x448xf32> to vector<32x448xf32>
    %51 = arith.maximumf %49, %50 : vector<32x448xf32>
    %52 = arith.truncf %51 : vector<32x448xf32> to vector<32x448xbf16>
    %c256 = arith.constant 256 : index
    %c0_16 = arith.constant 0 : index
    %53 = vector.load %arg14[%c256, %c0_16] : memref<448x448xbf16, #tpu.memory_space<vmem>>, vector<32x448xbf16>
    tpu.vector_store %arg14[%c256, %c0_16], %52 {strides = array<i32>} : memref<448x448xbf16, #tpu.memory_space<vmem>>, vector<32x448xbf16>,
    %54 = vector.extract_strided_slice %8 {offsets = [576, 0], sizes = [32, 448], strides = [1, 1]} : vector<896x448xf32> to vector<32x448xf32>
    %55 = vector.extract_strided_slice %8 {offsets = [608, 0], sizes = [32, 448], strides = [1, 1]} : vector<896x448xf32> to vector<32x448xf32>
    %56 = arith.maximumf %54, %55 : vector<32x448xf32>
    %57 = arith.truncf %56 : vector<32x448xf32> to vector<32x448xbf16>
    %c288 = arith.constant 288 : index
    %c0_17 = arith.constant 0 : index
    %58 = vector.load %arg14[%c288, %c0_17] : memref<448x448xbf16, #tpu.memory_space<vmem>>, vector<32x448xbf16>
    tpu.vector_store %arg14[%c288, %c0_17], %57 {strides = array<i32>} : memref<448x448xbf16, #tpu.memory_space<vmem>>, vector<32x448xbf16>,
    %59 = vector.extract_strided_slice %8 {offsets = [640, 0], sizes = [32, 448], strides = [1, 1]} : vector<896x448xf32> to vector<32x448xf32>
    %60 = vector.extract_strided_slice %8 {offsets = [672, 0], sizes = [32, 448], strides = [1, 1]} : vector<896x448xf32> to vector<32x448xf32>
    %61 = arith.maximumf %59, %60 : vector<32x448xf32>
    %62 = arith.truncf %61 : vector<32x448xf32> to vector<32x448xbf16>
    %c320 = arith.constant 320 : index
    %c0_18 = arith.constant 0 : index
    %63 = vector.load %arg14[%c320, %c0_18] : memref<448x448xbf16, #tpu.memory_space<vmem>>, vector<32x448xbf16>
    tpu.vector_store %arg14[%c320, %c0_18], %62 {strides = array<i32>} : memref<448x448xbf16, #tpu.memory_space<vmem>>, vector<32x448xbf16>,
    %64 = vector.extract_strided_slice %8 {offsets = [704, 0], sizes = [32, 448], strides = [1, 1]} : vector<896x448xf32> to vector<32x448xf32>
    %65 = vector.extract_strided_slice %8 {offsets = [736, 0], sizes = [32, 448], strides = [1, 1]} : vector<896x448xf32> to vector<32x448xf32>
    %66 = arith.maximumf %64, %65 : vector<32x448xf32>
    %67 = arith.truncf %66 : vector<32x448xf32> to vector<32x448xbf16>
    %c352 = arith.constant 352 : index
    %c0_19 = arith.constant 0 : index
    %68 = vector.load %arg14[%c352, %c0_19] : memref<448x448xbf16, #tpu.memory_space<vmem>>, vector<32x448xbf16>
    tpu.vector_store %arg14[%c352, %c0_19], %67 {strides = array<i32>} : memref<448x448xbf16, #tpu.memory_space<vmem>>, vector<32x448xbf16>,
    %69 = vector.extract_strided_slice %8 {offsets = [768, 0], sizes = [32, 448], strides = [1, 1]} : vector<896x448xf32> to vector<32x448xf32>
    %70 = vector.extract_strided_slice %8 {offsets = [800, 0], sizes = [32, 448], strides = [1, 1]} : vector<896x448xf32> to vector<32x448xf32>
    %71 = arith.maximumf %69, %70 : vector<32x448xf32>
    %72 = arith.truncf %71 : vector<32x448xf32> to vector<32x448xbf16>
    %c384 = arith.constant 384 : index
    %c0_20 = arith.constant 0 : index
    %73 = vector.load %arg14[%c384, %c0_20] : memref<448x448xbf16, #tpu.memory_space<vmem>>, vector<32x448xbf16>
    tpu.vector_store %arg14[%c384, %c0_20], %72 {strides = array<i32>} : memref<448x448xbf16, #tpu.memory_space<vmem>>, vector<32x448xbf16>,
    %74 = vector.extract_strided_slice %8 {offsets = [832, 0], sizes = [32, 448], strides = [1, 1]} : vector<896x448xf32> to vector<32x448xf32>
    %75 = vector.extract_strided_slice %8 {offsets = [864, 0], sizes = [32, 448], strides = [1, 1]} : vector<896x448xf32> to vector<32x448xf32>
    %76 = arith.maximumf %74, %75 : vector<32x448xf32>
    %77 = arith.truncf %76 : vector<32x448xf32> to vector<32x448xbf16>
    %c416 = arith.constant 416 : index
    %c0_21 = arith.constant 0 : index
    %78 = vector.load %arg14[%c416, %c0_21] : memref<448x448xbf16, #tpu.memory_space<vmem>>, vector<32x448xbf16>
    tpu.vector_store %arg14[%c416, %c0_21], %77 {strides = array<i32>} : memref<448x448xbf16, #tpu.memory_space<vmem>>, vector<32x448xbf16>,
    %c0_22 = arith.constant 0 : index
    %c0_23 = arith.constant 0 : index
    %79 = vector.load %arg14[%c0_22, %c0_23] : memref<448x448xbf16, #tpu.memory_space<vmem>>, vector<448x448xbf16>
    %c0_24 = arith.constant 0 : index
    %c0_25 = arith.constant 0 : index
    %80 = vector.load %arg6[%c0_24, %c0_25] : memref<448x224xbf16, #tpu.memory_space<vmem>>, vector<448x224xbf16>
    %cst_26 = arith.constant dense<0.000000e+00> : vector<448x224xf32>
    %81 = tpu.matmul %79, %80, %cst_26 {dimension_numbers = #tpu.dot_dimension_numbers<[1], [0], [0], [1], [0, 0, 1, 1], [], []>} : vector<448x448xbf16>, vector<448x224xbf16>, vector<448x224xf32> -> vector<448x224xf32>
    %c0_27 = arith.constant 0 : index
    %c0_28 = arith.constant 0 : index
    %82 = vector.load %arg7[%c0_27, %c0_28] : memref<448x224xbf16, #tpu.memory_space<vmem>>, vector<448x224xbf16>
    %cst_29 = arith.constant dense<0.000000e+00> : vector<448x224xf32>
    %83 = tpu.matmul %79, %82, %cst_29 {dimension_numbers = #tpu.dot_dimension_numbers<[1], [0], [0], [1], [0, 0, 1, 1], [], []>} : vector<448x448xbf16>, vector<448x224xbf16>, vector<448x224xf32> -> vector<448x224xf32>
    %84 = arith.maximumf %81, %83 : vector<448x224xf32>
    %cst_30 = arith.constant 0.000000e+00 : bf16
    %85 = vector.broadcast %cst_30 : bf16 to vector<64x224xbf16>
    %c0_31 = arith.constant 0 : index
    %c0_32 = arith.constant 0 : index
    %86 = vector.load %arg15[%c0_31, %c0_32] : memref<576x224xbf16, #tpu.memory_space<vmem>>, vector<64x224xbf16>
    tpu.vector_store %arg15[%c0_31, %c0_32], %85 {strides = array<i32>} : memref<576x224xbf16, #tpu.memory_space<vmem>>, vector<64x224xbf16>,
    %cst_33 = arith.constant 0.000000e+00 : bf16
    %87 = vector.broadcast %cst_33 : bf16 to vector<64x224xbf16>
    %c512 = arith.constant 512 : index
    %c0_34 = arith.constant 0 : index
    %88 = vector.load %arg15[%c512, %c0_34] : memref<576x224xbf16, #tpu.memory_space<vmem>>, vector<64x224xbf16>
    tpu.vector_store %arg15[%c512, %c0_34], %87 {strides = array<i32>} : memref<576x224xbf16, #tpu.memory_space<vmem>>, vector<64x224xbf16>,
    %89 = arith.truncf %84 : vector<448x224xf32> to vector<448x224xbf16>
    %c64_35 = arith.constant 64 : index
    %c0_36 = arith.constant 0 : index
    %90 = vector.load %arg15[%c64_35, %c0_36] : memref<576x224xbf16, #tpu.memory_space<vmem>>, vector<448x224xbf16>
    tpu.vector_store %arg15[%c64_35, %c0_36], %89 {strides = array<i32>} : memref<576x224xbf16, #tpu.memory_space<vmem>>, vector<448x224xbf16>,
    %c0_37 = arith.constant 0 : index
    %c0_38 = arith.constant 0 : index
    %91 = vector.load %arg15[%c0_37, %c0_38] : memref<576x224xbf16, #tpu.memory_space<vmem>>, vector<448x224xbf16>
    %c0_39 = arith.constant 0 : index
    %c0_40 = arith.constant 0 : index
    %c0_41 = arith.constant 0 : index
    %92 = vector.load %arg4[%c0_39, %c0_40, %c0_41] : memref<5x224x448xbf16, #tpu.memory_space<vmem>>, vector<1x224x448xbf16>
    %93 = vector.shape_cast %92 : vector<1x224x448xbf16> to vector<224x448xbf16>
    %cst_42 = arith.constant dense<0.000000e+00> : vector<448x448xf32>
    %94 = tpu.matmul %91, %93, %cst_42 {dimension_numbers = #tpu.dot_dimension_numbers<[1], [0], [0], [1], [0, 0, 1, 1], [], []>} : vector<448x224xbf16>, vector<224x448xbf16>, vector<448x448xf32> -> vector<448x448xf32>
    %c32_43 = arith.constant 32 : index
    %c0_44 = arith.constant 0 : index
    %95 = vector.load %arg15[%c32_43, %c0_44] : memref<576x224xbf16, #tpu.memory_space<vmem>>, vector<448x224xbf16>
    %c1 = arith.constant 1 : index
    %c0_45 = arith.constant 0 : index
    %c0_46 = arith.constant 0 : index
    %96 = vector.load %arg4[%c1, %c0_45, %c0_46] : memref<5x224x448xbf16, #tpu.memory_space<vmem>>, vector<1x224x448xbf16>
    %97 = vector.shape_cast %96 : vector<1x224x448xbf16> to vector<224x448xbf16>
    %cst_47 = arith.constant dense<0.000000e+00> : vector<448x448xf32>
    %98 = tpu.matmul %95, %97, %cst_47 {dimension_numbers = #tpu.dot_dimension_numbers<[1], [0], [0], [1], [0, 0, 1, 1], [], []>} : vector<448x224xbf16>, vector<224x448xbf16>, vector<448x448xf32> -> vector<448x448xf32>
    %99 = arith.addf %94, %98 : vector<448x448xf32>
    %c64_48 = arith.constant 64 : index
    %c0_49 = arith.constant 0 : index
    %100 = vector.load %arg15[%c64_48, %c0_49] : memref<576x224xbf16, #tpu.memory_space<vmem>>, vector<448x224xbf16>
    %c2 = arith.constant 2 : index
    %c0_50 = arith.constant 0 : index
    %c0_51 = arith.constant 0 : index
    %101 = vector.load %arg4[%c2, %c0_50, %c0_51] : memref<5x224x448xbf16, #tpu.memory_space<vmem>>, vector<1x224x448xbf16>
    %102 = vector.shape_cast %101 : vector<1x224x448xbf16> to vector<224x448xbf16>
    %cst_52 = arith.constant dense<0.000000e+00> : vector<448x448xf32>
    %103 = tpu.matmul %100, %102, %cst_52 {dimension_numbers = #tpu.dot_dimension_numbers<[1], [0], [0], [1], [0, 0, 1, 1], [], []>} : vector<448x224xbf16>, vector<224x448xbf16>, vector<448x448xf32> -> vector<448x448xf32>
    %104 = arith.addf %99, %103 : vector<448x448xf32>
    %c96_53 = arith.constant 96 : index
    %c0_54 = arith.constant 0 : index
    %105 = vector.load %arg15[%c96_53, %c0_54] : memref<576x224xbf16, #tpu.memory_space<vmem>>, vector<448x224xbf16>
    %c3 = arith.constant 3 : index
    %c0_55 = arith.constant 0 : index
    %c0_56 = arith.constant 0 : index
    %106 = vector.load %arg4[%c3, %c0_55, %c0_56] : memref<5x224x448xbf16, #tpu.memory_space<vmem>>, vector<1x224x448xbf16>
    %107 = vector.shape_cast %106 : vector<1x224x448xbf16> to vector<224x448xbf16>
    %cst_57 = arith.constant dense<0.000000e+00> : vector<448x448xf32>
    %108 = tpu.matmul %105, %107, %cst_57 {dimension_numbers = #tpu.dot_dimension_numbers<[1], [0], [0], [1], [0, 0, 1, 1], [], []>} : vector<448x224xbf16>, vector<224x448xbf16>, vector<448x448xf32> -> vector<448x448xf32>
    %109 = arith.addf %104, %108 : vector<448x448xf32>
    %c128_58 = arith.constant 128 : index
    %c0_59 = arith.constant 0 : index
    %110 = vector.load %arg15[%c128_58, %c0_59] : memref<576x224xbf16, #tpu.memory_space<vmem>>, vector<448x224xbf16>
    %c4 = arith.constant 4 : index
    %c0_60 = arith.constant 0 : index
    %c0_61 = arith.constant 0 : index
    %111 = vector.load %arg4[%c4, %c0_60, %c0_61] : memref<5x224x448xbf16, #tpu.memory_space<vmem>>, vector<1x224x448xbf16>
    %112 = vector.shape_cast %111 : vector<1x224x448xbf16> to vector<224x448xbf16>
    %cst_62 = arith.constant dense<0.000000e+00> : vector<448x448xf32>
    %113 = tpu.matmul %110, %112, %cst_62 {dimension_numbers = #tpu.dot_dimension_numbers<[1], [0], [0], [1], [0, 0, 1, 1], [], []>} : vector<448x224xbf16>, vector<224x448xbf16>, vector<448x448xf32> -> vector<448x448xf32>
    %114 = arith.addf %109, %113 : vector<448x448xf32>
    %c0_63 = arith.constant 0 : index
    %c0_64 = arith.constant 0 : index
    %115 = vector.load %arg5[%c0_63, %c0_64] : memref<1x448xf32, #tpu.memory_space<vmem>>, vector<1x448xf32>
    %116 = vector.broadcast %115 : vector<1x448xf32> to vector<448x448xf32>
    %117 = arith.addf %114, %116 : vector<448x448xf32>
    %cst_65 = arith.constant 0.000000e+00 : f32
    %118 = vector.broadcast %cst_65 : f32 to vector<448x448xf32>
    %119 = arith.maximumf %117, %118 : vector<448x448xf32>
    %120 = vector.extract_strided_slice %119 {offsets = [0, 0], sizes = [32, 448], strides = [1, 1]} : vector<448x448xf32> to vector<32x448xf32>
    %121 = vector.extract_strided_slice %119 {offsets = [32, 0], sizes = [32, 448], strides = [1, 1]} : vector<448x448xf32> to vector<32x448xf32>
    %122 = arith.maximumf %120, %121 : vector<32x448xf32>
    %123 = arith.truncf %122 : vector<32x448xf32> to vector<32x448xbf16>
    %c0_66 = arith.constant 0 : index
    %c0_67 = arith.constant 0 : index
    %124 = vector.load %arg16[%c0_66, %c0_67] : memref<224x448xbf16, #tpu.memory_space<vmem>>, vector<32x448xbf16>
    tpu.vector_store %arg16[%c0_66, %c0_67], %123 {strides = array<i32>} : memref<224x448xbf16, #tpu.memory_space<vmem>>, vector<32x448xbf16>,
    %125 = vector.extract_strided_slice %119 {offsets = [64, 0], sizes = [32, 448], strides = [1, 1]} : vector<448x448xf32> to vector<32x448xf32>
    %126 = vector.extract_strided_slice %119 {offsets = [96, 0], sizes = [32, 448], strides = [1, 1]} : vector<448x448xf32> to vector<32x448xf32>
    %127 = arith.maximumf %125, %126 : vector<32x448xf32>
    %128 = arith.truncf %127 : vector<32x448xf32> to vector<32x448xbf16>
    %c32_68 = arith.constant 32 : index
    %c0_69 = arith.constant 0 : index
    %129 = vector.load %arg16[%c32_68, %c0_69] : memref<224x448xbf16, #tpu.memory_space<vmem>>, vector<32x448xbf16>
    tpu.vector_store %arg16[%c32_68, %c0_69], %128 {strides = array<i32>} : memref<224x448xbf16, #tpu.memory_space<vmem>>, vector<32x448xbf16>,
    %130 = vector.extract_strided_slice %119 {offsets = [128, 0], sizes = [32, 448], strides = [1, 1]} : vector<448x448xf32> to vector<32x448xf32>
    %131 = vector.extract_strided_slice %119 {offsets = [160, 0], sizes = [32, 448], strides = [1, 1]} : vector<448x448xf32> to vector<32x448xf32>
    %132 = arith.maximumf %130, %131 : vector<32x448xf32>
    %133 = arith.truncf %132 : vector<32x448xf32> to vector<32x448xbf16>
    %c64_70 = arith.constant 64 : index
    %c0_71 = arith.constant 0 : index
    %134 = vector.load %arg16[%c64_70, %c0_71] : memref<224x448xbf16, #tpu.memory_space<vmem>>, vector<32x448xbf16>
    tpu.vector_store %arg16[%c64_70, %c0_71], %133 {strides = array<i32>} : memref<224x448xbf16, #tpu.memory_space<vmem>>, vector<32x448xbf16>,
    %135 = vector.extract_strided_slice %119 {offsets = [192, 0], sizes = [32, 448], strides = [1, 1]} : vector<448x448xf32> to vector<32x448xf32>
    %136 = vector.extract_strided_slice %119 {offsets = [224, 0], sizes = [32, 448], strides = [1, 1]} : vector<448x448xf32> to vector<32x448xf32>
    %137 = arith.maximumf %135, %136 : vector<32x448xf32>
    %138 = arith.truncf %137 : vector<32x448xf32> to vector<32x448xbf16>
    %c96_72 = arith.constant 96 : index
    %c0_73 = arith.constant 0 : index
    %139 = vector.load %arg16[%c96_72, %c0_73] : memref<224x448xbf16, #tpu.memory_space<vmem>>, vector<32x448xbf16>
    tpu.vector_store %arg16[%c96_72, %c0_73], %138 {strides = array<i32>} : memref<224x448xbf16, #tpu.memory_space<vmem>>, vector<32x448xbf16>,
    %140 = vector.extract_strided_slice %119 {offsets = [256, 0], sizes = [32, 448], strides = [1, 1]} : vector<448x448xf32> to vector<32x448xf32>
    %141 = vector.extract_strided_slice %119 {offsets = [288, 0], sizes = [32, 448], strides = [1, 1]} : vector<448x448xf32> to vector<32x448xf32>
    %142 = arith.maximumf %140, %141 : vector<32x448xf32>
    %143 = arith.truncf %142 : vector<32x448xf32> to vector<32x448xbf16>
    %c128_74 = arith.constant 128 : index
    %c0_75 = arith.constant 0 : index
    %144 = vector.load %arg16[%c128_74, %c0_75] : memref<224x448xbf16, #tpu.memory_space<vmem>>, vector<32x448xbf16>
    tpu.vector_store %arg16[%c128_74, %c0_75], %143 {strides = array<i32>} : memref<224x448xbf16, #tpu.memory_space<vmem>>, vector<32x448xbf16>,
    %145 = vector.extract_strided_slice %119 {offsets = [320, 0], sizes = [32, 448], strides = [1, 1]} : vector<448x448xf32> to vector<32x448xf32>
    %146 = vector.extract_strided_slice %119 {offsets = [352, 0], sizes = [32, 448], strides = [1, 1]} : vector<448x448xf32> to vector<32x448xf32>
    %147 = arith.maximumf %145, %146 : vector<32x448xf32>
    %148 = arith.truncf %147 : vector<32x448xf32> to vector<32x448xbf16>
    %c160_76 = arith.constant 160 : index
    %c0_77 = arith.constant 0 : index
    %149 = vector.load %arg16[%c160_76, %c0_77] : memref<224x448xbf16, #tpu.memory_space<vmem>>, vector<32x448xbf16>
    tpu.vector_store %arg16[%c160_76, %c0_77], %148 {strides = array<i32>} : memref<224x448xbf16, #tpu.memory_space<vmem>>, vector<32x448xbf16>,
    %150 = vector.extract_strided_slice %119 {offsets = [384, 0], sizes = [32, 448], strides = [1, 1]} : vector<448x448xf32> to vector<32x448xf32>
    %151 = vector.extract_strided_slice %119 {offsets = [416, 0], sizes = [32, 448], strides = [1, 1]} : vector<448x448xf32> to vector<32x448xf32>
    %152 = arith.maximumf %150, %151 : vector<32x448xf32>
    %153 = arith.truncf %152 : vector<32x448xf32> to vector<32x448xbf16>
    %c192_78 = arith.constant 192 : index
    %c0_79 = arith.constant 0 : index
    %154 = vector.load %arg16[%c192_78, %c0_79] : memref<224x448xbf16, #tpu.memory_space<vmem>>, vector<32x448xbf16>
    tpu.vector_store %arg16[%c192_78, %c0_79], %153 {strides = array<i32>} : memref<224x448xbf16, #tpu.memory_space<vmem>>, vector<32x448xbf16>,
    %c0_80 = arith.constant 0 : index
    %c0_81 = arith.constant 0 : index
    %155 = vector.load %arg16[%c0_80, %c0_81] : memref<224x448xbf16, #tpu.memory_space<vmem>>, vector<224x448xbf16>
    %c0_82 = arith.constant 0 : index
    %c0_83 = arith.constant 0 : index
    %156 = vector.load %arg8[%c0_82, %c0_83] : memref<448x224xbf16, #tpu.memory_space<vmem>>, vector<448x224xbf16>
    %cst_84 = arith.constant dense<0.000000e+00> : vector<224x224xf32>
    %157 = tpu.matmul %155, %156, %cst_84 {dimension_numbers = #tpu.dot_dimension_numbers<[1], [0], [0], [1], [0, 0, 1, 1], [], []>} : vector<224x448xbf16>, vector<448x224xbf16>, vector<224x224xf32> -> vector<224x224xf32>
    %c0_85 = arith.constant 0 : index
    %c0_86 = arith.constant 0 : index
    %158 = vector.load %arg9[%c0_85, %c0_86] : memref<448x224xbf16, #tpu.memory_space<vmem>>, vector<448x224xbf16>
    %cst_87 = arith.constant dense<0.000000e+00> : vector<224x224xf32>
    %159 = tpu.matmul %155, %158, %cst_87 {dimension_numbers = #tpu.dot_dimension_numbers<[1], [0], [0], [1], [0, 0, 1, 1], [], []>} : vector<224x448xbf16>, vector<448x224xbf16>, vector<224x224xf32> -> vector<224x224xf32>
    %160 = arith.maximumf %157, %159 : vector<224x224xf32>
    %161 = vector.extract_strided_slice %160 {offsets = [0, 0], sizes = [32, 224], strides = [1, 1]} : vector<224x224xf32> to vector<32x224xf32>
    %162 = vector.extract_strided_slice %160 {offsets = [32, 0], sizes = [32, 224], strides = [1, 1]} : vector<224x224xf32> to vector<32x224xf32>
    %163 = vector.extract_strided_slice %160 {offsets = [64, 0], sizes = [32, 224], strides = [1, 1]} : vector<224x224xf32> to vector<32x224xf32>
    %164 = vector.extract_strided_slice %160 {offsets = [96, 0], sizes = [32, 224], strides = [1, 1]} : vector<224x224xf32> to vector<32x224xf32>
    %165 = vector.extract_strided_slice %160 {offsets = [128, 0], sizes = [32, 224], strides = [1, 1]} : vector<224x224xf32> to vector<32x224xf32>
    %166 = vector.extract_strided_slice %160 {offsets = [160, 0], sizes = [32, 224], strides = [1, 1]} : vector<224x224xf32> to vector<32x224xf32>
    %167 = vector.extract_strided_slice %160 {offsets = [192, 0], sizes = [32, 224], strides = [1, 1]} : vector<224x224xf32> to vector<32x224xf32>
    %168 = tpu.concatenate %161, %162, %163, %164, %165, %166, %167 in 1 : vector<32x224xf32>, vector<32x224xf32>, vector<32x224xf32>, vector<32x224xf32>, vector<32x224xf32>, vector<32x224xf32>, vector<32x224xf32> -> vector<32x1568xf32>
    %c0_88 = arith.constant 0 : index
    %c0_89 = arith.constant 0 : index
    %169 = vector.load %arg12[%c0_88, %c0_89] : memref<32x1568xf32, #tpu.memory_space<vmem>>, vector<32x1568xf32>
    tpu.vector_store %arg12[%c0_88, %c0_89], %168 {strides = array<i32>} : memref<32x1568xf32, #tpu.memory_space<vmem>>, vector<32x1568xf32>,
    %170 = arith.truncf %168 : vector<32x1568xf32> to vector<32x1568xbf16>
    %c0_90 = arith.constant 0 : index
    %c0_91 = arith.constant 0 : index
    %171 = vector.load %arg10[%c0_90, %c0_91] : memref<1568x128xbf16, #tpu.memory_space<vmem>>, vector<1568x128xbf16>
    %cst_92 = arith.constant dense<0.000000e+00> : vector<32x128xf32>
    %172 = tpu.matmul %170, %171, %cst_92 {dimension_numbers = #tpu.dot_dimension_numbers<[1], [0], [0], [1], [0, 0, 1, 1], [], []>} : vector<32x1568xbf16>, vector<1568x128xbf16>, vector<32x128xf32> -> vector<32x128xf32>
    %c0_93 = arith.constant 0 : index
    %c0_94 = arith.constant 0 : index
    %173 = vector.load %arg11[%c0_93, %c0_94] : memref<1x128xf32, #tpu.memory_space<vmem>>, vector<1x128xf32>
    %174 = vector.broadcast %173 : vector<1x128xf32> to vector<32x128xf32>
    %175 = arith.addf %172, %174 : vector<32x128xf32>
    %c0_95 = arith.constant 0 : index
    %c0_96 = arith.constant 0 : index
    %176 = vector.load %arg13[%c0_95, %c0_96] : memref<32x128xf32, #tpu.memory_space<vmem>>, vector<32x128xf32>
    tpu.vector_store %arg13[%c0_95, %c0_96], %175 {strides = array<i32>} : memref<32x128xf32, #tpu.memory_space<vmem>>, vector<32x128xf32>,
    return
  }
  func.func @transform_0(%arg0: i32) -> (i32, i32, i32) {
    %c0_i32 = arith.constant 0 : i32
    %c0_i32_0 = arith.constant 0 : i32
    %c0_i32_1 = arith.constant 0 : i32
    return %arg0, %c0_i32, %c0_i32_0 : i32, i32, i32
  }
  func.func @transform_1(%arg0: i32) -> (i32, i32) {
    %c0_i32 = arith.constant 0 : i32
    %c0_i32_0 = arith.constant 0 : i32
    %c0_i32_1 = arith.constant 0 : i32
    return %c0_i32, %c0_i32_0 : i32, i32
  }
  func.func @transform_2(%arg0: i32) -> (i32, i32) {
    %c0_i32 = arith.constant 0 : i32
    %c0_i32_0 = arith.constant 0 : i32
    %c0_i32_1 = arith.constant 0 : i32
    return %c0_i32, %c0_i32_0 : i32, i32
  }
  func.func @transform_3(%arg0: i32) -> (i32, i32, i32) {
    %c0_i32 = arith.constant 0 : i32
    %c0_i32_0 = arith.constant 0 : i32
    %c0_i32_1 = arith.constant 0 : i32
    %c0_i32_2 = arith.constant 0 : i32
    return %c0_i32, %c0_i32_0, %c0_i32_1 : i32, i32, i32
  }
  func.func @transform_4(%arg0: i32) -> (i32, i32) {
    %c0_i32 = arith.constant 0 : i32
    %c0_i32_0 = arith.constant 0 : i32
    %c0_i32_1 = arith.constant 0 : i32
    return %c0_i32, %c0_i32_0 : i32, i32
  }
  func.func @transform_5(%arg0: i32) -> (i32, i32) {
    %c0_i32 = arith.constant 0 : i32
    %c0_i32_0 = arith.constant 0 : i32
    %c0_i32_1 = arith.constant 0 : i32
    return %c0_i32, %c0_i32_0 : i32, i32
  }
  func.func @transform_6(%arg0: i32) -> (i32, i32) {
    %c0_i32 = arith.constant 0 : i32
    %c0_i32_0 = arith.constant 0 : i32
    %c0_i32_1 = arith.constant 0 : i32
    return %c0_i32, %c0_i32_0 : i32, i32
  }
  func.func @transform_7(%arg0: i32) -> (i32, i32) {
    %c0_i32 = arith.constant 0 : i32
    %c0_i32_0 = arith.constant 0 : i32
    %c0_i32_1 = arith.constant 0 : i32
    return %c0_i32, %c0_i32_0 : i32, i32
  }
  func.func @transform_8(%arg0: i32) -> (i32, i32) {
    %c0_i32 = arith.constant 0 : i32
    %c0_i32_0 = arith.constant 0 : i32
    %c0_i32_1 = arith.constant 0 : i32
    return %c0_i32, %c0_i32_0 : i32, i32
  }
  func.func @transform_9(%arg0: i32) -> (i32, i32) {
    %c0_i32 = arith.constant 0 : i32
    %c0_i32_0 = arith.constant 0 : i32
    %c0_i32_1 = arith.constant 0 : i32
    return %c0_i32, %c0_i32_0 : i32, i32
  }
  func.func @transform_10(%arg0: i32) -> (i32, i32) {
    %c0_i32 = arith.constant 0 : i32
    %c0_i32_0 = arith.constant 0 : i32
    %c0_i32_1 = arith.constant 0 : i32
    return %c0_i32, %c0_i32_0 : i32, i32
  }
  func.func @transform_11(%arg0: i32) -> (i32, i32) {
    %c0_i32 = arith.constant 0 : i32
    %c0_i32_0 = arith.constant 0 : i32
    return %arg0, %c0_i32 : i32, i32
  }
  func.func @transform_12(%arg0: i32) -> (i32, i32) {
    %c0_i32 = arith.constant 0 : i32
    %c0_i32_0 = arith.constant 0 : i32
    return %arg0, %c0_i32 : i32, i32
  }
}

</mosaic_0001>

<bundles_post_ra>
// kernel: tile.13
= control target key start
LH: loop header
LB: loop body
LE: loop exit
PB: predicated region body
PF: predicated region fallthrough
CT: control target
= control target key end

     0   :  { %s40_s0 = inlined_call_operand.vmem [shape: f32[16], index: 0, kind: input, shape index: {}]   ;;  %s41_s1 = inlined_call_operand.vmem [shape: f32[28,16], index: 1, kind: output, shape index: {}]  }
   0x1   :  { %v4_v0 = vld [vmem:[%s40_s0] ss:$0 sm:$0xff] }
   0x2   :  { %5 = vst [vmem:[%s41_s1] sm:$0xff] %v4_v0  ;;  %12 = vst [vmem:[%s41_s1 + $0x8] sm:$0xff] %v4_v0 }
   0x3   :  { %13 = vst [vmem:[%s41_s1 + $0x10] sm:$0xff] %v4_v0  ;;  %14 = vst [vmem:[%s41_s1 + $0x18] sm:$0xff] %v4_v0 }

// kernel: tile.14
= control target key start
LH: loop header
LB: loop body
LE: loop exit
PB: predicated region body
PF: predicated region fallthrough
CT: control target
= control target key end

     0   :  { %s89_s8 = smov 112   ;;  %s90_s11 = smov 80   ;;  %vm3_vm0 = vcmask 130048   ;;  %vm9_vm1 = vcmask 1048448   ;;  %vm15_vm2 = vcmask 917248   ;;  %vm21_vm3 = vcmask 786048   ;;  %s142_s0 = inlined_call_operand.vmem [shape: f32[28,16], index: 0, kind: input, shape index: {}]   ;;  %s143_s1 = inlined_call_operand.vmem [shape: f32[1,448], index: 1, kind: output, shape index: {}]  }
   0x1   :  { %v72_v0 = vld [vmem:[%s142_s0 + $0x7] ss:$8 sm:$0x7]   ;;  %v74_v1 = vld [vmem:[%s142_s0 + $0x5] ss:$8 sm:$0x7]  }
   0x2   :  { %7 = vrot.lane.b32.xlu0 %v72_v0, %s89_s8  ;;  %19 = vrot.lane.b32.xlu1 %v74_v1, %s90_s11  ;;  %v73_v2 = vld [vmem:[%s142_s0 + $0x6] ss:$8 sm:$0x7]   ;;  %v75_v3 = vld [vmem:[%s142_s0 + $0x4] ss:$8 sm:$0x7]  }
   0x3   :  { %s91_s16 = smov 96   ;;  %v2_v4 = vld [vmem:[%s142_s0] ss:$8 sm:$0xf]   ;;  %s92_s19 = smov 64   ;;  %vm27_vm4 = vcmask 654848  }
   0x4   :  { %v76_v5 = vld [vmem:[%s142_s0 + $0x3] ss:$8 sm:$0xf]   ;;  %4 = vst.msk [vmem:[#allocation0] ss:$8 sm:$0xf] %vm3_vm0, %v2_v4  }
   0x5   :  { %v77_v6 = vld [vmem:[%s142_s0 + $0x2] ss:$8 sm:$0xf]   ;;  %s93_s24 = smov 48   ;;  %s94_s25 = smov 32   ;;  %vm33_vm5 = vcmask 523648  }
   0x6   :  { %13 = vrot.lane.b32.xlu0 %v73_v2, %s91_s16  ;;  %25 = vrot.lane.b32.xlu1 %v75_v3, %s92_s19  ;;  %v78_v7 = vld [vmem:[%s142_s0 + $0x1] ss:$8 sm:$0xf]   ;;  %s95_s0 = smov 16   ;;  %vm39_vm6 = vcmask 392448   ;;  %vm45_vm7 = vcmask 261248  }
   0xa   :  { %31 = vrot.lane.b32.xlu0 %v76_v5, %s93_s24  ;;  %37 = vrot.lane.b32.xlu1 %v77_v6, %s94_s25 }
   0xe   :  { %43 = vrot.lane.b32.xlu0 %v78_v7, %s95_s0 }
  0x74   :  { %v8_v8 = vpop.permute.xlu0 %7   ;;  %v20_v9 = vpop.permute.xlu1 %19  }
  0x75   :  { %10 = vst.msk [vmem:[#allocation0] ss:$8 sm:$0x7] %vm9_vm1, %v8_v8  }
  0x78   :  { %v14_v10 = vpop.permute.xlu0 %13   ;;  %v26_v11 = vpop.permute.xlu1 %25  }
  0x79   :  { %16 = vst.msk [vmem:[#allocation0] ss:$8 sm:$0x7] %vm15_vm2, %v14_v10  }
  0x7a   :  { %22 = vst.msk [vmem:[#allocation0] ss:$8 sm:$0x7] %vm21_vm3, %v20_v9  }
  0x7b   :  { %28 = vst.msk [vmem:[#allocation0] ss:$8 sm:$0x7] %vm27_vm4, %v26_v11  }
  0x7c   :  { %v32_v12 = vpop.permute.xlu0 %31   ;;  %v38_v13 = vpop.permute.xlu1 %37  }
  0x7d   :  { %34 = vst.msk [vmem:[#allocation0] ss:$8 sm:$0xf] %vm33_vm5, %v32_v12  }
  0x7e   :  { %40 = vst.msk [vmem:[#allocation0] ss:$8 sm:$0xf] %vm39_vm6, %v38_v13  }
  0x80   :  { %v44_v14 = vpop.permute.xlu0 %43  }
  0x81   :  { %46 = vst.msk [vmem:[#allocation0] ss:$8 sm:$0xf] %vm45_vm7, %v44_v14  }
  0x88   :  { %v50_v15 = vld [vmem:[#allocation0] sm:$0x1]  ;;  %v54_v16 = vld [vmem:[#allocation0 + $0x8] sm:$0x1]  ;;  %v59_v17 = vld [vmem:[#allocation0 + $0x10] sm:$0x1] }
  0x89   :  { %52 = vst [vmem:[%s143_s1] sm:$0x1] %v50_v15  ;;  %79 = vst [vmem:[%s143_s1 + $0x1] sm:$0x1] %v54_v16  ;;  %v65_v18 = vld [vmem:[#allocation0 + $0x18] sm:$0x1] }
  0x8a   :  { %80 = vst [vmem:[%s143_s1 + $0x2] sm:$0x1] %v59_v17  ;;  %81 = vst [vmem:[%s143_s1 + $0x3] sm:$0x1] %v65_v18 }

// kernel: tile.18
= control target key start
LH: loop header
LB: loop body
LE: loop exit
PB: predicated region body
PF: predicated region fallthrough
CT: control target
= control target key end

     0   :  { %s28_s0 = inlined_call_operand.vmem [shape: f32[32], index: 0, kind: input, shape index: {}]   ;;  %s29_s1 = inlined_call_operand.vmem [shape: f32[14,32], index: 1, kind: output, shape index: {}]  }
   0x1   :  { %v4_v0 = vld [vmem:[%s28_s0] ss:$0 sm:$0xff] }
   0x2   :  { %5 = vst [vmem:[%s29_s1] sm:$0xff] %v4_v0  ;;  %8 = vst [vmem:[%s29_s1 + $0x8] sm:$0xff] %v4_v0 }

// kernel: tile.19
= control target key start
LH: loop header
LB: loop body
LE: loop exit
PB: predicated region body
PF: predicated region fallthrough
CT: control target
= control target key end

     0   :  { %s57_s8 = smov 96   ;;  %vm3_vm0 = vcmask 261120   ;;  %s59_s15 = smov 64   ;;  %vm9_vm1 = vcmask 1048320   ;;  %vm15_vm2 = vcmask 785920   ;;  %vm21_vm3 = vcmask 523520   ;;  %s94_s0 = inlined_call_operand.vmem [shape: f32[14,32], index: 0, kind: input, shape index: {}]   ;;  %s95_s1 = inlined_call_operand.vmem [shape: f32[1,448], index: 1, kind: output, shape index: {}]  }
   0x1   :  { %v48_v0 = vld [vmem:[%s94_s0 + $0x3] ss:$4 sm:$0x7]   ;;  %v49_v1 = vld [vmem:[%s94_s0 + $0x2] ss:$4 sm:$0x7]  }
   0x2   :  { %7 = vrot.lane.b32.xlu0 %v48_v0, %s57_s8  ;;  %v50_v2 = vld [vmem:[%s94_s0 + $0x1] ss:$4 sm:$0xf]   ;;  %v2_v3 = vld [vmem:[%s94_s0] ss:$4 sm:$0xf]  }
   0x3   :  { %s58_s0 = smov 32   ;;  %4 = vst.msk [vmem:[#allocation0] ss:$8 sm:$0xf] %vm3_vm0, %v2_v3  }
   0x4   :  { %19 = vrot.lane.b32.xlu1 %v50_v2, %s58_s0 }
   0x6   :  { %13 = vrot.lane.b32.xlu0 %v49_v1, %s59_s15 }
  0x74   :  { %v8_v4 = vpop.permute.xlu0 %7  }
  0x75   :  { %10 = vst.msk [vmem:[#allocation0] ss:$8 sm:$0x7] %vm9_vm1, %v8_v4  }
  0x76   :  { %v20_v5 = vpop.permute.xlu1 %19  }
  0x78   :  { %v14_v6 = vpop.permute.xlu0 %13  }
  0x79   :  { %16 = vst.msk [vmem:[#allocation0] ss:$8 sm:$0x7] %vm15_vm2, %v14_v6  }
  0x7a   :  { %22 = vst.msk [vmem:[#allocation0] ss:$8 sm:$0xf] %vm21_vm3, %v20_v5  }
  0x81   :  { %v26_v7 = vld [vmem:[#allocation0] sm:$0x1]  ;;  %v30_v8 = vld [vmem:[#allocation0 + $0x8] sm:$0x1]  ;;  %v35_v9 = vld [vmem:[#allocation0 + $0x10] sm:$0x1] }
  0x82   :  { %28 = vst [vmem:[%s95_s1] sm:$0x1] %v26_v7  ;;  %51 = vst [vmem:[%s95_s1 + $0x1] sm:$0x1] %v30_v8  ;;  %v41_v10 = vld [vmem:[#allocation0 + $0x18] sm:$0x1] }
  0x83   :  { %52 = vst [vmem:[%s95_s1 + $0x2] sm:$0x1] %v35_v9  ;;  %53 = vst [vmem:[%s95_s1 + $0x3] sm:$0x1] %v41_v10 }

// kernel: cnn_forward.1
= control target key start
LH: loop header
LB: loop body
LE: loop exit
PB: predicated region body
PF: predicated region fallthrough
CT: control target
= control target key end

     0   :  { %vm919_vm0 = vcmask 261120   ;;  %vm2749_vm1 = vcmask 523264   ;;  %vm5404_vm2 = vcmask 785408   ;;  %s19215_s19 = smov 96   ;;  %s19216_s20 = smov 64   ;;  %s24989_s1 = inlined_call_operand.vmem [shape: bf16[160,448], index: 1, kind: input, shape index: {}]   ;;  %s24990_s0 = inlined_call_operand.vmem [shape: bf16[1,896,160], index: 0, kind: input, shape index: {}]   ;;  %s24991_s5 = inlined_call_operand.vmem [shape: bf16[448,224], index: 5, kind: input, shape index: {}]   ;;  %s24992_s6 = inlined_call_operand.vmem [shape: bf16[448,224], index: 6, kind: input, shape index: {}]   ;;  %s24993_s2 = inlined_call_operand.vmem [shape: f32[1,448], index: 2, kind: input, shape index: {}]   ;;  %s24994_s3 = inlined_call_operand.vmem [shape: bf16[5,224,448], index: 3, kind: input, shape index: {}]   ;;  %s24995_s7 = inlined_call_operand.vmem [shape: bf16[448,224], index: 7, kind: input, shape index: {}]   ;;  %s24996_s8 = inlined_call_operand.vmem [shape: bf16[448,224], index: 8, kind: input, shape index: {}]   ;;  %s24997_s4 = inlined_call_operand.vmem [shape: f32[1,448], index: 4, kind: input, shape index: {}]   ;;  %s24998_s9 = inlined_call_operand.vmem [shape: bf16[1568,128], index: 9, kind: input, shape index: {}]   ;;  %s24999_s11 = inlined_call_operand.vmem [shape: f32[32,1568], index: 11, kind: output, shape index: {0}]   ;;  %s25000_s10 = inlined_call_operand.vmem [shape: f32[1,128], index: 10, kind: input, shape index: {}]   ;;  %s25001_s12 = inlined_call_operand.vmem [shape: f32[32,128], index: 12, kind: output, shape index: {1}]  }
   0x1   :  { %v18119_v0 = vld [vmem:[%s24989_s1 + $0x4] ss:$16 sps:$4 sm:$0xff]   ;;  %v18121_v1 = vld [vmem:[%s24989_s1 + $0xc] ss:$16 sps:$4 sm:$0xff]   ;;  %v18123_v2 = vld [vmem:[%s24989_s1] ss:$16 sps:$4 sm:$0xff]  }
   0x2   :  { %1088 = vmatprep.subr.bf16.mxu0 %v18119_v0  ;;  %v18124_v3 = vld [vmem:[%s24989_s1 + $0x8] ss:$16 sps:$4 sm:$0xff]   ;;  %1681 = vmatprep.subr.bf16.mxu1 %v18121_v1  ;;  %v18125_v4 = vld [vmem:[%s24989_s1 + $0x24] ss:$16 sps:$4 sm:$0xff]   ;;  %v18127_v5 = vld [vmem:[%s24989_s1 + $0x2c] ss:$16 sps:$4 sm:$0xff]  }
   0x3   :  { %1089 = vmatpush1.bf16.msra.mxu0 %v18123_v2  ;;  %1682 = vmatpush1.bf16.msra.mxu1 %v18124_v3  ;;  %v18129_v6 = vld [vmem:[%s24989_s1 + $0x20] ss:$16 sps:$4 sm:$0xff]   ;;  %v18130_v7 = vld [vmem:[%s24989_s1 + $0x28] ss:$16 sps:$4 sm:$0xff]   ;;  %v18131_v8 = vld [vmem:[%s24989_s1 + $0x44] ss:$16 sps:$4 sm:$0xff]  }
   0x4   :  { %1090 = vmatprep.subr.bf16.mxu0 %v18125_v4  ;;  %1683 = vmatprep.subr.bf16.mxu1 %v18127_v5  ;;  %v18133_v9 = vld [vmem:[%s24989_s1 + $0x4c] ss:$16 sps:$4 sm:$0xff]   ;;  %v18135_v10 = vld [vmem:[%s24989_s1 + $0x40] ss:$16 sps:$4 sm:$0xff]   ;;  %v18136_v11 = vld [vmem:[%s24989_s1 + $0x48] ss:$16 sps:$4 sm:$0xff]  }
   0x5   :  { %v18137_v12 = vld [vmem:[%s24989_s1 + $0x64] ss:$16 sps:$4 sm:$0xff]   ;;  %v18139_v13 = vld [vmem:[%s24989_s1 + $0x6c] ss:$16 sps:$4 sm:$0xff]   ;;  %v18141_v14 = vld [vmem:[%s24989_s1 + $0x60] ss:$16 sps:$4 sm:$0xff]  }
   0x6   :  { %v18142_v15 = vld [vmem:[%s24989_s1 + $0x68] ss:$16 sps:$4 sm:$0xff]   ;;  %v18143_v16 = vld [vmem:[%s24989_s1 + $0x84] ss:$16 sps:$4 sm:$0xff]   ;;  %v18145_v17 = vld [vmem:[%s24989_s1 + $0x8c] ss:$16 sps:$4 sm:$0xff]  }
   0x7   :  { %1091 = vmatpush1.bf16.msra.mxu0 %v18129_v6  ;;  %1684 = vmatpush1.bf16.msra.mxu1 %v18130_v7  ;;  %v18147_v18 = vld [vmem:[%s24989_s1 + $0x80] ss:$16 sps:$4 sm:$0xff]   ;;  %v18148_v19 = vld [vmem:[%s24989_s1 + $0x88] ss:$16 sps:$4 sm:$0xff]   ;;  %v18149_v20 = vld [vmem:[%s24989_s1 + $0xa4] ss:$16 sps:$4 sm:$0xff]  }
   0x8   :  { %1092 = vmatprep.subr.bf16.mxu0 %v18131_v8  ;;  %1685 = vmatprep.subr.bf16.mxu1 %v18133_v9  ;;  %v18151_v21 = vld [vmem:[%s24989_s1 + $0xac] ss:$16 sps:$4 sm:$0xff]   ;;  %v18153_v22 = vld [vmem:[%s24989_s1 + $0xa0] ss:$16 sps:$4 sm:$0xff]   ;;  %v18154_v23 = vld [vmem:[%s24989_s1 + $0xa8] ss:$16 sps:$4 sm:$0xff]  }
   0x9   :  { %v18155_v24 = vld [vmem:[%s24989_s1 + $0xc4] ss:$16 sps:$4 sm:$0xff]   ;;  %v18157_v25 = vld [vmem:[%s24989_s1 + $0xcc] ss:$16 sps:$4 sm:$0xff]   ;;  %v18159_v26 = vld [vmem:[%s24989_s1 + $0xc0] ss:$16 sps:$4 sm:$0xff]  }
   0xa   :  { %v18160_v27 = vld [vmem:[%s24989_s1 + $0xc8] ss:$16 sps:$4 sm:$0xff]   ;;  %v18161_v28 = vld [vmem:[%s24989_s1 + $0xe4] ss:$16 sps:$4 sm:$0xff]   ;;  %v18163_v29 = vld [vmem:[%s24989_s1 + $0xec] ss:$16 sps:$4 sm:$0xff]  }
   0xb   :  { %1093 = vmatpush1.bf16.msra.mxu0 %v18135_v10  ;;  %1686 = vmatpush1.bf16.msra.mxu1 %v18136_v11  ;;  %v18165_v30 = vld [vmem:[%s24989_s1 + $0xe0] ss:$16 sps:$4 sm:$0xff]   ;;  %v18166_v31 = vld [vmem:[%s24989_s1 + $0xe8] ss:$16 sps:$4 sm:$0xff]   ;;  %v18181_v32 = vld [vmem:[%s24990_s0 + $0x4] ss:$8 sps:$4 sm:$0xff]  }
   0xc   :  { %1094 = vmatprep.subr.bf16.mxu0 %v18137_v12  ;;  %1687 = vmatprep.subr.bf16.mxu1 %v18139_v13  ;;  %v18167_v33 = vld [vmem:[%s24989_s1 + $0x104] ss:$16 sps:$4 sm:$0xff]   ;;  %v18169_v34 = vld [vmem:[%s24989_s1 + $0x10c] ss:$16 sps:$4 sm:$0xff]   ;;  %v18171_v35 = vld [vmem:[%s24989_s1 + $0x100] ss:$16 sps:$4 sm:$0xff]  }
   0xd   :  { %15398 = vmatprep.mubr.msk.bf16.mxu0 %vm919_vm0, %v18181_v32  ;;  %15454 = vmatprep.mubr.msk.bf16.mxu1 %vm919_vm0, %v18181_v32  ;;  %v18172_v36 = vld [vmem:[%s24989_s1 + $0x108] ss:$16 sps:$4 sm:$0xff]   ;;  %v18173_v37 = vld [vmem:[%s24989_s1 + $0x124] ss:$16 sps:$4 sm:$0xff]   ;;  %v18175_v38 = vld [vmem:[%s24989_s1 + $0x12c] ss:$16 sps:$4 sm:$0xff]  }
   0xe   :  { %v18177_v39 = vld [vmem:[%s24989_s1 + $0x120] ss:$16 sps:$4 sm:$0xff]   ;;  %v18178_v40 = vld [vmem:[%s24989_s1 + $0x128] ss:$16 sps:$4 sm:$0xff]   ;;  %v18186_v41 = vld [vmem:[%s24991_s5 + $0x4] ss:$8 sps:$4 sm:$0xff]  }
   0xf   :  { %1095 = vmatpush1.bf16.msra.mxu0 %v18141_v14  ;;  %1688 = vmatpush1.bf16.msra.mxu1 %v18142_v15  ;;  %v18193_v42 = vld [vmem:[%s24992_s6 + $0x4] ss:$8 sps:$4 sm:$0xff]   ;;  %v18179_v43 = vld [vmem:[%s24990_s0] ss:$8 sps:$4 sm:$0xff]   ;;  %v18182_v44 = vld [vmem:[%s24990_s0 + $0x14] ss:$8 sps:$4 sm:$0xff]  }
  0x10   :  { %1096 = vmatprep.subr.bf16.mxu0 %v18143_v16  ;;  %1689 = vmatprep.subr.bf16.mxu1 %v18145_v17  ;;  %v18184_v45 = vld [vmem:[%s24991_s5] ss:$8 sps:$4 sm:$0xff]   ;;  %v18202_v47 = vld [vmem:[%s24991_s5 + $0x14] ss:$8 sps:$4 sm:$0xff]   ;;  %v18200_v49 = vld [vmem:[%s24991_s5 + $0x10] ss:$8 sps:$4 sm:$0xff]  }
  0x11   :  { %v18191_v46 = vld [vmem:[%s24992_s6] ss:$8 sps:$4 sm:$0xff]   ;;  %v18210_v48 = vld [vmem:[%s24992_s6 + $0x14] ss:$8 sps:$4 sm:$0xff]   ;;  %v18208_v50 = vld [vmem:[%s24992_s6 + $0x10] ss:$8 sps:$4 sm:$0xff]  }
  0x12   :  { %v18187_v51 = vld [vmem:[%s24990_s0 + $0x10] ss:$8 sps:$4 sm:$0xff]   ;;  %v18219_v52 = vld [vmem:[%s24991_s5 + $0x24] ss:$8 sps:$4 sm:$0xff]   ;;  %v18217_v55 = vld [vmem:[%s24991_s5 + $0x20] ss:$8 sps:$4 sm:$0xff]  }
  0x13   :  { %1097 = vmatpush1.bf16.msra.mxu0 %v18147_v18  ;;  %1690 = vmatpush1.bf16.msra.mxu1 %v18148_v19  ;;  %v18188_v53 = vld [vmem:[%s24990_s0 + $0x24] ss:$8 sps:$4 sm:$0xff]   ;;  %v18224_v56 = vld [vmem:[%s24992_s6 + $0x20] ss:$8 sps:$4 sm:$0xff]   ;;  %v18235_v57 = vld [vmem:[%s24991_s5 + $0x34] ss:$8 sps:$4 sm:$0xff]  }
  0x14   :  { %1098 = vmatprep.subr.bf16.mxu0 %v18149_v20  ;;  %1691 = vmatprep.subr.bf16.mxu1 %v18151_v21  ;;  %v18226_v54 = vld [vmem:[%s24992_s6 + $0x24] ss:$8 sps:$4 sm:$0xff]   ;;  %v18233_v58 = vld [vmem:[%s24991_s5 + $0x30] ss:$8 sps:$4 sm:$0xff]   ;;  %v18190_v59 = vld [vmem:[%s24990_s0 + $0x20] ss:$8 sps:$4 sm:$0xff]  }
  0x15   :  { %v18241_v60 = vld [vmem:[%s24992_s6 + $0x30] ss:$8 sps:$4 sm:$0xff]   ;;  %v18243_v61 = vld [vmem:[%s24992_s6 + $0x34] ss:$8 sps:$4 sm:$0xff]   ;;  %v18250_v63 = vld [vmem:[%s24991_s5 + $0x40] ss:$8 sps:$4 sm:$0xff]  }
  0x16   :  { %v18194_v62 = vld [vmem:[%s24990_s0 + $0x34] ss:$8 sps:$4 sm:$0xff]   ;;  %v18252_v0 = vld [vmem:[%s24991_s5 + $0x44] ss:$8 sps:$4 sm:$0xff]   ;;  %v18257_v1 = vld [vmem:[%s24992_s6 + $0x40] ss:$8 sps:$4 sm:$0xff]  }
  0x17   :  { %1099 = vmatpush1.bf16.msra.mxu0 %v18153_v22  ;;  %1692 = vmatpush1.bf16.msra.mxu1 %v18154_v23  ;;  %v18259_v2 = vld [vmem:[%s24992_s6 + $0x44] ss:$8 sps:$4 sm:$0xff]   ;;  %v18196_v3 = vld [vmem:[%s24990_s0 + $0x30] ss:$8 sps:$4 sm:$0xff]   ;;  %v18268_v6 = vld [vmem:[%s24991_s5 + $0x54] ss:$8 sps:$4 sm:$0xff]  }
  0x18   :  { %1100 = vmatprep.subr.bf16.mxu0 %v18155_v24  ;;  %1693 = vmatprep.subr.bf16.mxu1 %v18157_v25  ;;  %v18197_v4 = vld [vmem:[%s24990_s0 + $0x44] ss:$8 sps:$4 sm:$0xff]   ;;  %v18266_v5 = vld [vmem:[%s24991_s5 + $0x50] ss:$8 sps:$4 sm:$0xff]   ;;  %v18199_v7 = vld [vmem:[%s24990_s0 + $0x40] ss:$8 sps:$4 sm:$0xff]  }
  0x19   :  { %v18274_v8 = vld [vmem:[%s24992_s6 + $0x50] ss:$8 sps:$4 sm:$0xff]   ;;  %v18203_v9 = vld [vmem:[%s24990_s0 + $0x54] ss:$8 sps:$4 sm:$0xff]   ;;  %v18206_v12 = vld [vmem:[%s24990_s0 + $0x64] ss:$8 sps:$4 sm:$0xff]  }
  0x1a   :  { %v18276_v10 = vld [vmem:[%s24992_s6 + $0x54] ss:$8 sps:$4 sm:$0xff]   ;;  %v18205_v11 = vld [vmem:[%s24990_s0 + $0x50] ss:$8 sps:$4 sm:$0xff]   ;;  %v18283_v13 = vld [vmem:[%s24991_s5 + $0x60] ss:$8 sps:$4 sm:$0xff]  }
  0x1b   :  { %1101 = vmatpush1.bf16.msra.mxu0 %v18159_v26  ;;  %1694 = vmatpush1.bf16.msra.mxu1 %v18160_v27  ;;  %v18285_v14 = vld [vmem:[%s24991_s5 + $0x64] ss:$8 sps:$4 sm:$0xff]   ;;  %v18211_v15 = vld [vmem:[%s24990_s0 + $0x60] ss:$8 sps:$4 sm:$0xff]   ;;  %v18212_v16 = vld [vmem:[%s24990_s0 + $0x74] ss:$8 sps:$4 sm:$0xff]  }
  0x1c   :  { %1102 = vmatprep.subr.bf16.mxu0 %v18161_v28  ;;  %1695 = vmatprep.subr.bf16.mxu1 %v18163_v29  ;;  %v18214_v17 = vld [vmem:[%s24990_s0 + $0x70] ss:$8 sps:$4 sm:$0xff]   ;;  %v18215_v18 = vld [vmem:[%s24990_s0 + $0x84] ss:$8 sps:$4 sm:$0xff]   ;;  %v18290_v19 = vld [vmem:[%s24992_s6 + $0x60] ss:$8 sps:$4 sm:$0xff]  }
  0x1d   :  { %v18292_v20 = vld [vmem:[%s24992_s6 + $0x64] ss:$8 sps:$4 sm:$0xff]   ;;  %v18220_v21 = vld [vmem:[%s24990_s0 + $0x80] ss:$8 sps:$4 sm:$0xff]   ;;  %v18221_v22 = vld [vmem:[%s24990_s0 + $0x94] ss:$8 sps:$4 sm:$0xff]  }
  0x1e   :  { %v18223_v23 = vld [vmem:[%s24990_s0 + $0x90] ss:$8 sps:$4 sm:$0xff]   ;;  %v18227_v24 = vld [vmem:[%s24990_s0 + $0xa4] ss:$8 sps:$4 sm:$0xff]   ;;  %v18301_v26 = vld [vmem:[%s24991_s5 + $0x74] ss:$8 sps:$4 sm:$0xff]  }
  0x1f   :  { %1103 = vmatpush1.bf16.msra.mxu0 %v18165_v30  ;;  %1696 = vmatpush1.bf16.msra.mxu1 %v18166_v31  ;;  %v18299_v25 = vld [vmem:[%s24991_s5 + $0x70] ss:$8 sps:$4 sm:$0xff]   ;;  %v18229_v27 = vld [vmem:[%s24990_s0 + $0xa0] ss:$8 sps:$4 sm:$0xff]   ;;  %v18230_v28 = vld [vmem:[%s24990_s0 + $0xb4] ss:$8 sps:$4 sm:$0xff]  }
  0x20   :  { %1104 = vmatprep.subr.bf16.mxu0 %v18167_v33  ;;  %1697 = vmatprep.subr.bf16.mxu1 %v18169_v34  ;;  %v18232_v29 = vld [vmem:[%s24990_s0 + $0xb0] ss:$8 sps:$4 sm:$0xff]   ;;  %v18236_v30 = vld [vmem:[%s24990_s0 + $0xc4] ss:$8 sps:$4 sm:$0xff]   ;;  %v18309_v32 = vld [vmem:[%s24992_s6 + $0x74] ss:$8 sps:$4 sm:$0xff]  }
  0x21   :  { %v18307_v31 = vld [vmem:[%s24992_s6 + $0x70] ss:$8 sps:$4 sm:$0xff]   ;;  %v18238_v33 = vld [vmem:[%s24990_s0 + $0xc0] ss:$8 sps:$4 sm:$0xff]   ;;  %v18239_v34 = vld [vmem:[%s24990_s0 + $0xd4] ss:$8 sps:$4 sm:$0xff]  }
  0x22   :  { %s19217_s21 = smov 32  }
  0x23   :  { %1105 = vmatpush1.bf16.msra.mxu0 %v18171_v35  ;;  %1698 = vmatpush1.bf16.msra.mxu1 %v18172_v36  ;;  %v18244_v35 = vld [vmem:[%s24990_s0 + $0xd0] ss:$8 sps:$4 sm:$0xff]   ;;  %v18245_v36 = vld [vmem:[%s24990_s0 + $0xe4] ss:$8 sps:$4 sm:$0xff]  }
  0x24   :  { %1106 = vmatprep.subr.bf16.mxu0 %v18173_v37  ;;  %1699 = vmatprep.subr.bf16.mxu1 %v18175_v38  ;;  %v18247_v37 = vld [vmem:[%s24990_s0 + $0xe0] ss:$8 sps:$4 sm:$0xff]   ;;  %v18248_v38 = vld [vmem:[%s24990_s0 + $0xf4] ss:$8 sps:$4 sm:$0xff]  }
  0x27   :  { %1107 = vmatpush1.bf16.msra.mxu0 %v18177_v39  ;;  %1700 = vmatpush1.bf16.msra.mxu1 %v18178_v40  ;;  %v18316_v39 = vld [vmem:[%s24991_s5 + $0x80] ss:$8 sps:$4 sm:$0xff]   ;;  %v18318_v40 = vld [vmem:[%s24991_s5 + $0x84] ss:$8 sps:$4 sm:$0xff]  }
  0x28   :  { %3703 = vmatprep.subr.bf16.mxu0 %v18186_v41  ;;  %4665 = vmatprep.subr.bf16.mxu1 %v18193_v42  ;;  %v18253_v41 = vld [vmem:[%s24990_s0 + $0xf0] ss:$8 sps:$4 sm:$0xff]   ;;  %v18254_v42 = vld [vmem:[%s24990_s0 + $0x104] ss:$8 sps:$4 sm:$0xff]  }
  0x2a   :  { %1121 = vmatmul.mubr.bf16.vlgmr.msra.gmra.mrb[0].mxu0 %v18179_v43  ;;  %1714 = vmatmul.mubr.bf16.vlgmr.msra.gmra.mrb[0].mxu1 %v18179_v43  ;;  %v18321_v43 = vld [vmem:[%s24992_s6 + $0x80] ss:$8 sps:$4 sm:$0xff]  }
  0x2b   :  { %15399 = vmatprep.mubr.msk.bf16.mxu0 %vm919_vm0, %v18182_v44  ;;  %15455 = vmatprep.mubr.msk.bf16.mxu1 %vm919_vm0, %v18182_v44  ;;  %v18323_v44 = vld [vmem:[%s24992_s6 + $0x84] ss:$8 sps:$4 sm:$0xff]  }
  0x2c   :  { %3704 = vmatpush1.bf16.msra.mxu0 %v18184_v45  ;;  %4666 = vmatpush1.bf16.msra.mxu1 %v18191_v46  ;;  %v18256_v45 = vld [vmem:[%s24990_s0 + $0x100] ss:$8 sps:$4 sm:$0xff]   ;;  %v18260_v46 = vld [vmem:[%s24990_s0 + $0x114] ss:$8 sps:$4 sm:$0xff]  }
  0x2d   :  { %3705 = vmatprep.subr.bf16.mxu0 %v18202_v47  ;;  %4667 = vmatprep.subr.bf16.mxu1 %v18210_v48  ;;  %v18262_v47 = vld [vmem:[%s24990_s0 + $0x110] ss:$8 sps:$4 sm:$0xff]   ;;  %v18263_v48 = vld [vmem:[%s24990_s0 + $0x124] ss:$8 sps:$4 sm:$0xff]  }
  0x30   :  { %3706 = vmatpush1.bf16.msra.mxu0 %v18200_v49  ;;  %4668 = vmatpush1.bf16.msra.mxu1 %v18208_v50  ;;  %v18330_v49 = vld [vmem:[%s24991_s5 + $0x90] ss:$8 sps:$4 sm:$0xff]   ;;  %v18332_v50 = vld [vmem:[%s24991_s5 + $0x94] ss:$8 sps:$4 sm:$0xff]  }
  0x31   :  { %3707 = vmatprep.subr.bf16.mxu0 %v18219_v52  ;;  %4669 = vmatprep.subr.bf16.mxu1 %v18226_v54  ;;  %v18269_v52 = vld [vmem:[%s24990_s0 + $0x134] ss:$8 sps:$4 sm:$0xff]   ;;  %v18272_v54 = vld [vmem:[%s24990_s0 + $0x144] ss:$8 sps:$4 sm:$0xff]  }
  0x32   :  { %1131 = vmatmul.mubr.bf16.gmra.mrb[4].mxu0 %v18187_v51  ;;  %1724 = vmatmul.mubr.bf16.gmra.mrb[4].mxu1 %v18187_v51  ;;  %v18265_v51 = vld [vmem:[%s24990_s0 + $0x120] ss:$8 sps:$4 sm:$0xff]  }
  0x33   :  { %15400 = vmatprep.mubr.msk.bf16.mxu0 %vm919_vm0, %v18188_v53  ;;  %15456 = vmatprep.mubr.msk.bf16.mxu1 %vm919_vm0, %v18188_v53  ;;  %v18271_v53 = vld [vmem:[%s24990_s0 + $0x130] ss:$8 sps:$4 sm:$0xff]  }
  0x34   :  { %3708 = vmatpush1.bf16.msra.mxu0 %v18217_v55  ;;  %4670 = vmatpush1.bf16.msra.mxu1 %v18224_v56  ;;  %v18337_v55 = vld [vmem:[%s24992_s6 + $0x90] ss:$8 sps:$4 sm:$0xff]   ;;  %v18339_v56 = vld [vmem:[%s24992_s6 + $0x94] ss:$8 sps:$4 sm:$0xff]  }
  0x35   :  { %3709 = vmatprep.subr.bf16.mxu0 %v18235_v57  ;;  %4671 = vmatprep.subr.bf16.mxu1 %v18243_v61  ;;  %v18277_v57 = vld [vmem:[%s24990_s0 + $0x140] ss:$8 sps:$4 sm:$0xff]   ;;  %v18280_v61 = vld [vmem:[%s24990_s0 + $0x150] ss:$8 sps:$4 sm:$0xff]  }
  0x38   :  { %3710 = vmatpush1.bf16.msra.mxu0 %v18233_v58  ;;  %4672 = vmatpush1.bf16.msra.mxu1 %v18241_v60  ;;  %v18278_v58 = vld [vmem:[%s24990_s0 + $0x154] ss:$8 sps:$4 sm:$0xff]   ;;  %v18347_v60 = vld [vmem:[%s24991_s5 + $0xa4] ss:$8 sps:$4 sm:$0xff]  }
  0x39   :  { %3711 = vmatprep.subr.bf16.mxu0 %v18252_v0  ;;  %4673 = vmatprep.subr.bf16.mxu1 %v18259_v2  ;;  %v18287_v0 = vld [vmem:[%s24990_s0 + $0x174] ss:$8 sps:$4 sm:$0xff]   ;;  %v18353_v2 = vld [vmem:[%s24992_s6 + $0xa4] ss:$8 sps:$4 sm:$0xff]  }
  0x3a   :  { %1141 = vmatmul.mubr.bf16.gmra.mrb[8].mxu0 %v18190_v59  ;;  %1734 = vmatmul.mubr.bf16.gmra.mrb[8].mxu1 %v18190_v59  ;;  %v18345_v59 = vld [vmem:[%s24991_s5 + $0xa0] ss:$8 sps:$4 sm:$0xff]  }
  0x3b   :  { %15401 = vmatprep.mubr.msk.bf16.mxu0 %vm919_vm0, %v18194_v62  ;;  %15457 = vmatprep.mubr.msk.bf16.mxu1 %vm919_vm0, %v18194_v62  ;;  %v18281_v62 = vld [vmem:[%s24990_s0 + $0x164] ss:$8 sps:$4 sm:$0xff]  }
  0x3c   :  { %3712 = vmatpush1.bf16.msra.mxu0 %v18250_v63  ;;  %4674 = vmatpush1.bf16.msra.mxu1 %v18257_v1  ;;  %v18286_v63 = vld [vmem:[%s24990_s0 + $0x160] ss:$8 sps:$4 sm:$0xff]  }
  0x3d   :  { %3713 = vmatprep.subr.bf16.mxu0 %v18268_v6  ;;  %4675 = vmatprep.subr.bf16.mxu1 %v18276_v10  ;;  %v18351_v1 = vld [vmem:[%s24992_s6 + $0xa0] ss:$8 sps:$4 sm:$0xff]   ;;  %v18296_v6 = vld [vmem:[%s24990_s0 + $0x194] ss:$8 sps:$4 sm:$0xff]   ;;  %v18302_v10 = vld [vmem:[%s24990_s0 + $0x1a4] ss:$8 sps:$4 sm:$0xff]  }
  0x40   :  { %3714 = vmatpush1.bf16.msra.mxu0 %v18266_v5  ;;  %4676 = vmatpush1.bf16.msra.mxu1 %v18274_v8  ;;  %v18295_v5 = vld [vmem:[%s24990_s0 + $0x180] ss:$8 sps:$4 sm:$0xff]   ;;  %v18359_v8 = vld [vmem:[%s24991_s5 + $0xb0] ss:$8 sps:$4 sm:$0xff]  }
  0x41   :  { %3715 = vmatprep.subr.bf16.mxu0 %v18285_v14  ;;  %4677 = vmatprep.subr.bf16.mxu1 %v18292_v20  ;;  %v18367_v14 = vld [vmem:[%s24992_s6 + $0xb0] ss:$8 sps:$4 sm:$0xff]  }
  0x42   :  { %1151 = vmatmul.mubr.bf16.gmra.mrb[12].mxu0 %v18196_v3  ;;  %1744 = vmatmul.mubr.bf16.gmra.mrb[12].mxu1 %v18196_v3  ;;  %v18289_v3 = vld [vmem:[%s24990_s0 + $0x170] ss:$8 sps:$4 sm:$0xff]  }
  0x43   :  { %15402 = vmatprep.mubr.msk.bf16.mxu0 %vm919_vm0, %v18197_v4  ;;  %15458 = vmatprep.mubr.msk.bf16.mxu1 %vm919_vm0, %v18197_v4  ;;  %v18293_v4 = vld [vmem:[%s24990_s0 + $0x184] ss:$8 sps:$4 sm:$0xff]  }
  0x44   :  { %3716 = vmatpush1.bf16.msra.mxu0 %v18283_v13  ;;  %4678 = vmatpush1.bf16.msra.mxu1 %v18290_v19  ;;  %v18305_v13 = vld [vmem:[%s24990_s0 + $0x1b4] ss:$8 sps:$4 sm:$0xff]  }
  0x45   :  { %3717 = vmatprep.subr.bf16.mxu0 %v18301_v26  ;;  %4679 = vmatprep.subr.bf16.mxu1 %v18309_v32 }
  0x48   :  { %3718 = vmatpush1.bf16.msra.mxu0 %v18299_v25  ;;  %4680 = vmatpush1.bf16.msra.mxu1 %v18307_v31 }
  0x49   :  { %3719 = vmatprep.subr.bf16.mxu0 %v18318_v40  ;;  %4681 = vmatprep.subr.bf16.mxu1 %v18323_v44  ;;  %v99_v44 = vld [vmem:[%s24990_s0 + $0x1d0] sm:$0xff] }
  0x4a   :  { %1161 = vmatmul.mubr.bf16.gmra.mrb[16].mxu0 %v18199_v7  ;;  %1754 = vmatmul.mubr.bf16.gmra.mrb[16].mxu1 %v18199_v7  ;;  %v18361_v7 = vld [vmem:[%s24991_s5 + $0xb4] ss:$8 sps:$4 sm:$0xff]  }
  0x4b   :  { %15403 = vmatprep.mubr.msk.bf16.mxu0 %vm919_vm0, %v18203_v9  ;;  %15459 = vmatprep.mubr.msk.bf16.mxu1 %vm919_vm0, %v18203_v9  ;;  %v18298_v9 = vld [vmem:[%s24990_s0 + $0x190] ss:$8 sps:$4 sm:$0xff]  }
  0x4c   :  { %3720 = vmatpush1.bf16.msra.mxu0 %v18316_v39  ;;  %4682 = vmatpush1.bf16.msra.mxu1 %v18321_v43 }
  0x4d   :  { %3721 = vmatprep.subr.bf16.mxu0 %v18332_v50  ;;  %4683 = vmatprep.subr.bf16.mxu1 %v18339_v56 }
  0x50   :  { %3722 = vmatpush1.bf16.msra.mxu0 %v18330_v49  ;;  %4684 = vmatpush1.bf16.msra.mxu1 %v18337_v55 }
  0x51   :  { %3723 = vmatprep.subr.bf16.mxu0 %v18347_v60  ;;  %4685 = vmatprep.subr.bf16.mxu1 %v18353_v2 }
  0x52   :  { %1171 = vmatmul.mubr.bf16.gmra.mrb[20].mxu0 %v18205_v11  ;;  %1764 = vmatmul.mubr.bf16.gmra.mrb[20].mxu1 %v18205_v11  ;;  %v18304_v11 = vld [vmem:[%s24990_s0 + $0x1a0] ss:$8 sps:$4 sm:$0xff]  }
  0x53   :  { %15404 = vmatprep.mubr.msk.bf16.mxu0 %vm919_vm0, %v18206_v12  ;;  %15460 = vmatprep.mubr.msk.bf16.mxu1 %vm919_vm0, %v18206_v12  ;;  %v195_v12 = vlaneseq }
  0x54   :  { %3724 = vmatpush1.bf16.msra.mxu0 %v18345_v59  ;;  %4686 = vmatpush1.bf16.msra.mxu1 %v18351_v1 }
  0x55   :  { %3725 = vmatprep.subr.bf16.mxu0 %v18361_v7 }
  0x58   :  { %3726 = vmatpush1.bf16.msra.mxu0 %v18359_v8 }
  0x5a   :  { %1181 = vmatmul.mubr.bf16.gmra.mrb[24].mxu0 %v18211_v15  ;;  %1774 = vmatmul.mubr.bf16.gmra.mrb[24].mxu1 %v18211_v15  ;;  %v18369_v15 = vld [vmem:[%s24992_s6 + $0xb4] ss:$8 sps:$4 sm:$0xff]  }
  0x5b   :  { %15405 = vmatprep.mubr.msk.bf16.mxu0 %vm919_vm0, %v18212_v16  ;;  %15461 = vmatprep.mubr.msk.bf16.mxu1 %vm919_vm0, %v18212_v16  ;;  %v19766_v16 = vshrl.u32 %v195_v12, 7 }
  0x5c   :  { %4687 = vmatprep.subr.bf16.mxu1 %v18369_v15 }
  0x5d   :  { %4688 = vmatpush1.bf16.msra.mxu1 %v18367_v14  ;;  %v197_v20 = vsub.s32 0, %v19766_v16  ;;  %v205_v26 = vsub.s32 2, %v19766_v16 }
  0x62   :  { %1191 = vmatmul.mubr.bf16.gmra.mrb[28].mxu0 %v18214_v17  ;;  %1784 = vmatmul.mubr.bf16.gmra.mrb[28].mxu1 %v18214_v17  ;;  %v193_v17 = vld [vmem:[%s24993_s2] sm:$0xf] }
  0x63   :  { %15406 = vmatprep.mubr.msk.bf16.mxu0 %vm919_vm0, %v18215_v18  ;;  %15462 = vmatprep.mubr.msk.bf16.mxu1 %vm919_vm0, %v18215_v18  ;;  %v19785_v32 = vrot.slane %v193_v17, %v197_v20 }
  0x6a   :  { %1201 = vmatmul.mubr.bf16.gmra.mrb[32].mxu0 %v18220_v21  ;;  %1794 = vmatmul.mubr.bf16.gmra.mrb[32].mxu1 %v18220_v21  ;;  %v201_v21 = vsub.s32 1, %v19766_v16 }
  0x6b   :  { %15407 = vmatprep.mubr.msk.bf16.mxu0 %vm919_vm0, %v18221_v22  ;;  %15463 = vmatprep.mubr.msk.bf16.mxu1 %vm919_vm0, %v18221_v22 }
  0x72   :  { %1211 = vmatmul.mubr.bf16.gmra.mrb[36].mxu0 %v18223_v23  ;;  %1804 = vmatmul.mubr.bf16.gmra.mrb[36].mxu1 %v18223_v23  ;;  %v18310_v23 = vld [vmem:[%s24990_s0 + $0x1b0] ss:$8 sps:$4 sm:$0xff]  }
  0x73   :  { %15408 = vmatprep.mubr.msk.bf16.mxu0 %vm919_vm0, %v18227_v24  ;;  %15464 = vmatprep.mubr.msk.bf16.mxu1 %vm919_vm0, %v18227_v24 }
  0x7a   :  { %1221 = vmatmul.mubr.bf16.gmra.mrb[40].mxu0 %v18229_v27  ;;  %1814 = vmatmul.mubr.bf16.gmra.mrb[40].mxu1 %v18229_v27  ;;  %v209_v27 = vsub.s32 3, %v19766_v16 }
  0x7b   :  { %15409 = vmatprep.mubr.msk.bf16.mxu0 %vm919_vm0, %v18230_v28  ;;  %15465 = vmatprep.mubr.msk.bf16.mxu1 %vm919_vm0, %v18230_v28 }
  0x82   :  { %1231 = vmatmul.mubr.bf16.gmra.mrb[44].mxu0 %v18232_v29  ;;  %1824 = vmatmul.mubr.bf16.gmra.mrb[44].mxu1 %v18232_v29  ;;  %v18311_v29 = vld [vmem:[%s24990_s0 + $0x1c4] ss:$8 sps:$4 sm:$0xff]  }
  0x83   :  { %15410 = vmatprep.mubr.msk.bf16.mxu0 %vm919_vm0, %v18236_v30  ;;  %15466 = vmatprep.mubr.msk.bf16.mxu1 %vm919_vm0, %v18236_v30 }
  0x8a   :  { %1241 = vmatmul.mubr.bf16.gmra.mrb[48].mxu0 %v18238_v33  ;;  %1834 = vmatmul.mubr.bf16.gmra.mrb[48].mxu1 %v18238_v33  ;;  %v19789_v33 = vrot.slane %v193_v17, %v201_v21 }
  0x8b   :  { %15411 = vmatprep.mubr.msk.bf16.mxu0 %vm919_vm0, %v18239_v34  ;;  %15467 = vmatprep.mubr.msk.bf16.mxu1 %vm919_vm0, %v18239_v34  ;;  %v19793_v34 = vrot.slane %v193_v17, %v205_v26 }
  0x92   :  { %1251 = vmatmul.mubr.bf16.gmra.mrb[52].mxu0 %v18244_v35  ;;  %1844 = vmatmul.mubr.bf16.gmra.mrb[52].mxu1 %v18244_v35  ;;  %v19797_v35 = vrot.slane %v193_v17, %v209_v27 }
  0x93   :  { %15412 = vmatprep.mubr.msk.bf16.mxu0 %vm919_vm0, %v18245_v36  ;;  %15468 = vmatprep.mubr.msk.bf16.mxu1 %vm919_vm0, %v18245_v36  ;;  %v18374_v36 = vld [vmem:[%s24991_s5 + $0xc0] ss:$8 sps:$4 sm:$0xff]  }
  0x9a   :  { %1261 = vmatmul.mubr.bf16.gmra.mrb[56].mxu0 %v18247_v37  ;;  %1854 = vmatmul.mubr.bf16.gmra.mrb[56].mxu1 %v18247_v37  ;;  %v18376_v37 = vld [vmem:[%s24991_s5 + $0xc4] ss:$8 sps:$4 sm:$0xff]  }
  0x9b   :  { %15413 = vmatprep.mubr.msk.bf16.mxu0 %vm919_vm0, %v18248_v38  ;;  %15469 = vmatprep.mubr.msk.bf16.mxu1 %vm919_vm0, %v18248_v38 }
  0x9c   :  { %3727 = vmatprep.subr.bf16.mxu0 %v18376_v37  ;;  %v18319_v37 = vld [vmem:[%s24990_s0 + $0x1e4] ss:$8 sps:$4 sm:$0xff]  }
  0x9d   :  { %3728 = vmatpush1.bf16.msra.mxu0 %v18374_v36 }
  0xa2   :  { %1271 = vmatmul.mubr.bf16.gmra.mrb[60].mxu0 %v18253_v41  ;;  %1864 = vmatmul.mubr.bf16.gmra.mrb[60].mxu1 %v18253_v41 }
  0xa3   :  { %15414 = vmatprep.mubr.msk.bf16.mxu0 %vm919_vm0, %v18254_v42  ;;  %15470 = vmatprep.mubr.msk.bf16.mxu1 %vm919_vm0, %v18254_v42  ;;  %v18313_v42 = vld [vmem:[%s24990_s0 + $0x1c0] ss:$8 sps:$4 sm:$0xff]  }
  0xaa   :  { %1281 = vmatmul.mubr.bf16.gmra.mrb[64].mxu0 %v18256_v45  ;;  %1874 = vmatmul.mubr.bf16.gmra.mrb[64].mxu1 %v18256_v45  ;;  %v100_v45 = vld [vmem:[%s24990_s0 + $0x1d8] sm:$0xff] }
  0xab   :  { %15415 = vmatprep.mubr.msk.bf16.mxu0 %vm919_vm0, %v18260_v46  ;;  %15471 = vmatprep.mubr.msk.bf16.mxu1 %vm919_vm0, %v18260_v46 }
  0xb2   :  { %1291 = vmatmul.mubr.bf16.gmra.mrb[68].mxu0 %v18262_v47  ;;  %1884 = vmatmul.mubr.bf16.gmra.mrb[68].mxu1 %v18262_v47 }
  0xb3   :  { %15416 = vmatprep.mubr.msk.bf16.mxu0 %vm919_vm0, %v18263_v48  ;;  %15472 = vmatprep.mubr.msk.bf16.mxu1 %vm919_vm0, %v18263_v48 }
  0xba   :  { %1301 = vmatmul.mubr.bf16.gmra.mrb[72].mxu0 %v18265_v51  ;;  %1894 = vmatmul.mubr.bf16.gmra.mrb[72].mxu1 %v18265_v51  ;;  %v18314_v51 = vld [vmem:[%s24990_s0 + $0x1d4] ss:$8 sps:$4 sm:$0xff]  }
  0xbb   :  { %15417 = vmatprep.mubr.msk.bf16.mxu0 %vm919_vm0, %v18269_v52  ;;  %15473 = vmatprep.mubr.msk.bf16.mxu1 %vm919_vm0, %v18269_v52  ;;  %v101_v52 = vld [vmem:[%s24990_s0 + $0x1e0] sm:$0xff] }
  0xc2   :  { %1311 = vmatmul.mubr.bf16.gmra.mrb[76].mxu0 %v18271_v53  ;;  %1904 = vmatmul.mubr.bf16.gmra.mrb[76].mxu1 %v18271_v53  ;;  %v102_v53 = vld [vmem:[%s24990_s0 + $0x1e8] sm:$0xff] }
  0xc3   :  { %15418 = vmatprep.mubr.msk.bf16.mxu0 %vm919_vm0, %v18272_v54  ;;  %15474 = vmatprep.mubr.msk.bf16.mxu1 %vm919_vm0, %v18272_v54  ;;  %v19859_v1 = vcombine.low %v101_v52, %v102_v53  ;;  %v18381_v52 = vld [vmem:[%s24992_s6 + $0xc0] ss:$8 sps:$4 sm:$0xff]   ;;  %v18383_v53 = vld [vmem:[%s24992_s6 + $0xc4] ss:$8 sps:$4 sm:$0xff]  }
  0xc4   :  { %4689 = vmatprep.subr.bf16.mxu1 %v18383_v53 }
  0xc5   :  { %4690 = vmatpush1.bf16.msra.mxu1 %v18381_v52 }
  0xca   :  { %1321 = vmatmul.mubr.bf16.gmra.mrb[80].mxu0 %v18277_v57  ;;  %1914 = vmatmul.mubr.bf16.gmra.mrb[80].mxu1 %v18277_v57 }
  0xcb   :  { %15419 = vmatprep.mubr.msk.bf16.mxu0 %vm919_vm0, %v18278_v58  ;;  %15475 = vmatprep.mubr.msk.bf16.mxu1 %vm919_vm0, %v18278_v58 }
  0xd2   :  { %1331 = vmatmul.mubr.bf16.gmra.mrb[84].mxu0 %v18280_v61  ;;  %1924 = vmatmul.mubr.bf16.gmra.mrb[84].mxu1 %v18280_v61 }
  0xd3   :  { %15420 = vmatprep.mubr.msk.bf16.mxu0 %vm919_vm0, %v18281_v62  ;;  %15476 = vmatprep.mubr.msk.bf16.mxu1 %vm919_vm0, %v18281_v62 }
  0xda   :  { %1341 = vmatmul.mubr.bf16.gmra.mrb[88].mxu0 %v18286_v63  ;;  %1934 = vmatmul.mubr.bf16.gmra.mrb[88].mxu1 %v18286_v63 }
  0xdb   :  { %15421 = vmatprep.mubr.msk.bf16.mxu0 %vm919_vm0, %v18287_v0  ;;  %15477 = vmatprep.mubr.msk.bf16.mxu1 %vm919_vm0, %v18287_v0  ;;  %v15304_v0 = vcombine.low %v99_v44, %v100_v45 }
  0xe2   :  { %1351 = vmatmul.mubr.bf16.gmra.mrb[92].mxu0 %v18289_v3  ;;  %1944 = vmatmul.mubr.bf16.gmra.mrb[92].mxu1 %v18289_v3 }
  0xe3   :  { %15422 = vmatprep.mubr.msk.bf16.mxu0 %vm919_vm0, %v18293_v4  ;;  %15478 = vmatprep.mubr.msk.bf16.mxu1 %vm919_vm0, %v18293_v4 }
  0xea   :  { %1361 = vmatmul.mubr.bf16.gmra.mrb[96].mxu0 %v18295_v5  ;;  %1954 = vmatmul.mubr.bf16.gmra.mrb[96].mxu1 %v18295_v5 }
  0xeb   :  { %15423 = vmatprep.mubr.msk.bf16.mxu0 %vm919_vm0, %v18296_v6  ;;  %15479 = vmatprep.mubr.msk.bf16.mxu1 %vm919_vm0, %v18296_v6 }
  0xf2   :  { %1371 = vmatmul.mubr.bf16.gmra.mrb[100].mxu0 %v18298_v9  ;;  %1964 = vmatmul.mubr.bf16.gmra.mrb[100].mxu1 %v18298_v9 }
  0xf3   :  { %15424 = vmatprep.mubr.msk.bf16.mxu0 %vm919_vm0, %v18302_v10  ;;  %15480 = vmatprep.mubr.msk.bf16.mxu1 %vm919_vm0, %v18302_v10 }
  0xfa   :  { %1381 = vmatmul.mubr.bf16.gmra.mrb[104].mxu0 %v18304_v11  ;;  %1974 = vmatmul.mubr.bf16.gmra.mrb[104].mxu1 %v18304_v11 }
  0xfb   :  { %15425 = vmatprep.mubr.msk.bf16.mxu0 %vm919_vm0, %v18305_v13  ;;  %15481 = vmatprep.mubr.msk.bf16.mxu1 %vm919_vm0, %v18305_v13 }
  0xfd   :  { %v1122_v18 = vpop.f32.mrb[0].mxu0  ;;  %v1715_v19 = vpop.f32.mrb[0].mxu1 }
  0xfe   :  { %v1124_v22 = vpop.f32.mrb[1].mxu0  ;;  %v1717_v24 = vpop.f32.mrb[1].mxu1  ;;  %v19808_v40 = vadd.f32 %v1122_v18, %v19785_v32  ;;  %v19823_v47 = vadd.f32 %v1715_v19, %v19793_v34 }
  0xff   :  { %v1126_v25 = vpop.f32.mrb[2].mxu0  ;;  %v1719_v28 = vpop.f32.mrb[2].mxu1  ;;  %v19820_v46 = vadd.f32 %v1124_v22, %v19789_v33  ;;  %v19826_v49 = vadd.f32 %v1717_v24, %v19797_v35 }
 0x100   :  { %v1128_v30 = vpop.f32.mrb[3].mxu0  ;;  %v1721_v31 = vpop.f32.mrb[3].mxu1  ;;  %v19838_v54 = vadd.f32 %v1126_v25, %v19785_v32  ;;  %v19844_v57 = vadd.f32 %v1719_v28, %v19793_v34  ;;  %v2274_v62 = vmax.f32 %v19808_v40, 0.0  ;;  %v2276_v3 = vmax.f32 %v19823_v47, 0.0 }
 0x101   :  { %v19841_v55 = vadd.f32 %v1128_v30, %v19789_v33  ;;  %v19847_v58 = vadd.f32 %v1721_v31, %v19797_v35  ;;  %v2275_v2 = vmax.f32 %v19820_v46, 0.0  ;;  %v2277_v4 = vmax.f32 %v19826_v49, 0.0 }
 0x102   :  { %1391 = vmatmul.mubr.bf16.gmra.mrb[108].mxu0 %v18310_v23  ;;  %1984 = vmatmul.mubr.bf16.gmra.mrb[108].mxu1 %v18310_v23  ;;  %v2278_v6 = vmax.f32 %v19838_v54, 0.0  ;;  %v2280_v8 = vmax.f32 %v19844_v57, 0.0 }
 0x103   :  { %15426 = vmatprep.mubr.msk.bf16.mxu0 %vm919_vm0, %v18311_v29  ;;  %15482 = vmatprep.mubr.msk.bf16.mxu1 %vm919_vm0, %v18311_v29  ;;  %v2279_v7 = vmax.f32 %v19841_v55, 0.0  ;;  %v2281_v9 = vmax.f32 %v19847_v58, 0.0 }
 0x105   :  { %v1132_v38 = vpop.f32.mrb[4].mxu0  ;;  %v1725_v39 = vpop.f32.mrb[4].mxu1 }
 0x106   :  { %v1134_v41 = vpop.f32.mrb[5].mxu0  ;;  %v1727_v43 = vpop.f32.mrb[5].mxu1  ;;  %v19850_v60 = vadd.f32 %v1132_v38, %v19785_v32  ;;  %v19853_v61 = vadd.f32 %v1725_v39, %v19793_v34 }
 0x107   :  { %v1136_v48 = vpop.f32.mrb[6].mxu0  ;;  %v1729_v50 = vpop.f32.mrb[6].mxu1  ;;  %v19857_v63 = vadd.f32 %v1134_v41, %v19789_v33  ;;  %v19865_v5 = vadd.f32 %v1727_v43, %v19797_v35 }
 0x108   :  { %v1138_v56 = vpop.f32.mrb[7].mxu0  ;;  %v1731_v59 = vpop.f32.mrb[7].mxu1  ;;  %v2282_v10 = vmax.f32 %v19850_v60, 0.0  ;;  %v19875_v11 = vadd.f32 %v1136_v48, %v19785_v32  ;;  %v2284_v12 = vmax.f32 %v19853_v61, 0.0  ;;  %v19879_v13 = vadd.f32 %v1729_v50, %v19793_v34 }
 0x109   :  { %v2283_v17 = vmax.f32 %v19857_v63, 0.0  ;;  %v19883_v18 = vadd.f32 %v1138_v56, %v19789_v33  ;;  %v2285_v25 = vmax.f32 %v19865_v5, 0.0  ;;  %v19889_v28 = vadd.f32 %v1731_v59, %v19797_v35  ;;  %v18326_v63 = vld [vmem:[%s24990_s0 + $0x1f0] ss:$8 sps:$4 sm:$0xff]  }
 0x10a   :  { %1401 = vmatmul.mubr.bf16.gmra.mrb[112].mxu0 %v18313_v42  ;;  %1994 = vmatmul.mubr.bf16.gmra.mrb[112].mxu1 %v18313_v42  ;;  %v2286_v58 = vmax.f32 %v19875_v11, 0.0  ;;  %v2288_v59 = vmax.f32 %v19879_v13, 0.0 }
 0x10b   :  { %15427 = vmatprep.mubr.msk.bf16.mxu0 %vm919_vm0, %v18314_v51  ;;  %15483 = vmatprep.mubr.msk.bf16.mxu1 %vm919_vm0, %v18314_v51 }
 0x10d   :  { %v1142_v14 = vpop.f32.mrb[8].mxu0  ;;  %v1735_v15 = vpop.f32.mrb[8].mxu1 }
 0x10e   :  { %v1143_v19 = vadd.f32 %v1142_v14, %v19785_v32  ;;  %v1144_v22 = vpop.f32.mrb[9].mxu0  ;;  %v1736_v23 = vadd.f32 %v1735_v15, %v19793_v34  ;;  %v1737_v24 = vpop.f32.mrb[9].mxu1  ;;  %v2289_v14 = vmax.f32 %v19889_v28, 0.0 }
 0x10f   :  { %v1145_v29 = vadd.f32 %v1144_v22, %v19789_v33  ;;  %v1146_v30 = vpop.f32.mrb[10].mxu0  ;;  %v1738_v31 = vadd.f32 %v1737_v24, %v19797_v35  ;;  %v1739_v36 = vpop.f32.mrb[10].mxu1 }
 0x110   :  { %v2290_v38 = vmax.f32 %v1143_v19, 0.0  ;;  %v2292_v39 = vmax.f32 %v1736_v23, 0.0  ;;  %v1147_v40 = vadd.f32 %v1146_v30, %v19785_v32  ;;  %v1148_v41 = vpop.f32.mrb[11].mxu0  ;;  %v1740_v42 = vadd.f32 %v1739_v36, %v19793_v34  ;;  %v1741_v43 = vpop.f32.mrb[11].mxu1 }
 0x111   :  { %v2291_v44 = vmax.f32 %v1145_v29, 0.0  ;;  %v2293_v45 = vmax.f32 %v1738_v31, 0.0  ;;  %v1149_v46 = vadd.f32 %v1148_v41, %v19789_v33  ;;  %v1742_v47 = vadd.f32 %v1741_v43, %v19797_v35 }
 0x112   :  { %v2722_v48 = vmax.f32 %v2274_v62, %v2290_v38  ;;  %v2724_v49 = vmax.f32 %v2276_v3, %v2292_v39  ;;  %v2294_v50 = vmax.f32 %v1147_v40, 0.0  ;;  %v2296_v51 = vmax.f32 %v1740_v42, 0.0  ;;  %1411 = vmatmul.mubr.bf16.gmra.mrb[116].mxu0 %v15304_v0  ;;  %2004 = vmatmul.mubr.bf16.gmra.mrb[116].mxu1 %v15304_v0 }
 0x113   :  { %v2723_v54 = vmax.f32 %v2275_v2, %v2291_v44  ;;  %v2725_v55 = vmax.f32 %v2277_v4, %v2293_v45  ;;  %v2295_v56 = vmax.f32 %v1149_v46, 0.0  ;;  %v2297_v57 = vmax.f32 %v1742_v47, 0.0  ;;  %15428 = vmatprep.mubr.msk.bf16.mxu0 %vm919_vm0, %v18319_v37  ;;  %15484 = vmatprep.mubr.msk.bf16.mxu1 %vm919_vm0, %v18319_v37 }
 0x114   :  { %v2726_v62 = vmax.f32 %v2278_v6, %v2294_v50  ;;  %v2728_v0 = vmax.f32 %v2280_v8, %v2296_v51  ;;  %v2287_v3 = vmax.f32 %v19883_v18, 0.0 }
 0x115   :  { %v2727_v15 = vmax.f32 %v2279_v7, %v2295_v56  ;;  %v2729_v2 = vmax.f32 %v2281_v9, %v2297_v57  ;;  %v1152_v4 = vpop.f32.mrb[12].mxu0  ;;  %v1745_v19 = vpop.f32.mrb[12].mxu1  ;;  %v18324_v9 = vld [vmem:[%s24990_s0 + $0x1f4] ss:$8 sps:$4 sm:$0xff]  }
 0x116   :  { %v2738_v22 = vpack.c.bf16 %v2726_v62, %v2722_v48  ;;  %v2740_v23 = vpack.c.bf16 %v2728_v0, %v2724_v49  ;;  %v1153_v24 = vadd.f32 %v1152_v4, %v19785_v32  ;;  %v1154_v29 = vpop.f32.mrb[13].mxu0  ;;  %v1746_v11 = vadd.f32 %v1745_v19, %v19793_v34  ;;  %v1747_v13 = vpop.f32.mrb[13].mxu1 }
 0x117   :  { %v2739_v6 = vpack.c.bf16 %v2727_v15, %v2723_v54  ;;  %v2741_v8 = vpack.c.bf16 %v2729_v2, %v2725_v55  ;;  %v1155_v30 = vadd.f32 %v1154_v29, %v19789_v33  ;;  %v1156_v18 = vpop.f32.mrb[14].mxu0  ;;  %v1748_v28 = vadd.f32 %v1747_v13, %v19797_v35  ;;  %v1749_v7 = vpop.f32.mrb[14].mxu1 }
 0x118   :  { %2746 = vst [vmem:[#allocation2] sm:$0xff] %v2738_v22  ;;  %2748 = vst [vmem:[#allocation2 + $0x10] sm:$0xff] %v2740_v23  ;;  %v2298_v31 = vmax.f32 %v1153_v24, 0.0  ;;  %v2300_v36 = vmax.f32 %v1746_v11, 0.0  ;;  %v1157_v37 = vadd.f32 %v1156_v18, %v19785_v32  ;;  %v1158_v38 = vpop.f32.mrb[15].mxu0  ;;  %v1750_v39 = vadd.f32 %v1749_v7, %v19793_v34  ;;  %v1751_v40 = vpop.f32.mrb[15].mxu1 }
 0x119   :  { %2747 = vst [vmem:[#allocation2 + $0x8] sm:$0xff] %v2739_v6  ;;  %2750 = vst.msk [vmem:[#allocation2 + $0x18] sm:$0xff] %vm2749_vm1, %v2741_v8  ;;  %v2299_v41 = vmax.f32 %v1155_v30, 0.0  ;;  %v2301_v42 = vmax.f32 %v1748_v28, 0.0  ;;  %v1159_v43 = vadd.f32 %v1158_v38, %v19789_v33  ;;  %v1752_v44 = vadd.f32 %v1751_v40, %v19797_v35  ;;  %v18329_v23 = vld [vmem:[%s24990_s0 + $0x200] ss:$8 sps:$4 sm:$0xff]  }
 0x11a   :  { %v2730_v45 = vmax.f32 %v2282_v10, %v2298_v31  ;;  %v2732_v46 = vmax.f32 %v2284_v12, %v2300_v36  ;;  %v2302_v47 = vmax.f32 %v1157_v37, 0.0  ;;  %v2304_v48 = vmax.f32 %v1750_v39, 0.0  ;;  %1421 = vmatmul.mubr.bf16.gmra.mrb[120].mxu0 %v19859_v1  ;;  %2014 = vmatmul.mubr.bf16.gmra.mrb[120].mxu1 %v19859_v1  ;;  %v107_v8 = vld [vmem:[%s24990_s0 + $0x210] sm:$0xff]  ;;  %v108_v30 = vld [vmem:[%s24990_s0 + $0x218] sm:$0xff]  ;;  %v109_v38 = vld [vmem:[%s24990_s0 + $0x220] sm:$0xff] }
 0x11b   :  { %v2731_v49 = vmax.f32 %v2283_v17, %v2299_v41  ;;  %v2733_v50 = vmax.f32 %v2285_v25, %v2301_v42  ;;  %v2303_v51 = vmax.f32 %v1159_v43, 0.0  ;;  %v2305_v52 = vmax.f32 %v1752_v44, 0.0  ;;  %15429 = vmatprep.mubr.msk.bf16.mxu0 %vm919_vm0, %v18324_v9  ;;  %15485 = vmatprep.mubr.msk.bf16.mxu1 %vm919_vm0, %v18324_v9  ;;  %v18333_v18 = vld [vmem:[%s24990_s0 + $0x214] ss:$8 sps:$4 sm:$0xff]   ;;  %v110_v39 = vld [vmem:[%s24990_s0 + $0x228] sm:$0xff] }
 0x11c   :  { %v2734_v60 = vmax.f32 %v2286_v58, %v2302_v47  ;;  %v2736_v61 = vmax.f32 %v2288_v59, %v2304_v48  ;;  %v18327_v58 = vld [vmem:[%s24990_s0 + $0x204] ss:$8 sps:$4 sm:$0xff]  }
 0x11d   :  { %v2735_v10 = vmax.f32 %v2287_v3, %v2303_v51  ;;  %v2737_v12 = vmax.f32 %v2289_v14, %v2305_v52  ;;  %v1162_v53 = vpop.f32.mrb[16].mxu0  ;;  %v1755_v54 = vpop.f32.mrb[16].mxu1  ;;  %v18388_v3 = vld [vmem:[%s24991_s5 + $0xd0] ss:$8 sps:$4 sm:$0xff]   ;;  %v18390_v14 = vld [vmem:[%s24991_s5 + $0xd4] ss:$8 sps:$4 sm:$0xff]  }
 0x11e   :  { %v2742_v55 = vpack.c.bf16 %v2734_v60, %v2730_v45  ;;  %v2744_v1 = vpack.c.bf16 %v2736_v61, %v2732_v46  ;;  %v1164_v56 = vpop.f32.mrb[17].mxu0  ;;  %v1757_v5 = vpop.f32.mrb[17].mxu1  ;;  %3729 = vmatprep.subr.bf16.mxu0 %v18390_v14  ;;  %v19952_v4 = vadd.f32 %v1162_v53, %v19785_v32  ;;  %v19955_v22 = vadd.f32 %v1755_v54, %v19793_v34  ;;  %v18398_v51 = vld [vmem:[%s24992_s6 + $0xd4] ss:$8 sps:$4 sm:$0xff]  }
 0x11f   :  { %v2743_v17 = vpack.c.bf16 %v2735_v10, %v2731_v49  ;;  %v2745_v25 = vpack.c.bf16 %v2737_v12, %v2733_v50  ;;  %v1166_v57 = vpop.f32.mrb[18].mxu0  ;;  %v1759_v62 = vpop.f32.mrb[18].mxu1  ;;  %3730 = vmatpush1.bf16.msra.mxu0 %v18388_v3  ;;  %v19961_v29 = vadd.f32 %v1164_v56, %v19789_v33  ;;  %v19964_v13 = vadd.f32 %v1757_v5, %v19797_v35  ;;  %v18396_v50 = vld [vmem:[%s24992_s6 + $0xd0] ss:$8 sps:$4 sm:$0xff]  }
 0x120   :  { %2751 = vst [vmem:[#allocation2 + $0x20] sm:$0xff] %v2742_v55  ;;  %2753 = vst [vmem:[#allocation2 + $0x30] sm:$0xff] %v2744_v1  ;;  %v1168_v59 = vpop.f32.mrb[19].mxu0  ;;  %v1761_v0 = vpop.f32.mrb[19].mxu1  ;;  %v19976_v28 = vadd.f32 %v1166_v57, %v19785_v32  ;;  %v19982_v31 = vadd.f32 %v1759_v62, %v19793_v34  ;;  %v2306_v42 = vmax.f32 %v19952_v4, 0.0  ;;  %v2308_v44 = vmax.f32 %v19955_v22, 0.0  ;;  %4691 = vmatprep.subr.bf16.mxu1 %v18398_v51 }
 0x121   :  { %2752 = vst [vmem:[#allocation2 + $0x28] sm:$0xff] %v2743_v17  ;;  %2754 = vst.msk [vmem:[#allocation2 + $0x38] sm:$0xff] %vm2749_vm1, %v2745_v25  ;;  %v19979_v7 = vadd.f32 %v1168_v59, %v19789_v33  ;;  %v19985_v36 = vadd.f32 %v1761_v0, %v19797_v35  ;;  %v15312_v45 = vcombine.low %v107_v8, %v108_v30  ;;  %v2307_v46 = vmax.f32 %v19961_v29, 0.0 }
 0x122   :  { %1431 = vmatmul.mubr.bf16.gmra.mrb[124].mxu0 %v18326_v63  ;;  %2024 = vmatmul.mubr.bf16.gmra.mrb[124].mxu1 %v18326_v63  ;;  %v2309_v47 = vmax.f32 %v19964_v13, 0.0  ;;  %v20011_v49 = vcombine.low %v109_v38, %v110_v39  ;;  %v2310_v52 = vmax.f32 %v19976_v28, 0.0  ;;  %v2312_v61 = vmax.f32 %v19982_v31, 0.0 }
 0x123   :  { %15430 = vmatprep.mubr.msk.bf16.mxu0 %vm919_vm0, %v18327_v58  ;;  %15486 = vmatprep.mubr.msk.bf16.mxu1 %vm919_vm0, %v18327_v58  ;;  %v2311_v60 = vmax.f32 %v19979_v7, 0.0  ;;  %v2313_v10 = vmax.f32 %v19985_v36, 0.0 }
 0x124   :  { %4692 = vmatpush1.bf16.msra.mxu1 %v18396_v50 }
 0x125   :  { %v1172_v15 = vpop.f32.mrb[20].mxu0  ;;  %v1765_v2 = vpop.f32.mrb[20].mxu1 }
 0x126   :  { %v1174_v19 = vpop.f32.mrb[21].mxu0  ;;  %v1767_v24 = vpop.f32.mrb[21].mxu1  ;;  %v19994_v40 = vadd.f32 %v1172_v15, %v19785_v32  ;;  %v19997_v41 = vadd.f32 %v1765_v2, %v19793_v34  ;;  %v18335_v2 = vld [vmem:[%s24990_s0 + $0x224] ss:$8 sps:$4 sm:$0xff]  }
 0x127   :  { %v1176_v11 = vpop.f32.mrb[22].mxu0  ;;  %v1769_v6 = vpop.f32.mrb[22].mxu1  ;;  %v20001_v43 = vadd.f32 %v1174_v19, %v19789_v33  ;;  %v20007_v48 = vadd.f32 %v1767_v24, %v19797_v35 }
 0x128   :  { %v1178_v9 = vpop.f32.mrb[23].mxu0  ;;  %v1771_v37 = vpop.f32.mrb[23].mxu1  ;;  %v2314_v12 = vmax.f32 %v19994_v40, 0.0  ;;  %v20025_v53 = vadd.f32 %v1176_v11, %v19785_v32  ;;  %v2316_v54 = vmax.f32 %v19997_v41, 0.0  ;;  %v20029_v55 = vadd.f32 %v1769_v6, %v19793_v34 }
 0x129   :  { %v2315_v63 = vmax.f32 %v20001_v43, 0.0  ;;  %v20033_v5 = vadd.f32 %v1178_v9, %v19789_v33  ;;  %v2317_v58 = vmax.f32 %v20007_v48, 0.0  ;;  %v20039_v59 = vadd.f32 %v1771_v37, %v19797_v35  ;;  %v18342_v43 = vld [vmem:[%s24990_s0 + $0x230] ss:$8 sps:$4 sm:$0xff]  }
 0x12a   :  { %1441 = vmatmul.mubr.bf16.gmra.mrb[128].mxu0 %v18329_v23  ;;  %2034 = vmatmul.mubr.bf16.gmra.mrb[128].mxu1 %v18329_v23  ;;  %v2318_v38 = vmax.f32 %v20025_v53, 0.0  ;;  %v2320_v39 = vmax.f32 %v20029_v55, 0.0 }
 0x12b   :  { %15431 = vmatprep.mubr.msk.bf16.mxu0 %vm919_vm0, %v18333_v18  ;;  %15487 = vmatprep.mubr.msk.bf16.mxu1 %vm919_vm0, %v18333_v18 }
 0x12d   :  { %v1182_v1 = vpop.f32.mrb[24].mxu0  ;;  %v1775_v56 = vpop.f32.mrb[24].mxu1 }
 0x12e   :  { %v1183_v17 = vadd.f32 %v1182_v1, %v19785_v32  ;;  %v1184_v25 = vpop.f32.mrb[25].mxu0  ;;  %v1776_v57 = vadd.f32 %v1775_v56, %v19793_v34  ;;  %v1777_v62 = vpop.f32.mrb[25].mxu1 }
 0x12f   :  { %v1185_v0 = vadd.f32 %v1184_v25, %v19789_v33  ;;  %v1186_v3 = vpop.f32.mrb[26].mxu0  ;;  %v1778_v14 = vadd.f32 %v1777_v62, %v19797_v35  ;;  %v1779_v15 = vpop.f32.mrb[26].mxu1 }
 0x130   :  { %v2322_v4 = vmax.f32 %v1183_v17, 0.0  ;;  %v2324_v19 = vmax.f32 %v1776_v57, 0.0  ;;  %v1187_v22 = vadd.f32 %v1186_v3, %v19785_v32  ;;  %v1188_v23 = vpop.f32.mrb[27].mxu0  ;;  %v1780_v24 = vadd.f32 %v1779_v15, %v19793_v34  ;;  %v1781_v29 = vpop.f32.mrb[27].mxu1 }
 0x131   :  { %v2323_v11 = vmax.f32 %v1185_v0, 0.0  ;;  %v2325_v13 = vmax.f32 %v1778_v14, 0.0  ;;  %v1189_v6 = vadd.f32 %v1188_v23, %v19789_v33  ;;  %v1782_v8 = vadd.f32 %v1781_v29, %v19797_v35 }
 0x132   :  { %v2755_v30 = vmax.f32 %v2306_v42, %v2322_v4  ;;  %v2757_v18 = vmax.f32 %v2308_v44, %v2324_v19  ;;  %v2326_v28 = vmax.f32 %v1187_v22, 0.0  ;;  %v2328_v7 = vmax.f32 %v1780_v24, 0.0  ;;  %1451 = vmatmul.mubr.bf16.gmra.mrb[132].mxu0 %v15312_v45  ;;  %2044 = vmatmul.mubr.bf16.gmra.mrb[132].mxu1 %v15312_v45 }
 0x133   :  { %v2756_v9 = vmax.f32 %v2307_v46, %v2323_v11  ;;  %v2758_v31 = vmax.f32 %v2309_v47, %v2325_v13  ;;  %v2327_v36 = vmax.f32 %v1189_v6, 0.0  ;;  %v2329_v37 = vmax.f32 %v1782_v8, 0.0  ;;  %15432 = vmatprep.mubr.msk.bf16.mxu0 %vm919_vm0, %v18335_v2  ;;  %15488 = vmatprep.mubr.msk.bf16.mxu1 %vm919_vm0, %v18335_v2 }
 0x134   :  { %v2759_v50 = vmax.f32 %v2310_v52, %v2326_v28  ;;  %v2761_v51 = vmax.f32 %v2312_v61, %v2328_v7  ;;  %v2319_v42 = vmax.f32 %v20033_v5, 0.0  ;;  %v2321_v44 = vmax.f32 %v20039_v59, 0.0 }
 0x135   :  { %v2760_v1 = vmax.f32 %v2311_v60, %v2327_v36  ;;  %v2762_v45 = vmax.f32 %v2313_v10, %v2329_v37  ;;  %v1192_v46 = vpop.f32.mrb[28].mxu0  ;;  %v1785_v47 = vpop.f32.mrb[28].mxu1  ;;  %v18340_v60 = vld [vmem:[%s24990_s0 + $0x234] ss:$8 sps:$4 sm:$0xff]  }
 0x136   :  { %v2771_v56 = vpack.c.bf16 %v2759_v50, %v2755_v30  ;;  %v2773_v17 = vpack.c.bf16 %v2761_v51, %v2757_v18  ;;  %v1193_v25 = vadd.f32 %v1192_v46, %v19785_v32  ;;  %v1194_v57 = vpop.f32.mrb[29].mxu0  ;;  %v1786_v62 = vadd.f32 %v1785_v47, %v19793_v34  ;;  %v1787_v53 = vpop.f32.mrb[29].mxu1 }
 0x137   :  { %v2772_v0 = vpack.c.bf16 %v2760_v1, %v2756_v9  ;;  %v2774_v55 = vpack.c.bf16 %v2762_v45, %v2758_v31  ;;  %v1195_v52 = vadd.f32 %v1194_v57, %v19789_v33  ;;  %v1196_v61 = vpop.f32.mrb[30].mxu0  ;;  %v1788_v5 = vadd.f32 %v1787_v53, %v19797_v35  ;;  %v1789_v59 = vpop.f32.mrb[30].mxu1  ;;  %v116_v57 = vld [vmem:[%s24990_s0 + $0x258] sm:$0xff] }
 0x138   :  { %2779 = vst [vmem:[#allocation2 + $0x40] sm:$0xff] %v2771_v56  ;;  %2781 = vst [vmem:[#allocation2 + $0x50] sm:$0xff] %v2773_v17  ;;  %v2330_v10 = vmax.f32 %v1193_v25, 0.0  ;;  %v2332_v3 = vmax.f32 %v1786_v62, 0.0  ;;  %v1197_v14 = vadd.f32 %v1196_v61, %v19785_v32  ;;  %v1198_v15 = vpop.f32.mrb[31].mxu0  ;;  %v1790_v2 = vadd.f32 %v1789_v59, %v19793_v34  ;;  %v1791_v4 = vpop.f32.mrb[31].mxu1 }
 0x139   :  { %2780 = vst [vmem:[#allocation2 + $0x48] sm:$0xff] %v2772_v0  ;;  %2782 = vst.msk [vmem:[#allocation2 + $0x58] sm:$0xff] %vm2749_vm1, %v2774_v55  ;;  %v2331_v19 = vmax.f32 %v1195_v52, 0.0  ;;  %v2333_v22 = vmax.f32 %v1788_v5, 0.0  ;;  %v1199_v23 = vadd.f32 %v1198_v15, %v19789_v33  ;;  %v1792_v24 = vadd.f32 %v1791_v4, %v19797_v35  ;;  %v18348_v56 = vld [vmem:[%s24990_s0 + $0x240] ss:$8 sps:$4 sm:$0xff]  }
 0x13a   :  { %v2763_v29 = vmax.f32 %v2314_v12, %v2330_v10  ;;  %v2765_v11 = vmax.f32 %v2316_v54, %v2332_v3  ;;  %v2334_v13 = vmax.f32 %v1197_v14, 0.0  ;;  %v2336_v6 = vmax.f32 %v1790_v2, 0.0  ;;  %1461 = vmatmul.mubr.bf16.gmra.mrb[136].mxu0 %v20011_v49  ;;  %2054 = vmatmul.mubr.bf16.gmra.mrb[136].mxu1 %v20011_v49  ;;  %v115_v25 = vld [vmem:[%s24990_s0 + $0x250] sm:$0xff]  ;;  %v117_v5 = vld [vmem:[%s24990_s0 + $0x260] sm:$0xff]  ;;  %v118_v59 = vld [vmem:[%s24990_s0 + $0x268] sm:$0xff] }
 0x13b   :  { %v2764_v8 = vmax.f32 %v2315_v63, %v2331_v19  ;;  %v2766_v30 = vmax.f32 %v2317_v58, %v2333_v22  ;;  %v2335_v18 = vmax.f32 %v1199_v23, 0.0  ;;  %v2337_v28 = vmax.f32 %v1792_v24, 0.0  ;;  %15433 = vmatprep.mubr.msk.bf16.mxu0 %vm919_vm0, %v18340_v60  ;;  %15489 = vmatprep.mubr.msk.bf16.mxu1 %vm919_vm0, %v18340_v60  ;;  %v18349_v61 = vld [vmem:[%s24990_s0 + $0x254] ss:$8 sps:$4 sm:$0xff]   ;;  %v18410_v22 = vld [vmem:[%s24992_s6 + $0xe0] ss:$8 sps:$4 sm:$0xff]  }
 0x13c   :  { %v2767_v40 = vmax.f32 %v2318_v38, %v2334_v13  ;;  %v2769_v41 = vmax.f32 %v2320_v39, %v2336_v6  ;;  %v18343_v38 = vld [vmem:[%s24990_s0 + $0x244] ss:$8 sps:$4 sm:$0xff]   ;;  %v20153_v13 = vcombine.low %v117_v5, %v118_v59 }
 0x13d   :  { %v2768_v12 = vmax.f32 %v2319_v42, %v2335_v18  ;;  %v2770_v54 = vmax.f32 %v2321_v44, %v2337_v28  ;;  %v1202_v7 = vpop.f32.mrb[32].mxu0  ;;  %v1795_v9 = vpop.f32.mrb[32].mxu1  ;;  %v18404_v42 = vld [vmem:[%s24991_s5 + $0xe0] ss:$8 sps:$4 sm:$0xff]   ;;  %v18406_v44 = vld [vmem:[%s24991_s5 + $0xe4] ss:$8 sps:$4 sm:$0xff]  }
 0x13e   :  { %v2775_v31 = vpack.c.bf16 %v2767_v40, %v2763_v29  ;;  %v2777_v49 = vpack.c.bf16 %v2769_v41, %v2765_v11  ;;  %v1204_v36 = vpop.f32.mrb[33].mxu0  ;;  %v1797_v48 = vpop.f32.mrb[33].mxu1  ;;  %3731 = vmatprep.subr.bf16.mxu0 %v18406_v44  ;;  %v20096_v46 = vadd.f32 %v1202_v7, %v19785_v32  ;;  %v20111_v53 = vadd.f32 %v1795_v9, %v19793_v34  ;;  %v18412_v23 = vld [vmem:[%s24992_s6 + $0xe4] ss:$8 sps:$4 sm:$0xff]  }
 0x13f   :  { %v2776_v63 = vpack.c.bf16 %v2768_v12, %v2764_v8  ;;  %v2778_v58 = vpack.c.bf16 %v2770_v54, %v2766_v30  ;;  %v1206_v37 = vpop.f32.mrb[34].mxu0  ;;  %v1799_v50 = vpop.f32.mrb[34].mxu1  ;;  %3732 = vmatpush1.bf16.msra.mxu0 %v18404_v42  ;;  %v20108_v62 = vadd.f32 %v1204_v36, %v19789_v33  ;;  %v20114_v55 = vadd.f32 %v1797_v48, %v19797_v35 }
 0x140   :  { %2783 = vst [vmem:[#allocation2 + $0x60] sm:$0xff] %v2775_v31  ;;  %2785 = vst [vmem:[#allocation2 + $0x70] sm:$0xff] %v2777_v49  ;;  %v1208_v39 = vpop.f32.mrb[35].mxu0  ;;  %v1801_v51 = vpop.f32.mrb[35].mxu1  ;;  %v20126_v60 = vadd.f32 %v1206_v37, %v19785_v32  ;;  %v20132_v14 = vadd.f32 %v1799_v50, %v19793_v34  ;;  %v2338_v24 = vmax.f32 %v20096_v46, 0.0  ;;  %v15320_v11 = vcombine.low %v115_v25, %v116_v57 }
 0x141   :  { %2784 = vst [vmem:[#allocation2 + $0x68] sm:$0xff] %v2776_v63  ;;  %2786 = vst.msk [vmem:[#allocation2 + $0x78] sm:$0xff] %vm2749_vm1, %v2778_v58  ;;  %v20129_v10 = vadd.f32 %v1208_v39, %v19789_v33  ;;  %v20135_v15 = vadd.f32 %v1801_v51, %v19797_v35  ;;  %v2339_v6 = vmax.f32 %v20108_v62, 0.0  ;;  %v2340_v8 = vmax.f32 %v20111_v53, 0.0  ;;  %4693 = vmatprep.subr.bf16.mxu1 %v18412_v23 }
 0x142   :  { %1471 = vmatmul.mubr.bf16.gmra.mrb[140].mxu0 %v18342_v43  ;;  %2064 = vmatmul.mubr.bf16.gmra.mrb[140].mxu1 %v18342_v43  ;;  %v2341_v30 = vmax.f32 %v20114_v55, 0.0  ;;  %v2342_v28 = vmax.f32 %v20126_v60, 0.0  ;;  %v2344_v41 = vmax.f32 %v20132_v14, 0.0 }
 0x143   :  { %15434 = vmatprep.mubr.msk.bf16.mxu0 %vm919_vm0, %v18343_v38  ;;  %15490 = vmatprep.mubr.msk.bf16.mxu1 %vm919_vm0, %v18343_v38  ;;  %v2343_v40 = vmax.f32 %v20129_v10, 0.0  ;;  %v2345_v12 = vmax.f32 %v20135_v15, 0.0 }
 0x144   :  { %4694 = vmatpush1.bf16.msra.mxu1 %v18410_v22 }
 0x145   :  { %v1212_v1 = vpop.f32.mrb[36].mxu0  ;;  %v1805_v45 = vpop.f32.mrb[36].mxu1 }
 0x146   :  { %v1214_v47 = vpop.f32.mrb[37].mxu0  ;;  %v1807_v17 = vpop.f32.mrb[37].mxu1  ;;  %v20138_v4 = vadd.f32 %v1212_v1, %v19785_v32  ;;  %v20141_v19 = vadd.f32 %v1805_v45, %v19793_v34  ;;  %v18354_v45 = vld [vmem:[%s24990_s0 + $0x264] ss:$8 sps:$4 sm:$0xff]  }
 0x147   :  { %v1216_v0 = vpop.f32.mrb[38].mxu0  ;;  %v1809_v52 = vpop.f32.mrb[38].mxu1  ;;  %v20151_v29 = vadd.f32 %v1214_v47, %v19789_v33  ;;  %v20159_v18 = vadd.f32 %v1807_v17, %v19797_v35 }
 0x148   :  { %v1218_v3 = vpop.f32.mrb[39].mxu0  ;;  %v1811_v2 = vpop.f32.mrb[39].mxu1  ;;  %v2346_v54 = vmax.f32 %v20138_v4, 0.0  ;;  %v20169_v7 = vadd.f32 %v1216_v0, %v19785_v32  ;;  %v2348_v9 = vmax.f32 %v20141_v19, 0.0  ;;  %v20173_v31 = vadd.f32 %v1809_v52, %v19793_v34 }
 0x149   :  { %v2347_v43 = vmax.f32 %v20151_v29, 0.0  ;;  %v20177_v48 = vadd.f32 %v1218_v3, %v19789_v33  ;;  %v2349_v38 = vmax.f32 %v20159_v18, 0.0  ;;  %v20183_v39 = vadd.f32 %v1811_v2, %v19797_v35  ;;  %v18358_v18 = vld [vmem:[%s24990_s0 + $0x270] ss:$8 sps:$4 sm:$0xff]  }
 0x14a   :  { %1481 = vmatmul.mubr.bf16.gmra.mrb[144].mxu0 %v18348_v56  ;;  %2074 = vmatmul.mubr.bf16.gmra.mrb[144].mxu1 %v18348_v56  ;;  %v2350_v15 = vmax.f32 %v20169_v7, 0.0  ;;  %v2352_v2 = vmax.f32 %v20173_v31, 0.0 }
 0x14b   :  { %15435 = vmatprep.mubr.msk.bf16.mxu0 %vm919_vm0, %v18349_v61  ;;  %15491 = vmatprep.mubr.msk.bf16.mxu1 %vm919_vm0, %v18349_v61 }
 0x14d   :  { %v1222_v49 = vpop.f32.mrb[40].mxu0  ;;  %v1815_v36 = vpop.f32.mrb[40].mxu1 }
 0x14e   :  { %v1223_v63 = vadd.f32 %v1222_v49, %v19785_v32  ;;  %v1224_v58 = vpop.f32.mrb[41].mxu0  ;;  %v1816_v37 = vadd.f32 %v1815_v36, %v19793_v34  ;;  %v1817_v50 = vpop.f32.mrb[41].mxu1 }
 0x14f   :  { %v1225_v51 = vadd.f32 %v1224_v58, %v19789_v33  ;;  %v1226_v42 = vpop.f32.mrb[42].mxu0  ;;  %v1818_v44 = vadd.f32 %v1817_v50, %v19797_v35  ;;  %v1819_v1 = vpop.f32.mrb[42].mxu1 }
 0x150   :  { %v2354_v46 = vmax.f32 %v1223_v63, 0.0  ;;  %v2356_v47 = vmax.f32 %v1816_v37, 0.0  ;;  %v1227_v56 = vadd.f32 %v1226_v42, %v19785_v32  ;;  %v1228_v17 = vpop.f32.mrb[43].mxu0  ;;  %v1820_v25 = vadd.f32 %v1819_v1, %v19793_v34  ;;  %v1821_v57 = vpop.f32.mrb[43].mxu1 }
 0x151   :  { %v2355_v62 = vmax.f32 %v1225_v51, 0.0  ;;  %v2357_v53 = vmax.f32 %v1818_v44, 0.0  ;;  %v1229_v0 = vadd.f32 %v1228_v17, %v19789_v33  ;;  %v1822_v55 = vadd.f32 %v1821_v57, %v19797_v35 }
 0x152   :  { %v2787_v52 = vmax.f32 %v2338_v24, %v2354_v46  ;;  %v2789_v61 = vmax.f32 %v2340_v8, %v2356_v47  ;;  %v2358_v5 = vmax.f32 %v1227_v56, 0.0  ;;  %v2360_v59 = vmax.f32 %v1820_v25, 0.0  ;;  %1491 = vmatmul.mubr.bf16.gmra.mrb[148].mxu0 %v15320_v11  ;;  %2084 = vmatmul.mubr.bf16.gmra.mrb[148].mxu1 %v15320_v11 }
 0x153   :  { %v2788_v60 = vmax.f32 %v2339_v6, %v2355_v62  ;;  %v2790_v10 = vmax.f32 %v2341_v30, %v2357_v53  ;;  %v2359_v3 = vmax.f32 %v1229_v0, 0.0  ;;  %v2361_v14 = vmax.f32 %v1822_v55, 0.0  ;;  %15436 = vmatprep.mubr.msk.bf16.mxu0 %vm919_vm0, %v18354_v45  ;;  %15492 = vmatprep.mubr.msk.bf16.mxu1 %vm919_vm0, %v18354_v45  ;;  %v18418_v55 = vld [vmem:[%s24991_s5 + $0xf0] ss:$8 sps:$4 sm:$0xff]  }
 0x154   :  { %v2791_v22 = vmax.f32 %v2342_v28, %v2358_v5  ;;  %v2793_v23 = vmax.f32 %v2344_v41, %v2360_v59  ;;  %v2351_v24 = vmax.f32 %v20177_v48, 0.0  ;;  %v2353_v8 = vmax.f32 %v20183_v39, 0.0 }
 0x155   :  { %v2792_v49 = vmax.f32 %v2343_v40, %v2359_v3  ;;  %v2794_v11 = vmax.f32 %v2345_v12, %v2361_v14  ;;  %v1232_v6 = vpop.f32.mrb[44].mxu0  ;;  %v1825_v30 = vpop.f32.mrb[44].mxu1  ;;  %v18356_v40 = vld [vmem:[%s24990_s0 + $0x274] ss:$8 sps:$4 sm:$0xff]  }
 0x156   :  { %v2803_v36 = vpack.c.bf16 %v2791_v22, %v2787_v52  ;;  %v2805_v63 = vpack.c.bf16 %v2793_v23, %v2789_v61  ;;  %v1233_v58 = vadd.f32 %v1232_v6, %v19785_v32  ;;  %v1234_v37 = vpop.f32.mrb[45].mxu0  ;;  %v1826_v50 = vadd.f32 %v1825_v30, %v19793_v34  ;;  %v1827_v7 = vpop.f32.mrb[45].mxu1  ;;  %v18420_v52 = vld [vmem:[%s24991_s5 + $0xf4] ss:$8 sps:$4 sm:$0xff]  }
 0x157   :  { %v2804_v51 = vpack.c.bf16 %v2792_v49, %v2788_v60  ;;  %v2806_v31 = vpack.c.bf16 %v2794_v11, %v2790_v10  ;;  %v1235_v28 = vadd.f32 %v1234_v37, %v19789_v33  ;;  %v1236_v41 = vpop.f32.mrb[46].mxu0  ;;  %v1828_v48 = vadd.f32 %v1827_v7, %v19797_v35  ;;  %v1829_v39 = vpop.f32.mrb[46].mxu1  ;;  %3733 = vmatprep.subr.bf16.mxu0 %v18420_v52  ;;  %v18427_v11 = vld [vmem:[%s24992_s6 + $0xf4] ss:$8 sps:$4 sm:$0xff]  }
 0x158   :  { %2811 = vst [vmem:[#allocation2 + $0x80] sm:$0xff] %v2803_v36  ;;  %2813 = vst [vmem:[#allocation2 + $0x90] sm:$0xff] %v2805_v63  ;;  %v2362_v12 = vmax.f32 %v1233_v58, 0.0  ;;  %v2364_v42 = vmax.f32 %v1826_v50, 0.0  ;;  %v1237_v44 = vadd.f32 %v1236_v41, %v19785_v32  ;;  %v1238_v1 = vpop.f32.mrb[47].mxu0  ;;  %v1830_v45 = vadd.f32 %v1829_v39, %v19793_v34  ;;  %v1831_v46 = vpop.f32.mrb[47].mxu1  ;;  %3734 = vmatpush1.bf16.msra.mxu0 %v18418_v55 }
 0x159   :  { %2812 = vst [vmem:[#allocation2 + $0x88] sm:$0xff] %v2804_v51  ;;  %2814 = vst.msk [vmem:[#allocation2 + $0x98] sm:$0xff] %vm2749_vm1, %v2806_v31  ;;  %v2363_v47 = vmax.f32 %v1235_v28, 0.0  ;;  %v2365_v56 = vmax.f32 %v1828_v48, 0.0  ;;  %v1239_v17 = vadd.f32 %v1238_v1, %v19789_v33  ;;  %v1832_v25 = vadd.f32 %v1831_v46, %v19797_v35  ;;  %4695 = vmatprep.subr.bf16.mxu1 %v18427_v11  ;;  %v18364_v58 = vld [vmem:[%s24990_s0 + $0x280] ss:$8 sps:$4 sm:$0xff]  }
 0x15a   :  { %v2795_v57 = vmax.f32 %v2346_v54, %v2362_v12  ;;  %v2797_v62 = vmax.f32 %v2348_v9, %v2364_v42  ;;  %v2366_v53 = vmax.f32 %v1237_v44, 0.0  ;;  %v2368_v0 = vmax.f32 %v1830_v45, 0.0  ;;  %1501 = vmatmul.mubr.bf16.gmra.mrb[152].mxu0 %v20153_v13  ;;  %2094 = vmatmul.mubr.bf16.gmra.mrb[152].mxu1 %v20153_v13  ;;  %v123_v50 = vld [vmem:[%s24990_s0 + $0x290] sm:$0xff]  ;;  %v124_v7 = vld [vmem:[%s24990_s0 + $0x298] sm:$0xff]  ;;  %v126_v12 = vld [vmem:[%s24990_s0 + $0x2a8] sm:$0xff] }
 0x15b   :  { %v2796_v4 = vmax.f32 %v2347_v43, %v2363_v47  ;;  %v2798_v19 = vmax.f32 %v2349_v38, %v2365_v56  ;;  %v2367_v54 = vmax.f32 %v1239_v17, 0.0  ;;  %v2369_v9 = vmax.f32 %v1832_v25, 0.0  ;;  %15437 = vmatprep.mubr.msk.bf16.mxu0 %vm919_vm0, %v18356_v40  ;;  %15493 = vmatprep.mubr.msk.bf16.mxu1 %vm919_vm0, %v18356_v40  ;;  %v18365_v39 = vld [vmem:[%s24990_s0 + $0x294] ss:$8 sps:$4 sm:$0xff]   ;;  %v125_v40 = vld [vmem:[%s24990_s0 + $0x2a0] sm:$0xff] }
 0x15c   :  { %v2799_v13 = vmax.f32 %v2350_v15, %v2366_v53  ;;  %v2801_v61 = vmax.f32 %v2352_v2, %v2368_v0  ;;  %v18362_v15 = vld [vmem:[%s24990_s0 + $0x284] ss:$8 sps:$4 sm:$0xff]   ;;  %v20295_v53 = vcombine.low %v125_v40, %v126_v12 }
 0x15d   :  { %v2800_v5 = vmax.f32 %v2351_v24, %v2367_v54  ;;  %v2802_v59 = vmax.f32 %v2353_v8, %v2369_v9  ;;  %v1242_v60 = vpop.f32.mrb[48].mxu0  ;;  %v1835_v10 = vpop.f32.mrb[48].mxu1  ;;  %v18425_v8 = vld [vmem:[%s24992_s6 + $0xf0] ss:$8 sps:$4 sm:$0xff]   ;;  %v18370_v11 = vld [vmem:[%s24990_s0 + $0x2a4] ss:$8 sps:$4 sm:$0xff]  }
 0x15e   :  { %v2807_v3 = vpack.c.bf16 %v2799_v13, %v2795_v57  ;;  %v2809_v29 = vpack.c.bf16 %v2801_v61, %v2797_v62  ;;  %v1244_v43 = vpop.f32.mrb[49].mxu0  ;;  %v1837_v38 = vpop.f32.mrb[49].mxu1  ;;  %v20246_v36 = vadd.f32 %v1242_v60, %v19785_v32  ;;  %4696 = vmatpush1.bf16.msra.mxu1 %v18425_v8  ;;  %v1836_v31 = vadd.f32 %v1835_v10, %v19793_v34 }
 0x15f   :  { %v2808_v14 = vpack.c.bf16 %v2800_v5, %v2796_v4  ;;  %v2810_v22 = vpack.c.bf16 %v2802_v59, %v2798_v19  ;;  %v1246_v23 = vpop.f32.mrb[50].mxu0  ;;  %v1839_v49 = vpop.f32.mrb[50].mxu1  ;;  %v20258_v51 = vadd.f32 %v1244_v43, %v19789_v33  ;;  %v20262_v41 = vadd.f32 %v1837_v38, %v19797_v35 }
 0x160   :  { %2815 = vst [vmem:[#allocation2 + $0xa0] sm:$0xff] %v2807_v3  ;;  %2817 = vst [vmem:[#allocation2 + $0xb0] sm:$0xff] %v2809_v29  ;;  %v1248_v2 = vpop.f32.mrb[51].mxu0  ;;  %v1841_v24 = vpop.f32.mrb[51].mxu1  ;;  %v20274_v42 = vadd.f32 %v1246_v23, %v19785_v32  ;;  %v20280_v45 = vadd.f32 %v1839_v49, %v19793_v34  ;;  %v2370_v25 = vmax.f32 %v20246_v36, 0.0  ;;  %v15328_v62 = vcombine.low %v123_v50, %v124_v7 }
 0x161   :  { %2816 = vst [vmem:[#allocation2 + $0xa8] sm:$0xff] %v2808_v14  ;;  %2818 = vst.msk [vmem:[#allocation2 + $0xb8] sm:$0xff] %vm2749_vm1, %v2810_v22  ;;  %v20277_v44 = vadd.f32 %v1248_v2, %v19789_v33  ;;  %v20283_v46 = vadd.f32 %v1841_v24, %v19797_v35  ;;  %v2371_v0 = vmax.f32 %v20258_v51, 0.0  ;;  %v2372_v55 = vmax.f32 %v1836_v31, 0.0 }
 0x162   :  { %1511 = vmatmul.mubr.bf16.gmra.mrb[156].mxu0 %v18358_v18  ;;  %2104 = vmatmul.mubr.bf16.gmra.mrb[156].mxu1 %v18358_v18  ;;  %v2373_v52 = vmax.f32 %v20262_v41, 0.0  ;;  %v2374_v19 = vmax.f32 %v20274_v42, 0.0  ;;  %v2376_v9 = vmax.f32 %v20280_v45, 0.0 }
 0x163   :  { %15438 = vmatprep.mubr.msk.bf16.mxu0 %vm919_vm0, %v18362_v15  ;;  %15494 = vmatprep.mubr.msk.bf16.mxu1 %vm919_vm0, %v18362_v15  ;;  %v2375_v54 = vmax.f32 %v20277_v44, 0.0  ;;  %v2377_v13 = vmax.f32 %v20283_v46, 0.0 }
 0x165   :  { %v1252_v6 = vpop.f32.mrb[52].mxu0  ;;  %v1845_v30 = vpop.f32.mrb[52].mxu1 }
 0x166   :  { %v1254_v63 = vpop.f32.mrb[53].mxu0  ;;  %v1847_v37 = vpop.f32.mrb[53].mxu1  ;;  %v20286_v56 = vadd.f32 %v1252_v6, %v19785_v32  ;;  %v20289_v17 = vadd.f32 %v1845_v30, %v19793_v34 }
 0x167   :  { %v1256_v28 = vpop.f32.mrb[54].mxu0  ;;  %v1849_v48 = vpop.f32.mrb[54].mxu1  ;;  %v20293_v57 = vadd.f32 %v1254_v63, %v19789_v33  ;;  %v20300_v4 = vadd.f32 %v1847_v37, %v19797_v35 }
 0x168   :  { %v1258_v1 = vpop.f32.mrb[55].mxu0  ;;  %v1851_v47 = vpop.f32.mrb[55].mxu1  ;;  %v2378_v61 = vmax.f32 %v20286_v56, 0.0  ;;  %v20310_v5 = vadd.f32 %v1256_v28, %v19785_v32  ;;  %v2380_v59 = vmax.f32 %v20289_v17, 0.0  ;;  %v20314_v60 = vadd.f32 %v1849_v48, %v19793_v34 }
 0x169   :  { %v2379_v29 = vmax.f32 %v20293_v57, 0.0  ;;  %v20318_v43 = vadd.f32 %v1258_v1, %v19789_v33  ;;  %v2381_v23 = vmax.f32 %v20300_v4, 0.0  ;;  %v20324_v49 = vadd.f32 %v1851_v47, %v19797_v35  ;;  %v18377_v4 = vld [vmem:[%s24990_s0 + $0x2b0] ss:$8 sps:$4 sm:$0xff]  }
 0x16a   :  { %1521 = vmatmul.mubr.bf16.gmra.mrb[160].mxu0 %v18364_v58  ;;  %2114 = vmatmul.mubr.bf16.gmra.mrb[160].mxu1 %v18364_v58  ;;  %v2382_v1 = vmax.f32 %v20310_v5, 0.0  ;;  %v2384_v45 = vmax.f32 %v20314_v60, 0.0 }
 0x16b   :  { %15439 = vmatprep.mubr.msk.bf16.mxu0 %vm919_vm0, %v18365_v39  ;;  %15495 = vmatprep.mubr.msk.bf16.mxu1 %vm919_vm0, %v18365_v39 }
 0x16d   :  { %v1262_v10 = vpop.f32.mrb[56].mxu0  ;;  %v1855_v3 = vpop.f32.mrb[56].mxu1 }
 0x16e   :  { %v1263_v18 = vadd.f32 %v1262_v10, %v19785_v32  ;;  %v1264_v38 = vpop.f32.mrb[57].mxu0  ;;  %v1856_v14 = vadd.f32 %v1855_v3, %v19793_v34  ;;  %v1857_v22 = vpop.f32.mrb[57].mxu1 }
 0x16f   :  { %v1265_v15 = vadd.f32 %v1264_v38, %v19789_v33  ;;  %v1266_v2 = vpop.f32.mrb[58].mxu0  ;;  %v1858_v24 = vadd.f32 %v1857_v22, %v19797_v35  ;;  %v1859_v8 = vpop.f32.mrb[58].mxu1 }
 0x170   :  { %v2386_v6 = vmax.f32 %v1263_v18, 0.0  ;;  %v2388_v30 = vmax.f32 %v1856_v14, 0.0  ;;  %v1267_v36 = vadd.f32 %v1266_v2, %v19785_v32  ;;  %v1268_v63 = vpop.f32.mrb[59].mxu0  ;;  %v1860_v58 = vadd.f32 %v1859_v8, %v19793_v34  ;;  %v1861_v37 = vpop.f32.mrb[59].mxu1 }
 0x171   :  { %v2387_v50 = vmax.f32 %v1265_v15, 0.0  ;;  %v2389_v7 = vmax.f32 %v1858_v24, 0.0  ;;  %v1269_v51 = vadd.f32 %v1268_v63, %v19789_v33  ;;  %v1862_v31 = vadd.f32 %v1861_v37, %v19797_v35  ;;  %v18431_v37 = vld [vmem:[%s24991_s5 + $0x104] ss:$8 sps:$4 sm:$0xff]  }
 0x172   :  { %v2819_v28 = vmax.f32 %v2370_v25, %v2386_v6  ;;  %v2821_v41 = vmax.f32 %v2372_v55, %v2388_v30  ;;  %v2390_v48 = vmax.f32 %v1267_v36, 0.0  ;;  %v2392_v39 = vmax.f32 %v1860_v58, 0.0  ;;  %1531 = vmatmul.mubr.bf16.gmra.mrb[164].mxu0 %v15328_v62  ;;  %2124 = vmatmul.mubr.bf16.gmra.mrb[164].mxu1 %v15328_v62 }
 0x173   :  { %v2820_v40 = vmax.f32 %v2371_v0, %v2387_v50  ;;  %v2822_v12 = vmax.f32 %v2373_v52, %v2389_v7  ;;  %v2391_v42 = vmax.f32 %v1269_v51, 0.0  ;;  %v2393_v44 = vmax.f32 %v1862_v31, 0.0  ;;  %15440 = vmatprep.mubr.msk.bf16.mxu0 %vm919_vm0, %v18370_v11  ;;  %15496 = vmatprep.mubr.msk.bf16.mxu1 %vm919_vm0, %v18370_v11 }
 0x174   :  { %v2823_v46 = vmax.f32 %v2374_v19, %v2390_v48  ;;  %v2825_v47 = vmax.f32 %v2376_v9, %v2392_v39  ;;  %v2383_v25 = vmax.f32 %v20318_v43, 0.0  ;;  %v2385_v55 = vmax.f32 %v20324_v49, 0.0  ;;  %4016 = vmatprep.subr.bf16.mxu0 %v18431_v37 }
 0x175   :  { %v2824_v10 = vmax.f32 %v2375_v54, %v2391_v42  ;;  %v2826_v62 = vmax.f32 %v2377_v13, %v2393_v44  ;;  %v1272_v0 = vpop.f32.mrb[60].mxu0  ;;  %v1865_v52 = vpop.f32.mrb[60].mxu1  ;;  %v18372_v54 = vld [vmem:[%s24990_s0 + $0x2b4] ss:$8 sps:$4 sm:$0xff]  }
 0x176   :  { %v2835_v3 = vpack.c.bf16 %v2823_v46, %v2819_v28  ;;  %v2837_v18 = vpack.c.bf16 %v2825_v47, %v2821_v41  ;;  %v1273_v38 = vadd.f32 %v1272_v0, %v19785_v32  ;;  %v1274_v14 = vpop.f32.mrb[61].mxu0  ;;  %v1866_v22 = vadd.f32 %v1865_v52, %v19793_v34  ;;  %v1867_v5 = vpop.f32.mrb[61].mxu1 }
 0x177   :  { %v2836_v15 = vpack.c.bf16 %v2824_v10, %v2820_v40  ;;  %v2838_v60 = vpack.c.bf16 %v2826_v62, %v2822_v12  ;;  %v1275_v19 = vadd.f32 %v1274_v14, %v19789_v33  ;;  %v1276_v9 = vpop.f32.mrb[62].mxu0  ;;  %v1868_v43 = vadd.f32 %v1867_v5, %v19797_v35  ;;  %v1869_v49 = vpop.f32.mrb[62].mxu1  ;;  %v132_v14 = vld [vmem:[%s24990_s0 + $0x2d8] sm:$0xff] }
 0x178   :  { %2843 = vst [vmem:[#allocation2 + $0xc0] sm:$0xff] %v2835_v3  ;;  %2845 = vst [vmem:[#allocation2 + $0xd0] sm:$0xff] %v2837_v18  ;;  %v2394_v13 = vmax.f32 %v1273_v38, 0.0  ;;  %v2396_v2 = vmax.f32 %v1866_v22, 0.0  ;;  %v1277_v24 = vadd.f32 %v1276_v9, %v19785_v32  ;;  %v1278_v8 = vpop.f32.mrb[63].mxu0  ;;  %v1870_v11 = vadd.f32 %v1869_v49, %v19793_v34  ;;  %v1871_v6 = vpop.f32.mrb[63].mxu1 }
 0x179   :  { %2844 = vst [vmem:[#allocation2 + $0xc8] sm:$0xff] %v2836_v15  ;;  %2846 = vst.msk [vmem:[#allocation2 + $0xd8] sm:$0xff] %vm2749_vm1, %v2838_v60  ;;  %v2395_v30 = vmax.f32 %v1275_v19, 0.0  ;;  %v2397_v36 = vmax.f32 %v1868_v43, 0.0  ;;  %v1279_v63 = vadd.f32 %v1278_v8, %v19789_v33  ;;  %v1872_v58 = vadd.f32 %v1871_v6, %v19797_v35  ;;  %v18380_v3 = vld [vmem:[%s24990_s0 + $0x2c0] ss:$8 sps:$4 sm:$0xff]  }
 0x17a   :  { %v2827_v50 = vmax.f32 %v2378_v61, %v2394_v13  ;;  %v2829_v7 = vmax.f32 %v2380_v59, %v2396_v2  ;;  %v2398_v51 = vmax.f32 %v1277_v24, 0.0  ;;  %v2400_v31 = vmax.f32 %v1870_v11, 0.0  ;;  %1541 = vmatmul.mubr.bf16.gmra.mrb[168].mxu0 %v20295_v53  ;;  %2134 = vmatmul.mubr.bf16.gmra.mrb[168].mxu1 %v20295_v53  ;;  %v131_v38 = vld [vmem:[%s24990_s0 + $0x2d0] sm:$0xff]  ;;  %v133_v43 = vld [vmem:[%s24990_s0 + $0x2e0] sm:$0xff]  ;;  %v134_v49 = vld [vmem:[%s24990_s0 + $0x2e8] sm:$0xff] }
 0x17b   :  { %v2828_v28 = vmax.f32 %v2379_v29, %v2395_v30  ;;  %v2830_v41 = vmax.f32 %v2381_v23, %v2397_v36  ;;  %v2399_v48 = vmax.f32 %v1279_v63, 0.0  ;;  %v2401_v39 = vmax.f32 %v1872_v58, 0.0  ;;  %15441 = vmatprep.mubr.msk.bf16.mxu0 %vm919_vm0, %v18372_v54  ;;  %15497 = vmatprep.mubr.msk.bf16.mxu1 %vm919_vm0, %v18372_v54  ;;  %v18384_v9 = vld [vmem:[%s24990_s0 + $0x2d4] ss:$8 sps:$4 sm:$0xff]  }
 0x17c   :  { %v2831_v56 = vmax.f32 %v2382_v1, %v2398_v51  ;;  %v2833_v17 = vmax.f32 %v2384_v45, %v2400_v31  ;;  %v18378_v1 = vld [vmem:[%s24990_s0 + $0x2c4] ss:$8 sps:$4 sm:$0xff]   ;;  %v15336_v58 = vcombine.low %v131_v38, %v132_v14  ;;  %v20430_v37 = vcombine.low %v133_v43, %v134_v49 }
 0x17d   :  { %v2832_v61 = vmax.f32 %v2383_v25, %v2399_v48  ;;  %v2834_v59 = vmax.f32 %v2385_v55, %v2401_v39  ;;  %v1282_v40 = vpop.f32.mrb[64].mxu0  ;;  %v1875_v12 = vpop.f32.mrb[64].mxu1  ;;  %v18434_v55 = vld [vmem:[%s24992_s6 + $0x104] ss:$8 sps:$4 sm:$0xff]  }
 0x17e   :  { %v2839_v53 = vpack.c.bf16 %v2831_v56, %v2827_v50  ;;  %v2841_v42 = vpack.c.bf16 %v2833_v17, %v2829_v7  ;;  %v1284_v57 = vpop.f32.mrb[65].mxu0  ;;  %v1877_v29 = vpop.f32.mrb[65].mxu1  ;;  %4978 = vmatprep.subr.bf16.mxu1 %v18434_v55  ;;  %v20381_v0 = vadd.f32 %v1282_v40, %v19785_v32  ;;  %v1876_v5 = vadd.f32 %v1875_v12, %v19793_v34  ;;  %v18386_v55 = vld [vmem:[%s24990_s0 + $0x2e4] ss:$8 sps:$4 sm:$0xff]  }
 0x17f   :  { %v2840_v23 = vpack.c.bf16 %v2832_v61, %v2828_v28  ;;  %v2842_v44 = vpack.c.bf16 %v2834_v59, %v2830_v41  ;;  %v1286_v46 = vpop.f32.mrb[66].mxu0  ;;  %v1879_v47 = vpop.f32.mrb[66].mxu1  ;;  %v20393_v22 = vadd.f32 %v1284_v57, %v19789_v33  ;;  %v20397_v60 = vadd.f32 %v1877_v29, %v19797_v35 }
 0x180   :  { %2847 = vst [vmem:[#allocation2 + $0xe0] sm:$0xff] %v2839_v53  ;;  %2849 = vst [vmem:[#allocation2 + $0xf0] sm:$0xff] %v2841_v42  ;;  %v1288_v45 = vpop.f32.mrb[67].mxu0  ;;  %v1881_v25 = vpop.f32.mrb[67].mxu1  ;;  %v20409_v54 = vadd.f32 %v1286_v46, %v19785_v32  ;;  %v20415_v24 = vadd.f32 %v1879_v47, %v19793_v34  ;;  %v2402_v36 = vmax.f32 %v20381_v0, 0.0  ;;  %v2404_v7 = vmax.f32 %v1876_v5, 0.0 }
 0x181   :  { %2848 = vst [vmem:[#allocation2 + $0xe8] sm:$0xff] %v2840_v23  ;;  %2850 = vst.msk [vmem:[#allocation2 + $0xf8] sm:$0xff] %vm2749_vm1, %v2842_v44  ;;  %v20412_v13 = vadd.f32 %v1288_v45, %v19789_v33  ;;  %v20418_v8 = vadd.f32 %v1881_v25, %v19797_v35  ;;  %v2403_v50 = vmax.f32 %v20393_v22, 0.0  ;;  %v2405_v51 = vmax.f32 %v20397_v60, 0.0 }
 0x182   :  { %1551 = vmatmul.mubr.bf16.gmra.mrb[172].mxu0 %v18377_v4  ;;  %2144 = vmatmul.mubr.bf16.gmra.mrb[172].mxu1 %v18377_v4  ;;  %v2406_v28 = vmax.f32 %v20409_v54, 0.0  ;;  %v2408_v48 = vmax.f32 %v20415_v24, 0.0 }
 0x183   :  { %15442 = vmatprep.mubr.msk.bf16.mxu0 %vm919_vm0, %v18378_v1  ;;  %15498 = vmatprep.mubr.msk.bf16.mxu1 %vm919_vm0, %v18378_v1  ;;  %v2407_v41 = vmax.f32 %v20412_v13, 0.0  ;;  %v2409_v39 = vmax.f32 %v20418_v8, 0.0 }
 0x185   :  { %v1292_v10 = vpop.f32.mrb[68].mxu0  ;;  %v1885_v62 = vpop.f32.mrb[68].mxu1 }
 0x186   :  { %v1294_v52 = vpop.f32.mrb[69].mxu0  ;;  %v1887_v18 = vpop.f32.mrb[69].mxu1  ;;  %v20421_v6 = vadd.f32 %v1292_v10, %v19785_v32  ;;  %v20424_v30 = vadd.f32 %v1885_v62, %v19793_v34 }
 0x187   :  { %v1296_v15 = vpop.f32.mrb[70].mxu0  ;;  %v1889_v19 = vpop.f32.mrb[70].mxu1  ;;  %v20428_v63 = vadd.f32 %v1294_v52, %v19789_v33  ;;  %v20435_v31 = vadd.f32 %v1887_v18, %v19797_v35 }
 0x188   :  { %v1298_v2 = vpop.f32.mrb[71].mxu0  ;;  %v1891_v11 = vpop.f32.mrb[71].mxu1  ;;  %v2410_v56 = vmax.f32 %v20421_v6, 0.0  ;;  %v20445_v17 = vadd.f32 %v1296_v15, %v19785_v32  ;;  %v2412_v61 = vmax.f32 %v20424_v30, 0.0  ;;  %v20449_v59 = vadd.f32 %v1889_v19, %v19793_v34 }
 0x189   :  { %v2411_v53 = vmax.f32 %v20428_v63, 0.0  ;;  %v20453_v42 = vadd.f32 %v1298_v2, %v19789_v33  ;;  %v2413_v44 = vmax.f32 %v20435_v31, 0.0  ;;  %v20459_v46 = vadd.f32 %v1891_v11, %v19797_v35  ;;  %v18393_v63 = vld [vmem:[%s24990_s0 + $0x2f0] ss:$8 sps:$4 sm:$0xff]  }
 0x18a   :  { %1561 = vmatmul.mubr.bf16.gmra.mrb[176].mxu0 %v18380_v3  ;;  %2154 = vmatmul.mubr.bf16.gmra.mrb[176].mxu1 %v18380_v3  ;;  %v2414_v2 = vmax.f32 %v20445_v17, 0.0  ;;  %v2416_v24 = vmax.f32 %v20449_v59, 0.0 }
 0x18b   :  { %15443 = vmatprep.mubr.msk.bf16.mxu0 %vm919_vm0, %v18384_v9  ;;  %15499 = vmatprep.mubr.msk.bf16.mxu1 %vm919_vm0, %v18384_v9 }
 0x18d   :  { %v1302_v40 = vpop.f32.mrb[72].mxu0  ;;  %v1895_v12 = vpop.f32.mrb[72].mxu1 }
 0x18e   :  { %v1303_v57 = vadd.f32 %v1302_v40, %v19785_v32  ;;  %v1304_v4 = vpop.f32.mrb[73].mxu0  ;;  %v1896_v29 = vadd.f32 %v1895_v12, %v19793_v34  ;;  %v1897_v23 = vpop.f32.mrb[73].mxu1 }
 0x18f   :  { %v1305_v47 = vadd.f32 %v1304_v4, %v19789_v33  ;;  %v1306_v1 = vpop.f32.mrb[74].mxu0  ;;  %v1898_v45 = vadd.f32 %v1897_v23, %v19797_v35  ;;  %v1899_v25 = vpop.f32.mrb[74].mxu1 }
 0x190   :  { %v2418_v10 = vmax.f32 %v1303_v57, 0.0  ;;  %v2420_v62 = vmax.f32 %v1896_v29, 0.0  ;;  %v1307_v0 = vadd.f32 %v1306_v1, %v19785_v32  ;;  %v1308_v52 = vpop.f32.mrb[75].mxu0  ;;  %v1900_v3 = vadd.f32 %v1899_v25, %v19793_v34  ;;  %v1901_v18 = vpop.f32.mrb[75].mxu1 }
 0x191   :  { %v2419_v38 = vmax.f32 %v1305_v47, 0.0  ;;  %v2421_v14 = vmax.f32 %v1898_v45, 0.0  ;;  %v1309_v22 = vadd.f32 %v1308_v52, %v19789_v33  ;;  %v1902_v5 = vadd.f32 %v1901_v18, %v19797_v35 }
 0x192   :  { %v2851_v15 = vmax.f32 %v2402_v36, %v2418_v10  ;;  %v2853_v60 = vmax.f32 %v2404_v7, %v2420_v62  ;;  %v2422_v19 = vmax.f32 %v1307_v0, 0.0  ;;  %v2424_v9 = vmax.f32 %v1900_v3, 0.0  ;;  %1571 = vmatmul.mubr.bf16.gmra.mrb[180].mxu0 %v15336_v58  ;;  %2164 = vmatmul.mubr.bf16.gmra.mrb[180].mxu1 %v15336_v58 }
 0x193   :  { %v2852_v43 = vmax.f32 %v2403_v50, %v2419_v38  ;;  %v2854_v49 = vmax.f32 %v2405_v51, %v2421_v14  ;;  %v2423_v54 = vmax.f32 %v1309_v22, 0.0  ;;  %v2425_v13 = vmax.f32 %v1902_v5, 0.0  ;;  %15444 = vmatprep.mubr.msk.bf16.mxu0 %vm919_vm0, %v18386_v55  ;;  %15500 = vmatprep.mubr.msk.bf16.mxu1 %vm919_vm0, %v18386_v55 }
 0x194   :  { %v2855_v8 = vmax.f32 %v2406_v28, %v2422_v19  ;;  %v2857_v11 = vmax.f32 %v2408_v48, %v2424_v9  ;;  %v2415_v36 = vmax.f32 %v20453_v42, 0.0  ;;  %v2417_v7 = vmax.f32 %v20459_v46, 0.0 }
 0x195   :  { %v2856_v40 = vmax.f32 %v2407_v41, %v2423_v54  ;;  %v2858_v58 = vmax.f32 %v2409_v39, %v2425_v13  ;;  %v1312_v50 = vpop.f32.mrb[76].mxu0  ;;  %v1905_v51 = vpop.f32.mrb[76].mxu1  ;;  %v18391_v41 = vld [vmem:[%s24990_s0 + $0x2f4] ss:$8 sps:$4 sm:$0xff]  }
 0x196   :  { %v2867_v12 = vpack.c.bf16 %v2855_v8, %v2851_v15  ;;  %v2869_v57 = vpack.c.bf16 %v2857_v11, %v2853_v60  ;;  %v1313_v4 = vadd.f32 %v1312_v50, %v19785_v32  ;;  %v1314_v29 = vpop.f32.mrb[77].mxu0  ;;  %v1906_v23 = vadd.f32 %v1905_v51, %v19793_v34  ;;  %v1907_v17 = vpop.f32.mrb[77].mxu1  ;;  %v18399_v50 = vld [vmem:[%s24990_s0 + $0x300] ss:$8 sps:$4 sm:$0xff]  }
 0x197   :  { %v2868_v47 = vpack.c.bf16 %v2856_v40, %v2852_v43  ;;  %v2870_v59 = vpack.c.bf16 %v2858_v58, %v2854_v49  ;;  %v1315_v28 = vadd.f32 %v1314_v29, %v19789_v33  ;;  %v1316_v48 = vpop.f32.mrb[78].mxu0  ;;  %v1908_v42 = vadd.f32 %v1907_v17, %v19797_v35  ;;  %v1909_v46 = vpop.f32.mrb[78].mxu1 }
 0x198   :  { %2875 = vst [vmem:[#allocation2 + $0x100] sm:$0xff] %v2867_v12  ;;  %2877 = vst [vmem:[#allocation2 + $0x110] sm:$0xff] %v2869_v57  ;;  %v2426_v39 = vmax.f32 %v1313_v4, 0.0  ;;  %v2428_v1 = vmax.f32 %v1906_v23, 0.0  ;;  %v1317_v45 = vadd.f32 %v1316_v48, %v19785_v32  ;;  %v1318_v25 = vpop.f32.mrb[79].mxu0  ;;  %v1910_v55 = vadd.f32 %v1909_v46, %v19793_v34  ;;  %v1911_v10 = vpop.f32.mrb[79].mxu1 }
 0x199   :  { %2876 = vst [vmem:[#allocation2 + $0x108] sm:$0xff] %v2868_v47  ;;  %2878 = vst.msk [vmem:[#allocation2 + $0x118] sm:$0xff] %vm2749_vm1, %v2870_v59  ;;  %v2427_v62 = vmax.f32 %v1315_v28, 0.0  ;;  %v2429_v0 = vmax.f32 %v1908_v42, 0.0  ;;  %v1319_v52 = vadd.f32 %v1318_v25, %v19789_v33  ;;  %v1912_v3 = vadd.f32 %v1911_v10, %v19797_v35  ;;  %v139_v12 = vld [vmem:[%s24990_s0 + $0x310] sm:$0xff]  ;;  %v140_v57 = vld [vmem:[%s24990_s0 + $0x318] sm:$0xff] }
 0x19a   :  { %v2859_v18 = vmax.f32 %v2410_v56, %v2426_v39  ;;  %v2861_v38 = vmax.f32 %v2412_v61, %v2428_v1  ;;  %v2430_v14 = vmax.f32 %v1317_v45, 0.0  ;;  %v2432_v22 = vmax.f32 %v1910_v55, 0.0  ;;  %1581 = vmatmul.mubr.bf16.gmra.mrb[184].mxu0 %v20430_v37  ;;  %2174 = vmatmul.mubr.bf16.gmra.mrb[184].mxu1 %v20430_v37  ;;  %v18400_v59 = vld [vmem:[%s24990_s0 + $0x314] ss:$8 sps:$4 sm:$0xff]   ;;  %v141_v28 = vld [vmem:[%s24990_s0 + $0x320] sm:$0xff]  ;;  %v142_v48 = vld [vmem:[%s24990_s0 + $0x328] sm:$0xff] }
 0x19b   :  { %v2860_v5 = vmax.f32 %v2411_v53, %v2427_v62  ;;  %v2862_v15 = vmax.f32 %v2413_v44, %v2429_v0  ;;  %v2431_v60 = vmax.f32 %v1319_v52, 0.0  ;;  %v2433_v19 = vmax.f32 %v1912_v3, 0.0  ;;  %15445 = vmatprep.mubr.msk.bf16.mxu0 %vm919_vm0, %v18391_v41  ;;  %15501 = vmatprep.mubr.msk.bf16.mxu1 %vm919_vm0, %v18391_v41 }
 0x19c   :  { %v2863_v6 = vmax.f32 %v2414_v2, %v2430_v14  ;;  %v2865_v30 = vmax.f32 %v2416_v24, %v2432_v22  ;;  %v18394_v2 = vld [vmem:[%s24990_s0 + $0x304] ss:$8 sps:$4 sm:$0xff]   ;;  %v15344_v0 = vcombine.low %v139_v12, %v140_v57  ;;  %v20559_v52 = vcombine.low %v141_v28, %v142_v48 }
 0x19d   :  { %v2864_v56 = vmax.f32 %v2415_v36, %v2431_v60  ;;  %v2866_v61 = vmax.f32 %v2417_v7, %v2433_v19  ;;  %v1322_v9 = vpop.f32.mrb[80].mxu0  ;;  %v1915_v43 = vpop.f32.mrb[80].mxu1 }
 0x19e   :  { %v2871_v49 = vpack.c.bf16 %v2863_v6, %v2859_v18  ;;  %v2873_v37 = vpack.c.bf16 %v2865_v30, %v2861_v38  ;;  %v1324_v54 = vpop.f32.mrb[81].mxu0  ;;  %v1917_v31 = vpop.f32.mrb[81].mxu1  ;;  %v20510_v40 = vadd.f32 %v1322_v9, %v19785_v32  ;;  %v1916_v29 = vadd.f32 %v1915_v43, %v19793_v34 }
 0x19f   :  { %v2872_v53 = vpack.c.bf16 %v2864_v56, %v2860_v5  ;;  %v2874_v44 = vpack.c.bf16 %v2866_v61, %v2862_v15  ;;  %v1326_v13 = vpop.f32.mrb[82].mxu0  ;;  %v1919_v8 = vpop.f32.mrb[82].mxu1  ;;  %v20522_v4 = vadd.f32 %v1324_v54, %v19789_v33  ;;  %v20526_v17 = vadd.f32 %v1917_v31, %v19797_v35 }
 0x1a0   :  { %2879 = vst [vmem:[#allocation2 + $0x120] sm:$0xff] %v2871_v49  ;;  %2881 = vst [vmem:[#allocation2 + $0x130] sm:$0xff] %v2873_v37  ;;  %v1328_v24 = vpop.f32.mrb[83].mxu0  ;;  %v1921_v11 = vpop.f32.mrb[83].mxu1  ;;  %v20538_v42 = vadd.f32 %v1326_v13, %v19785_v32  ;;  %v20544_v39 = vadd.f32 %v1919_v8, %v19793_v34  ;;  %v2434_v10 = vmax.f32 %v20510_v40, 0.0  ;;  %v2436_v18 = vmax.f32 %v1916_v29, 0.0 }
 0x1a1   :  { %2880 = vst [vmem:[#allocation2 + $0x128] sm:$0xff] %v2872_v53  ;;  %2882 = vst.msk [vmem:[#allocation2 + $0x138] sm:$0xff] %vm2749_vm1, %v2874_v44  ;;  %v20541_v46 = vadd.f32 %v1328_v24, %v19789_v33  ;;  %v20547_v1 = vadd.f32 %v1921_v11, %v19797_v35  ;;  %v2435_v3 = vmax.f32 %v20522_v4, 0.0  ;;  %v2437_v38 = vmax.f32 %v20526_v17, 0.0  ;;  %v18402_v11 = vld [vmem:[%s24990_s0 + $0x324] ss:$8 sps:$4 sm:$0xff]  }
 0x1a2   :  { %1591 = vmatmul.mubr.bf16.gmra.mrb[188].mxu0 %v18393_v63  ;;  %2184 = vmatmul.mubr.bf16.gmra.mrb[188].mxu1 %v18393_v63  ;;  %v2438_v22 = vmax.f32 %v20538_v42, 0.0  ;;  %v2440_v15 = vmax.f32 %v20544_v39, 0.0 }
 0x1a3   :  { %15446 = vmatprep.mubr.msk.bf16.mxu0 %vm919_vm0, %v18394_v2  ;;  %15502 = vmatprep.mubr.msk.bf16.mxu1 %vm919_vm0, %v18394_v2  ;;  %v2439_v5 = vmax.f32 %v20541_v46, 0.0  ;;  %v2441_v60 = vmax.f32 %v20547_v1, 0.0 }
 0x1a5   :  { %v1332_v36 = vpop.f32.mrb[84].mxu0  ;;  %v1925_v7 = vpop.f32.mrb[84].mxu1 }
 0x1a6   :  { %v1334_v58 = vpop.f32.mrb[85].mxu0  ;;  %v1927_v51 = vpop.f32.mrb[85].mxu1  ;;  %v20550_v25 = vadd.f32 %v1332_v36, %v19785_v32  ;;  %v20553_v55 = vadd.f32 %v1925_v7, %v19793_v34 }
 0x1a7   :  { %v1336_v23 = vpop.f32.mrb[86].mxu0  ;;  %v1929_v47 = vpop.f32.mrb[86].mxu1  ;;  %v20557_v62 = vadd.f32 %v1334_v58, %v19789_v33  ;;  %v20564_v14 = vadd.f32 %v1927_v51, %v19797_v35 }
 0x1a8   :  { %v1338_v41 = vpop.f32.mrb[87].mxu0  ;;  %v1931_v45 = vpop.f32.mrb[87].mxu1  ;;  %v2442_v19 = vmax.f32 %v20550_v25, 0.0  ;;  %v20574_v6 = vadd.f32 %v1336_v23, %v19785_v32  ;;  %v2444_v30 = vmax.f32 %v20553_v55, 0.0  ;;  %v20578_v56 = vadd.f32 %v1929_v47, %v19793_v34 }
 0x1a9   :  { %v2443_v43 = vmax.f32 %v20557_v62, 0.0  ;;  %v20582_v49 = vadd.f32 %v1338_v41, %v19789_v33  ;;  %v2445_v53 = vmax.f32 %v20564_v14, 0.0  ;;  %v20588_v44 = vadd.f32 %v1931_v45, %v19797_v35  ;;  %v18409_v62 = vld [vmem:[%s24990_s0 + $0x330] ss:$8 sps:$4 sm:$0xff]  }
 0x1aa   :  { %1601 = vmatmul.mubr.bf16.gmra.mrb[192].mxu0 %v18399_v50  ;;  %2194 = vmatmul.mubr.bf16.gmra.mrb[192].mxu1 %v18399_v50  ;;  %v2446_v41 = vmax.f32 %v20574_v6, 0.0  ;;  %v2448_v39 = vmax.f32 %v20578_v56, 0.0 }
 0x1ab   :  { %15447 = vmatprep.mubr.msk.bf16.mxu0 %vm919_vm0, %v18400_v59  ;;  %15503 = vmatprep.mubr.msk.bf16.mxu1 %vm919_vm0, %v18400_v59 }
 0x1ad   :  { %v1342_v61 = vpop.f32.mrb[88].mxu0  ;;  %v1935_v9 = vpop.f32.mrb[88].mxu1 }
 0x1ae   :  { %v1343_v37 = vadd.f32 %v1342_v61, %v19785_v32  ;;  %v1344_v54 = vpop.f32.mrb[89].mxu0  ;;  %v1936_v63 = vadd.f32 %v1935_v9, %v19793_v34  ;;  %v1937_v31 = vpop.f32.mrb[89].mxu1 }
 0x1af   :  { %v1345_v13 = vadd.f32 %v1344_v54, %v19789_v33  ;;  %v1346_v8 = vpop.f32.mrb[90].mxu0  ;;  %v1938_v2 = vadd.f32 %v1937_v31, %v19797_v35  ;;  %v1939_v24 = vpop.f32.mrb[90].mxu1 }
 0x1b0   :  { %v2450_v36 = vmax.f32 %v1343_v37, 0.0  ;;  %v2452_v7 = vmax.f32 %v1936_v63, 0.0  ;;  %v1347_v40 = vadd.f32 %v1346_v8, %v19785_v32  ;;  %v1348_v58 = vpop.f32.mrb[91].mxu0  ;;  %v1940_v50 = vadd.f32 %v1939_v24, %v19793_v34  ;;  %v1941_v51 = vpop.f32.mrb[91].mxu1 }
 0x1b1   :  { %v2451_v12 = vmax.f32 %v1345_v13, 0.0  ;;  %v2453_v57 = vmax.f32 %v1938_v2, 0.0  ;;  %v1349_v4 = vadd.f32 %v1348_v58, %v19789_v33  ;;  %v1942_v29 = vadd.f32 %v1941_v51, %v19797_v35 }
 0x1b2   :  { %v2883_v23 = vmax.f32 %v2434_v10, %v2450_v36  ;;  %v2885_v17 = vmax.f32 %v2436_v18, %v2452_v7  ;;  %v2454_v47 = vmax.f32 %v1347_v40, 0.0  ;;  %v2456_v59 = vmax.f32 %v1940_v50, 0.0  ;;  %1611 = vmatmul.mubr.bf16.gmra.mrb[196].mxu0 %v15344_v0  ;;  %2204 = vmatmul.mubr.bf16.gmra.mrb[196].mxu1 %v15344_v0 }
 0x1b3   :  { %v2884_v28 = vmax.f32 %v2435_v3, %v2451_v12  ;;  %v2886_v48 = vmax.f32 %v2437_v38, %v2453_v57  ;;  %v2455_v42 = vmax.f32 %v1349_v4, 0.0  ;;  %v2457_v46 = vmax.f32 %v1942_v29, 0.0  ;;  %15448 = vmatprep.mubr.msk.bf16.mxu0 %vm919_vm0, %v18402_v11  ;;  %15504 = vmatprep.mubr.msk.bf16.mxu1 %vm919_vm0, %v18402_v11 }
 0x1b4   :  { %v2887_v1 = vmax.f32 %v2438_v22, %v2454_v47  ;;  %v2889_v45 = vmax.f32 %v2440_v15, %v2456_v59  ;;  %v2447_v10 = vmax.f32 %v20582_v49, 0.0  ;;  %v2449_v18 = vmax.f32 %v20588_v44, 0.0 }
 0x1b5   :  { %v2888_v61 = vmax.f32 %v2439_v5, %v2455_v42  ;;  %v2890_v0 = vmax.f32 %v2441_v60, %v2457_v46  ;;  %v1352_v3 = vpop.f32.mrb[92].mxu0  ;;  %v1945_v38 = vpop.f32.mrb[92].mxu1  ;;  %v18407_v5 = vld [vmem:[%s24990_s0 + $0x334] ss:$8 sps:$4 sm:$0xff]  }
 0x1b6   :  { %v2899_v9 = vpack.c.bf16 %v2887_v1, %v2883_v23  ;;  %v2901_v37 = vpack.c.bf16 %v2889_v45, %v2885_v17  ;;  %v1353_v54 = vadd.f32 %v1352_v3, %v19785_v32  ;;  %v1354_v63 = vpop.f32.mrb[93].mxu0  ;;  %v1946_v31 = vadd.f32 %v1945_v38, %v19793_v34  ;;  %v1947_v6 = vpop.f32.mrb[93].mxu1  ;;  %v18415_v3 = vld [vmem:[%s24990_s0 + $0x340] ss:$8 sps:$4 sm:$0xff]  }
 0x1b7   :  { %v2900_v13 = vpack.c.bf16 %v2888_v61, %v2884_v28  ;;  %v2902_v56 = vpack.c.bf16 %v2890_v0, %v2886_v48  ;;  %v1355_v22 = vadd.f32 %v1354_v63, %v19789_v33  ;;  %v1356_v15 = vpop.f32.mrb[94].mxu0  ;;  %v1948_v49 = vadd.f32 %v1947_v6, %v19797_v35  ;;  %v1949_v44 = vpop.f32.mrb[94].mxu1 }
 0x1b8   :  { %2907 = vst [vmem:[#allocation2 + $0x140] sm:$0xff] %v2899_v9  ;;  %2909 = vst [vmem:[#allocation2 + $0x150] sm:$0xff] %v2901_v37  ;;  %v2458_v60 = vmax.f32 %v1353_v54, 0.0  ;;  %v2460_v8 = vmax.f32 %v1946_v31, 0.0  ;;  %v1357_v2 = vadd.f32 %v1356_v15, %v19785_v32  ;;  %v1358_v24 = vpop.f32.mrb[95].mxu0  ;;  %v1950_v11 = vadd.f32 %v1949_v44, %v19793_v34  ;;  %v1951_v36 = vpop.f32.mrb[95].mxu1 }
 0x1b9   :  { %2908 = vst [vmem:[#allocation2 + $0x148] sm:$0xff] %v2900_v13  ;;  %2910 = vst.msk [vmem:[#allocation2 + $0x158] sm:$0xff] %vm2749_vm1, %v2902_v56  ;;  %v2459_v7 = vmax.f32 %v1355_v22, 0.0  ;;  %v2461_v40 = vmax.f32 %v1948_v49, 0.0  ;;  %v1359_v58 = vadd.f32 %v1358_v24, %v19789_v33  ;;  %v1952_v50 = vadd.f32 %v1951_v36, %v19797_v35  ;;  %v147_v9 = vld [vmem:[%s24990_s0 + $0x350] sm:$0xff]  ;;  %v148_v37 = vld [vmem:[%s24990_s0 + $0x358] sm:$0xff] }
 0x1ba   :  { %v2891_v51 = vmax.f32 %v2442_v19, %v2458_v60  ;;  %v2893_v12 = vmax.f32 %v2444_v30, %v2460_v8  ;;  %v2462_v57 = vmax.f32 %v1357_v2, 0.0  ;;  %v2464_v4 = vmax.f32 %v1950_v11, 0.0  ;;  %1621 = vmatmul.mubr.bf16.gmra.mrb[200].mxu0 %v20559_v52  ;;  %2214 = vmatmul.mubr.bf16.gmra.mrb[200].mxu1 %v20559_v52  ;;  %v18416_v56 = vld [vmem:[%s24990_s0 + $0x354] ss:$8 sps:$4 sm:$0xff]   ;;  %v149_v22 = vld [vmem:[%s24990_s0 + $0x360] sm:$0xff]  ;;  %v150_v15 = vld [vmem:[%s24990_s0 + $0x368] sm:$0xff] }
 0x1bb   :  { %v2892_v29 = vmax.f32 %v2443_v43, %v2459_v7  ;;  %v2894_v23 = vmax.f32 %v2445_v53, %v2461_v40  ;;  %v2463_v17 = vmax.f32 %v1359_v58, 0.0  ;;  %v2465_v47 = vmax.f32 %v1952_v50, 0.0  ;;  %15449 = vmatprep.mubr.msk.bf16.mxu0 %vm919_vm0, %v18407_v5  ;;  %15505 = vmatprep.mubr.msk.bf16.mxu1 %vm919_vm0, %v18407_v5 }
 0x1bc   :  { %v2895_v25 = vmax.f32 %v2446_v41, %v2462_v57  ;;  %v2897_v55 = vmax.f32 %v2448_v39, %v2464_v4  ;;  %v18413_v41 = vld [vmem:[%s24990_s0 + $0x344] ss:$8 sps:$4 sm:$0xff]   ;;  %v15352_v40 = vcombine.low %v147_v9, %v148_v37  ;;  %v20688_v58 = vcombine.low %v149_v22, %v150_v15 }
 0x1bd   :  { %v2896_v19 = vmax.f32 %v2447_v10, %v2463_v17  ;;  %v2898_v30 = vmax.f32 %v2449_v18, %v2465_v47  ;;  %v1362_v59 = vpop.f32.mrb[96].mxu0  ;;  %v1955_v28 = vpop.f32.mrb[96].mxu1 }
 0x1be   :  { %v2903_v48 = vpack.c.bf16 %v2895_v25, %v2891_v51  ;;  %v2905_v52 = vpack.c.bf16 %v2897_v55, %v2893_v12  ;;  %v1364_v42 = vpop.f32.mrb[97].mxu0  ;;  %v1957_v14 = vpop.f32.mrb[97].mxu1  ;;  %v20639_v61 = vadd.f32 %v1362_v59, %v19785_v32  ;;  %v1956_v63 = vadd.f32 %v1955_v28, %v19793_v34 }
 0x1bf   :  { %v2904_v43 = vpack.c.bf16 %v2896_v19, %v2892_v29  ;;  %v2906_v53 = vpack.c.bf16 %v2898_v30, %v2894_v23  ;;  %v1366_v46 = vpop.f32.mrb[98].mxu0  ;;  %v1959_v1 = vpop.f32.mrb[98].mxu1  ;;  %v20651_v54 = vadd.f32 %v1364_v42, %v19789_v33  ;;  %v20655_v6 = vadd.f32 %v1957_v14, %v19797_v35 }
 0x1c0   :  { %2911 = vst [vmem:[#allocation2 + $0x160] sm:$0xff] %v2903_v48  ;;  %2913 = vst [vmem:[#allocation2 + $0x170] sm:$0xff] %v2905_v52  ;;  %v1368_v39 = vpop.f32.mrb[99].mxu0  ;;  %v1961_v45 = vpop.f32.mrb[99].mxu1  ;;  %v20667_v49 = vadd.f32 %v1366_v46, %v19785_v32  ;;  %v20673_v60 = vadd.f32 %v1959_v1, %v19793_v34  ;;  %v2466_v36 = vmax.f32 %v20639_v61, 0.0  ;;  %v2468_v51 = vmax.f32 %v1956_v63, 0.0 }
 0x1c1   :  { %2912 = vst [vmem:[#allocation2 + $0x168] sm:$0xff] %v2904_v43  ;;  %2914 = vst.msk [vmem:[#allocation2 + $0x178] sm:$0xff] %vm2749_vm1, %v2906_v53  ;;  %v20670_v44 = vadd.f32 %v1368_v39, %v19789_v33  ;;  %v20676_v8 = vadd.f32 %v1961_v45, %v19797_v35  ;;  %v2467_v50 = vmax.f32 %v20651_v54, 0.0  ;;  %v2469_v12 = vmax.f32 %v20655_v6, 0.0  ;;  %v18421_v45 = vld [vmem:[%s24990_s0 + $0x364] ss:$8 sps:$4 sm:$0xff]  }
 0x1c2   :  { %1631 = vmatmul.mubr.bf16.gmra.mrb[204].mxu0 %v18409_v62  ;;  %2224 = vmatmul.mubr.bf16.gmra.mrb[204].mxu1 %v18409_v62  ;;  %v2470_v4 = vmax.f32 %v20667_v49, 0.0  ;;  %v2472_v23 = vmax.f32 %v20673_v60, 0.0 }
 0x1c3   :  { %15450 = vmatprep.mubr.msk.bf16.mxu0 %vm919_vm0, %v18413_v41  ;;  %15506 = vmatprep.mubr.msk.bf16.mxu1 %vm919_vm0, %v18413_v41  ;;  %v2471_v29 = vmax.f32 %v20670_v44, 0.0  ;;  %v2473_v17 = vmax.f32 %v20676_v8, 0.0 }
 0x1c5   :  { %v1372_v10 = vpop.f32.mrb[100].mxu0  ;;  %v1965_v18 = vpop.f32.mrb[100].mxu1 }
 0x1c6   :  { %v1374_v0 = vpop.f32.mrb[101].mxu0  ;;  %v1967_v38 = vpop.f32.mrb[101].mxu1  ;;  %v20679_v24 = vadd.f32 %v1372_v10, %v19785_v32  ;;  %v20682_v11 = vadd.f32 %v1965_v18, %v19793_v34 }
 0x1c7   :  { %v1376_v31 = vpop.f32.mrb[102].mxu0  ;;  %v1969_v13 = vpop.f32.mrb[102].mxu1  ;;  %v20686_v7 = vadd.f32 %v1374_v0, %v19789_v33  ;;  %v20693_v57 = vadd.f32 %v1967_v38, %v19797_v35 }
 0x1c8   :  { %v1378_v5 = vpop.f32.mrb[103].mxu0  ;;  %v1971_v2 = vpop.f32.mrb[103].mxu1  ;;  %v2474_v47 = vmax.f32 %v20679_v24, 0.0  ;;  %v20703_v25 = vadd.f32 %v1376_v31, %v19785_v32  ;;  %v2476_v55 = vmax.f32 %v20682_v11, 0.0  ;;  %v20707_v19 = vadd.f32 %v1969_v13, %v19793_v34 }
 0x1c9   :  { %v2475_v28 = vmax.f32 %v20686_v7, 0.0  ;;  %v20711_v48 = vadd.f32 %v1378_v5, %v19789_v33  ;;  %v2477_v43 = vmax.f32 %v20693_v57, 0.0  ;;  %v20717_v53 = vadd.f32 %v1971_v2, %v19797_v35  ;;  %v18428_v7 = vld [vmem:[%s24990_s0 + $0x370] ss:$8 sps:$4 sm:$0xff]  }
 0x1ca   :  { %1641 = vmatmul.mubr.bf16.gmra.mrb[208].mxu0 %v18415_v3  ;;  %2234 = vmatmul.mubr.bf16.gmra.mrb[208].mxu1 %v18415_v3  ;;  %v2478_v5 = vmax.f32 %v20703_v25, 0.0  ;;  %v2480_v60 = vmax.f32 %v20707_v19, 0.0 }
 0x1cb   :  { %15451 = vmatprep.mubr.msk.bf16.mxu0 %vm919_vm0, %v18416_v56  ;;  %15507 = vmatprep.mubr.msk.bf16.mxu1 %vm919_vm0, %v18416_v56 }
 0x1cd   :  { %v1382_v30 = vpop.f32.mrb[104].mxu0  ;;  %v1975_v59 = vpop.f32.mrb[104].mxu1 }
 0x1ce   :  { %v1383_v52 = vadd.f32 %v1382_v30, %v19785_v32  ;;  %v1384_v42 = vpop.f32.mrb[105].mxu0  ;;  %v1976_v62 = vadd.f32 %v1975_v59, %v19793_v34  ;;  %v1977_v14 = vpop.f32.mrb[105].mxu1 }
 0x1cf   :  { %v1385_v46 = vadd.f32 %v1384_v42, %v19789_v33  ;;  %v1386_v1 = vpop.f32.mrb[106].mxu0  ;;  %v1978_v41 = vadd.f32 %v1977_v14, %v19797_v35  ;;  %v1979_v39 = vpop.f32.mrb[106].mxu1 }
 0x1d0   :  { %v2482_v10 = vmax.f32 %v1383_v52, 0.0  ;;  %v2484_v18 = vmax.f32 %v1976_v62, 0.0  ;;  %v1387_v61 = vadd.f32 %v1386_v1, %v19785_v32  ;;  %v1388_v0 = vpop.f32.mrb[107].mxu0  ;;  %v1980_v3 = vadd.f32 %v1979_v39, %v19793_v34  ;;  %v1981_v38 = vpop.f32.mrb[107].mxu1 }
 0x1d1   :  { %v2483_v9 = vmax.f32 %v1385_v46, 0.0  ;;  %v2485_v37 = vmax.f32 %v1978_v41, 0.0  ;;  %v1389_v54 = vadd.f32 %v1388_v0, %v19789_v33  ;;  %v1982_v63 = vadd.f32 %v1981_v38, %v19797_v35 }
 0x1d2   :  { %v2915_v31 = vmax.f32 %v2466_v36, %v2482_v10  ;;  %v2917_v6 = vmax.f32 %v2468_v51, %v2484_v18  ;;  %v2486_v13 = vmax.f32 %v1387_v61, 0.0  ;;  %v2488_v56 = vmax.f32 %v1980_v3, 0.0  ;;  %1651 = vmatmul.mubr.bf16.gmra.mrb[212].mxu0 %v15352_v40  ;;  %2244 = vmatmul.mubr.bf16.gmra.mrb[212].mxu1 %v15352_v40 }
 0x1d3   :  { %v2916_v22 = vmax.f32 %v2467_v50, %v2483_v9  ;;  %v2918_v15 = vmax.f32 %v2469_v12, %v2485_v37  ;;  %v2487_v49 = vmax.f32 %v1389_v54, 0.0  ;;  %v2489_v44 = vmax.f32 %v1982_v63, 0.0  ;;  %15452 = vmatprep.mubr.msk.bf16.mxu0 %vm919_vm0, %v18421_v45  ;;  %15508 = vmatprep.mubr.msk.bf16.mxu1 %vm919_vm0, %v18421_v45 }
 0x1d4   :  { %v2919_v8 = vmax.f32 %v2470_v4, %v2486_v13  ;;  %v2921_v2 = vmax.f32 %v2472_v23, %v2488_v56  ;;  %v2479_v36 = vmax.f32 %v20711_v48, 0.0  ;;  %v2481_v51 = vmax.f32 %v20717_v53, 0.0 }
 0x1d5   :  { %v2920_v30 = vmax.f32 %v2471_v29, %v2487_v49  ;;  %v2922_v40 = vmax.f32 %v2473_v17, %v2489_v44  ;;  %v1392_v50 = vpop.f32.mrb[108].mxu0  ;;  %v1985_v12 = vpop.f32.mrb[108].mxu1  ;;  %v18423_v29 = vld [vmem:[%s24990_s0 + $0x374] ss:$8 sps:$4 sm:$0xff]  }
 0x1d6   :  { %v2931_v59 = vpack.c.bf16 %v2919_v8, %v2915_v31  ;;  %v2933_v52 = vpack.c.bf16 %v2921_v2, %v2917_v6  ;;  %v1393_v42 = vadd.f32 %v1392_v50, %v19785_v32  ;;  %v1394_v62 = vpop.f32.mrb[109].mxu0  ;;  %v1986_v14 = vadd.f32 %v1985_v12, %v19793_v34  ;;  %v1987_v25 = vpop.f32.mrb[109].mxu1  ;;  %v3172_v2 = vld [vmem:[#allocation2 + $0x8] sm:$0xff] }
 0x1d7   :  { %v2932_v46 = vpack.c.bf16 %v2920_v30, %v2916_v22  ;;  %v2934_v19 = vpack.c.bf16 %v2922_v40, %v2918_v15  ;;  %v1395_v4 = vadd.f32 %v1394_v62, %v19789_v33  ;;  %v1396_v23 = vpop.f32.mrb[110].mxu0  ;;  %v1988_v48 = vadd.f32 %v1987_v25, %v19797_v35  ;;  %v1989_v53 = vpop.f32.mrb[110].mxu1 }
 0x1d8   :  { %2939 = vst [vmem:[#allocation2 + $0x180] sm:$0xff] %v2931_v59  ;;  %2941 = vst [vmem:[#allocation2 + $0x190] sm:$0xff] %v2933_v52  ;;  %v2490_v17 = vmax.f32 %v1393_v42, 0.0  ;;  %v2492_v1 = vmax.f32 %v1986_v14, 0.0  ;;  %v1397_v41 = vadd.f32 %v1396_v23, %v19785_v32  ;;  %v1398_v39 = vpop.f32.mrb[111].mxu0  ;;  %v1990_v45 = vadd.f32 %v1989_v53, %v19793_v34  ;;  %v1991_v10 = vpop.f32.mrb[111].mxu1 }
 0x1d9   :  { %2940 = vst [vmem:[#allocation2 + $0x188] sm:$0xff] %v2932_v46  ;;  %2942 = vst.msk [vmem:[#allocation2 + $0x198] sm:$0xff] %vm2749_vm1, %v2934_v19  ;;  %v2491_v18 = vmax.f32 %v1395_v4, 0.0  ;;  %v2493_v61 = vmax.f32 %v1988_v48, 0.0  ;;  %v1399_v0 = vadd.f32 %v1398_v39, %v19789_v33  ;;  %v1992_v3 = vadd.f32 %v1991_v10, %v19797_v35  ;;  %v18429_v48 = vld [vmem:[%s24991_s5 + $0x100] ss:$8 sps:$4 sm:$0xff]  }
 0x1da   :  { %v2923_v38 = vmax.f32 %v2474_v47, %v2490_v17  ;;  %v2925_v9 = vmax.f32 %v2476_v55, %v2492_v1  ;;  %v2494_v37 = vmax.f32 %v1397_v41, 0.0  ;;  %v2496_v54 = vmax.f32 %v1990_v45, 0.0  ;;  %1661 = vmatmul.mubr.bf16.gmra.mrb[216].mxu0 %v20688_v58  ;;  %2254 = vmatmul.mubr.bf16.gmra.mrb[216].mxu1 %v20688_v58  ;;  %v18432_v53 = vld [vmem:[%s24992_s6 + $0x100] ss:$8 sps:$4 sm:$0xff]   ;;  %v18437_v41 = vld [vmem:[%s24991_s5 + $0x114] ss:$8 sps:$4 sm:$0xff]  }
 0x1db   :  { %v2924_v63 = vmax.f32 %v2475_v28, %v2491_v18  ;;  %v2926_v31 = vmax.f32 %v2477_v43, %v2493_v61  ;;  %v2495_v6 = vmax.f32 %v1399_v0, 0.0  ;;  %v2497_v13 = vmax.f32 %v1992_v3, 0.0  ;;  %15453 = vmatprep.mubr.msk.bf16.mxu0 %vm919_vm0, %v18423_v29  ;;  %15509 = vmatprep.mubr.msk.bf16.mxu1 %vm919_vm0, %v18423_v29  ;;  %v3171_v1 = vld [vmem:[#allocation2] sm:$0xff]  ;;  %v18440_v39 = vld [vmem:[%s24992_s6 + $0x114] ss:$8 sps:$4 sm:$0xff]   ;;  %v3176_v18 = vld [vmem:[#allocation2 + $0x28] sm:$0xff] }
 0x1dc   :  { %v2927_v24 = vmax.f32 %v2478_v5, %v2494_v37  ;;  %v2929_v11 = vmax.f32 %v2480_v60, %v2496_v54  ;;  %v18435_v61 = vld [vmem:[%s24991_s5 + $0x110] ss:$8 sps:$4 sm:$0xff]  }
 0x1dd   :  { %v2928_v47 = vmax.f32 %v2479_v36, %v2495_v6  ;;  %v2930_v55 = vmax.f32 %v2481_v51, %v2497_v13  ;;  %v1402_v56 = vpop.f32.mrb[112].mxu0  ;;  %v1995_v22 = vpop.f32.mrb[112].mxu1  ;;  %v18438_v37 = vld [vmem:[%s24992_s6 + $0x110] ss:$8 sps:$4 sm:$0xff]   ;;  %v18443_v13 = vld [vmem:[%s24991_s5 + $0x124] ss:$8 sps:$4 sm:$0xff]  }
 0x1de   :  { %v2935_v15 = vpack.c.bf16 %v2927_v24, %v2923_v38  ;;  %v2937_v58 = vpack.c.bf16 %v2929_v11, %v2925_v9  ;;  %v1404_v49 = vpop.f32.mrb[113].mxu0  ;;  %v1997_v57 = vpop.f32.mrb[113].mxu1  ;;  %v20763_v30 = vadd.f32 %v1402_v56, %v19785_v32  ;;  %v20769_v59 = vadd.f32 %v1995_v22, %v19793_v34 }
 0x1df   :  { %v2936_v28 = vpack.c.bf16 %v2928_v47, %v2924_v63  ;;  %v2938_v43 = vpack.c.bf16 %v2930_v55, %v2926_v31  ;;  %v1406_v44 = vpop.f32.mrb[114].mxu0  ;;  %v1999_v8 = vpop.f32.mrb[114].mxu1  ;;  %v20766_v12 = vadd.f32 %v1404_v49, %v19789_v33  ;;  %v20772_v42 = vadd.f32 %v1997_v57, %v19797_v35 }
 0x1e0   :  { %2943 = vst [vmem:[#allocation2 + $0x1a0] sm:$0xff] %v2935_v15  ;;  %2945 = vst [vmem:[#allocation2 + $0x1b0] sm:$0xff] %v2937_v58  ;;  %v1408_v5 = vpop.f32.mrb[115].mxu0  ;;  %v2001_v60 = vpop.f32.mrb[115].mxu1  ;;  %v20775_v14 = vadd.f32 %v1406_v44, %v19785_v32  ;;  %v20781_v19 = vadd.f32 %v1999_v8, %v19793_v34  ;;  %v2498_v45 = vmax.f32 %v20763_v30, 0.0  ;;  %v2500_v3 = vmax.f32 %v20769_v59, 0.0 }
 0x1e1   :  { %2944 = vst [vmem:[#allocation2 + $0x1a8] sm:$0xff] %v2936_v28  ;;  %2946 = vst.msk [vmem:[#allocation2 + $0x1b8] sm:$0xff] %vm2749_vm1, %v2938_v43  ;;  %v20778_v25 = vadd.f32 %v1408_v5, %v19789_v33  ;;  %v20784_v4 = vadd.f32 %v2001_v60, %v19797_v35  ;;  %v2499_v0 = vmax.f32 %v20766_v12, 0.0  ;;  %v2501_v38 = vmax.f32 %v20772_v42, 0.0  ;;  %v18446_v15 = vld [vmem:[%s24992_s6 + $0x124] ss:$8 sps:$4 sm:$0xff]  }
 0x1e2   :  { %1671 = vmatmul.mubr.bf16.gmra.mrb[220].mxu0 %v18428_v7  ;;  %2264 = vmatmul.mubr.bf16.gmra.mrb[220].mxu1 %v18428_v7  ;;  %v2502_v54 = vmax.f32 %v20775_v14, 0.0  ;;  %v2504_v31 = vmax.f32 %v20781_v19, 0.0  ;;  %v18441_v30 = vld [vmem:[%s24991_s5 + $0x120] ss:$8 sps:$4 sm:$0xff]  }
 0x1e3   :  { %3735 = vmatprep.mubr.bf16.mxu0 %v3172_v2  ;;  %4697 = vmatprep.mubr.bf16.mxu1 %v3172_v2  ;;  %v2503_v63 = vmax.f32 %v20778_v25, 0.0  ;;  %v2505_v6 = vmax.f32 %v20784_v4, 0.0 }
 0x1e5   :  { %v1412_v36 = vpop.f32.mrb[116].mxu0  ;;  %v2005_v51 = vpop.f32.mrb[116].mxu1 }
 0x1e6   :  { %v1414_v40 = vpop.f32.mrb[117].mxu0  ;;  %v2007_v50 = vpop.f32.mrb[117].mxu1  ;;  %v20793_v29 = vadd.f32 %v1412_v36, %v19785_v32  ;;  %v20796_v17 = vadd.f32 %v2005_v51, %v19793_v34  ;;  %v3175_v51 = vld [vmem:[#allocation2 + $0x20] sm:$0xff] }
 0x1e7   :  { %v1416_v52 = vpop.f32.mrb[118].mxu0  ;;  %v2009_v62 = vpop.f32.mrb[118].mxu1  ;;  %v20806_v10 = vadd.f32 %v1414_v40, %v19789_v33  ;;  %v20815_v9 = vadd.f32 %v2007_v50, %v19797_v35 }
 0x1e8   :  { %v1418_v46 = vpop.f32.mrb[119].mxu0  ;;  %v2011_v23 = vpop.f32.mrb[119].mxu1  ;;  %v2506_v24 = vmax.f32 %v20793_v29, 0.0  ;;  %v20829_v11 = vadd.f32 %v1416_v52, %v19785_v32  ;;  %v2508_v47 = vmax.f32 %v20796_v17, 0.0  ;;  %v20833_v55 = vadd.f32 %v2009_v62, %v19793_v34  ;;  %v18444_v62 = vld [vmem:[%s24992_s6 + $0x120] ss:$8 sps:$4 sm:$0xff]  }
 0x1e9   :  { %v2507_v58 = vmax.f32 %v20806_v10, 0.0  ;;  %v20840_v49 = vadd.f32 %v1418_v46, %v19789_v33  ;;  %v2509_v44 = vmax.f32 %v20815_v9, 0.0  ;;  %v20846_v8 = vadd.f32 %v2011_v23, %v19797_v35  ;;  %v18459_v10 = vld [vmem:[%s24991_s5 + $0x150] ss:$8 sps:$4 sm:$0xff]  }
 0x1ea   :  { %3736 = vmatmul.mubr.bf16.vlgmr.msra.gmra.mrb[224].mxu0 %v3171_v1  ;;  %4698 = vmatmul.mubr.bf16.vlgmr.msra.gmra.mrb[224].mxu1 %v3171_v1  ;;  %v18452_v1 = vld [vmem:[%s24992_s6 + $0x134] ss:$8 sps:$4 sm:$0xff]   ;;  %v18462_v9 = vld [vmem:[%s24992_s6 + $0x150] ss:$8 sps:$4 sm:$0xff]  }
 0x1eb   :  { %3745 = vmatprep.mubr.bf16.mxu0 %v3176_v18  ;;  %4707 = vmatprep.mubr.bf16.mxu1 %v3176_v18 }
 0x1ec   :  { %4017 = vmatpush1.bf16.msra.mxu0 %v18429_v48  ;;  %4979 = vmatpush1.bf16.msra.mxu1 %v18432_v53  ;;  %v18449_v53 = vld [vmem:[%s24991_s5 + $0x134] ss:$8 sps:$4 sm:$0xff]  }
 0x1ed   :  { %v1422_v56 = vpop.f32.mrb[120].mxu0  ;;  %v2015_v22 = vpop.f32.mrb[120].mxu1  ;;  %4018 = vmatprep.subr.bf16.mxu0 %v18437_v41  ;;  %4980 = vmatprep.subr.bf16.mxu1 %v18440_v39 }
 0x1ee   :  { %v1423_v7 = vadd.f32 %v1422_v56, %v19785_v32  ;;  %v1424_v57 = vpop.f32.mrb[121].mxu0  ;;  %v2016_v28 = vadd.f32 %v2015_v22, %v19793_v34  ;;  %v2017_v43 = vpop.f32.mrb[121].mxu1 }
 0x1ef   :  { %v1425_v5 = vadd.f32 %v1424_v57, %v19789_v33  ;;  %v1426_v60 = vpop.f32.mrb[122].mxu0  ;;  %v2018_v2 = vadd.f32 %v2017_v43, %v19797_v35  ;;  %v2019_v36 = vpop.f32.mrb[122].mxu1  ;;  %v2510_v57 = vmax.f32 %v20829_v11, 0.0  ;;  %v2511_v43 = vmax.f32 %v20840_v49, 0.0 }
 0x1f0   :  { %v2514_v40 = vmax.f32 %v1423_v7, 0.0  ;;  %v2516_v50 = vmax.f32 %v2016_v28, 0.0  ;;  %v1427_v12 = vadd.f32 %v1426_v60, %v19785_v32  ;;  %v1428_v59 = vpop.f32.mrb[123].mxu0  ;;  %v2020_v52 = vadd.f32 %v2019_v36, %v19793_v34  ;;  %v2021_v42 = vpop.f32.mrb[123].mxu1  ;;  %4019 = vmatpush1.bf16.msra.mxu0 %v18435_v61  ;;  %4981 = vmatpush1.bf16.msra.mxu1 %v18438_v37  ;;  %v3180_v37 = vld [vmem:[#allocation2 + $0x48] sm:$0xff] }
 0x1f1   :  { %v2515_v46 = vmax.f32 %v1425_v5, 0.0  ;;  %v2517_v19 = vmax.f32 %v2018_v2, 0.0  ;;  %v1429_v23 = vadd.f32 %v1428_v59, %v19789_v33  ;;  %v2022_v48 = vadd.f32 %v2021_v42, %v19797_v35  ;;  %4020 = vmatprep.subr.bf16.mxu0 %v18443_v13  ;;  %4982 = vmatprep.subr.bf16.mxu1 %v18446_v15  ;;  %v18447_v15 = vld [vmem:[%s24991_s5 + $0x130] ss:$8 sps:$4 sm:$0xff]   ;;  %v18458_v2 = vld [vmem:[%s24992_s6 + $0x144] ss:$8 sps:$4 sm:$0xff]  }
 0x1f2   :  { %v2947_v41 = vmax.f32 %v2498_v45, %v2514_v40  ;;  %v2949_v39 = vmax.f32 %v2500_v3, %v2516_v50  ;;  %v2518_v18 = vmax.f32 %v1427_v12, 0.0  ;;  %v2520_v61 = vmax.f32 %v2020_v52, 0.0  ;;  %3746 = vmatmul.mubr.bf16.gmra.mrb[228].mxu0 %v3175_v51  ;;  %4708 = vmatmul.mubr.bf16.gmra.mrb[228].mxu1 %v3175_v51  ;;  %v3179_v42 = vld [vmem:[#allocation2 + $0x40] sm:$0xff] }
 0x1f3   :  { %v2948_v56 = vmax.f32 %v2499_v0, %v2515_v46  ;;  %v2950_v22 = vmax.f32 %v2501_v38, %v2517_v19  ;;  %v2519_v7 = vmax.f32 %v1429_v23, 0.0  ;;  %v2521_v13 = vmax.f32 %v2022_v48, 0.0  ;;  %3755 = vmatprep.mubr.bf16.mxu0 %v3180_v37  ;;  %4717 = vmatprep.mubr.bf16.mxu1 %v3180_v37  ;;  %v18450_v0 = vld [vmem:[%s24992_s6 + $0x130] ss:$8 sps:$4 sm:$0xff]   ;;  %v18455_v38 = vld [vmem:[%s24991_s5 + $0x144] ss:$8 sps:$4 sm:$0xff]  }
 0x1f4   :  { %v2512_v45 = vmax.f32 %v20833_v55, 0.0  ;;  %v2951_v3 = vmax.f32 %v2502_v54, %v2518_v18  ;;  %v2953_v28 = vmax.f32 %v2504_v31, %v2520_v61  ;;  %4021 = vmatpush1.bf16.msra.mxu0 %v18441_v30  ;;  %4983 = vmatpush1.bf16.msra.mxu1 %v18444_v62  ;;  %v2513_v5 = vmax.f32 %v20846_v8, 0.0  ;;  %v18453_v62 = vld [vmem:[%s24991_s5 + $0x140] ss:$8 sps:$4 sm:$0xff]   ;;  %v18467_v55 = vld [vmem:[%s24991_s5 + $0x164] ss:$8 sps:$4 sm:$0xff]  }
 0x1f5   :  { %v2952_v60 = vmax.f32 %v2503_v63, %v2519_v7  ;;  %v2954_v14 = vmax.f32 %v2505_v6, %v2521_v13  ;;  %v1432_v54 = vpop.f32.mrb[124].mxu0  ;;  %v2025_v31 = vpop.f32.mrb[124].mxu1  ;;  %4022 = vmatprep.subr.bf16.mxu0 %v18449_v53  ;;  %4984 = vmatprep.subr.bf16.mxu1 %v18452_v1 }
 0x1f6   :  { %v2963_v36 = vpack.c.bf16 %v2951_v3, %v2947_v41  ;;  %v2965_v51 = vpack.c.bf16 %v2953_v28, %v2949_v39  ;;  %v1433_v30 = vadd.f32 %v1432_v54, %v19785_v32  ;;  %v1434_v40 = vpop.f32.mrb[125].mxu0  ;;  %v2026_v50 = vadd.f32 %v2025_v31, %v19793_v34  ;;  %v2027_v25 = vpop.f32.mrb[125].mxu1  ;;  %v18456_v41 = vld [vmem:[%s24992_s6 + $0x140] ss:$8 sps:$4 sm:$0xff]  }
 0x1f7   :  { %v2964_v63 = vpack.c.bf16 %v2952_v60, %v2948_v56  ;;  %v2966_v12 = vpack.c.bf16 %v2954_v14, %v2950_v22  ;;  %v1435_v4 = vadd.f32 %v1434_v40, %v19789_v33  ;;  %v1436_v6 = vpop.f32.mrb[126].mxu0  ;;  %v2028_v59 = vadd.f32 %v2027_v25, %v19797_v35  ;;  %v2029_v52 = vpop.f32.mrb[126].mxu1  ;;  %v18461_v56 = vld [vmem:[%s24991_s5 + $0x154] ss:$8 sps:$4 sm:$0xff]   ;;  %v3184_v28 = vld [vmem:[#allocation2 + $0x68] sm:$0xff]  ;;  %v3183_v40 = vld [vmem:[#allocation2 + $0x60] sm:$0xff] }
 0x1f8   :  { %2971 = vst [vmem:[#allocation2 + $0x1c0] sm:$0xff] %v2963_v36  ;;  %2973 = vst [vmem:[#allocation2 + $0x1d0] sm:$0xff] %v2965_v51  ;;  %v2522_v46 = vmax.f32 %v1433_v30, 0.0  ;;  %v2524_v19 = vmax.f32 %v2026_v50, 0.0  ;;  %v1437_v23 = vadd.f32 %v1436_v6, %v19785_v32  ;;  %v1438_v48 = vpop.f32.mrb[127].mxu0  ;;  %v2030_v53 = vadd.f32 %v2029_v52, %v19793_v34  ;;  %v2031_v1 = vpop.f32.mrb[127].mxu1  ;;  %4023 = vmatpush1.bf16.msra.mxu0 %v18447_v15 }
 0x1f9   :  { %4985 = vmatpush1.bf16.msra.mxu1 %v18450_v0  ;;  %2972 = vst [vmem:[#allocation2 + $0x1c8] sm:$0xff] %v2964_v63  ;;  %2974 = vst.msk [vmem:[#allocation2 + $0x1d8] sm:$0xff] %vm2749_vm1, %v2966_v12  ;;  %v2523_v39 = vmax.f32 %v1435_v4, 0.0  ;;  %v2525_v18 = vmax.f32 %v2028_v59, 0.0  ;;  %v1439_v61 = vadd.f32 %v1438_v48, %v19789_v33  ;;  %v2032_v37 = vadd.f32 %v2031_v1, %v19797_v35  ;;  %v18464_v22 = vld [vmem:[%s24992_s6 + $0x154] ss:$8 sps:$4 sm:$0xff]  }
 0x1fa   :  { %4024 = vmatprep.subr.bf16.mxu0 %v18455_v38  ;;  %4986 = vmatprep.subr.bf16.mxu1 %v18458_v2  ;;  %v2955_v7 = vmax.f32 %v2506_v24, %v2522_v46  ;;  %v2957_v13 = vmax.f32 %v2508_v47, %v2524_v19  ;;  %v2526_v15 = vmax.f32 %v1437_v23, 0.0  ;;  %v2528_v3 = vmax.f32 %v2030_v53, 0.0  ;;  %v18465_v51 = vld [vmem:[%s24991_s5 + $0x160] ss:$8 sps:$4 sm:$0xff]   ;;  %v18473_v50 = vld [vmem:[%s24991_s5 + $0x174] ss:$8 sps:$4 sm:$0xff]  }
 0x1fb   :  { %3756 = vmatmul.mubr.bf16.gmra.mrb[232].mxu0 %v3179_v42  ;;  %4718 = vmatmul.mubr.bf16.gmra.mrb[232].mxu1 %v3179_v42  ;;  %v2956_v0 = vmax.f32 %v2507_v58, %v2523_v39  ;;  %v2958_v38 = vmax.f32 %v2509_v44, %v2525_v18  ;;  %v2527_v60 = vmax.f32 %v1439_v61, 0.0  ;;  %v2529_v14 = vmax.f32 %v2032_v37, 0.0  ;;  %v18470_v44 = vld [vmem:[%s24992_s6 + $0x164] ss:$8 sps:$4 sm:$0xff]   ;;  %v18468_v30 = vld [vmem:[%s24992_s6 + $0x160] ss:$8 sps:$4 sm:$0xff]  }
 0x1fc   :  { %3765 = vmatprep.mubr.bf16.mxu0 %v3184_v28  ;;  %4727 = vmatprep.mubr.bf16.mxu1 %v3184_v28  ;;  %v2959_v29 = vmax.f32 %v2510_v57, %v2526_v15  ;;  %v2961_v17 = vmax.f32 %v2512_v45, %v2528_v3  ;;  %v3188_v25 = vld [vmem:[#allocation2 + $0x88] sm:$0xff]  ;;  %v18476_v63 = vld [vmem:[%s24992_s6 + $0x174] ss:$8 sps:$4 sm:$0xff]   ;;  %v18471_v12 = vld [vmem:[%s24991_s5 + $0x170] ss:$8 sps:$4 sm:$0xff]  }
 0x1fd   :  { %4025 = vmatpush1.bf16.msra.mxu0 %v18453_v62  ;;  %4987 = vmatpush1.bf16.msra.mxu1 %v18456_v41  ;;  %v2960_v24 = vmax.f32 %v2511_v43, %v2527_v60  ;;  %v2962_v11 = vmax.f32 %v2513_v5, %v2529_v14  ;;  %v1442_v47 = vpop.f32.mrb[128].mxu0  ;;  %v2035_v58 = vpop.f32.mrb[128].mxu1  ;;  %v18474_v4 = vld [vmem:[%s24992_s6 + $0x170] ss:$8 sps:$4 sm:$0xff]   ;;  %v3192_v3 = vld [vmem:[#allocation2 + $0xa8] sm:$0xff] }
 0x1fe   :  { %4026 = vmatprep.subr.bf16.mxu0 %v18461_v56  ;;  %4988 = vmatprep.subr.bf16.mxu1 %v18464_v22  ;;  %v2967_v57 = vpack.c.bf16 %v2959_v29, %v2955_v7  ;;  %v2969_v45 = vpack.c.bf16 %v2961_v17, %v2957_v13  ;;  %v1444_v54 = vpop.f32.mrb[129].mxu0  ;;  %v2037_v49 = vpop.f32.mrb[129].mxu1  ;;  %v20957_v52 = vadd.f32 %v1442_v47, %v19785_v32  ;;  %v3187_v7 = vld [vmem:[#allocation2 + $0x80] sm:$0xff] }
 0x1ff   :  { %v2968_v43 = vpack.c.bf16 %v2960_v24, %v2956_v0  ;;  %v2970_v31 = vpack.c.bf16 %v2962_v11, %v2958_v38  ;;  %v1446_v8 = vpop.f32.mrb[130].mxu0  ;;  %v2039_v5 = vpop.f32.mrb[130].mxu1  ;;  %v20960_v46 = vadd.f32 %v1444_v54, %v19789_v33  ;;  %v20966_v23 = vadd.f32 %v2035_v58, %v19793_v34  ;;  %v18477_v28 = vld [vmem:[%s24991_s5 + $0x180] ss:$8 sps:$4 sm:$0xff]   ;;  %v18479_v0 = vld [vmem:[%s24991_s5 + $0x184] ss:$8 sps:$4 sm:$0xff]  }
 0x200   :  { %2975 = vst [vmem:[#allocation2 + $0x1e0] sm:$0xff] %v2967_v57  ;;  %2977 = vst [vmem:[#allocation2 + $0x1f0] sm:$0xff] %v2969_v45  ;;  %v1448_v2 = vpop.f32.mrb[131].mxu0  ;;  %v2041_v36 = vpop.f32.mrb[131].mxu1  ;;  %v20963_v19 = vadd.f32 %v1446_v8, %v19785_v32  ;;  %v20969_v53 = vadd.f32 %v2037_v49, %v19797_v35  ;;  %v20975_v18 = vadd.f32 %v2039_v5, %v19793_v34  ;;  %v2530_v13 = vmax.f32 %v20957_v52, 0.0 }
 0x201   :  { %4027 = vmatpush1.bf16.msra.mxu0 %v18459_v10  ;;  %4989 = vmatpush1.bf16.msra.mxu1 %v18462_v9  ;;  %2976 = vst [vmem:[#allocation2 + $0x1e8] sm:$0xff] %v2968_v43  ;;  %2978 = vst.msk [vmem:[#allocation2 + $0x1f8] sm:$0xff] %vm2749_vm1, %v2970_v31  ;;  %v20972_v41 = vadd.f32 %v1448_v2, %v19789_v33  ;;  %v20978_v61 = vadd.f32 %v2041_v36, %v19797_v35  ;;  %v2531_v38 = vmax.f32 %v20960_v46, 0.0  ;;  %v3191_v46 = vld [vmem:[#allocation2 + $0xa0] sm:$0xff] }
 0x202   :  { %4028 = vmatprep.subr.bf16.mxu0 %v18467_v55  ;;  %4990 = vmatprep.subr.bf16.mxu1 %v18470_v44  ;;  %v2532_v60 = vmax.f32 %v20966_v23, 0.0  ;;  %v2533_v14 = vmax.f32 %v20969_v53, 0.0  ;;  %v2534_v17 = vmax.f32 %v20963_v19, 0.0  ;;  %v2536_v9 = vmax.f32 %v20975_v18, 0.0 }
 0x203   :  { %3766 = vmatmul.mubr.bf16.gmra.mrb[236].mxu0 %v3183_v40  ;;  %4728 = vmatmul.mubr.bf16.gmra.mrb[236].mxu1 %v3183_v40  ;;  %v2535_v10 = vmax.f32 %v20972_v41, 0.0  ;;  %v2537_v24 = vmax.f32 %v20978_v61, 0.0 }
 0x204   :  { %3775 = vmatprep.mubr.bf16.mxu0 %v3188_v25  ;;  %4737 = vmatprep.mubr.bf16.mxu1 %v3188_v25 }
 0x205   :  { %4029 = vmatpush1.bf16.msra.mxu0 %v18465_v51  ;;  %4991 = vmatpush1.bf16.msra.mxu1 %v18468_v30  ;;  %v1452_v6 = vpop.f32.mrb[132].mxu0  ;;  %v2045_v59 = vpop.f32.mrb[132].mxu1 }
 0x206   :  { %4030 = vmatprep.subr.bf16.mxu0 %v18473_v50  ;;  %4992 = vmatprep.subr.bf16.mxu1 %v18476_v63  ;;  %v1454_v42 = vpop.f32.mrb[133].mxu0  ;;  %v2047_v62 = vpop.f32.mrb[133].mxu1  ;;  %v20981_v56 = vadd.f32 %v1452_v6, %v19785_v32  ;;  %v20984_v22 = vadd.f32 %v2045_v59, %v19793_v34 }
 0x207   :  { %v1456_v48 = vpop.f32.mrb[134].mxu0  ;;  %v2049_v1 = vpop.f32.mrb[134].mxu1  ;;  %v20988_v15 = vadd.f32 %v1454_v42, %v19789_v33  ;;  %v21000_v29 = vadd.f32 %v2047_v62, %v19797_v35 }
 0x208   :  { %v1458_v39 = vpop.f32.mrb[135].mxu0  ;;  %v2051_v37 = vpop.f32.mrb[135].mxu1  ;;  %v2538_v11 = vmax.f32 %v20981_v56, 0.0  ;;  %v21008_v47 = vadd.f32 %v1456_v48, %v19785_v32  ;;  %v2540_v58 = vmax.f32 %v20984_v22, 0.0  ;;  %v21012_v55 = vadd.f32 %v2049_v1, %v19793_v34  ;;  %v3196_v1 = vld [vmem:[#allocation2 + $0xc8] sm:$0xff] }
 0x209   :  { %4031 = vmatpush1.bf16.msra.mxu0 %v18471_v12  ;;  %4993 = vmatpush1.bf16.msra.mxu1 %v18474_v4  ;;  %v2539_v45 = vmax.f32 %v20988_v15, 0.0  ;;  %v21016_v54 = vadd.f32 %v1458_v39, %v19789_v33  ;;  %v2541_v5 = vmax.f32 %v21000_v29, 0.0  ;;  %v21022_v2 = vadd.f32 %v2051_v37, %v19797_v35 }
 0x20a   :  { %4032 = vmatprep.subr.bf16.mxu0 %v18479_v0  ;;  %v2542_v37 = vmax.f32 %v21008_v47, 0.0 }
 0x20b   :  { %3776 = vmatmul.mubr.bf16.gmra.mrb[240].mxu0 %v3187_v7  ;;  %4738 = vmatmul.mubr.bf16.gmra.mrb[240].mxu1 %v3187_v7  ;;  %v2544_v7 = vmax.f32 %v21012_v55, 0.0  ;;  %v2545_v0 = vmax.f32 %v21022_v2, 0.0 }
 0x20c   :  { %3785 = vmatprep.mubr.bf16.mxu0 %v3192_v3  ;;  %4747 = vmatprep.mubr.bf16.mxu1 %v3192_v3 }
 0x20d   :  { %v1462_v44 = vpop.f32.mrb[136].mxu0  ;;  %v2055_v57 = vpop.f32.mrb[136].mxu1  ;;  %4033 = vmatpush1.bf16.msra.mxu0 %v18477_v28 }
 0x20e   :  { %v1463_v49 = vadd.f32 %v1462_v44, %v19785_v32  ;;  %v1464_v43 = vpop.f32.mrb[137].mxu0  ;;  %v2056_v31 = vadd.f32 %v2055_v57, %v19793_v34  ;;  %v2057_v8 = vpop.f32.mrb[137].mxu1 }
 0x20f   :  { %v1465_v36 = vadd.f32 %v1464_v43, %v19789_v33  ;;  %v1466_v51 = vpop.f32.mrb[138].mxu0  ;;  %v2058_v30 = vadd.f32 %v2057_v8, %v19797_v35  ;;  %v2059_v40 = vpop.f32.mrb[138].mxu1 }
 0x210   :  { %v2546_v50 = vmax.f32 %v1463_v49, 0.0  ;;  %v2548_v25 = vmax.f32 %v2056_v31, 0.0  ;;  %v1467_v63 = vadd.f32 %v1466_v51, %v19785_v32  ;;  %v1468_v12 = vpop.f32.mrb[139].mxu0  ;;  %v2060_v4 = vadd.f32 %v2059_v40, %v19793_v34  ;;  %v2061_v6 = vpop.f32.mrb[139].mxu1 }
 0x211   :  { %v2547_v59 = vmax.f32 %v1465_v36, 0.0  ;;  %v2549_v52 = vmax.f32 %v2058_v30, 0.0  ;;  %v1469_v42 = vadd.f32 %v1468_v12, %v19789_v33  ;;  %v2062_v62 = vadd.f32 %v2061_v6, %v19797_v35 }
 0x212   :  { %v2979_v19 = vmax.f32 %v2530_v13, %v2546_v50  ;;  %v2981_v23 = vmax.f32 %v2532_v60, %v2548_v25  ;;  %v2550_v48 = vmax.f32 %v1467_v63, 0.0  ;;  %v2552_v53 = vmax.f32 %v2060_v4, 0.0  ;;  %v3195_v25 = vld [vmem:[#allocation2 + $0xc0] sm:$0xff] }
 0x213   :  { %3786 = vmatmul.mubr.bf16.gmra.mrb[244].mxu0 %v3191_v46  ;;  %4748 = vmatmul.mubr.bf16.gmra.mrb[244].mxu1 %v3191_v46  ;;  %v2980_v41 = vmax.f32 %v2531_v38, %v2547_v59  ;;  %v2982_v39 = vmax.f32 %v2533_v14, %v2549_v52  ;;  %v2551_v18 = vmax.f32 %v1469_v42, 0.0  ;;  %v2553_v61 = vmax.f32 %v2062_v62, 0.0  ;;  %v18480_v59 = vld [vmem:[%s24992_s6 + $0x180] ss:$8 sps:$4 sm:$0xff]   ;;  %v18482_v52 = vld [vmem:[%s24992_s6 + $0x184] ss:$8 sps:$4 sm:$0xff]  }
 0x214   :  { %3795 = vmatprep.mubr.bf16.mxu0 %v3196_v1  ;;  %4757 = vmatprep.mubr.bf16.mxu1 %v3196_v1  ;;  %v2983_v3 = vmax.f32 %v2534_v17, %v2550_v48  ;;  %v2985_v28 = vmax.f32 %v2536_v9, %v2552_v53  ;;  %v2543_v13 = vmax.f32 %v21016_v54, 0.0 }
 0x215   :  { %v2984_v60 = vmax.f32 %v2535_v10, %v2551_v18  ;;  %v2986_v44 = vmax.f32 %v2537_v24, %v2553_v61  ;;  %v1472_v57 = vpop.f32.mrb[140].mxu0  ;;  %v2065_v49 = vpop.f32.mrb[140].mxu1  ;;  %4994 = vmatprep.subr.bf16.mxu1 %v18482_v52 }
 0x216   :  { %v21034_v38 = vpack.c.bf16 %v2983_v3, %v2979_v19  ;;  %v2997_v14 = vpack.c.bf16 %v2985_v28, %v2981_v23  ;;  %v1473_v43 = vadd.f32 %v1472_v57, %v19785_v32  ;;  %v1474_v31 = vpop.f32.mrb[141].mxu0  ;;  %v2066_v47 = vadd.f32 %v2065_v49, %v19793_v34  ;;  %v2067_v8 = vpop.f32.mrb[141].mxu1  ;;  %v3200_v23 = vld [vmem:[#allocation2 + $0xe8] sm:$0xff]  ;;  %4995 = vmatpush1.bf16.msra.mxu1 %v18480_v59 }
 0x217   :  { %v21038_v55 = vpack.c.bf16 %v2984_v60, %v2980_v41  ;;  %v2998_v17 = vpack.c.bf16 %v2986_v44, %v2982_v39  ;;  %v1475_v9 = vadd.f32 %v1474_v31, %v19789_v33  ;;  %v1476_v54 = vpop.f32.mrb[142].mxu0  ;;  %v2068_v10 = vadd.f32 %v2067_v8, %v19797_v35  ;;  %v2069_v24 = vpop.f32.mrb[142].mxu1  ;;  %v3204_v57 = vld [vmem:[#allocation2 + $0x108] sm:$0xff] }
 0x218   :  { %3005 = vst [vmem:[#allocation2 + $0x210] sm:$0xff] %v2997_v14  ;;  %v2554_v2 = vmax.f32 %v1473_v43, 0.0  ;;  %v2556_v36 = vmax.f32 %v2066_v47, 0.0  ;;  %v1477_v51 = vadd.f32 %v1476_v54, %v19785_v32  ;;  %v1478_v30 = vpop.f32.mrb[143].mxu0  ;;  %v2070_v40 = vadd.f32 %v2069_v24, %v19793_v34  ;;  %v2071_v50 = vpop.f32.mrb[143].mxu1 }
 0x219   :  { %3006 = vst.msk [vmem:[#allocation2 + $0x218] sm:$0xff] %vm2749_vm1, %v2998_v17  ;;  %v2555_v63 = vmax.f32 %v1475_v9, 0.0  ;;  %v2557_v12 = vmax.f32 %v2068_v10, 0.0  ;;  %v1479_v4 = vadd.f32 %v1478_v30, %v19789_v33  ;;  %v2072_v6 = vadd.f32 %v2071_v50, %v19797_v35 }
 0x21a   :  { %v2987_v42 = vmax.f32 %v2538_v11, %v2554_v2  ;;  %v2989_v62 = vmax.f32 %v2540_v58, %v2556_v36  ;;  %v2558_v46 = vmax.f32 %v1477_v51, 0.0  ;;  %v2560_v19 = vmax.f32 %v2070_v40, 0.0 }
 0x21b   :  { %3796 = vmatmul.mubr.bf16.gmra.mrb[248].mxu0 %v3195_v25  ;;  %4758 = vmatmul.mubr.bf16.gmra.mrb[248].mxu1 %v3195_v25  ;;  %v2988_v48 = vmax.f32 %v2539_v45, %v2555_v63  ;;  %v2990_v53 = vmax.f32 %v2541_v5, %v2557_v12  ;;  %v2559_v1 = vmax.f32 %v1479_v4, 0.0  ;;  %v2561_v41 = vmax.f32 %v2072_v6, 0.0  ;;  %v3203_v63 = vld [vmem:[#allocation2 + $0x100] sm:$0xff]  ;;  %v18486_v12 = vld [vmem:[%s24992_s6 + $0x190] ss:$8 sps:$4 sm:$0xff]  }
 0x21c   :  { %3805 = vmatprep.mubr.bf16.mxu0 %v3200_v23  ;;  %4767 = vmatprep.mubr.bf16.mxu1 %v3200_v23  ;;  %v2991_v56 = vmax.f32 %v2542_v37, %v2558_v46  ;;  %v2993_v11 = vmax.f32 %v2544_v7, %v2560_v19  ;;  %v3199_v7 = vld [vmem:[#allocation2 + $0xe0] sm:$0xff]  ;;  %v18488_v4 = vld [vmem:[%s24992_s6 + $0x194] ss:$8 sps:$4 sm:$0xff]  }
 0x21d   :  { %v2992_v22 = vmax.f32 %v2543_v13, %v2559_v1  ;;  %v2994_v58 = vmax.f32 %v2545_v0, %v2561_v41  ;;  %v1482_v39 = vpop.f32.mrb[144].mxu0  ;;  %v2075_v18 = vpop.f32.mrb[144].mxu1  ;;  %v18483_v13 = vld [vmem:[%s24991_s5 + $0x190] ss:$8 sps:$4 sm:$0xff]   ;;  %v18485_v0 = vld [vmem:[%s24991_s5 + $0x194] ss:$8 sps:$4 sm:$0xff]   ;;  %4996 = vmatprep.subr.bf16.mxu1 %v18488_v4 }
 0x21e   :  { %v2999_v61 = vpack.c.bf16 %v2991_v56, %v2987_v42  ;;  %v3001_v3 = vpack.c.bf16 %v2993_v11, %v2989_v62  ;;  %v1484_v28 = vpop.f32.mrb[145].mxu0  ;;  %v2077_v15 = vpop.f32.mrb[145].mxu1  ;;  %4034 = vmatprep.subr.bf16.mxu0 %v18485_v0  ;;  %v21071_v43 = vadd.f32 %v1482_v39, %v19785_v32  ;;  %v21074_v47 = vadd.f32 %v2075_v18, %v19793_v34  ;;  %v3208_v42 = vld [vmem:[#allocation2 + $0x128] sm:$0xff] }
 0x21f   :  { %v21061_v45 = vpack.c.bf16 %v2992_v22, %v2988_v48  ;;  %v3002_v29 = vpack.c.bf16 %v2994_v58, %v2990_v53  ;;  %v1486_v5 = vpop.f32.mrb[146].mxu0  ;;  %v2079_v60 = vpop.f32.mrb[146].mxu1  ;;  %4035 = vmatpush1.bf16.msra.mxu0 %v18483_v13  ;;  %v21077_v17 = vadd.f32 %v1484_v28, %v19789_v33  ;;  %v21080_v54 = vadd.f32 %v2077_v15, %v19797_v35  ;;  %v18489_v23 = vld [vmem:[%s24991_s5 + $0x1a0] ss:$8 sps:$4 sm:$0xff]   ;;  %v18491_v48 = vld [vmem:[%s24991_s5 + $0x1a4] ss:$8 sps:$4 sm:$0xff]  }
 0x220   :  { %3007 = vst [vmem:[#allocation2 + $0x220] sm:$0xff] %v2999_v61  ;;  %3009 = vst [vmem:[#allocation2 + $0x230] sm:$0xff] %v3001_v3  ;;  %v1488_v44 = vpop.f32.mrb[147].mxu0  ;;  %v2081_v37 = vpop.f32.mrb[147].mxu1  ;;  %v21083_v24 = vadd.f32 %v1486_v5, %v19785_v32  ;;  %v21089_v51 = vadd.f32 %v2079_v60, %v19793_v34  ;;  %v2562_v6 = vmax.f32 %v21071_v43, 0.0  ;;  %v2564_v52 = vmax.f32 %v21074_v47, 0.0  ;;  %4997 = vmatpush1.bf16.msra.mxu1 %v18486_v12 }
 0x221   :  { %3010 = vst.msk [vmem:[#allocation2 + $0x238] sm:$0xff] %vm2749_vm1, %v3002_v29  ;;  %v21086_v2 = vadd.f32 %v1488_v44, %v19789_v33  ;;  %v21092_v30 = vadd.f32 %v2081_v37, %v19797_v35  ;;  %v2563_v62 = vmax.f32 %v21077_v17, 0.0  ;;  %v2565_v46 = vmax.f32 %v21080_v54, 0.0  ;;  %4036 = vmatprep.subr.bf16.mxu0 %v18491_v48 }
 0x222   :  { %v2566_v53 = vmax.f32 %v21083_v24, 0.0  ;;  %v2568_v41 = vmax.f32 %v21089_v51, 0.0  ;;  %v3207_v24 = vld [vmem:[#allocation2 + $0x120] sm:$0xff] }
 0x223   :  { %3806 = vmatmul.mubr.bf16.gmra.mrb[252].mxu0 %v3199_v7  ;;  %4768 = vmatmul.mubr.bf16.gmra.mrb[252].mxu1 %v3199_v7  ;;  %v2567_v1 = vmax.f32 %v21086_v2, 0.0  ;;  %v2569_v56 = vmax.f32 %v21092_v30, 0.0 }
 0x224   :  { %3815 = vmatprep.mubr.bf16.mxu0 %v3204_v57  ;;  %4777 = vmatprep.mubr.bf16.mxu1 %v3204_v57 }
 0x225   :  { %v1492_v49 = vpop.f32.mrb[148].mxu0  ;;  %v2085_v14 = vpop.f32.mrb[148].mxu1  ;;  %4037 = vmatpush1.bf16.msra.mxu0 %v18489_v23 }
 0x226   :  { %v1494_v31 = vpop.f32.mrb[149].mxu0  ;;  %v2087_v8 = vpop.f32.mrb[149].mxu1  ;;  %v21095_v50 = vadd.f32 %v1492_v49, %v19785_v32  ;;  %v21098_v25 = vadd.f32 %v2085_v14, %v19793_v34 }
 0x227   :  { %v1496_v9 = vpop.f32.mrb[150].mxu0  ;;  %v2089_v10 = vpop.f32.mrb[150].mxu1  ;;  %v21108_v59 = vadd.f32 %v1494_v31, %v19789_v33  ;;  %v21114_v19 = vadd.f32 %v2087_v8, %v19797_v35 }
 0x228   :  { %v1498_v36 = vpop.f32.mrb[151].mxu0  ;;  %v2091_v40 = vpop.f32.mrb[151].mxu1  ;;  %v2570_v11 = vmax.f32 %v21095_v50, 0.0  ;;  %v21128_v22 = vadd.f32 %v1496_v9, %v19785_v32  ;;  %v2572_v58 = vmax.f32 %v21098_v25, 0.0  ;;  %v21132_v39 = vadd.f32 %v2089_v10, %v19793_v34 }
 0x229   :  { %v2571_v3 = vmax.f32 %v21108_v59, 0.0  ;;  %v21136_v28 = vadd.f32 %v1498_v36, %v19789_v33  ;;  %v2573_v44 = vmax.f32 %v21114_v19, 0.0  ;;  %v21142_v37 = vadd.f32 %v2091_v40, %v19797_v35  ;;  %v3212_v40 = vld [vmem:[#allocation2 + $0x148] sm:$0xff] }
 0x22a   :  { %v2574_v23 = vmax.f32 %v21128_v22, 0.0  ;;  %v2576_v48 = vmax.f32 %v21132_v39, 0.0 }
 0x22b   :  { %3816 = vmatmul.mubr.bf16.gmra.mrb[0].mxu0 %v3203_v63  ;;  %4778 = vmatmul.mubr.bf16.gmra.mrb[0].mxu1 %v3203_v63 }
 0x22c   :  { %3825 = vmatprep.mubr.bf16.mxu0 %v3208_v42  ;;  %4787 = vmatprep.mubr.bf16.mxu1 %v3208_v42 }
 0x22d   :  { %v1502_v18 = vpop.f32.mrb[152].mxu0  ;;  %v2095_v61 = vpop.f32.mrb[152].mxu1 }
 0x22e   :  { %v1503_v15 = vadd.f32 %v1502_v18, %v19785_v32  ;;  %v1504_v29 = vpop.f32.mrb[153].mxu0  ;;  %v2096_v5 = vadd.f32 %v2095_v61, %v19793_v34  ;;  %v2097_v60 = vpop.f32.mrb[153].mxu1 }
 0x22f   :  { %v1505_v7 = vadd.f32 %v1504_v29, %v19789_v33  ;;  %v1506_v13 = vpop.f32.mrb[154].mxu0  ;;  %v2098_v0 = vadd.f32 %v2097_v60, %v19797_v35  ;;  %v2099_v57 = vpop.f32.mrb[154].mxu1 }
 0x230   :  { %v2578_v49 = vmax.f32 %v1503_v15, 0.0  ;;  %v2580_v14 = vmax.f32 %v2096_v5, 0.0  ;;  %v1507_v43 = vadd.f32 %v1506_v13, %v19785_v32  ;;  %v1508_v31 = vpop.f32.mrb[155].mxu0  ;;  %v2100_v47 = vadd.f32 %v2099_v57, %v19793_v34  ;;  %v2101_v8 = vpop.f32.mrb[155].mxu1 }
 0x231   :  { %v2579_v17 = vmax.f32 %v1505_v7, 0.0  ;;  %v2581_v9 = vmax.f32 %v2098_v0, 0.0  ;;  %v1509_v54 = vadd.f32 %v1508_v31, %v19789_v33  ;;  %v2102_v10 = vadd.f32 %v2101_v8, %v19797_v35 }
 0x232   :  { %v3011_v2 = vmax.f32 %v2562_v6, %v2578_v49  ;;  %v3013_v36 = vmax.f32 %v2564_v52, %v2580_v14  ;;  %v2582_v51 = vmax.f32 %v1507_v43, 0.0  ;;  %v2584_v30 = vmax.f32 %v2100_v47, 0.0 }
 0x233   :  { %3826 = vmatmul.mubr.bf16.gmra.mrb[4].mxu0 %v3207_v24  ;;  %4788 = vmatmul.mubr.bf16.gmra.mrb[4].mxu1 %v3207_v24  ;;  %v3012_v63 = vmax.f32 %v2563_v62, %v2579_v17  ;;  %v3014_v12 = vmax.f32 %v2565_v46, %v2581_v9  ;;  %v2583_v4 = vmax.f32 %v1509_v54, 0.0  ;;  %v2585_v42 = vmax.f32 %v2102_v10, 0.0  ;;  %v3211_v54 = vld [vmem:[#allocation2 + $0x140] sm:$0xff] }
 0x234   :  { %3835 = vmatprep.mubr.bf16.mxu0 %v3212_v40  ;;  %4797 = vmatprep.mubr.bf16.mxu1 %v3212_v40  ;;  %v3015_v18 = vmax.f32 %v2566_v53, %v2582_v51  ;;  %v3017_v61 = vmax.f32 %v2568_v41, %v2584_v30  ;;  %v2575_v6 = vmax.f32 %v21136_v28, 0.0  ;;  %v2577_v52 = vmax.f32 %v21142_v37, 0.0  ;;  %v3216_v51 = vld [vmem:[#allocation2 + $0x168] sm:$0xff] }
 0x235   :  { %v3016_v15 = vmax.f32 %v2567_v1, %v2583_v4  ;;  %v3018_v29 = vmax.f32 %v2569_v56, %v2585_v42  ;;  %v1512_v5 = vpop.f32.mrb[156].mxu0  ;;  %v2105_v60 = vpop.f32.mrb[156].mxu1 }
 0x236   :  { %v21154_v62 = vpack.c.bf16 %v3015_v18, %v3011_v2  ;;  %v3029_v46 = vpack.c.bf16 %v3017_v61, %v3013_v36  ;;  %v1513_v7 = vadd.f32 %v1512_v5, %v19785_v32  ;;  %v1514_v13 = vpop.f32.mrb[157].mxu0  ;;  %v2106_v22 = vadd.f32 %v2105_v60, %v19793_v34  ;;  %v2107_v0 = vpop.f32.mrb[157].mxu1 }
 0x237   :  { %v21158_v39 = vpack.c.bf16 %v3016_v15, %v3012_v63  ;;  %v3030_v53 = vpack.c.bf16 %v3018_v29, %v3014_v12  ;;  %v1515_v41 = vadd.f32 %v1514_v13, %v19789_v33  ;;  %v1516_v28 = vpop.f32.mrb[158].mxu0  ;;  %v2108_v1 = vadd.f32 %v2107_v0, %v19797_v35  ;;  %v2109_v56 = vpop.f32.mrb[158].mxu1  ;;  %v18500_v13 = vld [vmem:[%s24992_s6 + $0x1b4] ss:$8 sps:$4 sm:$0xff]  }
 0x238   :  { %3037 = vst [vmem:[#allocation2 + $0x250] sm:$0xff] %v3029_v46  ;;  %v2586_v37 = vmax.f32 %v1513_v7, 0.0  ;;  %v2588_v57 = vmax.f32 %v2106_v22, 0.0  ;;  %v1517_v49 = vadd.f32 %v1516_v28, %v19785_v32  ;;  %v1518_v14 = vpop.f32.mrb[159].mxu0  ;;  %v2110_v43 = vadd.f32 %v2109_v56, %v19793_v34  ;;  %v2111_v31 = vpop.f32.mrb[159].mxu1 }
 0x239   :  { %3038 = vst.msk [vmem:[#allocation2 + $0x258] sm:$0xff] %vm2749_vm1, %v3030_v53  ;;  %v2587_v47 = vmax.f32 %v1515_v41, 0.0  ;;  %v2589_v8 = vmax.f32 %v2108_v1, 0.0  ;;  %v1519_v17 = vadd.f32 %v1518_v14, %v19789_v33  ;;  %v2112_v9 = vadd.f32 %v2111_v31, %v19797_v35  ;;  %v18495_v46 = vld [vmem:[%s24991_s5 + $0x1b0] ss:$8 sps:$4 sm:$0xff]  }
 0x23a   :  { %v3019_v10 = vmax.f32 %v2570_v11, %v2586_v37  ;;  %v3021_v24 = vmax.f32 %v2572_v58, %v2588_v57  ;;  %v2590_v2 = vmax.f32 %v1517_v49, 0.0  ;;  %v2592_v36 = vmax.f32 %v2110_v43, 0.0  ;;  %v18497_v7 = vld [vmem:[%s24991_s5 + $0x1b4] ss:$8 sps:$4 sm:$0xff]   ;;  %v18498_v22 = vld [vmem:[%s24992_s6 + $0x1b0] ss:$8 sps:$4 sm:$0xff]  }
 0x23b   :  { %3836 = vmatmul.mubr.bf16.gmra.mrb[8].mxu0 %v3211_v54  ;;  %4798 = vmatmul.mubr.bf16.gmra.mrb[8].mxu1 %v3211_v54  ;;  %v3020_v30 = vmax.f32 %v2571_v3, %v2587_v47  ;;  %v3022_v40 = vmax.f32 %v2573_v44, %v2589_v8  ;;  %v2591_v63 = vmax.f32 %v1519_v17, 0.0  ;;  %v2593_v12 = vmax.f32 %v2112_v9, 0.0  ;;  %v18503_v41 = vld [vmem:[%s24994_s3 + $0x1c4] ss:$16 sps:$4 sm:$0xff]  }
 0x23c   :  { %3845 = vmatprep.mubr.bf16.mxu0 %v3216_v51  ;;  %4807 = vmatprep.mubr.bf16.mxu1 %v3216_v51  ;;  %v3023_v50 = vmax.f32 %v2574_v23, %v2590_v2  ;;  %v3025_v11 = vmax.f32 %v2576_v48, %v2592_v36  ;;  %v3215_v23 = vld [vmem:[#allocation2 + $0x160] sm:$0xff] }
 0x23d   :  { %v3024_v4 = vmax.f32 %v2575_v6, %v2591_v63  ;;  %v3026_v25 = vmax.f32 %v2577_v52, %v2593_v12  ;;  %v1522_v58 = vpop.f32.mrb[160].mxu0  ;;  %v2115_v42 = vpop.f32.mrb[160].mxu1  ;;  %v18492_v48 = vld [vmem:[%s24992_s6 + $0x1a0] ss:$8 sps:$4 sm:$0xff]   ;;  %v18494_v6 = vld [vmem:[%s24992_s6 + $0x1a4] ss:$8 sps:$4 sm:$0xff]   ;;  %4038 = vmatprep.subr.bf16.mxu0 %v18497_v7 }
 0x23e   :  { %v21175_v18 = vpack.c.bf16 %v3023_v50, %v3019_v10  ;;  %v3033_v61 = vpack.c.bf16 %v3025_v11, %v3021_v24  ;;  %v1524_v15 = vpop.f32.mrb[161].mxu0  ;;  %v2117_v29 = vpop.f32.mrb[161].mxu1  ;;  %v3220_v52 = vld [vmem:[#allocation2 + $0x188] sm:$0xff]  ;;  %4998 = vmatprep.subr.bf16.mxu1 %v18494_v6  ;;  %4039 = vmatpush1.bf16.msra.mxu0 %v18495_v46  ;;  %v21202_v28 = vadd.f32 %v1522_v58, %v19785_v32  ;;  %v3219_v47 = vld [vmem:[#allocation2 + $0x180] sm:$0xff] }
 0x23f   :  { %v21177_v59 = vpack.c.bf16 %v3024_v4, %v3020_v30  ;;  %v3034_v3 = vpack.c.bf16 %v3026_v25, %v3022_v40  ;;  %v1526_v19 = vpop.f32.mrb[162].mxu0  ;;  %v2119_v44 = vpop.f32.mrb[162].mxu1  ;;  %4999 = vmatpush1.bf16.msra.mxu1 %v18492_v48  ;;  %v21205_v1 = vadd.f32 %v1524_v15, %v19789_v33  ;;  %v21208_v37 = vadd.f32 %v2115_v42, %v19793_v34  ;;  %v3224_v24 = vld [vmem:[#allocation2 + $0x1a8] sm:$0xff] }
 0x240   :  { %3041 = vst [vmem:[#allocation2 + $0x270] sm:$0xff] %v3033_v61  ;;  %v1528_v5 = vpop.f32.mrb[163].mxu0  ;;  %v2121_v60 = vpop.f32.mrb[163].mxu1  ;;  %5000 = vmatprep.subr.bf16.mxu1 %v18500_v13  ;;  %v21211_v49 = vadd.f32 %v1526_v19, %v19785_v32  ;;  %v21214_v43 = vadd.f32 %v2117_v29, %v19797_v35  ;;  %v21217_v31 = vadd.f32 %v2119_v44, %v19793_v34  ;;  %v2594_v30 = vmax.f32 %v21202_v28, 0.0 }
 0x241   :  { %3042 = vst.msk [vmem:[#allocation2 + $0x278] sm:$0xff] %vm2749_vm1, %v3034_v3  ;;  %6069 = vmatprep.subr.bf16.mxu0 %v18503_v41  ;;  %v21220_v17 = vadd.f32 %v1528_v5, %v19789_v33  ;;  %v21226_v10 = vadd.f32 %v2121_v60, %v19797_v35  ;;  %v2595_v40 = vmax.f32 %v21205_v1, 0.0  ;;  %v2596_v63 = vmax.f32 %v21208_v37, 0.0  ;;  %v3223_v41 = vld [vmem:[#allocation2 + $0x1a0] sm:$0xff] }
 0x242   :  { %v2598_v50 = vmax.f32 %v21211_v49, 0.0  ;;  %v2597_v4 = vmax.f32 %v21214_v43, 0.0  ;;  %v2600_v25 = vmax.f32 %v21217_v31, 0.0 }
 0x243   :  { %3846 = vmatmul.mubr.bf16.gmra.mrb[12].mxu0 %v3215_v23  ;;  %4808 = vmatmul.mubr.bf16.gmra.mrb[12].mxu1 %v3215_v23  ;;  %v2599_v58 = vmax.f32 %v21220_v17, 0.0  ;;  %v2601_v61 = vmax.f32 %v21226_v10, 0.0 }
 0x244   :  { %3855 = vmatprep.mubr.bf16.mxu0 %v3220_v52  ;;  %4817 = vmatprep.mubr.bf16.mxu1 %v3220_v52 }
 0x245   :  { %v1532_v0 = vpop.f32.mrb[164].mxu0  ;;  %v2125_v53 = vpop.f32.mrb[164].mxu1  ;;  %5001 = vmatpush1.bf16.msra.mxu1 %v18498_v22 }
 0x246   :  { %v1534_v56 = vpop.f32.mrb[165].mxu0  ;;  %v2127_v57 = vpop.f32.mrb[165].mxu1  ;;  %v21223_v9 = vadd.f32 %v1532_v0, %v19785_v32  ;;  %v21232_v51 = vadd.f32 %v2125_v53, %v19793_v34 }
 0x247   :  { %v1536_v14 = vpop.f32.mrb[166].mxu0  ;;  %v2129_v8 = vpop.f32.mrb[166].mxu1  ;;  %v21229_v36 = vadd.f32 %v1534_v56, %v19789_v33  ;;  %v21238_v12 = vadd.f32 %v2127_v57, %v19797_v35 }
 0x248   :  { %v1538_v54 = vpop.f32.mrb[167].mxu0  ;;  %v2131_v2 = vpop.f32.mrb[167].mxu1  ;;  %v21242_v11 = vadd.f32 %v1536_v14, %v19785_v32  ;;  %v2602_v42 = vmax.f32 %v21223_v9, 0.0  ;;  %v2604_v29 = vmax.f32 %v21232_v51, 0.0  ;;  %v21252_v3 = vadd.f32 %v2129_v8, %v19793_v34  ;;  %v3228_v14 = vld [vmem:[#allocation2 + $0x1c8] sm:$0xff] }
 0x249   :  { %v2603_v15 = vmax.f32 %v21229_v36, 0.0  ;;  %v21255_v5 = vadd.f32 %v1538_v54, %v19789_v33  ;;  %v2605_v60 = vmax.f32 %v21238_v12, 0.0  ;;  %v21262_v7 = vadd.f32 %v2131_v2, %v19797_v35 }
 0x24a   :  { %v2606_v46 = vmax.f32 %v21242_v11, 0.0 }
 0x24b   :  { %3856 = vmatmul.mubr.bf16.gmra.mrb[16].mxu0 %v3219_v47  ;;  %4818 = vmatmul.mubr.bf16.gmra.mrb[16].mxu1 %v3219_v47 }
 0x24c   :  { %3865 = vmatprep.mubr.bf16.mxu0 %v3224_v24  ;;  %4827 = vmatprep.mubr.bf16.mxu1 %v3224_v24 }
 0x24d   :  { %v1542_v19 = vpop.f32.mrb[168].mxu0  ;;  %v2135_v44 = vpop.f32.mrb[168].mxu1 }
 0x24e   :  { %v1543_v23 = vadd.f32 %v1542_v19, %v19785_v32  ;;  %v1544_v48 = vpop.f32.mrb[169].mxu0  ;;  %v2136_v6 = vadd.f32 %v2135_v44, %v19793_v34  ;;  %v2137_v52 = vpop.f32.mrb[169].mxu1 }
 0x24f   :  { %v1545_v13 = vadd.f32 %v1544_v48, %v19789_v33  ;;  %v1546_v22 = vpop.f32.mrb[170].mxu0  ;;  %v2138_v0 = vadd.f32 %v2137_v52, %v19797_v35  ;;  %v2139_v53 = vpop.f32.mrb[170].mxu1  ;;  %v2607_v48 = vmax.f32 %v21255_v5, 0.0 }
 0x250   :  { %v2610_v28 = vmax.f32 %v1543_v23, 0.0  ;;  %v2612_v1 = vmax.f32 %v2136_v6, 0.0  ;;  %v1547_v56 = vadd.f32 %v1546_v22, %v19785_v32  ;;  %v1548_v37 = vpop.f32.mrb[171].mxu0  ;;  %v2140_v57 = vadd.f32 %v2139_v53, %v19793_v34  ;;  %v2141_v49 = vpop.f32.mrb[171].mxu1 }
 0x251   :  { %v2611_v43 = vmax.f32 %v1545_v13, 0.0  ;;  %v2613_v31 = vmax.f32 %v2138_v0, 0.0  ;;  %v1549_v47 = vadd.f32 %v1548_v37, %v19789_v33  ;;  %v2142_v8 = vadd.f32 %v2141_v49, %v19797_v35 }
 0x252   :  { %v3043_v17 = vmax.f32 %v2594_v30, %v2610_v28  ;;  %v3045_v54 = vmax.f32 %v2596_v63, %v2612_v1  ;;  %v2614_v10 = vmax.f32 %v1547_v56, 0.0  ;;  %v2616_v24 = vmax.f32 %v2140_v57, 0.0 }
 0x253   :  { %3866 = vmatmul.mubr.bf16.gmra.mrb[20].mxu0 %v3223_v41  ;;  %4828 = vmatmul.mubr.bf16.gmra.mrb[20].mxu1 %v3223_v41  ;;  %v3044_v2 = vmax.f32 %v2595_v40, %v2611_v43  ;;  %v3046_v19 = vmax.f32 %v2597_v4, %v2613_v31  ;;  %v2615_v44 = vmax.f32 %v1549_v47, 0.0  ;;  %v2617_v23 = vmax.f32 %v2142_v8, 0.0  ;;  %v3232_v47 = vld [vmem:[#allocation2 + $0x1e8] sm:$0xff] }
 0x254   :  { %3875 = vmatprep.mubr.bf16.mxu0 %v3228_v14  ;;  %4837 = vmatprep.mubr.bf16.mxu1 %v3228_v14  ;;  %v2608_v6 = vmax.f32 %v21252_v3, 0.0  ;;  %v3047_v52 = vmax.f32 %v2598_v50, %v2614_v10  ;;  %v3049_v13 = vmax.f32 %v2600_v25, %v2616_v24  ;;  %v2609_v22 = vmax.f32 %v21262_v7, 0.0  ;;  %v3227_v7 = vld [vmem:[#allocation2 + $0x1c0] sm:$0xff] }
 0x255   :  { %v3048_v30 = vmax.f32 %v2599_v58, %v2615_v44  ;;  %v3050_v63 = vmax.f32 %v2601_v61, %v2617_v23  ;;  %v1552_v0 = vpop.f32.mrb[172].mxu0  ;;  %v2145_v53 = vpop.f32.mrb[172].mxu1 }
 0x256   :  { %v21273_v28 = vpack.c.bf16 %v3047_v52, %v3043_v17  ;;  %v3061_v40 = vpack.c.bf16 %v3049_v13, %v3045_v54  ;;  %v1553_v4 = vadd.f32 %v1552_v0, %v19785_v32  ;;  %v1554_v41 = vpop.f32.mrb[173].mxu0  ;;  %v2146_v1 = vadd.f32 %v2145_v53, %v19793_v34  ;;  %v2147_v56 = vpop.f32.mrb[173].mxu1 }
 0x257   :  { %v21277_v5 = vpack.c.bf16 %v3048_v30, %v3044_v2  ;;  %v3062_v3 = vpack.c.bf16 %v3050_v63, %v3046_v19  ;;  %v1555_v50 = vadd.f32 %v1554_v41, %v19789_v33  ;;  %v1556_v25 = vpop.f32.mrb[174].mxu0  ;;  %v2148_v58 = vadd.f32 %v2147_v56, %v19797_v35  ;;  %v2149_v61 = vpop.f32.mrb[174].mxu1  ;;  %v3231_v56 = vld [vmem:[#allocation2 + $0x1e0] sm:$0xff] }
 0x258   :  { %3069 = vst [vmem:[#allocation2 + $0x290] sm:$0xff] %v3061_v40  ;;  %v2618_v37 = vmax.f32 %v1553_v4, 0.0  ;;  %v2620_v57 = vmax.f32 %v2146_v1, 0.0  ;;  %v1557_v49 = vadd.f32 %v1556_v25, %v19785_v32  ;;  %v1558_v14 = vpop.f32.mrb[175].mxu0  ;;  %v2150_v43 = vadd.f32 %v2149_v61, %v19793_v34  ;;  %v2151_v31 = vpop.f32.mrb[175].mxu1 }
 0x259   :  { %3070 = vst.msk [vmem:[#allocation2 + $0x298] sm:$0xff] %vm2749_vm1, %v3062_v3  ;;  %v2619_v8 = vmax.f32 %v1555_v50, 0.0  ;;  %v2621_v17 = vmax.f32 %v2148_v58, 0.0  ;;  %v1559_v54 = vadd.f32 %v1558_v14, %v19789_v33  ;;  %v2152_v10 = vadd.f32 %v2151_v31, %v19797_v35 }
 0x25a   :  { %v3051_v24 = vmax.f32 %v2602_v42, %v2618_v37  ;;  %v3053_v2 = vmax.f32 %v2604_v29, %v2620_v57  ;;  %v2622_v19 = vmax.f32 %v1557_v49, 0.0  ;;  %v2624_v44 = vmax.f32 %v2150_v43, 0.0 }
 0x25b   :  { %3876 = vmatmul.mubr.bf16.gmra.mrb[24].mxu0 %v3227_v7  ;;  %4838 = vmatmul.mubr.bf16.gmra.mrb[24].mxu1 %v3227_v7  ;;  %v3052_v23 = vmax.f32 %v2603_v15, %v2619_v8  ;;  %v3054_v52 = vmax.f32 %v2605_v60, %v2621_v17  ;;  %v2623_v13 = vmax.f32 %v1559_v54, 0.0  ;;  %v2625_v30 = vmax.f32 %v2152_v10, 0.0 }
 0x25c   :  { %3885 = vmatprep.mubr.bf16.mxu0 %v3232_v47  ;;  %4847 = vmatprep.mubr.bf16.mxu1 %v3232_v47  ;;  %v3055_v9 = vmax.f32 %v2606_v46, %v2622_v19  ;;  %v3057_v42 = vmax.f32 %v2608_v6, %v2624_v44 }
 0x25d   :  { %v3056_v51 = vmax.f32 %v2607_v48, %v2623_v13  ;;  %v3058_v29 = vmax.f32 %v2609_v22, %v2625_v30  ;;  %v1562_v63 = vpop.f32.mrb[176].mxu0  ;;  %v2155_v0 = vpop.f32.mrb[176].mxu1 }
 0x25e   :  { %v21296_v53 = vpack.c.bf16 %v3055_v9, %v3051_v24  ;;  %v3065_v40 = vpack.c.bf16 %v3057_v42, %v3053_v2  ;;  %v1564_v36 = vpop.f32.mrb[177].mxu0  ;;  %v2157_v15 = vpop.f32.mrb[177].mxu1  ;;  %v1563_v46 = vadd.f32 %v1562_v63, %v19785_v32  ;;  %v2156_v50 = vadd.f32 %v2155_v0, %v19793_v34 }
 0x25f   :  { %v21298_v4 = vpack.c.bf16 %v3056_v51, %v3052_v23  ;;  %v3066_v12 = vpack.c.bf16 %v3058_v29, %v3054_v52  ;;  %v1566_v60 = vpop.f32.mrb[178].mxu0  ;;  %v2159_v41 = vpop.f32.mrb[178].mxu1  ;;  %v21305_v22 = vadd.f32 %v1564_v36, %v19789_v33  ;;  %v21309_v25 = vadd.f32 %v2157_v15, %v19797_v35 }
 0x260   :  { %3073 = vst [vmem:[#allocation2 + $0x2b0] sm:$0xff] %v3065_v40  ;;  %v1568_v1 = vpop.f32.mrb[179].mxu0  ;;  %v2161_v11 = vpop.f32.mrb[179].mxu1  ;;  %v21312_v61 = vadd.f32 %v1566_v60, %v19785_v32  ;;  %v21318_v37 = vadd.f32 %v2159_v41, %v19793_v34  ;;  %v2626_v8 = vmax.f32 %v1563_v46, 0.0  ;;  %v2628_v10 = vmax.f32 %v2156_v50, 0.0 }
 0x261   :  { %3074 = vst.msk [vmem:[#allocation2 + $0x2b8] sm:$0xff] %vm2749_vm1, %v3066_v12  ;;  %v21315_v7 = vadd.f32 %v1568_v1, %v19789_v33  ;;  %v21324_v43 = vadd.f32 %v2161_v11, %v19797_v35  ;;  %v2627_v54 = vmax.f32 %v21305_v22, 0.0  ;;  %v2629_v24 = vmax.f32 %v21309_v25, 0.0 }
 0x262   :  { %v2630_v19 = vmax.f32 %v21312_v61, 0.0  ;;  %v2632_v52 = vmax.f32 %v21318_v37, 0.0 }
 0x263   :  { %3886 = vmatmul.mubr.bf16.gmra.mrb[28].mxu0 %v3231_v56  ;;  %4848 = vmatmul.mubr.bf16.gmra.mrb[28].mxu1 %v3231_v56  ;;  %v2631_v44 = vmax.f32 %v21315_v7, 0.0 }
 0x264   :  { %3895 = vmatprep.mubr.bf16.mxu0 %v21038_v55  ;;  %4857 = vmatprep.mubr.bf16.mxu1 %v21038_v55 }
 0x265   :  { %v1572_v48 = vpop.f32.mrb[180].mxu0  ;;  %v2165_v6 = vpop.f32.mrb[180].mxu1 }
 0x266   :  { %v1574_v3 = vpop.f32.mrb[181].mxu0  ;;  %v2167_v58 = vpop.f32.mrb[181].mxu1  ;;  %v21321_v49 = vadd.f32 %v1572_v48, %v19785_v32  ;;  %v21327_v31 = vadd.f32 %v2165_v6, %v19793_v34 }
 0x267   :  { %v1576_v55 = vpop.f32.mrb[182].mxu0  ;;  %v2169_v57 = vpop.f32.mrb[182].mxu1  ;;  %v21330_v17 = vadd.f32 %v1574_v3, %v19789_v33  ;;  %v21337_v2 = vadd.f32 %v2167_v58, %v19797_v35 }
 0x268   :  { %v1578_v14 = vpop.f32.mrb[183].mxu0  ;;  %v2171_v47 = vpop.f32.mrb[183].mxu1  ;;  %v21342_v23 = vadd.f32 %v1576_v55, %v19785_v32  ;;  %v2634_v13 = vmax.f32 %v21321_v49, 0.0  ;;  %v2636_v30 = vmax.f32 %v21327_v31, 0.0  ;;  %v21352_v42 = vadd.f32 %v2169_v57, %v19793_v34 }
 0x269   :  { %v2635_v9 = vmax.f32 %v21330_v17, 0.0  ;;  %v21355_v63 = vadd.f32 %v1578_v14, %v19789_v33  ;;  %v2637_v0 = vmax.f32 %v21337_v2, 0.0  ;;  %v21362_v60 = vadd.f32 %v2171_v47, %v19797_v35 }
 0x26a   :  { %v2638_v12 = vmax.f32 %v21342_v23, 0.0 }
 0x26b   :  { %3896 = vmatmul.mubr.bf16.gmra.mrb[32].mxu0 %v21034_v38  ;;  %4858 = vmatmul.mubr.bf16.gmra.mrb[32].mxu1 %v21034_v38  ;;  %v2633_v38 = vmax.f32 %v21324_v43, 0.0  ;;  %v19187_v43 = vld [vmem:[#allocation2 + $0x220] sm:$0xff] }
 0x26c   :  { %3905 = vmatprep.mubr.bf16.mxu0 %v21061_v45  ;;  %4867 = vmatprep.mubr.bf16.mxu1 %v21061_v45 }
 0x26d   :  { %v1582_v51 = vpop.f32.mrb[184].mxu0  ;;  %v2175_v29 = vpop.f32.mrb[184].mxu1 }
 0x26e   :  { %v1583_v45 = vadd.f32 %v1582_v51, %v19785_v32  ;;  %v1584_v40 = vpop.f32.mrb[185].mxu0  ;;  %v2176_v36 = vadd.f32 %v2175_v29, %v19793_v34  ;;  %v2177_v15 = vpop.f32.mrb[185].mxu1 }
 0x26f   :  { %v1585_v41 = vadd.f32 %v1584_v40, %v19789_v33  ;;  %v1586_v1 = vpop.f32.mrb[186].mxu0  ;;  %v2178_v56 = vadd.f32 %v2177_v15, %v19797_v35  ;;  %v2179_v11 = vpop.f32.mrb[186].mxu1  ;;  %v2639_v40 = vmax.f32 %v21355_v63, 0.0 }
 0x270   :  { %v2642_v46 = vmax.f32 %v1583_v45, 0.0  ;;  %v2644_v48 = vmax.f32 %v2176_v36, 0.0  ;;  %v1587_v6 = vadd.f32 %v1586_v1, %v19785_v32  ;;  %v1588_v22 = vpop.f32.mrb[187].mxu0  ;;  %v2180_v3 = vadd.f32 %v2179_v11, %v19793_v34  ;;  %v2181_v50 = vpop.f32.mrb[187].mxu1 }
 0x271   :  { %v2643_v25 = vmax.f32 %v1585_v41, 0.0  ;;  %v2645_v58 = vmax.f32 %v2178_v56, 0.0  ;;  %v1589_v61 = vadd.f32 %v1588_v22, %v19789_v33  ;;  %v2182_v7 = vadd.f32 %v2181_v50, %v19797_v35 }
 0x272   :  { %v3075_v55 = vmax.f32 %v2626_v8, %v2642_v46  ;;  %v3077_v37 = vmax.f32 %v2628_v10, %v2644_v48  ;;  %v2646_v57 = vmax.f32 %v1587_v6, 0.0  ;;  %v2648_v14 = vmax.f32 %v2180_v3, 0.0 }
 0x273   :  { %3906 = vmatmul.mubr.bf16.gmra.mrb[36].mxu0 %v19187_v43  ;;  %4868 = vmatmul.mubr.bf16.gmra.mrb[36].mxu1 %v19187_v43  ;;  %v3076_v47 = vmax.f32 %v2627_v54, %v2643_v25  ;;  %v3078_v51 = vmax.f32 %v2629_v24, %v2645_v58  ;;  %v2647_v29 = vmax.f32 %v1589_v61, 0.0  ;;  %v2649_v45 = vmax.f32 %v2182_v7, 0.0 }
 0x274   :  { %3915 = vmatprep.mubr.bf16.mxu0 %v21158_v39  ;;  %4877 = vmatprep.mubr.bf16.mxu1 %v21158_v39  ;;  %v2640_v36 = vmax.f32 %v21352_v42, 0.0  ;;  %v3079_v15 = vmax.f32 %v2630_v19, %v2646_v57  ;;  %v3081_v8 = vmax.f32 %v2632_v52, %v2648_v14  ;;  %v2641_v10 = vmax.f32 %v21362_v60, 0.0 }
 0x275   :  { %v3080_v41 = vmax.f32 %v2631_v44, %v2647_v29  ;;  %v3082_v1 = vmax.f32 %v2633_v38, %v2649_v45  ;;  %v1592_v56 = vpop.f32.mrb[188].mxu0  ;;  %v2185_v11 = vpop.f32.mrb[188].mxu1 }
 0x276   :  { %v21375_v54 = vpack.c.bf16 %v3079_v15, %v3075_v55  ;;  %v3093_v24 = vpack.c.bf16 %v3081_v8, %v3077_v37  ;;  %v1593_v46 = vadd.f32 %v1592_v56, %v19785_v32  ;;  %v1594_v48 = vpop.f32.mrb[189].mxu0  ;;  %v2186_v39 = vadd.f32 %v2185_v11, %v19793_v34  ;;  %v2187_v6 = vpop.f32.mrb[189].mxu1 }
 0x277   :  { %v21379_v63 = vpack.c.bf16 %v3080_v41, %v3076_v47  ;;  %v3094_v42 = vpack.c.bf16 %v3082_v1, %v3078_v51  ;;  %v1595_v19 = vadd.f32 %v1594_v48, %v19789_v33  ;;  %v1596_v52 = vpop.f32.mrb[190].mxu0  ;;  %v2188_v44 = vadd.f32 %v2187_v6, %v19797_v35  ;;  %v2189_v38 = vpop.f32.mrb[190].mxu1 }
 0x278   :  { %3101 = vst [vmem:[#allocation2 + $0x2d0] sm:$0xff] %v3093_v24  ;;  %v2650_v60 = vmax.f32 %v1593_v46, 0.0  ;;  %v2652_v22 = vmax.f32 %v2186_v39, 0.0  ;;  %v1597_v3 = vadd.f32 %v1596_v52, %v19785_v32  ;;  %v1598_v50 = vpop.f32.mrb[191].mxu0  ;;  %v2190_v25 = vadd.f32 %v2189_v38, %v19793_v34  ;;  %v2191_v58 = vpop.f32.mrb[191].mxu1 }
 0x279   :  { %3102 = vst.msk [vmem:[#allocation2 + $0x2d8] sm:$0xff] %vm2749_vm1, %v3094_v42  ;;  %v2651_v61 = vmax.f32 %v1595_v19, 0.0  ;;  %v2653_v7 = vmax.f32 %v2188_v44, 0.0  ;;  %v1599_v55 = vadd.f32 %v1598_v50, %v19789_v33  ;;  %v2192_v37 = vadd.f32 %v2191_v58, %v19797_v35 }
 0x27a   :  { %v3083_v57 = vmax.f32 %v2634_v13, %v2650_v60  ;;  %v3085_v14 = vmax.f32 %v2636_v30, %v2652_v22  ;;  %v2654_v43 = vmax.f32 %v1597_v3, 0.0  ;;  %v2656_v47 = vmax.f32 %v2190_v25, 0.0 }
 0x27b   :  { %3916 = vmatmul.mubr.bf16.gmra.mrb[40].mxu0 %v21154_v62  ;;  %4878 = vmatmul.mubr.bf16.gmra.mrb[40].mxu1 %v21154_v62  ;;  %v3084_v51 = vmax.f32 %v2635_v9, %v2651_v61  ;;  %v3086_v29 = vmax.f32 %v2637_v0, %v2653_v7  ;;  %v2655_v45 = vmax.f32 %v1599_v55, 0.0  ;;  %v2657_v15 = vmax.f32 %v2192_v37, 0.0 }
 0x27c   :  { %3925 = vmatprep.mubr.bf16.mxu0 %v21177_v59  ;;  %4887 = vmatprep.mubr.bf16.mxu1 %v21177_v59  ;;  %v3087_v49 = vmax.f32 %v2638_v12, %v2654_v43  ;;  %v3089_v31 = vmax.f32 %v2640_v36, %v2656_v47 }
 0x27d   :  { %v3088_v13 = vmax.f32 %v2639_v40, %v2655_v45  ;;  %v3090_v30 = vmax.f32 %v2641_v10, %v2657_v15  ;;  %v1602_v8 = vpop.f32.mrb[192].mxu0  ;;  %v2195_v62 = vpop.f32.mrb[192].mxu1 }
 0x27e   :  { %v21402_v41 = vpack.c.bf16 %v3087_v49, %v3083_v57  ;;  %v3097_v17 = vpack.c.bf16 %v3089_v31, %v3085_v14  ;;  %v1604_v9 = vpop.f32.mrb[193].mxu0  ;;  %v2197_v2 = vpop.f32.mrb[193].mxu1  ;;  %v1603_v23 = vadd.f32 %v1602_v8, %v19785_v32  ;;  %v2196_v46 = vadd.f32 %v2195_v62, %v19793_v34 }
 0x27f   :  { %v21404_v0 = vpack.c.bf16 %v3088_v13, %v3084_v51  ;;  %v3098_v1 = vpack.c.bf16 %v3090_v30, %v3086_v29  ;;  %v1606_v56 = vpop.f32.mrb[194].mxu0  ;;  %v2199_v11 = vpop.f32.mrb[194].mxu1  ;;  %v21413_v36 = vadd.f32 %v1604_v9, %v19789_v33  ;;  %v21417_v48 = vadd.f32 %v2197_v2, %v19797_v35 }
 0x280   :  { %3105 = vst [vmem:[#allocation2 + $0x2f0] sm:$0xff] %v3097_v17  ;;  %v1608_v59 = vpop.f32.mrb[195].mxu0  ;;  %v2201_v24 = vpop.f32.mrb[195].mxu1  ;;  %v21426_v42 = vadd.f32 %v2199_v11, %v19793_v34  ;;  %v2658_v3 = vmax.f32 %v1603_v23, 0.0  ;;  %v2660_v58 = vmax.f32 %v2196_v46, 0.0 }
 0x281   :  { %3106 = vst.msk [vmem:[#allocation2 + $0x2f8] sm:$0xff] %vm2749_vm1, %v3098_v1  ;;  %v21423_v6 = vadd.f32 %v1608_v59, %v19789_v33  ;;  %v21432_v38 = vadd.f32 %v2201_v24, %v19797_v35  ;;  %v2659_v25 = vmax.f32 %v21413_v36, 0.0  ;;  %v2661_v61 = vmax.f32 %v21417_v48, 0.0 }
 0x282   :  { %v2664_v14 = vmax.f32 %v21426_v42, 0.0 }
 0x283   :  { %3926 = vmatmul.mubr.bf16.gmra.mrb[44].mxu0 %v21175_v18  ;;  %4888 = vmatmul.mubr.bf16.gmra.mrb[44].mxu1 %v21175_v18  ;;  %v21420_v18 = vadd.f32 %v1606_v56, %v19785_v32  ;;  %v2663_v37 = vmax.f32 %v21423_v6, 0.0 }
 0x284   :  { %3935 = vmatprep.mubr.bf16.mxu0 %v21277_v5  ;;  %4897 = vmatprep.mubr.bf16.mxu1 %v21277_v5 }
 0x285   :  { %v1612_v12 = vpop.f32.mrb[196].mxu0  ;;  %v2205_v40 = vpop.f32.mrb[196].mxu1  ;;  %v2662_v55 = vmax.f32 %v21420_v18, 0.0 }
 0x286   :  { %v1614_v10 = vpop.f32.mrb[197].mxu0  ;;  %v2207_v39 = vpop.f32.mrb[197].mxu1  ;;  %v21429_v52 = vadd.f32 %v1612_v12, %v19785_v32  ;;  %v21435_v60 = vadd.f32 %v2205_v40, %v19793_v34 }
 0x287   :  { %v1616_v5 = vpop.f32.mrb[198].mxu0  ;;  %v2209_v19 = vpop.f32.mrb[198].mxu1  ;;  %v21438_v50 = vadd.f32 %v1614_v10, %v19789_v33  ;;  %v21445_v7 = vadd.f32 %v2207_v39, %v19797_v35 }
 0x288   :  { %v1618_v44 = vpop.f32.mrb[199].mxu0  ;;  %v2211_v22 = vpop.f32.mrb[199].mxu1  ;;  %v21450_v57 = vadd.f32 %v1616_v5, %v19785_v32  ;;  %v2666_v43 = vmax.f32 %v21429_v52, 0.0  ;;  %v2668_v47 = vmax.f32 %v21435_v60, 0.0  ;;  %v21460_v29 = vadd.f32 %v2209_v19, %v19793_v34 }
 0x289   :  { %v2667_v51 = vmax.f32 %v21438_v50, 0.0  ;;  %v21463_v49 = vadd.f32 %v1618_v44, %v19789_v33  ;;  %v2669_v31 = vmax.f32 %v21445_v7, 0.0  ;;  %v21470_v17 = vadd.f32 %v2211_v22, %v19797_v35 }
 0x28a   :  { %v2670_v62 = vmax.f32 %v21450_v57, 0.0 }
 0x28b   :  { %3936 = vmatmul.mubr.bf16.gmra.mrb[48].mxu0 %v21273_v28  ;;  %4898 = vmatmul.mubr.bf16.gmra.mrb[48].mxu1 %v21273_v28  ;;  %v2665_v28 = vmax.f32 %v21432_v38, 0.0  ;;  %v2671_v22 = vmax.f32 %v21463_v49, 0.0 }
 0x28c   :  { %3945 = vmatprep.mubr.bf16.mxu0 %v21298_v4  ;;  %4907 = vmatprep.mubr.bf16.mxu1 %v21298_v4 }
 0x28d   :  { %v1622_v45 = vpop.f32.mrb[200].mxu0  ;;  %v2215_v15 = vpop.f32.mrb[200].mxu1 }
 0x28e   :  { %v1623_v4 = vadd.f32 %v1622_v45, %v19785_v32  ;;  %v1624_v13 = vpop.f32.mrb[201].mxu0  ;;  %v2216_v30 = vadd.f32 %v2215_v15, %v19793_v34  ;;  %v2217_v8 = vpop.f32.mrb[201].mxu1  ;;  %v2672_v45 = vmax.f32 %v21460_v29, 0.0  ;;  %v2673_v15 = vmax.f32 %v21470_v17, 0.0 }
 0x28f   :  { %v1625_v9 = vadd.f32 %v1624_v13, %v19789_v33  ;;  %v1626_v2 = vpop.f32.mrb[202].mxu0  ;;  %v2218_v1 = vadd.f32 %v2217_v8, %v19797_v35  ;;  %v2219_v56 = vpop.f32.mrb[202].mxu1 }
 0x290   :  { %v2674_v11 = vmax.f32 %v1623_v4, 0.0  ;;  %v2676_v59 = vmax.f32 %v2216_v30, 0.0  ;;  %v1627_v24 = vadd.f32 %v1626_v2, %v19785_v32  ;;  %v1628_v23 = vpop.f32.mrb[203].mxu0  ;;  %v2220_v12 = vadd.f32 %v2219_v56, %v19793_v34  ;;  %v2221_v40 = vpop.f32.mrb[203].mxu1 }
 0x291   :  { %v2675_v36 = vmax.f32 %v1625_v9, 0.0  ;;  %v2677_v10 = vmax.f32 %v2218_v1, 0.0  ;;  %v1629_v46 = vadd.f32 %v1628_v23, %v19789_v33  ;;  %v2222_v48 = vadd.f32 %v2221_v40, %v19797_v35 }
 0x292   :  { %v3107_v39 = vmax.f32 %v2658_v3, %v2674_v11  ;;  %v3109_v18 = vmax.f32 %v2660_v58, %v2676_v59  ;;  %v2678_v6 = vmax.f32 %v1627_v24, 0.0  ;;  %v2680_v5 = vmax.f32 %v2220_v12, 0.0 }
 0x293   :  { %3946 = vmatmul.mubr.bf16.gmra.mrb[52].mxu0 %v21296_v53  ;;  %4908 = vmatmul.mubr.bf16.gmra.mrb[52].mxu1 %v21296_v53  ;;  %v3108_v42 = vmax.f32 %v2659_v25, %v2675_v36  ;;  %v3110_v19 = vmax.f32 %v2661_v61, %v2677_v10  ;;  %v2679_v44 = vmax.f32 %v1629_v46, 0.0  ;;  %v2681_v38 = vmax.f32 %v2222_v48, 0.0 }
 0x294   :  { %3955 = vmatprep.mubr.bf16.mxu0 %v21379_v63  ;;  %4917 = vmatprep.mubr.bf16.mxu1 %v21379_v63  ;;  %v3111_v3 = vmax.f32 %v2662_v55, %v2678_v6  ;;  %v3113_v58 = vmax.f32 %v2664_v14, %v2680_v5 }
 0x295   :  { %v3112_v4 = vmax.f32 %v2663_v37, %v2679_v44  ;;  %v3114_v13 = vmax.f32 %v2665_v28, %v2681_v38  ;;  %v1632_v30 = vpop.f32.mrb[204].mxu0  ;;  %v2225_v53 = vpop.f32.mrb[204].mxu1 }
 0x296   :  { %v21485_v25 = vpack.c.bf16 %v3111_v3, %v3107_v39  ;;  %v3125_v61 = vpack.c.bf16 %v3113_v58, %v3109_v18  ;;  %v1633_v8 = vadd.f32 %v1632_v30, %v19785_v32  ;;  %v1634_v9 = vpop.f32.mrb[205].mxu0  ;;  %v2226_v63 = vadd.f32 %v2225_v53, %v19793_v34  ;;  %v2227_v2 = vpop.f32.mrb[205].mxu1 }
 0x297   :  { %v3124_v49 = vpack.c.bf16 %v3112_v4, %v3108_v42  ;;  %v3126_v1 = vpack.c.bf16 %v3114_v13, %v3110_v19  ;;  %v1635_v55 = vadd.f32 %v1634_v9, %v19789_v33  ;;  %v1636_v14 = vpop.f32.mrb[206].mxu0  ;;  %v2228_v29 = vadd.f32 %v2227_v2, %v19797_v35  ;;  %v2229_v37 = vpop.f32.mrb[206].mxu1 }
 0x298   :  { %3133 = vst [vmem:[#allocation2 + $0x310] sm:$0xff] %v3125_v61  ;;  %v2682_v28 = vmax.f32 %v1633_v8, 0.0  ;;  %v2684_v17 = vmax.f32 %v2226_v63, 0.0  ;;  %v1637_v56 = vadd.f32 %v1636_v14, %v19785_v32  ;;  %v1638_v11 = vpop.f32.mrb[207].mxu0  ;;  %v2230_v59 = vadd.f32 %v2229_v37, %v19793_v34  ;;  %v2231_v24 = vpop.f32.mrb[207].mxu1 }
 0x299   :  { %3134 = vst.msk [vmem:[#allocation2 + $0x318] sm:$0xff] %vm2749_vm1, %v3126_v1  ;;  %v2683_v23 = vmax.f32 %v1635_v55, 0.0  ;;  %v2685_v12 = vmax.f32 %v2228_v29, 0.0  ;;  %v1639_v40 = vadd.f32 %v1638_v11, %v19789_v33  ;;  %v2232_v36 = vadd.f32 %v2231_v24, %v19797_v35 }
 0x29a   :  { %v3115_v10 = vmax.f32 %v2666_v43, %v2682_v28  ;;  %v3117_v46 = vmax.f32 %v2668_v47, %v2684_v17  ;;  %v2686_v48 = vmax.f32 %v1637_v56, 0.0  ;;  %v2688_v39 = vmax.f32 %v2230_v59, 0.0 }
 0x29b   :  { %3956 = vmatmul.mubr.bf16.gmra.mrb[56].mxu0 %v21375_v54  ;;  %4918 = vmatmul.mubr.bf16.gmra.mrb[56].mxu1 %v21375_v54  ;;  %v3116_v18 = vmax.f32 %v2667_v51, %v2683_v23  ;;  %v3118_v6 = vmax.f32 %v2669_v31, %v2685_v12  ;;  %v2687_v5 = vmax.f32 %v1639_v40, 0.0  ;;  %v2689_v42 = vmax.f32 %v2232_v36, 0.0 }
 0x29c   :  { %3965 = vmatprep.mubr.bf16.mxu0 %v21404_v0  ;;  %4927 = vmatprep.mubr.bf16.mxu1 %v21404_v0  ;;  %v3119_v52 = vmax.f32 %v2670_v62, %v2686_v48  ;;  %v3121_v60 = vmax.f32 %v2672_v45, %v2688_v39 }
 0x29d   :  { %v3120_v43 = vmax.f32 %v2671_v22, %v2687_v5  ;;  %v3122_v47 = vmax.f32 %v2673_v15, %v2689_v42  ;;  %v1642_v19 = vpop.f32.mrb[208].mxu0  ;;  %v2235_v54 = vpop.f32.mrb[208].mxu1 }
 0x29e   :  { %v21510_v44 = vpack.c.bf16 %v3119_v52, %v3115_v10  ;;  %v21512_v50 = vpack.c.bf16 %v3121_v60, %v3117_v46  ;;  %v1644_v7 = vpop.f32.mrb[209].mxu0  ;;  %v2237_v51 = vpop.f32.mrb[209].mxu1  ;;  %v1643_v22 = vadd.f32 %v1642_v19, %v19785_v32  ;;  %v2236_v13 = vadd.f32 %v2235_v54, %v19793_v34 }
 0x29f   :  { %v3128_v31 = vpack.c.bf16 %v3120_v43, %v3116_v18  ;;  %v3130_v38 = vpack.c.bf16 %v3122_v47, %v3118_v6  ;;  %v1646_v3 = vpop.f32.mrb[210].mxu0  ;;  %v2239_v58 = vpop.f32.mrb[210].mxu1  ;;  %v21519_v45 = vadd.f32 %v1644_v7, %v19789_v33  ;;  %v2238_v8 = vadd.f32 %v2237_v51, %v19797_v35 }
 0x2a0   :  { %v1648_v4 = vpop.f32.mrb[211].mxu0  ;;  %v2241_v0 = vpop.f32.mrb[211].mxu1  ;;  %v21523_v53 = vadd.f32 %v1646_v3, %v19785_v32  ;;  %v2690_v29 = vmax.f32 %v1643_v22, 0.0  ;;  %v2692_v17 = vmax.f32 %v2236_v13, 0.0 }
 0x2a1   :  { %3138 = vst.msk [vmem:[#allocation2 + $0x338] sm:$0xff] %vm2749_vm1, %v3130_v38  ;;  %v21530_v63 = vadd.f32 %v1648_v4, %v19789_v33  ;;  %v21536_v1 = vadd.f32 %v2241_v0, %v19797_v35  ;;  %v2691_v37 = vmax.f32 %v21519_v45, 0.0  ;;  %v2693_v11 = vmax.f32 %v2238_v8, 0.0 }
 0x2a2   :  { %v2694_v56 = vmax.f32 %v21523_v53, 0.0 }
 0x2a3   :  { %3966 = vmatmul.mubr.bf16.gmra.mrb[60].mxu0 %v21402_v41  ;;  %4928 = vmatmul.mubr.bf16.gmra.mrb[60].mxu1 %v21402_v41  ;;  %v21527_v41 = vadd.f32 %v2239_v58, %v19793_v34  ;;  %v2695_v23 = vmax.f32 %v21530_v63, 0.0  ;;  %v2697_v40 = vmax.f32 %v21536_v1, 0.0 }
 0x2a4   :  { %3975 = vmatprep.mubr.bf16.mxu0 %v3124_v49  ;;  %4937 = vmatprep.mubr.bf16.mxu1 %v3124_v49 }
 0x2a5   :  { %v1652_v57 = vpop.f32.mrb[212].mxu0  ;;  %v2245_v62 = vpop.f32.mrb[212].mxu1  ;;  %v2696_v59 = vmax.f32 %v21527_v41, 0.0 }
 0x2a6   :  { %v1654_v15 = vpop.f32.mrb[213].mxu0  ;;  %v2247_v30 = vpop.f32.mrb[213].mxu1  ;;  %v21533_v2 = vadd.f32 %v1652_v57, %v19785_v32  ;;  %v21539_v14 = vadd.f32 %v2245_v62, %v19793_v34 }
 0x2a7   :  { %v1656_v61 = vpop.f32.mrb[214].mxu0  ;;  %v2249_v9 = vpop.f32.mrb[214].mxu1  ;;  %v21543_v28 = vadd.f32 %v1654_v15, %v19789_v33  ;;  %v21550_v24 = vadd.f32 %v2247_v30, %v19797_v35 }
 0x2a8   :  { %v1658_v49 = vpop.f32.mrb[215].mxu0  ;;  %v2251_v55 = vpop.f32.mrb[215].mxu1  ;;  %v2698_v12 = vmax.f32 %v21533_v2, 0.0  ;;  %v21556_v36 = vadd.f32 %v1656_v61, %v19785_v32  ;;  %v21560_v10 = vadd.f32 %v2249_v9, %v19793_v34 }
 0x2a9   :  { %v2699_v39 = vmax.f32 %v21543_v28, 0.0  ;;  %v21564_v18 = vadd.f32 %v1658_v49, %v19789_v33  ;;  %v2701_v60 = vmax.f32 %v21550_v24, 0.0  ;;  %v21570_v43 = vadd.f32 %v2251_v55, %v19797_v35  ;;  %v18527_v55 = vld [vmem:[%s24994_s3 + $0x1cc] ss:$16 sps:$4 sm:$0xff]   ;;  %v18501_v24 = vld [vmem:[%s24994_s3 + $0x1c0] ss:$16 sps:$4 sm:$0xff]  }
 0x2aa   :  { %v2702_v9 = vmax.f32 %v21556_v36, 0.0  ;;  %v2704_v63 = vmax.f32 %v21560_v10, 0.0  ;;  %6382 = vmatprep.subr.bf16.mxu1 %v18527_v55  ;;  %v3174_v28 = vld [vmem:[#allocation2 + $0x18] sm:$0xff] }
 0x2ab   :  { %3976 = vmatmul.mubr.bf16.gmra.mrb[64].mxu0 %v21485_v25  ;;  %4938 = vmatmul.mubr.bf16.gmra.mrb[64].mxu1 %v21485_v25  ;;  %v2700_v25 = vmax.f32 %v21539_v14, 0.0  ;;  %v3182_v55 = vld [vmem:[#allocation2 + $0x58] sm:$0xff] }
 0x2ac   :  { %3985 = vmatprep.mubr.bf16.mxu0 %v3128_v31  ;;  %4947 = vmatprep.mubr.bf16.mxu1 %v3128_v31 }
 0x2ad   :  { %v1662_v46 = vpop.f32.mrb[216].mxu0  ;;  %v2255_v48 = vpop.f32.mrb[216].mxu1 }
 0x2ae   :  { %v1663_v6 = vadd.f32 %v1662_v46, %v19785_v32  ;;  %v1664_v5 = vpop.f32.mrb[217].mxu0  ;;  %v2256_v42 = vadd.f32 %v2255_v48, %v19793_v34  ;;  %v2257_v52 = vpop.f32.mrb[217].mxu1 }
 0x2af   :  { %v1665_v47 = vadd.f32 %v1664_v5, %v19789_v33  ;;  %v1666_v19 = vpop.f32.mrb[218].mxu0  ;;  %v2258_v54 = vadd.f32 %v2257_v52, %v19797_v35  ;;  %v2259_v7 = vpop.f32.mrb[218].mxu1 }
 0x2b0   :  { %v2706_v51 = vmax.f32 %v1663_v6, 0.0  ;;  %v2708_v31 = vmax.f32 %v2256_v42, 0.0  ;;  %v1667_v38 = vadd.f32 %v1666_v19, %v19785_v32  ;;  %v1668_v3 = vpop.f32.mrb[219].mxu0  ;;  %v2260_v58 = vadd.f32 %v2259_v7, %v19793_v34  ;;  %v2261_v4 = vpop.f32.mrb[219].mxu1 }
 0x2b1   :  { %v2707_v0 = vmax.f32 %v1665_v47, 0.0  ;;  %v2709_v57 = vmax.f32 %v2258_v54, 0.0  ;;  %v1669_v62 = vadd.f32 %v1668_v3, %v19789_v33  ;;  %v2262_v22 = vadd.f32 %v2261_v4, %v19797_v35 }
 0x2b2   :  { %v3139_v45 = vmax.f32 %v2690_v29, %v2706_v51  ;;  %v3141_v15 = vmax.f32 %v2692_v17, %v2708_v31  ;;  %v2710_v13 = vmax.f32 %v1667_v38, 0.0  ;;  %v2712_v30 = vmax.f32 %v2260_v58, 0.0 }
 0x2b3   :  { %3986 = vmatmul.mubr.bf16.gmra.mrb[68].mxu0 %v21510_v44  ;;  %4948 = vmatmul.mubr.bf16.gmra.mrb[68].mxu1 %v21510_v44  ;;  %v3140_v53 = vmax.f32 %v2691_v37, %v2707_v0  ;;  %v3142_v61 = vmax.f32 %v2693_v11, %v2709_v57  ;;  %v2711_v8 = vmax.f32 %v1669_v62, 0.0  ;;  %v2713_v41 = vmax.f32 %v2262_v22, 0.0 }
 0x2b4   :  { %v3143_v49 = vmax.f32 %v2694_v56, %v2710_v13  ;;  %v3145_v1 = vmax.f32 %v2696_v59, %v2712_v30  ;;  %v2703_v29 = vmax.f32 %v21564_v18, 0.0  ;;  %v2705_v17 = vmax.f32 %v21570_v43, 0.0  ;;  %v18525_v30 = vld [vmem:[%s24994_s3 + $0x1c8] ss:$16 sps:$4 sm:$0xff]  }
 0x2b5   :  { %v3144_v46 = vmax.f32 %v2695_v23, %v2711_v8  ;;  %v3146_v44 = vmax.f32 %v2697_v40, %v2713_v41  ;;  %v1672_v37 = vpop.f32.mrb[220].mxu0  ;;  %v2265_v11 = vpop.f32.mrb[220].mxu1  ;;  %v18504_v8 = vld [vmem:[%s24994_s3 + $0x1e0] ss:$16 sps:$4 sm:$0xff]   ;;  %v18509_v41 = vld [vmem:[%s24994_s3 + $0x204] ss:$16 sps:$4 sm:$0xff]  }
 0x2b6   :  { %v3155_v48 = vpack.c.bf16 %v3143_v49, %v3139_v45  ;;  %v21587_v6 = vpack.c.bf16 %v3145_v1, %v3141_v15  ;;  %v1673_v36 = vadd.f32 %v1672_v37, %v19785_v32  ;;  %v1674_v10 = vpop.f32.mrb[221].mxu0  ;;  %v2266_v56 = vadd.f32 %v2265_v11, %v19793_v34  ;;  %v2267_v59 = vpop.f32.mrb[221].mxu1  ;;  %v3177_v49 = vld [vmem:[#allocation2 + $0x30] sm:$0xff] }
 0x2b7   :  { %v3156_v5 = vpack.c.bf16 %v3144_v46, %v3140_v53  ;;  %v3158_v42 = vpack.c.bf16 %v3146_v44, %v3142_v61  ;;  %v1675_v18 = vadd.f32 %v1674_v10, %v19789_v33  ;;  %v1676_v52 = vpop.f32.mrb[222].mxu0  ;;  %v2268_v23 = vadd.f32 %v2267_v59, %v19797_v35  ;;  %v2269_v40 = vpop.f32.mrb[222].mxu1  ;;  %v3178_v53 = vld [vmem:[#allocation2 + $0x38] sm:$0xff]  ;;  %v18512_v1 = vld [vmem:[%s24994_s3 + $0x224] ss:$16 sps:$4 sm:$0xff]  }
 0x2b8   :  { %v2714_v43 = vmax.f32 %v1673_v36, 0.0  ;;  %v2716_v47 = vmax.f32 %v2266_v56, 0.0  ;;  %v1677_v19 = vadd.f32 %v1676_v52, %v19785_v32  ;;  %v1678_v54 = vpop.f32.mrb[223].mxu0  ;;  %v2270_v7 = vadd.f32 %v2269_v40, %v19793_v34  ;;  %v2271_v51 = vpop.f32.mrb[223].mxu1  ;;  %v18533_v61 = vld [vmem:[%s24994_s3 + $0x1ec] ss:$16 sps:$4 sm:$0xff]  }
 0x2b9   :  { %3166 = vst.msk [vmem:[#allocation2 + $0x358] sm:$0xff] %vm2749_vm1, %v3158_v42  ;;  %v2715_v31 = vmax.f32 %v1675_v18, 0.0  ;;  %v2717_v38 = vmax.f32 %v2268_v23, 0.0  ;;  %v1679_v3 = vadd.f32 %v1678_v54, %v19789_v33  ;;  %v2272_v58 = vadd.f32 %v2271_v51, %v19797_v35  ;;  %3995 = vmatprep.mubr.bf16.mxu0 %v3156_v5  ;;  %4957 = vmatprep.mubr.bf16.mxu1 %v3156_v5  ;;  %v18539_v46 = vld [vmem:[%s24994_s3 + $0x20c] ss:$16 sps:$4 sm:$0xff]   ;;  %v3181_v11 = vld [vmem:[#allocation2 + $0x50] sm:$0xff] }
 0x2ba   :  { %v3147_v4 = vmax.f32 %v2698_v12, %v2714_v43  ;;  %v3149_v32 = vmax.f32 %v2700_v25, %v2716_v47  ;;  %v2718_v0 = vmax.f32 %v1677_v19, 0.0  ;;  %v2720_v57 = vmax.f32 %v2270_v7, 0.0  ;;  %v18515_v44 = vld [vmem:[%s24994_s3 + $0x244] ss:$16 sps:$4 sm:$0xff]   ;;  %v18513_v37 = vld [vmem:[%s24994_s3 + $0x240] ss:$16 sps:$4 sm:$0xff]  }
 0x2bb   :  { %3996 = vmatmul.mubr.bf16.gmra.mrb[72].mxu0 %v3155_v48  ;;  %4958 = vmatmul.mubr.bf16.gmra.mrb[72].mxu1 %v3155_v48  ;;  %v3148_v34 = vmax.f32 %v2699_v39, %v2715_v31  ;;  %v3150_v33 = vmax.f32 %v2701_v60, %v2717_v38  ;;  %v2719_v62 = vmax.f32 %v1679_v3, 0.0  ;;  %v2721_v35 = vmax.f32 %v2272_v58, 0.0  ;;  %v18506_v39 = vld [vmem:[%s24994_s3 + $0x1e4] ss:$16 sps:$4 sm:$0xff]   ;;  %v3186_v36 = vld [vmem:[#allocation2 + $0x78] sm:$0xff] }
 0x2bc   :  { %v3151_v22 = vmax.f32 %v2702_v9, %v2718_v0  ;;  %v3153_v45 = vmax.f32 %v2704_v63, %v2720_v57  ;;  %v3173_v60 = vld [vmem:[#allocation2 + $0x10] sm:$0xff]  ;;  %v18531_v9 = vld [vmem:[%s24994_s3 + $0x1e8] ss:$16 sps:$4 sm:$0xff]   ;;  %v18545_v40 = vld [vmem:[%s24994_s3 + $0x22c] ss:$16 sps:$4 sm:$0xff]  }
 0x2bd   :  { %v3152_v15 = vmax.f32 %v2703_v29, %v2719_v62  ;;  %v3154_v2 = vmax.f32 %v2705_v17, %v2721_v35  ;;  %v18507_v63 = vld [vmem:[%s24994_s3 + $0x200] ss:$16 sps:$4 sm:$0xff]   ;;  %v18537_v29 = vld [vmem:[%s24994_s3 + $0x208] ss:$16 sps:$4 sm:$0xff]   ;;  %v18518_v48 = vld [vmem:[%s24994_s3 + $0x264] ss:$16 sps:$4 sm:$0xff]  }
 0x2be   :  { %v3159_v12 = vpack.c.bf16 %v3151_v22, %v3147_v4  ;;  %v21606_v13 = vpack.c.bf16 %v3153_v45, %v3149_v32  ;;  %v18510_v17 = vld [vmem:[%s24994_s3 + $0x220] ss:$16 sps:$4 sm:$0xff]   ;;  %v18521_v56 = vld [vmem:[%s24994_s3 + $0x284] ss:$16 sps:$4 sm:$0xff]   ;;  %v3190_v18 = vld [vmem:[#allocation2 + $0x98] sm:$0xff] }
 0x2bf   :  { %v3160_v14 = vpack.c.bf16 %v3152_v15, %v3148_v34  ;;  %v3162_v25 = vpack.c.bf16 %v3154_v2, %v3150_v33  ;;  %v18516_v10 = vld [vmem:[%s24994_s3 + $0x260] ss:$16 sps:$4 sm:$0xff]   ;;  %v18524_v42 = vld [vmem:[%s24994_s3 + $0x2a4] ss:$16 sps:$4 sm:$0xff]   ;;  %v18543_v52 = vld [vmem:[%s24994_s3 + $0x228] ss:$16 sps:$4 sm:$0xff]  }
 0x2c0   :  { %v18519_v59 = vld [vmem:[%s24994_s3 + $0x280] ss:$16 sps:$4 sm:$0xff]   ;;  %v18530_v43 = vld [vmem:[%s24994_s3 + $0x2c4] ss:$16 sps:$4 sm:$0xff]   ;;  %v3194_v7 = vld [vmem:[#allocation2 + $0xb8] sm:$0xff] }
 0x2c1   :  { %3170 = vst.msk [vmem:[#allocation2 + $0x378] sm:$0xff] %vm2749_vm1, %v3162_v25  ;;  %4005 = vmatprep.mubr.bf16.mxu0 %v3160_v14  ;;  %4967 = vmatprep.mubr.bf16.mxu1 %v3160_v14  ;;  %v3185_v5 = vld [vmem:[#allocation2 + $0x70] sm:$0xff]  ;;  %v3198_v58 = vld [vmem:[#allocation2 + $0xd8] sm:$0xff] }
 0x2c2   :  { %v18522_v23 = vld [vmem:[%s24994_s3 + $0x2a0] ss:$16 sps:$4 sm:$0xff]   ;;  %v18536_v54 = vld [vmem:[%s24994_s3 + $0x2e4] ss:$16 sps:$4 sm:$0xff]   ;;  %v18549_v32 = vld [vmem:[%s24994_s3 + $0x248] ss:$16 sps:$4 sm:$0xff]  }
 0x2c3   :  { %4006 = vmatmul.mubr.bf16.gmra.mrb[76].mxu0 %v3159_v12  ;;  %4968 = vmatmul.mubr.bf16.gmra.mrb[76].mxu1 %v3159_v12  ;;  %v18528_v47 = vld [vmem:[%s24994_s3 + $0x2c0] ss:$16 sps:$4 sm:$0xff]   ;;  %v18542_v31 = vld [vmem:[%s24994_s3 + $0x304] ss:$16 sps:$4 sm:$0xff]   ;;  %v18551_v57 = vld [vmem:[%s24994_s3 + $0x24c] ss:$16 sps:$4 sm:$0xff]  }
 0x2c4   :  { %15566 = vmatprep.mubr.msk.bf16.mxu0 %vm2749_vm1, %v3174_v28  ;;  %15650 = vmatprep.mubr.msk.bf16.mxu1 %vm2749_vm1, %v3174_v28  ;;  %v3189_v19 = vld [vmem:[#allocation2 + $0x90] sm:$0xff]  ;;  %v3202_v33 = vld [vmem:[#allocation2 + $0xf8] sm:$0xff] }
 0x2c5   :  { %v18534_v51 = vld [vmem:[%s24994_s3 + $0x2e0] ss:$16 sps:$4 sm:$0xff]   ;;  %v18548_v4 = vld [vmem:[%s24994_s3 + $0x324] ss:$16 sps:$4 sm:$0xff]   ;;  %v3206_v35 = vld [vmem:[#allocation2 + $0x118] sm:$0xff] }
 0x2c6   :  { %v18540_v38 = vld [vmem:[%s24994_s3 + $0x300] ss:$16 sps:$4 sm:$0xff]   ;;  %v18552_v22 = vld [vmem:[%s24994_s3 + $0x268] ss:$16 sps:$4 sm:$0xff]   ;;  %v18554_v45 = vld [vmem:[%s24994_s3 + $0x26c] ss:$16 sps:$4 sm:$0xff]  }
 0x2c7   :  { %v3193_v3 = vld [vmem:[#allocation2 + $0xb0] sm:$0xff]  ;;  %v3210_v14 = vld [vmem:[#allocation2 + $0x138] sm:$0xff] }
 0x2c8   :  { %v18546_v0 = vld [vmem:[%s24994_s3 + $0x320] ss:$16 sps:$4 sm:$0xff]   ;;  %v18557_v2 = vld [vmem:[%s24994_s3 + $0x344] ss:$16 sps:$4 sm:$0xff]   ;;  %v18558_v25 = vld [vmem:[%s24994_s3 + $0x288] ss:$16 sps:$4 sm:$0xff]  }
 0x2c9   :  { %v3197_v34 = vld [vmem:[#allocation2 + $0xd0] sm:$0xff]  ;;  %v18560_v28 = vld [vmem:[%s24994_s3 + $0x28c] ss:$16 sps:$4 sm:$0xff]  }
 0x2ca   :  { %v3201_v62 = vld [vmem:[#allocation2 + $0xf0] sm:$0xff] }
 0x2cb   :  { %4049 = vmatmul.mubr.bf16.vlgmr.msra.gmra.mrb[224].mxu0 %v3173_v60  ;;  %5011 = vmatmul.mubr.bf16.vlgmr.msra.gmra.mrb[224].mxu1 %v3173_v60  ;;  %v18555_v15 = vld [vmem:[%s24994_s3 + $0x340] ss:$16 sps:$4 sm:$0xff]  }
 0x2cc   :  { %6070 = vmatpush1.bf16.msra.mxu0 %v18501_v24  ;;  %15567 = vmatprep.mubr.msk.bf16.mxu0 %vm2749_vm1, %v3178_v53  ;;  %v3205_v12 = vld [vmem:[#allocation2 + $0x110] sm:$0xff]  ;;  %v18563_v24 = vld [vmem:[%s24994_s3 + $0x2ac] ss:$16 sps:$4 sm:$0xff]  }
 0x2cd   :  { %15651 = vmatprep.mubr.msk.bf16.mxu1 %vm2749_vm1, %v3178_v53  ;;  %6071 = vmatprep.subr.bf16.mxu0 %v18506_v39  ;;  %v18561_v39 = vld [vmem:[%s24994_s3 + $0x2a8] ss:$16 sps:$4 sm:$0xff]   ;;  %v3209_v60 = vld [vmem:[#allocation2 + $0x130] sm:$0xff] }
 0x2ce   :  { %6383 = vmatpush1.bf16.msra.mxu1 %v18525_v30  ;;  %v3214_v30 = vld [vmem:[#allocation2 + $0x158] sm:$0xff] }
 0x2cf   :  { %6384 = vmatprep.subr.bf16.mxu1 %v18533_v61  ;;  %v18564_v53 = vld [vmem:[%s24994_s3 + $0x2c8] ss:$16 sps:$4 sm:$0xff]   ;;  %v18566_v61 = vld [vmem:[%s24994_s3 + $0x2cc] ss:$16 sps:$4 sm:$0xff]  }
 0x2d0   :  { %6072 = vmatpush1.bf16.msra.mxu0 %v18504_v8  ;;  %v18569_v8 = vld [vmem:[%s24994_s3 + $0x2ec] ss:$16 sps:$4 sm:$0xff]  }
 0x2d1   :  { %6073 = vmatprep.subr.bf16.mxu0 %v18509_v41  ;;  %v18570_v41 = vld [vmem:[%s24994_s3 + $0x360] ss:$16 sps:$4 sm:$0xff]  }
 0x2d2   :  { %6385 = vmatpush1.bf16.msra.mxu1 %v18531_v9  ;;  %v18572_v9 = vld [vmem:[%s24994_s3 + $0x364] ss:$16 sps:$4 sm:$0xff]  }
 0x2d3   :  { %4059 = vmatmul.mubr.bf16.gmra.mrb[228].mxu0 %v3177_v49  ;;  %5021 = vmatmul.mubr.bf16.gmra.mrb[228].mxu1 %v3177_v49  ;;  %v3213_v49 = vld [vmem:[#allocation2 + $0x150] sm:$0xff] }
 0x2d4   :  { %15568 = vmatprep.mubr.msk.bf16.mxu0 %vm2749_vm1, %v3182_v55  ;;  %15652 = vmatprep.mubr.msk.bf16.mxu1 %vm2749_vm1, %v3182_v55  ;;  %v18573_v55 = vld [vmem:[%s24994_s3 + $0x308] ss:$16 sps:$4 sm:$0xff]  }
 0x2d5   :  { %6074 = vmatpush1.bf16.msra.mxu0 %v18507_v63  ;;  %6386 = vmatprep.subr.bf16.mxu1 %v18539_v46  ;;  %v18567_v63 = vld [vmem:[%s24994_s3 + $0x2e8] ss:$16 sps:$4 sm:$0xff]  }
 0x2d6   :  { %6075 = vmatprep.subr.bf16.mxu0 %v18512_v1  ;;  %6387 = vmatpush1.bf16.msra.mxu1 %v18537_v29  ;;  %v3218_v1 = vld [vmem:[#allocation2 + $0x178] sm:$0xff] }
 0x2d7   :  { %6388 = vmatprep.subr.bf16.mxu1 %v18545_v40  ;;  %v18575_v29 = vld [vmem:[%s24994_s3 + $0x30c] ss:$16 sps:$4 sm:$0xff]   ;;  %v18576_v46 = vld [vmem:[%s24994_s3 + $0x328] ss:$16 sps:$4 sm:$0xff]  }
 0x2d8   :  { %v3234_v40 = vld [vmem:[#allocation2 + $0x1f8] sm:$0xff] }
 0x2d9   :  { %6076 = vmatpush1.bf16.msra.mxu0 %v18510_v17  ;;  %v18578_v17 = vld [vmem:[%s24994_s3 + $0x32c] ss:$16 sps:$4 sm:$0xff]  }
 0x2da   :  { %6077 = vmatprep.subr.bf16.mxu0 %v18515_v44  ;;  %6389 = vmatpush1.bf16.msra.mxu1 %v18543_v52  ;;  %v3217_v44 = vld [vmem:[#allocation2 + $0x170] sm:$0xff]  ;;  %v3230_v52 = vld [vmem:[#allocation2 + $0x1d8] sm:$0xff] }
 0x2db   :  { %4069 = vmatmul.mubr.bf16.gmra.mrb[232].mxu0 %v3181_v11  ;;  %5031 = vmatmul.mubr.bf16.gmra.mrb[232].mxu1 %v3181_v11  ;;  %v18579_v11 = vld [vmem:[%s24994_s3 + $0x348] ss:$16 sps:$4 sm:$0xff]  }
 0x2dc   :  { %15569 = vmatprep.mubr.msk.bf16.mxu0 %vm2749_vm1, %v3186_v36  ;;  %15653 = vmatprep.mubr.msk.bf16.mxu1 %vm2749_vm1, %v3186_v36  ;;  %v18584_v36 = vld [vmem:[%s24994_s3 + $0x36c] ss:$16 sps:$4 sm:$0xff]  }
 0x2dd   :  { %6078 = vmatpush1.bf16.msra.mxu0 %v18513_v37  ;;  %6390 = vmatprep.subr.bf16.mxu1 %v18551_v57  ;;  %v3222_v37 = vld [vmem:[#allocation2 + $0x198] sm:$0xff] }
 0x2de   :  { %6079 = vmatprep.subr.bf16.mxu0 %v18518_v48  ;;  %6391 = vmatpush1.bf16.msra.mxu1 %v18549_v32  ;;  %v18581_v48 = vld [vmem:[%s24994_s3 + $0x34c] ss:$16 sps:$4 sm:$0xff]  }
 0x2df   :  { %6392 = vmatprep.subr.bf16.mxu1 %v18554_v45  ;;  %v3258_v32 = vld [vmem:[#allocation2 + $0x2b8] sm:$0xff] }
 0x2e0   :  { %v3262_v57 = vld [vmem:[#allocation2 + $0x2d8] sm:$0xff] }
 0x2e1   :  { %6080 = vmatpush1.bf16.msra.mxu0 %v18516_v10  ;;  %v18582_v10 = vld [vmem:[%s24994_s3 + $0x368] ss:$16 sps:$4 sm:$0xff]  }
 0x2e2   :  { %6081 = vmatprep.subr.bf16.mxu0 %v18521_v56  ;;  %6393 = vmatpush1.bf16.msra.mxu1 %v18552_v22  ;;  %v19214_v56 = vmov 0   ;;  %v3269_v22 = vld [vmem:[#allocation2 + $0x310] sm:$0xff]  ;;  %v3274_v45 = vld [vmem:[#allocation2 + $0x338] sm:$0xff] }
 0x2e3   :  { %4079 = vmatmul.mubr.bf16.gmra.mrb[236].mxu0 %v3185_v5  ;;  %5041 = vmatmul.mubr.bf16.gmra.mrb[236].mxu1 %v3185_v5  ;;  %5409 = vst.msk [vmem:[#allocation3 + $0x28] sm:$0xff] %vm5404_vm2, %v19214_v56  ;;  %5403 = vst [vmem:[#allocation3] sm:$0xff] %v19214_v56  ;;  %v3226_v5 = vld [vmem:[#allocation2 + $0x1b8] sm:$0xff] }
 0x2e4   :  { %15570 = vmatprep.mubr.msk.bf16.mxu0 %vm2749_vm1, %v3190_v18  ;;  %15654 = vmatprep.mubr.msk.bf16.mxu1 %vm2749_vm1, %v3190_v18  ;;  %5405 = vst.msk [vmem:[#allocation3 + $0x8] sm:$0xff] %vm5404_vm2, %v19214_v56  ;;  %5407 = vst.msk [vmem:[#allocation3 + $0x18] sm:$0xff] %vm5404_vm2, %v19214_v56  ;;  %v3225_v18 = vld [vmem:[#allocation2 + $0x1b0] sm:$0xff] }
 0x2e5   :  { %6082 = vmatpush1.bf16.msra.mxu0 %v18519_v59  ;;  %6394 = vmatprep.subr.bf16.mxu1 %v18560_v28  ;;  %5411 = vst.msk [vmem:[#allocation3 + $0x38] sm:$0xff] %vm5404_vm2, %v19214_v56  ;;  %5413 = vst.msk [vmem:[#allocation3 + $0x208] sm:$0xff] %vm5404_vm2, %v19214_v56  ;;  %v3221_v59 = vld [vmem:[#allocation2 + $0x190] sm:$0xff] }
 0x2e6   :  { %6083 = vmatprep.subr.bf16.mxu0 %v18524_v42  ;;  %6395 = vmatpush1.bf16.msra.mxu1 %v18558_v25  ;;  %5415 = vst.msk [vmem:[#allocation3 + $0x218] sm:$0xff] %vm5404_vm2, %v19214_v56  ;;  %5417 = vst.msk [vmem:[#allocation3 + $0x228] sm:$0xff] %vm5404_vm2, %v19214_v56  ;;  %v18587_v42 = vld [vmem:[%s24994_s3 + $0x4] ss:$16 sps:$4 sm:$0xff]  }
 0x2e7   :  { %6396 = vmatprep.subr.bf16.mxu1 %v18563_v24  ;;  %5419 = vst.msk [vmem:[#allocation3 + $0x238] sm:$0xff] %vm5404_vm2, %v19214_v56 }
 0x2e9   :  { %6084 = vmatpush1.bf16.msra.mxu0 %v18522_v23  ;;  %v3229_v23 = vld [vmem:[#allocation2 + $0x1d0] sm:$0xff] }
 0x2ea   :  { %6085 = vmatprep.subr.bf16.mxu0 %v18530_v43  ;;  %6397 = vmatpush1.bf16.msra.mxu1 %v18561_v39  ;;  %v3233_v43 = vld [vmem:[#allocation2 + $0x1f0] sm:$0xff] }
 0x2eb   :  { %4089 = vmatmul.mubr.bf16.gmra.mrb[240].mxu0 %v3189_v19  ;;  %5051 = vmatmul.mubr.bf16.gmra.mrb[240].mxu1 %v3189_v19  ;;  %v3237_v19 = vld [vmem:[#allocation2 + $0x210] sm:$0xff] }
 0x2ec   :  { %15571 = vmatprep.mubr.msk.bf16.mxu0 %vm2749_vm1, %v3194_v7  ;;  %15655 = vmatprep.mubr.msk.bf16.mxu1 %vm2749_vm1, %v3194_v7  ;;  %v3241_v7 = vld [vmem:[#allocation2 + $0x230] sm:$0xff] }
 0x2ed   :  { %6086 = vmatpush1.bf16.msra.mxu0 %v18528_v47  ;;  %6398 = vmatprep.subr.bf16.mxu1 %v18566_v61  ;;  %v3238_v47 = vld [vmem:[#allocation2 + $0x218] sm:$0xff] }
 0x2ee   :  { %6087 = vmatprep.subr.bf16.mxu0 %v18536_v54  ;;  %6399 = vmatpush1.bf16.msra.mxu1 %v18564_v53  ;;  %v3242_v54 = vld [vmem:[#allocation2 + $0x238] sm:$0xff] }
 0x2ef   :  { %6400 = vmatprep.subr.bf16.mxu1 %v18569_v8  ;;  %v5537_v8 = vld [vmem:[#allocation3 + $0x28] sm:$0xff] }
 0x2f1   :  { %6088 = vmatpush1.bf16.msra.mxu0 %v18534_v51  ;;  %v3246_v51 = vld [vmem:[#allocation2 + $0x258] sm:$0xff] }
 0x2f2   :  { %6089 = vmatprep.subr.bf16.mxu0 %v18542_v31  ;;  %6401 = vmatpush1.bf16.msra.mxu1 %v18567_v63  ;;  %v3245_v31 = vld [vmem:[#allocation2 + $0x250] sm:$0xff] }
 0x2f3   :  { %4099 = vmatmul.mubr.bf16.gmra.mrb[244].mxu0 %v3193_v3  ;;  %5061 = vmatmul.mubr.bf16.gmra.mrb[244].mxu1 %v3193_v3  ;;  %v3249_v3 = vld [vmem:[#allocation2 + $0x270] sm:$0xff] }
 0x2f4   :  { %15572 = vmatprep.mubr.msk.bf16.mxu0 %vm2749_vm1, %v3198_v58  ;;  %15656 = vmatprep.mubr.msk.bf16.mxu1 %vm2749_vm1, %v3198_v58  ;;  %v3254_v58 = vld [vmem:[#allocation2 + $0x298] sm:$0xff] }
 0x2f5   :  { %6090 = vmatpush1.bf16.msra.mxu0 %v18540_v38  ;;  %6402 = vmatprep.subr.bf16.mxu1 %v18575_v29  ;;  %v3250_v38 = vld [vmem:[#allocation2 + $0x278] sm:$0xff] }
 0x2f6   :  { %6091 = vmatprep.subr.bf16.mxu0 %v18548_v4  ;;  %6403 = vmatpush1.bf16.msra.mxu1 %v18573_v55  ;;  %v3253_v4 = vld [vmem:[#allocation2 + $0x290] sm:$0xff] }
 0x2f7   :  { %6404 = vmatprep.subr.bf16.mxu1 %v18578_v17 }
 0x2f9   :  { %6092 = vmatpush1.bf16.msra.mxu0 %v18546_v0  ;;  %v3257_v0 = vld [vmem:[#allocation2 + $0x2b0] sm:$0xff] }
 0x2fa   :  { %6093 = vmatprep.subr.bf16.mxu0 %v18557_v2  ;;  %6405 = vmatpush1.bf16.msra.mxu1 %v18576_v46  ;;  %v3282_v2 = vld [vmem:[#allocation2 + $0x378] sm:$0xff] }
 0x2fb   :  { %4109 = vmatmul.mubr.bf16.gmra.mrb[248].mxu0 %v3197_v34  ;;  %5071 = vmatmul.mubr.bf16.gmra.mrb[248].mxu1 %v3197_v34  ;;  %v3261_v34 = vld [vmem:[#allocation2 + $0x2d0] sm:$0xff] }
 0x2fc   :  { %15573 = vmatprep.mubr.msk.bf16.mxu0 %vm2749_vm1, %v3202_v33  ;;  %15657 = vmatprep.mubr.msk.bf16.mxu1 %vm2749_vm1, %v3202_v33  ;;  %v3266_v33 = vld [vmem:[#allocation2 + $0x2f8] sm:$0xff] }
 0x2fd   :  { %6094 = vmatpush1.bf16.msra.mxu0 %v18555_v15  ;;  %6406 = vmatprep.subr.bf16.mxu1 %v18581_v48  ;;  %v3278_v15 = vld [vmem:[#allocation2 + $0x358] sm:$0xff] }
 0x2fe   :  { %6095 = vmatprep.subr.bf16.mxu0 %v18572_v9  ;;  %6407 = vmatpush1.bf16.msra.mxu1 %v18579_v11 }
 0x2ff   :  { %6408 = vmatprep.subr.bf16.mxu1 %v18584_v36 }
 0x301   :  { %6096 = vmatpush1.bf16.msra.mxu0 %v18570_v41 }
 0x302   :  { %6409 = vmatpush1.bf16.msra.mxu1 %v18582_v10  ;;  %6981 = vmatprep.subr.bf16.mxu0 %v18587_v42  ;;  %v5539_v10 = vld [vmem:[#allocation3 + $0x38] sm:$0xff] }
 0x303   :  { %4119 = vmatmul.mubr.bf16.gmra.mrb[252].mxu0 %v3201_v62  ;;  %5081 = vmatmul.mubr.bf16.gmra.mrb[252].mxu1 %v3201_v62  ;;  %v3265_v62 = vld [vmem:[#allocation2 + $0x2f0] sm:$0xff]  ;;  %v18609_v42 = vld [vmem:[%s24994_s3 + $0x8] ss:$16 sps:$4 sm:$0xff]  }
 0x304   :  { %15574 = vmatprep.mubr.msk.bf16.mxu0 %vm2749_vm1, %v3206_v35  ;;  %15658 = vmatprep.mubr.msk.bf16.mxu1 %vm2749_vm1, %v3206_v35  ;;  %v3270_v35 = vld [vmem:[#allocation2 + $0x318] sm:$0xff] }
 0x30b   :  { %4129 = vmatmul.mubr.bf16.gmra.mrb[0].mxu0 %v3205_v12  ;;  %5091 = vmatmul.mubr.bf16.gmra.mrb[0].mxu1 %v3205_v12 }
 0x30c   :  { %15575 = vmatprep.mubr.msk.bf16.mxu0 %vm2749_vm1, %v3210_v14  ;;  %15659 = vmatprep.mubr.msk.bf16.mxu1 %vm2749_vm1, %v3210_v14 }
 0x313   :  { %4139 = vmatmul.mubr.bf16.gmra.mrb[4].mxu0 %v3209_v60  ;;  %5101 = vmatmul.mubr.bf16.gmra.mrb[4].mxu1 %v3209_v60 }
 0x314   :  { %15576 = vmatprep.mubr.msk.bf16.mxu0 %vm2749_vm1, %v3214_v30  ;;  %15660 = vmatprep.mubr.msk.bf16.mxu1 %vm2749_vm1, %v3214_v30 }
 0x31b   :  { %4149 = vmatmul.mubr.bf16.gmra.mrb[8].mxu0 %v3213_v49  ;;  %5111 = vmatmul.mubr.bf16.gmra.mrb[8].mxu1 %v3213_v49 }
 0x31c   :  { %15577 = vmatprep.mubr.msk.bf16.mxu0 %vm2749_vm1, %v3218_v1  ;;  %15661 = vmatprep.mubr.msk.bf16.mxu1 %vm2749_vm1, %v3218_v1 }
 0x323   :  { %4159 = vmatmul.mubr.bf16.gmra.mrb[12].mxu0 %v3217_v44  ;;  %5121 = vmatmul.mubr.bf16.gmra.mrb[12].mxu1 %v3217_v44 }
 0x324   :  { %15578 = vmatprep.mubr.msk.bf16.mxu0 %vm2749_vm1, %v3222_v37  ;;  %15662 = vmatprep.mubr.msk.bf16.mxu1 %vm2749_vm1, %v3222_v37 }
 0x32b   :  { %4169 = vmatmul.mubr.bf16.gmra.mrb[16].mxu0 %v3221_v59  ;;  %5131 = vmatmul.mubr.bf16.gmra.mrb[16].mxu1 %v3221_v59  ;;  %v18590_v59 = vld [vmem:[%s24994_s3 + $0x24] ss:$16 sps:$4 sm:$0xff]  }
 0x32c   :  { %15579 = vmatprep.mubr.msk.bf16.mxu0 %vm2749_vm1, %v3226_v5  ;;  %15663 = vmatprep.mubr.msk.bf16.mxu1 %vm2749_vm1, %v3226_v5 }
 0x333   :  { %4179 = vmatmul.mubr.bf16.gmra.mrb[20].mxu0 %v3225_v18  ;;  %5141 = vmatmul.mubr.bf16.gmra.mrb[20].mxu1 %v3225_v18 }
 0x334   :  { %15580 = vmatprep.mubr.msk.bf16.mxu0 %vm2749_vm1, %v3230_v52  ;;  %15664 = vmatprep.mubr.msk.bf16.mxu1 %vm2749_vm1, %v3230_v52 }
 0x33b   :  { %4189 = vmatmul.mubr.bf16.gmra.mrb[24].mxu0 %v3229_v23  ;;  %5151 = vmatmul.mubr.bf16.gmra.mrb[24].mxu1 %v3229_v23  ;;  %v18588_v23 = vld [vmem:[%s24994_s3 + $0x20] ss:$16 sps:$4 sm:$0xff]  }
 0x33c   :  { %15581 = vmatprep.mubr.msk.bf16.mxu0 %vm2749_vm1, %v3234_v40  ;;  %15665 = vmatprep.mubr.msk.bf16.mxu1 %vm2749_vm1, %v3234_v40  ;;  %v18593_v40 = vld [vmem:[%s24994_s3 + $0x44] ss:$16 sps:$4 sm:$0xff]  }
 0x343   :  { %4199 = vmatmul.mubr.bf16.gmra.mrb[28].mxu0 %v3233_v43  ;;  %5161 = vmatmul.mubr.bf16.gmra.mrb[28].mxu1 %v3233_v43 }
 0x344   :  { %15582 = vmatprep.mubr.msk.bf16.mxu0 %vm2749_vm1, %v3238_v47  ;;  %15666 = vmatprep.mubr.msk.bf16.mxu1 %vm2749_vm1, %v3238_v47 }
 0x34b   :  { %4209 = vmatmul.mubr.bf16.gmra.mrb[32].mxu0 %v3237_v19  ;;  %5171 = vmatmul.mubr.bf16.gmra.mrb[32].mxu1 %v3237_v19 }
 0x34c   :  { %15583 = vmatprep.mubr.msk.bf16.mxu0 %vm2749_vm1, %v3242_v54  ;;  %15667 = vmatprep.mubr.msk.bf16.mxu1 %vm2749_vm1, %v3242_v54 }
 0x353   :  { %4219 = vmatmul.mubr.bf16.gmra.mrb[36].mxu0 %v3241_v7  ;;  %5181 = vmatmul.mubr.bf16.gmra.mrb[36].mxu1 %v3241_v7 }
 0x354   :  { %15584 = vmatprep.mubr.msk.bf16.mxu0 %vm2749_vm1, %v3246_v51  ;;  %15668 = vmatprep.mubr.msk.bf16.mxu1 %vm2749_vm1, %v3246_v51  ;;  %v18615_v51 = vld [vmem:[%s24994_s3 + $0x28] ss:$16 sps:$4 sm:$0xff]  }
 0x35b   :  { %4229 = vmatmul.mubr.bf16.gmra.mrb[40].mxu0 %v3245_v31  ;;  %5191 = vmatmul.mubr.bf16.gmra.mrb[40].mxu1 %v3245_v31  ;;  %v18617_v31 = vld [vmem:[%s24994_s3 + $0x2c] ss:$16 sps:$4 sm:$0xff]  }
 0x35c   :  { %15585 = vmatprep.mubr.msk.bf16.mxu0 %vm2749_vm1, %v3250_v38  ;;  %15669 = vmatprep.mubr.msk.bf16.mxu1 %vm2749_vm1, %v3250_v38 }
 0x363   :  { %4239 = vmatmul.mubr.bf16.gmra.mrb[44].mxu0 %v3249_v3  ;;  %5201 = vmatmul.mubr.bf16.gmra.mrb[44].mxu1 %v3249_v3 }
 0x364   :  { %15586 = vmatprep.mubr.msk.bf16.mxu0 %vm2749_vm1, %v3254_v58  ;;  %15670 = vmatprep.mubr.msk.bf16.mxu1 %vm2749_vm1, %v3254_v58 }
 0x36b   :  { %4249 = vmatmul.mubr.bf16.gmra.mrb[48].mxu0 %v3253_v4  ;;  %5211 = vmatmul.mubr.bf16.gmra.mrb[48].mxu1 %v3253_v4 }
 0x36c   :  { %15587 = vmatprep.mubr.msk.bf16.mxu0 %vm2749_vm1, %v3258_v32  ;;  %15671 = vmatprep.mubr.msk.bf16.mxu1 %vm2749_vm1, %v3258_v32 }
 0x373   :  { %4259 = vmatmul.mubr.bf16.gmra.mrb[52].mxu0 %v3257_v0  ;;  %5221 = vmatmul.mubr.bf16.gmra.mrb[52].mxu1 %v3257_v0 }
 0x374   :  { %15588 = vmatprep.mubr.msk.bf16.mxu0 %vm2749_vm1, %v3262_v57  ;;  %15672 = vmatprep.mubr.msk.bf16.mxu1 %vm2749_vm1, %v3262_v57  ;;  %v18591_v57 = vld [vmem:[%s24994_s3 + $0x40] ss:$16 sps:$4 sm:$0xff]  }
 0x37b   :  { %4269 = vmatmul.mubr.bf16.gmra.mrb[56].mxu0 %v3261_v34  ;;  %5231 = vmatmul.mubr.bf16.gmra.mrb[56].mxu1 %v3261_v34 }
 0x37c   :  { %15589 = vmatprep.mubr.msk.bf16.mxu0 %vm2749_vm1, %v3266_v33  ;;  %15673 = vmatprep.mubr.msk.bf16.mxu1 %vm2749_vm1, %v3266_v33  ;;  %v18596_v33 = vld [vmem:[%s24994_s3 + $0x64] ss:$16 sps:$4 sm:$0xff]  }
 0x383   :  { %4279 = vmatmul.mubr.bf16.gmra.mrb[60].mxu0 %v3265_v62  ;;  %5241 = vmatmul.mubr.bf16.gmra.mrb[60].mxu1 %v3265_v62 }
 0x384   :  { %15590 = vmatprep.mubr.msk.bf16.mxu0 %vm2749_vm1, %v3270_v35  ;;  %15674 = vmatprep.mubr.msk.bf16.mxu1 %vm2749_vm1, %v3270_v35 }
 0x38b   :  { %4289 = vmatmul.mubr.bf16.gmra.mrb[64].mxu0 %v3269_v22  ;;  %5251 = vmatmul.mubr.bf16.gmra.mrb[64].mxu1 %v3269_v22 }
 0x38c   :  { %15591 = vmatprep.mubr.msk.bf16.mxu0 %vm2749_vm1, %v3274_v45  ;;  %15675 = vmatprep.mubr.msk.bf16.mxu1 %vm2749_vm1, %v3274_v45  ;;  %v18594_v45 = vld [vmem:[%s24994_s3 + $0x60] ss:$16 sps:$4 sm:$0xff]  }
 0x393   :  { %4299 = vmatmul.mubr.bf16.gmra.mrb[68].mxu0 %v21512_v50  ;;  %5261 = vmatmul.mubr.bf16.gmra.mrb[68].mxu1 %v21512_v50  ;;  %v18611_v50 = vld [vmem:[%s24994_s3 + $0xc] ss:$16 sps:$4 sm:$0xff]  }
 0x394   :  { %15592 = vmatprep.mubr.msk.bf16.mxu0 %vm2749_vm1, %v3278_v15  ;;  %15676 = vmatprep.mubr.msk.bf16.mxu1 %vm2749_vm1, %v3278_v15 }
 0x395   :  { %7294 = vmatprep.subr.bf16.mxu1 %v18611_v50 }
 0x39b   :  { %4309 = vmatmul.mubr.bf16.gmra.mrb[72].mxu0 %v21587_v6  ;;  %5271 = vmatmul.mubr.bf16.gmra.mrb[72].mxu1 %v21587_v6 }
 0x39c   :  { %15593 = vmatprep.mubr.msk.bf16.mxu0 %vm2749_vm1, %v3282_v2  ;;  %15677 = vmatprep.mubr.msk.bf16.mxu1 %vm2749_vm1, %v3282_v2 }
 0x39e   :  { %v4050_v12 = vpop.f32.mrb[224].mxu0  ;;  %v5012_v14 = vpop.f32.mrb[224].mxu1 }
 0x39f   :  { %v5291_v25 = vmax.f32 %v4050_v12, %v5012_v14  ;;  %v4052_v28 = vpop.f32.mrb[225].mxu0  ;;  %v5014_v24 = vpop.f32.mrb[225].mxu1 }
 0x3a0   :  { %v5292_v39 = vmax.f32 %v4052_v28, %v5014_v24  ;;  %v4054_v60 = vpop.f32.mrb[226].mxu0  ;;  %v5016_v30 = vpop.f32.mrb[226].mxu1 }
 0x3a1   :  { %v5293_v53 = vmax.f32 %v4054_v60, %v5016_v30  ;;  %v4056_v61 = vpop.f32.mrb[227].mxu0  ;;  %v5018_v6 = vpop.f32.mrb[227].mxu1 }
 0x3a2   :  { %v5294_v41 = vmax.f32 %v4056_v61, %v5018_v6  ;;  %v18602_v6 = vld [vmem:[%s24994_s3 + $0xa4] ss:$16 sps:$4 sm:$0xff]  }
 0x3a3   :  { %v21854_v9 = vpack.c.bf16 %v5293_v53, %v5291_v25  ;;  %4319 = vmatmul.mubr.bf16.gmra.mrb[76].mxu0 %v21606_v13  ;;  %5281 = vmatmul.mubr.bf16.gmra.mrb[76].mxu1 %v21606_v13  ;;  %v18585_v13 = vld [vmem:[%s24994_s3] ss:$16 sps:$4 sm:$0xff]  }
 0x3a4   :  { %v5421_v63 = vpack.c.bf16 %v5294_v41, %v5292_v39  ;;  %15790 = vmatprep.mubr.msk.bf16.mxu0 %vm5404_vm2, %v5537_v8  ;;  %15818 = vmatprep.mubr.msk.bf16.mxu1 %vm5404_vm2, %v5537_v8  ;;  %v18597_v53 = vld [vmem:[%s24994_s3 + $0x80] ss:$16 sps:$4 sm:$0xff]  }
 0x3a5   :  { %5476 = vst [vmem:[#allocation3 + $0x40] sm:$0xff] %v21854_v9 }
 0x3a6   :  { %5477 = vst.msk [vmem:[#allocation3 + $0x48] sm:$0xff] %vm5404_vm2, %v5421_v63  ;;  %v4060_v49 = vpop.f32.mrb[228].mxu0  ;;  %v5022_v1 = vpop.f32.mrb[228].mxu1 }
 0x3a7   :  { %v5295_v55 = vmax.f32 %v4060_v49, %v5022_v1  ;;  %v4062_v29 = vpop.f32.mrb[229].mxu0  ;;  %v5024_v17 = vpop.f32.mrb[229].mxu1  ;;  %v18600_v49 = vld [vmem:[%s24994_s3 + $0xa0] ss:$16 sps:$4 sm:$0xff]  }
 0x3a8   :  { %v5296_v46 = vmax.f32 %v4062_v29, %v5024_v17  ;;  %v4064_v44 = vpop.f32.mrb[230].mxu0  ;;  %v5026_v37 = vpop.f32.mrb[230].mxu1 }
 0x3a9   :  { %v5297_v11 = vmax.f32 %v4064_v44, %v5026_v37  ;;  %v4066_v48 = vpop.f32.mrb[231].mxu0  ;;  %v5028_v36 = vpop.f32.mrb[231].mxu1  ;;  %v18621_v44 = vld [vmem:[%s24994_s3 + $0x48] ss:$16 sps:$4 sm:$0xff]   ;;  %v18623_v37 = vld [vmem:[%s24994_s3 + $0x4c] ss:$16 sps:$4 sm:$0xff]  }
 0x3aa   :  { %v5298_v5 = vmax.f32 %v4066_v48, %v5028_v36 }
 0x3ab   :  { %v21871_v18 = vpack.c.bf16 %v5297_v11, %v5295_v55  ;;  %6102 = vmatmul.mubr.bf16.vlgmr.msra.gmra.mrb[80].mxu0 %v19214_v56  ;;  %6415 = vmatmul.mubr.bf16.vlgmr.msra.gmra.mrb[80].mxu1 %v19214_v56 }
 0x3ac   :  { %v5423_v52 = vpack.c.bf16 %v5298_v5, %v5296_v46  ;;  %6982 = vmatpush1.bf16.msra.mxu0 %v18585_v13  ;;  %15791 = vmatprep.mubr.msk.bf16.mxu0 %vm5404_vm2, %v5539_v10  ;;  %v18603_v5 = vld [vmem:[%s24994_s3 + $0xc0] ss:$16 sps:$4 sm:$0xff]  }
 0x3ad   :  { %5478 = vst [vmem:[#allocation3 + $0x50] sm:$0xff] %v21871_v18  ;;  %15819 = vmatprep.mubr.msk.bf16.mxu1 %vm5404_vm2, %v5539_v10  ;;  %6983 = vmatprep.subr.bf16.mxu0 %v18590_v59  ;;  %v5541_v35 = vld [vmem:[#allocation3 + $0x48] sm:$0xff] }
 0x3ae   :  { %5479 = vst.msk [vmem:[#allocation3 + $0x58] sm:$0xff] %vm5404_vm2, %v5423_v52  ;;  %v4070_v43 = vpop.f32.mrb[232].mxu0  ;;  %v5032_v47 = vpop.f32.mrb[232].mxu1  ;;  %7295 = vmatpush1.bf16.msra.mxu1 %v18609_v42  ;;  %v18608_v52 = vld [vmem:[%s24994_s3 + $0xe4] ss:$16 sps:$4 sm:$0xff]  }
 0x3af   :  { %v5299_v19 = vmax.f32 %v4070_v43, %v5032_v47  ;;  %v4072_v54 = vpop.f32.mrb[233].mxu0  ;;  %v5034_v7 = vpop.f32.mrb[233].mxu1  ;;  %7296 = vmatprep.subr.bf16.mxu1 %v18617_v31  ;;  %v18606_v47 = vld [vmem:[%s24994_s3 + $0xe0] ss:$16 sps:$4 sm:$0xff]  }
 0x3b0   :  { %v5300_v38 = vmax.f32 %v4072_v54, %v5034_v7  ;;  %v4074_v3 = vpop.f32.mrb[234].mxu0  ;;  %v5036_v58 = vpop.f32.mrb[234].mxu1  ;;  %6984 = vmatpush1.bf16.msra.mxu0 %v18588_v23 }
 0x3b1   :  { %v5301_v4 = vmax.f32 %v4074_v3, %v5036_v58  ;;  %v4076_v32 = vpop.f32.mrb[235].mxu0  ;;  %v5038_v0 = vpop.f32.mrb[235].mxu1  ;;  %6985 = vmatprep.subr.bf16.mxu0 %v18593_v40 }
 0x3b2   :  { %v5302_v34 = vmax.f32 %v4076_v32, %v5038_v0  ;;  %7297 = vmatpush1.bf16.msra.mxu1 %v18615_v51 }
 0x3b3   :  { %v21897_v62 = vpack.c.bf16 %v5301_v4, %v5299_v19  ;;  %6112 = vmatmul.mubr.bf16.gmra.mrb[84].mxu0 %v19214_v56  ;;  %6425 = vmatmul.mubr.bf16.gmra.mrb[84].mxu1 %v19214_v56  ;;  %v18599_v56 = vld [vmem:[%s24994_s3 + $0x84] ss:$16 sps:$4 sm:$0xff]  }
 0x3b4   :  { %v5425_v22 = vpack.c.bf16 %v5302_v34, %v5300_v38  ;;  %15792 = vmatprep.mubr.msk.bf16.mxu0 %vm5404_vm2, %v5541_v35  ;;  %15820 = vmatprep.mubr.msk.bf16.mxu1 %vm5404_vm2, %v5541_v35 }
 0x3b5   :  { %5480 = vst [vmem:[#allocation3 + $0x60] sm:$0xff] %v21897_v62  ;;  %6986 = vmatpush1.bf16.msra.mxu0 %v18591_v57  ;;  %v5543_v41 = vld [vmem:[#allocation3 + $0x58] sm:$0xff]  ;;  %7298 = vmatprep.subr.bf16.mxu1 %v18623_v37  ;;  %v18612_v57 = vld [vmem:[%s24994_s3 + $0x100] ss:$16 sps:$4 sm:$0xff]  }
 0x3b6   :  { %5481 = vst.msk [vmem:[#allocation3 + $0x68] sm:$0xff] %vm5404_vm2, %v5425_v22  ;;  %v4080_v15 = vpop.f32.mrb[236].mxu0  ;;  %v5042_v2 = vpop.f32.mrb[236].mxu1  ;;  %6987 = vmatprep.subr.bf16.mxu0 %v18596_v33  ;;  %7299 = vmatpush1.bf16.msra.mxu1 %v18621_v44  ;;  %v18620_v33 = vld [vmem:[%s24994_s3 + $0x124] ss:$16 sps:$4 sm:$0xff]  }
 0x3b7   :  { %v5303_v12 = vmax.f32 %v4080_v15, %v5042_v2  ;;  %v4082_v14 = vpop.f32.mrb[237].mxu0  ;;  %v5044_v25 = vpop.f32.mrb[237].mxu1  ;;  %v18618_v15 = vld [vmem:[%s24994_s3 + $0x120] ss:$16 sps:$4 sm:$0xff]  }
 0x3b8   :  { %v5304_v28 = vmax.f32 %v4082_v14, %v5044_v25  ;;  %v4084_v24 = vpop.f32.mrb[238].mxu0  ;;  %v5046_v50 = vpop.f32.mrb[238].mxu1 }
 0x3b9   :  { %v5305_v39 = vmax.f32 %v4084_v24, %v5046_v50  ;;  %v4086_v60 = vpop.f32.mrb[239].mxu0  ;;  %v5048_v30 = vpop.f32.mrb[239].mxu1  ;;  %6988 = vmatpush1.bf16.msra.mxu0 %v18594_v45  ;;  %v18629_v24 = vld [vmem:[%s24994_s3 + $0x6c] ss:$16 sps:$4 sm:$0xff]  }
 0x3ba   :  { %v5306_v61 = vmax.f32 %v4086_v60, %v5048_v30  ;;  %6989 = vmatprep.subr.bf16.mxu0 %v18599_v56  ;;  %7300 = vmatprep.subr.bf16.mxu1 %v18629_v24 }
 0x3bb   :  { %v21917_v8 = vpack.c.bf16 %v5305_v39, %v5303_v12  ;;  %6122 = vmatmul.mubr.bf16.gmra.mrb[88].mxu0 %v21854_v9  ;;  %6435 = vmatmul.mubr.bf16.gmra.mrb[88].mxu1 %v21854_v9  ;;  %v18605_v9 = vld [vmem:[%s24994_s3 + $0xc4] ss:$16 sps:$4 sm:$0xff]  }
 0x3bc   :  { %v5427_v63 = vpack.c.bf16 %v5306_v61, %v5304_v28  ;;  %15793 = vmatprep.mubr.msk.bf16.mxu0 %vm5404_vm2, %v5543_v41  ;;  %15821 = vmatprep.mubr.msk.bf16.mxu1 %vm5404_vm2, %v5543_v41  ;;  %v18627_v28 = vld [vmem:[%s24994_s3 + $0x68] ss:$16 sps:$4 sm:$0xff]  }
 0x3bd   :  { %5482 = vst [vmem:[#allocation3 + $0x70] sm:$0xff] %v21917_v8  ;;  %6990 = vmatpush1.bf16.msra.mxu0 %v18597_v53  ;;  %v5545_v40 = vld [vmem:[#allocation3 + $0x68] sm:$0xff]  ;;  %7301 = vmatpush1.bf16.msra.mxu1 %v18627_v28 }
 0x3be   :  { %5483 = vst.msk [vmem:[#allocation3 + $0x78] sm:$0xff] %vm5404_vm2, %v5427_v63  ;;  %v4090_v1 = vpop.f32.mrb[240].mxu0  ;;  %v5052_v55 = vpop.f32.mrb[240].mxu1  ;;  %6991 = vmatprep.subr.bf16.mxu0 %v18602_v6  ;;  %v18624_v6 = vld [vmem:[%s24994_s3 + $0x140] ss:$16 sps:$4 sm:$0xff]  }
 0x3bf   :  { %v5307_v29 = vmax.f32 %v4090_v1, %v5052_v55  ;;  %v4092_v17 = vpop.f32.mrb[241].mxu0  ;;  %v5054_v46 = vpop.f32.mrb[241].mxu1  ;;  %v18636_v28 = vld [vmem:[%s24994_s3 + $0xa8] ss:$16 sps:$4 sm:$0xff]  }
 0x3c0   :  { %v5308_v13 = vmax.f32 %v4092_v17, %v5054_v46  ;;  %v4094_v11 = vpop.f32.mrb[242].mxu0  ;;  %v5056_v48 = vpop.f32.mrb[242].mxu1 }
 0x3c1   :  { %v5309_v36 = vmax.f32 %v4094_v11, %v5056_v48  ;;  %v4096_v10 = vpop.f32.mrb[243].mxu0  ;;  %v5058_v59 = vpop.f32.mrb[243].mxu1  ;;  %6992 = vmatpush1.bf16.msra.mxu0 %v18600_v49 }
 0x3c2   :  { %v5310_v42 = vmax.f32 %v4096_v10, %v5058_v59  ;;  %6993 = vmatprep.subr.bf16.mxu0 %v18605_v9 }
 0x3c3   :  { %v21943_v23 = vpack.c.bf16 %v5309_v36, %v5307_v29  ;;  %6132 = vmatmul.mubr.bf16.gmra.mrb[92].mxu0 %v21871_v18  ;;  %6445 = vmatmul.mubr.bf16.gmra.mrb[92].mxu1 %v21871_v18  ;;  %v18614_v18 = vld [vmem:[%s24994_s3 + $0x104] ss:$16 sps:$4 sm:$0xff]  }
 0x3c4   :  { %v5429_v43 = vpack.c.bf16 %v5310_v42, %v5308_v13  ;;  %15794 = vmatprep.mubr.msk.bf16.mxu0 %vm5404_vm2, %v5545_v40  ;;  %15822 = vmatprep.mubr.msk.bf16.mxu1 %vm5404_vm2, %v5545_v40  ;;  %v18630_v40 = vld [vmem:[%s24994_s3 + $0x160] ss:$16 sps:$4 sm:$0xff]  }
 0x3c5   :  { %5484 = vst [vmem:[#allocation3 + $0x80] sm:$0xff] %v21943_v23  ;;  %6994 = vmatpush1.bf16.msra.mxu0 %v18603_v5  ;;  %v5547_v22 = vld [vmem:[#allocation3 + $0x78] sm:$0xff] }
 0x3c6   :  { %5485 = vst.msk [vmem:[#allocation3 + $0x88] sm:$0xff] %vm5404_vm2, %v5429_v43  ;;  %v4100_v19 = vpop.f32.mrb[244].mxu0  ;;  %v5062_v54 = vpop.f32.mrb[244].mxu1  ;;  %6995 = vmatprep.subr.bf16.mxu0 %v18608_v52 }
 0x3c7   :  { %v5311_v7 = vmax.f32 %v4100_v19, %v5062_v54  ;;  %v4102_v51 = vpop.f32.mrb[245].mxu0  ;;  %v5064_v31 = vpop.f32.mrb[245].mxu1  ;;  %v18633_v54 = vld [vmem:[%s24994_s3 + $0x88] ss:$16 sps:$4 sm:$0xff]  }
 0x3c8   :  { %v5312_v38 = vmax.f32 %v4102_v51, %v5064_v31  ;;  %v4104_v3 = vpop.f32.mrb[246].mxu0  ;;  %v5066_v58 = vpop.f32.mrb[246].mxu1 }
 0x3c9   :  { %v5313_v4 = vmax.f32 %v4104_v3, %v5066_v58  ;;  %v4106_v32 = vpop.f32.mrb[247].mxu0  ;;  %v5068_v0 = vpop.f32.mrb[247].mxu1  ;;  %6996 = vmatpush1.bf16.msra.mxu0 %v18606_v47 }
 0x3ca   :  { %v5314_v34 = vmax.f32 %v4106_v32, %v5068_v0  ;;  %6997 = vmatprep.subr.bf16.mxu0 %v18614_v18  ;;  %v18635_v18 = vld [vmem:[%s24994_s3 + $0x8c] ss:$16 sps:$4 sm:$0xff]  }
 0x3cb   :  { %v21963_v35 = vpack.c.bf16 %v5313_v4, %v5311_v7  ;;  %6142 = vmatmul.mubr.bf16.gmra.mrb[96].mxu0 %v21897_v62  ;;  %6455 = vmatmul.mubr.bf16.gmra.mrb[96].mxu1 %v21897_v62  ;;  %v18626_v62 = vld [vmem:[%s24994_s3 + $0x144] ss:$16 sps:$4 sm:$0xff]  }
 0x3cc   :  { %v5431_v45 = vpack.c.bf16 %v5314_v34, %v5312_v38  ;;  %15795 = vmatprep.mubr.msk.bf16.mxu0 %vm5404_vm2, %v5547_v22  ;;  %15823 = vmatprep.mubr.msk.bf16.mxu1 %vm5404_vm2, %v5547_v22 }
 0x3cd   :  { %5486 = vst [vmem:[#allocation3 + $0x90] sm:$0xff] %v21963_v35  ;;  %6998 = vmatpush1.bf16.msra.mxu0 %v18612_v57  ;;  %v5549_v49 = vld [vmem:[#allocation3 + $0x88] sm:$0xff]  ;;  %7302 = vmatprep.subr.bf16.mxu1 %v18635_v18 }
 0x3ce   :  { %5487 = vst.msk [vmem:[#allocation3 + $0x98] sm:$0xff] %vm5404_vm2, %v5431_v45  ;;  %v4110_v2 = vpop.f32.mrb[248].mxu0  ;;  %v5072_v56 = vpop.f32.mrb[248].mxu1  ;;  %6999 = vmatprep.subr.bf16.mxu0 %v18620_v33  ;;  %7303 = vmatpush1.bf16.msra.mxu1 %v18633_v54 }
 0x3cf   :  { %v5315_v12 = vmax.f32 %v4110_v2, %v5072_v56  ;;  %v4112_v14 = vpop.f32.mrb[249].mxu0  ;;  %v5074_v25 = vpop.f32.mrb[249].mxu1 }
 0x3d0   :  { %v5316_v50 = vmax.f32 %v4112_v14, %v5074_v25  ;;  %v4114_v39 = vpop.f32.mrb[250].mxu0  ;;  %v5076_v60 = vpop.f32.mrb[250].mxu1 }
 0x3d1   :  { %v5317_v30 = vmax.f32 %v4114_v39, %v5076_v60  ;;  %v4116_v53 = vpop.f32.mrb[251].mxu0  ;;  %v5078_v61 = vpop.f32.mrb[251].mxu1  ;;  %7000 = vmatpush1.bf16.msra.mxu0 %v18618_v15 }
 0x3d2   :  { %v5318_v41 = vmax.f32 %v4116_v53, %v5078_v61  ;;  %7001 = vmatprep.subr.bf16.mxu0 %v18626_v62  ;;  %v18639_v61 = vld [vmem:[%s24994_s3 + $0x180] ss:$16 sps:$4 sm:$0xff]  }
 0x3d3   :  { %v21986_v63 = vpack.c.bf16 %v5317_v30, %v5315_v12  ;;  %6152 = vmatmul.mubr.bf16.gmra.mrb[100].mxu0 %v21917_v8  ;;  %6465 = vmatmul.mubr.bf16.gmra.mrb[100].mxu1 %v21917_v8 }
 0x3d4   :  { %v5433_v1 = vpack.c.bf16 %v5318_v41, %v5316_v50  ;;  %15796 = vmatprep.mubr.msk.bf16.mxu0 %vm5404_vm2, %v5549_v49  ;;  %15824 = vmatprep.mubr.msk.bf16.mxu1 %vm5404_vm2, %v5549_v49 }
 0x3d5   :  { %5488 = vst [vmem:[#allocation3 + $0xa0] sm:$0xff] %v21986_v63  ;;  %7002 = vmatpush1.bf16.msra.mxu0 %v18624_v6  ;;  %v5551_v59 = vld [vmem:[#allocation3 + $0x98] sm:$0xff]  ;;  %v18641_v6 = vld [vmem:[%s24994_s3 + $0x184] ss:$16 sps:$4 sm:$0xff]  }
 0x3d6   :  { %5489 = vst.msk [vmem:[#allocation3 + $0xa8] sm:$0xff] %vm5404_vm2, %v5433_v1  ;;  %v4120_v55 = vpop.f32.mrb[252].mxu0  ;;  %v5082_v9 = vpop.f32.mrb[252].mxu1  ;;  %v18642_v1 = vld [vmem:[%s24994_s3 + $0xc8] ss:$16 sps:$4 sm:$0xff]  }
 0x3d7   :  { %v5319_v29 = vmax.f32 %v4120_v55, %v5082_v9  ;;  %v4122_v17 = vpop.f32.mrb[253].mxu0  ;;  %v5084_v46 = vpop.f32.mrb[253].mxu1  ;;  %v18644_v55 = vld [vmem:[%s24994_s3 + $0xcc] ss:$16 sps:$4 sm:$0xff]  }
 0x3d8   :  { %v5320_v44 = vmax.f32 %v4122_v17, %v5084_v46  ;;  %v4124_v37 = vpop.f32.mrb[254].mxu0  ;;  %v5086_v13 = vpop.f32.mrb[254].mxu1 }
 0x3d9   :  { %v5321_v8 = vmax.f32 %v4124_v37, %v5086_v13  ;;  %v4126_v11 = vpop.f32.mrb[255].mxu0  ;;  %v5088_v48 = vpop.f32.mrb[255].mxu1  ;;  %v18647_v13 = vld [vmem:[%s24994_s3 + $0xec] ss:$16 sps:$4 sm:$0xff]  }
 0x3da   :  { %v5322_v36 = vmax.f32 %v4126_v11, %v5088_v48  ;;  %v18645_v11 = vld [vmem:[%s24994_s3 + $0xe8] ss:$16 sps:$4 sm:$0xff]  }
 0x3db   :  { %v21994_v10 = vpack.c.bf16 %v5321_v8, %v5319_v29  ;;  %6162 = vmatmul.mubr.bf16.gmra.mrb[104].mxu0 %v21943_v23  ;;  %6475 = vmatmul.mubr.bf16.gmra.mrb[104].mxu1 %v21943_v23  ;;  %v18632_v23 = vld [vmem:[%s24994_s3 + $0x164] ss:$16 sps:$4 sm:$0xff]  }
 0x3dc   :  { %v5435_v5 = vpack.c.bf16 %v5322_v36, %v5320_v44  ;;  %15797 = vmatprep.mubr.msk.bf16.mxu0 %vm5404_vm2, %v5551_v59  ;;  %15825 = vmatprep.mubr.msk.bf16.mxu1 %vm5404_vm2, %v5551_v59 }
 0x3dd   :  { %5490 = vst [vmem:[#allocation3 + $0xb0] sm:$0xff] %v21994_v10  ;;  %7003 = vmatprep.subr.bf16.mxu0 %v18632_v23  ;;  %v5553_v0 = vld [vmem:[#allocation3 + $0xa8] sm:$0xff] }
 0x3de   :  { %5491 = vst.msk [vmem:[#allocation3 + $0xb8] sm:$0xff] %vm5404_vm2, %v5435_v5  ;;  %v4130_v42 = vpop.f32.mrb[0].mxu0  ;;  %v5092_v52 = vpop.f32.mrb[0].mxu1  ;;  %7004 = vmatpush1.bf16.msra.mxu0 %v18630_v40 }
 0x3df   :  { %v5323_v43 = vmax.f32 %v4130_v42, %v5092_v52  ;;  %v4132_v47 = vpop.f32.mrb[1].mxu0  ;;  %v5094_v19 = vpop.f32.mrb[1].mxu1  ;;  %7005 = vmatprep.subr.bf16.mxu0 %v18641_v6  ;;  %v18648_v52 = vld [vmem:[%s24994_s3 + $0x108] ss:$16 sps:$4 sm:$0xff]  }
 0x3e0   :  { %v5324_v7 = vmax.f32 %v4132_v47, %v5094_v19  ;;  %v4134_v51 = vpop.f32.mrb[2].mxu0  ;;  %v5096_v31 = vpop.f32.mrb[2].mxu1 }
 0x3e1   :  { %v5325_v38 = vmax.f32 %v4134_v51, %v5096_v31  ;;  %v4136_v3 = vpop.f32.mrb[3].mxu0  ;;  %v5098_v58 = vpop.f32.mrb[3].mxu1  ;;  %v18653_v31 = vld [vmem:[%s24994_s3 + $0x12c] ss:$16 sps:$4 sm:$0xff]  }
 0x3e2   :  { %v5326_v4 = vmax.f32 %v4136_v3, %v5098_v58  ;;  %7006 = vmatpush1.bf16.msra.mxu0 %v18639_v61  ;;  %v18651_v3 = vld [vmem:[%s24994_s3 + $0x128] ss:$16 sps:$4 sm:$0xff]   ;;  %v18665_v61 = vld [vmem:[%s24994_s3 + $0x18c] ss:$16 sps:$4 sm:$0xff]  }
 0x3e3   :  { %v22014_v32 = vpack.c.bf16 %v5325_v38, %v5323_v43  ;;  %6172 = vmatmul.mubr.bf16.gmra.mrb[108].mxu0 %v21963_v35  ;;  %6485 = vmatmul.mubr.bf16.gmra.mrb[108].mxu1 %v21963_v35  ;;  %v18638_v35 = vld [vmem:[%s24994_s3 + $0xac] ss:$16 sps:$4 sm:$0xff]  }
 0x3e4   :  { %v5437_v57 = vpack.c.bf16 %v5326_v4, %v5324_v7  ;;  %15798 = vmatprep.mubr.msk.bf16.mxu0 %vm5404_vm2, %v5553_v0  ;;  %15826 = vmatprep.mubr.msk.bf16.mxu1 %vm5404_vm2, %v5553_v0 }
 0x3e5   :  { %5492 = vst [vmem:[#allocation3 + $0xc0] sm:$0xff] %v22014_v32  ;;  %7304 = vmatprep.subr.bf16.mxu1 %v18638_v35  ;;  %v5555_v39 = vld [vmem:[#allocation3 + $0xb8] sm:$0xff] }
 0x3e6   :  { %5493 = vst.msk [vmem:[#allocation3 + $0xc8] sm:$0xff] %vm5404_vm2, %v5437_v57  ;;  %v4140_v34 = vpop.f32.mrb[4].mxu0  ;;  %v5102_v33 = vpop.f32.mrb[4].mxu1  ;;  %7305 = vmatpush1.bf16.msra.mxu1 %v18636_v28 }
 0x3e7   :  { %v5327_v22 = vmax.f32 %v4140_v34, %v5102_v33  ;;  %v4142_v45 = vpop.f32.mrb[5].mxu0  ;;  %v5104_v15 = vpop.f32.mrb[5].mxu1  ;;  %7306 = vmatprep.subr.bf16.mxu1 %v18644_v55  ;;  %v18654_v33 = vld [vmem:[%s24994_s3 + $0x1a0] ss:$16 sps:$4 sm:$0xff]  }
 0x3e8   :  { %v5328_v2 = vmax.f32 %v4142_v45, %v5104_v15  ;;  %v4144_v56 = vpop.f32.mrb[6].mxu0  ;;  %v5106_v62 = vpop.f32.mrb[6].mxu1 }
 0x3e9   :  { %v5329_v12 = vmax.f32 %v4144_v56, %v5106_v62  ;;  %v4146_v14 = vpop.f32.mrb[7].mxu0  ;;  %v5108_v25 = vpop.f32.mrb[7].mxu1  ;;  %v18659_v56 = vld [vmem:[%s24994_s3 + $0x14c] ss:$16 sps:$4 sm:$0xff]  }
 0x3ea   :  { %v5330_v24 = vmax.f32 %v4146_v14, %v5108_v25  ;;  %7307 = vmatpush1.bf16.msra.mxu1 %v18642_v1 }
 0x3eb   :  { %v22028_v50 = vpack.c.bf16 %v5329_v12, %v5327_v22  ;;  %6182 = vmatmul.mubr.bf16.gmra.mrb[112].mxu0 %v21986_v63  ;;  %6495 = vmatmul.mubr.bf16.gmra.mrb[112].mxu1 %v21986_v63 }
 0x3ec   :  { %v5439_v60 = vpack.c.bf16 %v5330_v24, %v5328_v2  ;;  %15799 = vmatprep.mubr.msk.bf16.mxu0 %vm5404_vm2, %v5555_v39  ;;  %15827 = vmatprep.mubr.msk.bf16.mxu1 %vm5404_vm2, %v5555_v39  ;;  %v18657_v2 = vld [vmem:[%s24994_s3 + $0x148] ss:$16 sps:$4 sm:$0xff]   ;;  %v18662_v24 = vld [vmem:[%s24994_s3 + $0x16c] ss:$16 sps:$4 sm:$0xff]  }
 0x3ed   :  { %5494 = vst [vmem:[#allocation3 + $0xd0] sm:$0xff] %v22028_v50  ;;  %v5557_v36 = vld [vmem:[#allocation3 + $0xc8] sm:$0xff]  ;;  %7308 = vmatprep.subr.bf16.mxu1 %v18647_v13 }
 0x3ee   :  { %5495 = vst.msk [vmem:[#allocation3 + $0xd8] sm:$0xff] %vm5404_vm2, %v5439_v60  ;;  %v4150_v30 = vpop.f32.mrb[8].mxu0  ;;  %v5112_v53 = vpop.f32.mrb[8].mxu1  ;;  %7309 = vmatpush1.bf16.msra.mxu1 %v18645_v11  ;;  %v18660_v60 = vld [vmem:[%s24994_s3 + $0x168] ss:$16 sps:$4 sm:$0xff]  }
 0x3ef   :  { %v5331_v41 = vmax.f32 %v4150_v30, %v5112_v53  ;;  %v4152_v63 = vpop.f32.mrb[9].mxu0  ;;  %v5114_v49 = vpop.f32.mrb[9].mxu1 }
 0x3f0   :  { %v5332_v9 = vmax.f32 %v4152_v63, %v5114_v49  ;;  %v4154_v29 = vpop.f32.mrb[10].mxu0  ;;  %v5116_v17 = vpop.f32.mrb[10].mxu1  ;;  %v18663_v49 = vld [vmem:[%s24994_s3 + $0x188] ss:$16 sps:$4 sm:$0xff]  }
 0x3f1   :  { %v5333_v46 = vmax.f32 %v4154_v29, %v5116_v17  ;;  %v4156_v44 = vpop.f32.mrb[11].mxu0  ;;  %v5118_v37 = vpop.f32.mrb[11].mxu1 }
 0x3f2   :  { %v5334_v8 = vmax.f32 %v4156_v44, %v5118_v37 }
 0x3f3   :  { %v22054_v48 = vpack.c.bf16 %v5333_v46, %v5331_v41  ;;  %6192 = vmatmul.mubr.bf16.gmra.mrb[116].mxu0 %v21994_v10  ;;  %6505 = vmatmul.mubr.bf16.gmra.mrb[116].mxu1 %v21994_v10  ;;  %v18650_v10 = vld [vmem:[%s24994_s3 + $0x10c] ss:$16 sps:$4 sm:$0xff]  }
 0x3f4   :  { %v5441_v59 = vpack.c.bf16 %v5334_v8, %v5332_v9  ;;  %15800 = vmatprep.mubr.msk.bf16.mxu0 %vm5404_vm2, %v5557_v36  ;;  %15828 = vmatprep.mubr.msk.bf16.mxu1 %vm5404_vm2, %v5557_v36  ;;  %v18668_v8 = vld [vmem:[%s24994_s3 + $0x1ac] ss:$16 sps:$4 sm:$0xff]   ;;  %v18666_v36 = vld [vmem:[%s24994_s3 + $0x1a8] ss:$16 sps:$4 sm:$0xff]  }
 0x3f5   :  { %5496 = vst [vmem:[#allocation3 + $0xe0] sm:$0xff] %v22054_v48  ;;  %7310 = vmatprep.subr.bf16.mxu1 %v18650_v10  ;;  %v5559_v4 = vld [vmem:[#allocation3 + $0xd8] sm:$0xff] }
 0x3f6   :  { %5497 = vst.msk [vmem:[#allocation3 + $0xe8] sm:$0xff] %vm5404_vm2, %v5441_v59  ;;  %v4160_v5 = vpop.f32.mrb[12].mxu0  ;;  %v5122_v42 = vpop.f32.mrb[12].mxu1  ;;  %7311 = vmatpush1.bf16.msra.mxu1 %v18648_v52 }
 0x3f7   :  { %v5335_v40 = vmax.f32 %v4160_v5, %v5122_v42  ;;  %v4162_v23 = vpop.f32.mrb[13].mxu0  ;;  %v5124_v43 = vpop.f32.mrb[13].mxu1  ;;  %7312 = vmatprep.subr.bf16.mxu1 %v18653_v31 }
 0x3f8   :  { %v5336_v47 = vmax.f32 %v4162_v23, %v5124_v43  ;;  %v4164_v19 = vpop.f32.mrb[14].mxu0  ;;  %v5126_v54 = vpop.f32.mrb[14].mxu1 }
 0x3f9   :  { %v5337_v18 = vmax.f32 %v4164_v19, %v5126_v54  ;;  %v4166_v7 = vpop.f32.mrb[15].mxu0  ;;  %v5128_v51 = vpop.f32.mrb[15].mxu1 }
 0x3fa   :  { %v5338_v38 = vmax.f32 %v4166_v7, %v5128_v51  ;;  %7313 = vmatpush1.bf16.msra.mxu1 %v18651_v3 }
 0x3fb   :  { %v22074_v58 = vpack.c.bf16 %v5337_v18, %v5335_v40  ;;  %6202 = vmatmul.mubr.bf16.gmra.mrb[120].mxu0 %v22014_v32  ;;  %6515 = vmatmul.mubr.bf16.gmra.mrb[120].mxu1 %v22014_v32  ;;  %v18656_v32 = vld [vmem:[%s24994_s3 + $0x1a4] ss:$16 sps:$4 sm:$0xff]  }
 0x3fc   :  { %v5443_v0 = vpack.c.bf16 %v5338_v38, %v5336_v47  ;;  %15801 = vmatprep.mubr.msk.bf16.mxu0 %vm5404_vm2, %v5559_v4  ;;  %15829 = vmatprep.mubr.msk.bf16.mxu1 %vm5404_vm2, %v5559_v4 }
 0x3fd   :  { %5498 = vst [vmem:[#allocation3 + $0xf0] sm:$0xff] %v22074_v58  ;;  %7007 = vmatprep.subr.bf16.mxu0 %v18656_v32  ;;  %7314 = vmatprep.subr.bf16.mxu1 %v18659_v56  ;;  %v22104_v53 = vld [vmem:[#allocation3 + $0xe8] sm:$0xff] }
 0x3fe   :  { %5499 = vst.msk [vmem:[#allocation3 + $0xf8] sm:$0xff] %vm5404_vm2, %v5443_v0  ;;  %v4170_v57 = vpop.f32.mrb[16].mxu0  ;;  %v5132_v34 = vpop.f32.mrb[16].mxu1  ;;  %7008 = vmatpush1.bf16.msra.mxu0 %v18654_v33  ;;  %7315 = vmatpush1.bf16.msra.mxu1 %v18657_v2 }
 0x3ff   :  { %v5339_v22 = vmax.f32 %v4170_v57, %v5132_v34  ;;  %v4172_v45 = vpop.f32.mrb[17].mxu0  ;;  %v5134_v15 = vpop.f32.mrb[17].mxu1  ;;  %7316 = vmatprep.subr.bf16.mxu1 %v18662_v24 }
 0x400   :  { %v5340_v62 = vmax.f32 %v4172_v45, %v5134_v15  ;;  %v4174_v35 = vpop.f32.mrb[18].mxu0  ;;  %v5136_v12 = vpop.f32.mrb[18].mxu1 }
 0x401   :  { %v5341_v14 = vmax.f32 %v4174_v35, %v5136_v12  ;;  %v4176_v25 = vpop.f32.mrb[19].mxu0  ;;  %v5138_v28 = vpop.f32.mrb[19].mxu1 }
 0x402   :  { %v5342_v39 = vmax.f32 %v4176_v25, %v5138_v28  ;;  %7317 = vmatpush1.bf16.msra.mxu1 %v18660_v60 }
 0x403   :  { %v22100_v30 = vpack.c.bf16 %v5341_v14, %v5339_v22  ;;  %6212 = vmatmul.mubr.bf16.gmra.mrb[124].mxu0 %v22028_v50  ;;  %6525 = vmatmul.mubr.bf16.gmra.mrb[124].mxu1 %v22028_v50  ;;  %v18671_v50 = vld [vmem:[%s24994_s3 + $0x384] ss:$16 sps:$4 sm:$0xff]  }
 0x404   :  { %v5445_v6 = vpack.c.bf16 %v5342_v39, %v5340_v62  ;;  %15802 = vmatprep.mubr.msk.bf16.mxu0 %vm5404_vm2, %v22104_v53  ;;  %15830 = vmatprep.mubr.msk.bf16.mxu1 %vm5404_vm2, %v22104_v53 }
 0x405   :  { %5500 = vst [vmem:[#allocation3 + $0x100] sm:$0xff] %v22100_v30  ;;  %7318 = vmatprep.subr.bf16.mxu1 %v18665_v61  ;;  %8084 = vmatprep.subr.bf16.mxu0 %v18671_v50  ;;  %v22131_v5 = vld [vmem:[#allocation3 + $0xf8] sm:$0xff] }
 0x406   :  { %5501 = vst.msk [vmem:[#allocation3 + $0x108] sm:$0xff] %vm5404_vm2, %v5445_v6  ;;  %v4180_v41 = vpop.f32.mrb[20].mxu0  ;;  %v5142_v63 = vpop.f32.mrb[20].mxu1  ;;  %7319 = vmatpush1.bf16.msra.mxu1 %v18663_v49 }
 0x407   :  { %v5343_v1 = vmax.f32 %v4180_v41, %v5142_v63  ;;  %v4182_v55 = vpop.f32.mrb[21].mxu0  ;;  %v5144_v9 = vpop.f32.mrb[21].mxu1  ;;  %7320 = vmatprep.subr.bf16.mxu1 %v18668_v8 }
 0x408   :  { %v5344_v29 = vmax.f32 %v4182_v55, %v5144_v9  ;;  %v4184_v17 = vpop.f32.mrb[22].mxu0  ;;  %v5146_v46 = vpop.f32.mrb[22].mxu1 }
 0x409   :  { %v5345_v44 = vmax.f32 %v4184_v17, %v5146_v46  ;;  %v4186_v37 = vpop.f32.mrb[23].mxu0  ;;  %v5148_v13 = vpop.f32.mrb[23].mxu1 }
 0x40a   :  { %v5346_v11 = vmax.f32 %v4186_v37, %v5148_v13  ;;  %7321 = vmatpush1.bf16.msra.mxu1 %v18666_v36 }
 0x40b   :  { %v22127_v59 = vpack.c.bf16 %v5345_v44, %v5343_v1  ;;  %6222 = vmatmul.mubr.bf16.gmra.mrb[128].mxu0 %v22054_v48  ;;  %6535 = vmatmul.mubr.bf16.gmra.mrb[128].mxu1 %v22054_v48 }
 0x40c   :  { %v5447_v42 = vpack.c.bf16 %v5346_v11, %v5344_v29  ;;  %15803 = vmatprep.mubr.msk.bf16.mxu0 %vm5404_vm2, %v22131_v5  ;;  %15831 = vmatprep.mubr.msk.bf16.mxu1 %vm5404_vm2, %v22131_v5 }
 0x40d   :  { %5502 = vst [vmem:[#allocation3 + $0x110] sm:$0xff] %v22127_v59  ;;  %v22143_v38 = vld [vmem:[#allocation3 + $0x108] sm:$0xff] }
 0x40e   :  { %5503 = vst.msk [vmem:[#allocation3 + $0x118] sm:$0xff] %vm5404_vm2, %v5447_v42  ;;  %v4190_v52 = vpop.f32.mrb[24].mxu0  ;;  %v5152_v10 = vpop.f32.mrb[24].mxu1 }
 0x40f   :  { %v5347_v40 = vmax.f32 %v4190_v52, %v5152_v10  ;;  %v4192_v23 = vpop.f32.mrb[25].mxu0  ;;  %v5154_v48 = vpop.f32.mrb[25].mxu1 }
 0x410   :  { %v5348_v43 = vmax.f32 %v4192_v23, %v5154_v48  ;;  %v4194_v47 = vpop.f32.mrb[26].mxu0  ;;  %v5156_v19 = vpop.f32.mrb[26].mxu1 }
 0x411   :  { %v5349_v54 = vmax.f32 %v4194_v47, %v5156_v19  ;;  %v4196_v18 = vpop.f32.mrb[27].mxu0  ;;  %v5158_v7 = vpop.f32.mrb[27].mxu1 }
 0x412   :  { %v5350_v51 = vmax.f32 %v4196_v18, %v5158_v7 }
 0x413   :  { %v22139_v31 = vpack.c.bf16 %v5349_v54, %v5347_v40  ;;  %6232 = vmatmul.mubr.bf16.gmra.mrb[132].mxu0 %v22074_v58  ;;  %6545 = vmatmul.mubr.bf16.gmra.mrb[132].mxu1 %v22074_v58 }
 0x414   :  { %v5449_v3 = vpack.c.bf16 %v5350_v51, %v5348_v43  ;;  %15804 = vmatprep.mubr.msk.bf16.mxu0 %vm5404_vm2, %v22143_v38  ;;  %15832 = vmatprep.mubr.msk.bf16.mxu1 %vm5404_vm2, %v22143_v38 }
 0x415   :  { %5504 = vst [vmem:[#allocation3 + $0x120] sm:$0xff] %v22139_v31  ;;  %v22155_v35 = vld [vmem:[#allocation3 + $0x118] sm:$0xff] }
 0x416   :  { %5505 = vst.msk [vmem:[#allocation3 + $0x128] sm:$0xff] %vm5404_vm2, %v5449_v3  ;;  %v4200_v4 = vpop.f32.mrb[28].mxu0  ;;  %v5162_v0 = vpop.f32.mrb[28].mxu1 }
 0x417   :  { %v5351_v57 = vmax.f32 %v4200_v4, %v5162_v0  ;;  %v4202_v34 = vpop.f32.mrb[29].mxu0  ;;  %v5164_v33 = vpop.f32.mrb[29].mxu1 }
 0x418   :  { %v5352_v32 = vmax.f32 %v4202_v34, %v5164_v33  ;;  %v4204_v58 = vpop.f32.mrb[30].mxu0  ;;  %v5166_v22 = vpop.f32.mrb[30].mxu1 }
 0x419   :  { %v5353_v45 = vmax.f32 %v4204_v58, %v5166_v22  ;;  %v4206_v15 = vpop.f32.mrb[31].mxu0  ;;  %v5168_v2 = vpop.f32.mrb[31].mxu1 }
 0x41a   :  { %v5354_v56 = vmax.f32 %v4206_v15, %v5168_v2 }
 0x41b   :  { %v22151_v62 = vpack.c.bf16 %v5353_v45, %v5351_v57  ;;  %6242 = vmatmul.mubr.bf16.gmra.mrb[136].mxu0 %v22100_v30  ;;  %6555 = vmatmul.mubr.bf16.gmra.mrb[136].mxu1 %v22100_v30 }
 0x41c   :  { %v5451_v12 = vpack.c.bf16 %v5354_v56, %v5352_v32  ;;  %15805 = vmatprep.mubr.msk.bf16.mxu0 %vm5404_vm2, %v22155_v35  ;;  %15833 = vmatprep.mubr.msk.bf16.mxu1 %vm5404_vm2, %v22155_v35 }
 0x41d   :  { %5506 = vst [vmem:[#allocation3 + $0x130] sm:$0xff] %v22151_v62  ;;  %v22167_v55 = vld [vmem:[#allocation3 + $0x128] sm:$0xff] }
 0x41e   :  { %5507 = vst.msk [vmem:[#allocation3 + $0x138] sm:$0xff] %vm5404_vm2, %v5451_v12  ;;  %v4210_v14 = vpop.f32.mrb[32].mxu0  ;;  %v5172_v25 = vpop.f32.mrb[32].mxu1 }
 0x41f   :  { %v5355_v28 = vmax.f32 %v4210_v14, %v5172_v25  ;;  %v4212_v24 = vpop.f32.mrb[33].mxu0  ;;  %v5174_v39 = vpop.f32.mrb[33].mxu1 }
 0x420   :  { %v5356_v60 = vmax.f32 %v4212_v24, %v5174_v39  ;;  %v4214_v61 = vpop.f32.mrb[34].mxu0  ;;  %v5176_v6 = vpop.f32.mrb[34].mxu1 }
 0x421   :  { %v5357_v50 = vmax.f32 %v4214_v61, %v5176_v6  ;;  %v4216_v41 = vpop.f32.mrb[35].mxu0  ;;  %v5178_v63 = vpop.f32.mrb[35].mxu1 }
 0x422   :  { %v5358_v49 = vmax.f32 %v4216_v41, %v5178_v63 }
 0x423   :  { %v22163_v1 = vpack.c.bf16 %v5357_v50, %v5355_v28  ;;  %6252 = vmatmul.mubr.bf16.gmra.mrb[140].mxu0 %v22127_v59  ;;  %6565 = vmatmul.mubr.bf16.gmra.mrb[140].mxu1 %v22127_v59 }
 0x424   :  { %v5453_v9 = vpack.c.bf16 %v5358_v49, %v5356_v60  ;;  %15806 = vmatprep.mubr.msk.bf16.mxu0 %vm5404_vm2, %v22167_v55  ;;  %15834 = vmatprep.mubr.msk.bf16.mxu1 %vm5404_vm2, %v22167_v55 }
 0x425   :  { %5508 = vst [vmem:[#allocation3 + $0x140] sm:$0xff] %v22163_v1  ;;  %v22179_v23 = vld [vmem:[#allocation3 + $0x138] sm:$0xff] }
 0x426   :  { %5509 = vst.msk [vmem:[#allocation3 + $0x148] sm:$0xff] %vm5404_vm2, %v5453_v9  ;;  %v4220_v29 = vpop.f32.mrb[36].mxu0  ;;  %v5182_v17 = vpop.f32.mrb[36].mxu1 }
 0x427   :  { %v5359_v46 = vmax.f32 %v4220_v29, %v5182_v17  ;;  %v4222_v44 = vpop.f32.mrb[37].mxu0  ;;  %v5184_v37 = vpop.f32.mrb[37].mxu1 }
 0x428   :  { %v5360_v13 = vmax.f32 %v4222_v44, %v5184_v37  ;;  %v4224_v8 = vpop.f32.mrb[38].mxu0  ;;  %v5186_v11 = vpop.f32.mrb[38].mxu1 }
 0x429   :  { %v5361_v36 = vmax.f32 %v4224_v8, %v5186_v11  ;;  %v4226_v42 = vpop.f32.mrb[39].mxu0  ;;  %v5188_v52 = vpop.f32.mrb[39].mxu1 }
 0x42a   :  { %v5362_v10 = vmax.f32 %v4226_v42, %v5188_v52 }
 0x42b   :  { %v22175_v40 = vpack.c.bf16 %v5361_v36, %v5359_v46  ;;  %6262 = vmatmul.mubr.bf16.gmra.mrb[144].mxu0 %v22139_v31  ;;  %6575 = vmatmul.mubr.bf16.gmra.mrb[144].mxu1 %v22139_v31 }
 0x42c   :  { %v5455_v48 = vpack.c.bf16 %v5362_v10, %v5360_v13  ;;  %15807 = vmatprep.mubr.msk.bf16.mxu0 %vm5404_vm2, %v22179_v23  ;;  %15835 = vmatprep.mubr.msk.bf16.mxu1 %vm5404_vm2, %v22179_v23 }
 0x42d   :  { %5510 = vst [vmem:[#allocation3 + $0x150] sm:$0xff] %v22175_v40  ;;  %v22191_v32 = vld [vmem:[#allocation3 + $0x148] sm:$0xff] }
 0x42e   :  { %5511 = vst.msk [vmem:[#allocation3 + $0x158] sm:$0xff] %vm5404_vm2, %v5455_v48  ;;  %v4230_v43 = vpop.f32.mrb[40].mxu0  ;;  %v5192_v47 = vpop.f32.mrb[40].mxu1 }
 0x42f   :  { %v5363_v19 = vmax.f32 %v4230_v43, %v5192_v47  ;;  %v4232_v54 = vpop.f32.mrb[41].mxu0  ;;  %v5194_v18 = vpop.f32.mrb[41].mxu1 }
 0x430   :  { %v5364_v7 = vmax.f32 %v4232_v54, %v5194_v18  ;;  %v4234_v51 = vpop.f32.mrb[42].mxu0  ;;  %v5196_v3 = vpop.f32.mrb[42].mxu1 }
 0x431   :  { %v5365_v4 = vmax.f32 %v4234_v51, %v5196_v3  ;;  %v4236_v0 = vpop.f32.mrb[43].mxu0  ;;  %v5198_v57 = vpop.f32.mrb[43].mxu1 }
 0x432   :  { %v5366_v34 = vmax.f32 %v4236_v0, %v5198_v57 }
 0x433   :  { %v22187_v33 = vpack.c.bf16 %v5365_v4, %v5363_v19  ;;  %6272 = vmatmul.mubr.bf16.gmra.mrb[148].mxu0 %v22151_v62  ;;  %6585 = vmatmul.mubr.bf16.gmra.mrb[148].mxu1 %v22151_v62 }
 0x434   :  { %v5457_v58 = vpack.c.bf16 %v5366_v34, %v5364_v7  ;;  %15808 = vmatprep.mubr.msk.bf16.mxu0 %vm5404_vm2, %v22191_v32  ;;  %15836 = vmatprep.mubr.msk.bf16.mxu1 %vm5404_vm2, %v22191_v32 }
 0x435   :  { %5512 = vst [vmem:[#allocation3 + $0x160] sm:$0xff] %v22187_v33  ;;  %v22203_v6 = vld [vmem:[#allocation3 + $0x158] sm:$0xff] }
 0x436   :  { %5513 = vst.msk [vmem:[#allocation3 + $0x168] sm:$0xff] %vm5404_vm2, %v5457_v58  ;;  %v4240_v22 = vpop.f32.mrb[44].mxu0  ;;  %v5202_v45 = vpop.f32.mrb[44].mxu1 }
 0x437   :  { %v5367_v15 = vmax.f32 %v4240_v22, %v5202_v45  ;;  %v4242_v2 = vpop.f32.mrb[45].mxu0  ;;  %v5204_v56 = vpop.f32.mrb[45].mxu1 }
 0x438   :  { %v5368_v12 = vmax.f32 %v4242_v2, %v5204_v56  ;;  %v4244_v14 = vpop.f32.mrb[46].mxu0  ;;  %v5206_v25 = vpop.f32.mrb[46].mxu1 }
 0x439   :  { %v5369_v28 = vmax.f32 %v4244_v14, %v5206_v25  ;;  %v4246_v24 = vpop.f32.mrb[47].mxu0  ;;  %v5208_v39 = vpop.f32.mrb[47].mxu1 }
 0x43a   :  { %v5370_v60 = vmax.f32 %v4246_v24, %v5208_v39 }
 0x43b   :  { %v22199_v61 = vpack.c.bf16 %v5369_v28, %v5367_v15  ;;  %6282 = vmatmul.mubr.bf16.gmra.mrb[152].mxu0 %v22163_v1  ;;  %6595 = vmatmul.mubr.bf16.gmra.mrb[152].mxu1 %v22163_v1 }
 0x43c   :  { %v5459_v50 = vpack.c.bf16 %v5370_v60, %v5368_v12  ;;  %15809 = vmatprep.mubr.msk.bf16.mxu0 %vm5404_vm2, %v22203_v6  ;;  %15837 = vmatprep.mubr.msk.bf16.mxu1 %vm5404_vm2, %v22203_v6 }
 0x43d   :  { %5514 = vst [vmem:[#allocation3 + $0x170] sm:$0xff] %v22199_v61  ;;  %v22215_v42 = vld [vmem:[#allocation3 + $0x168] sm:$0xff] }
 0x43e   :  { %5515 = vst.msk [vmem:[#allocation3 + $0x178] sm:$0xff] %vm5404_vm2, %v5459_v50  ;;  %v4250_v41 = vpop.f32.mrb[48].mxu0  ;;  %v5212_v63 = vpop.f32.mrb[48].mxu1 }
 0x43f   :  { %v5371_v49 = vmax.f32 %v4250_v41, %v5212_v63  ;;  %v4252_v9 = vpop.f32.mrb[49].mxu0  ;;  %v5214_v29 = vpop.f32.mrb[49].mxu1 }
 0x440   :  { %v5372_v17 = vmax.f32 %v4252_v9, %v5214_v29  ;;  %v4254_v46 = vpop.f32.mrb[50].mxu0  ;;  %v5216_v44 = vpop.f32.mrb[50].mxu1 }
 0x441   :  { %v5373_v37 = vmax.f32 %v4254_v46, %v5216_v44  ;;  %v4256_v13 = vpop.f32.mrb[51].mxu0  ;;  %v5218_v8 = vpop.f32.mrb[51].mxu1 }
 0x442   :  { %v5374_v11 = vmax.f32 %v4256_v13, %v5218_v8 }
 0x443   :  { %v22211_v36 = vpack.c.bf16 %v5373_v37, %v5371_v49  ;;  %6292 = vmatmul.mubr.bf16.gmra.mrb[156].mxu0 %v22175_v40  ;;  %6605 = vmatmul.mubr.bf16.gmra.mrb[156].mxu1 %v22175_v40 }
 0x444   :  { %v5461_v52 = vpack.c.bf16 %v5374_v11, %v5372_v17  ;;  %15810 = vmatprep.mubr.msk.bf16.mxu0 %vm5404_vm2, %v22215_v42  ;;  %15838 = vmatprep.mubr.msk.bf16.mxu1 %vm5404_vm2, %v22215_v42 }
 0x445   :  { %5516 = vst [vmem:[#allocation3 + $0x180] sm:$0xff] %v22211_v36  ;;  %v22227_v34 = vld [vmem:[#allocation3 + $0x178] sm:$0xff] }
 0x446   :  { %5517 = vst.msk [vmem:[#allocation3 + $0x188] sm:$0xff] %vm5404_vm2, %v5461_v52  ;;  %v4260_v10 = vpop.f32.mrb[52].mxu0  ;;  %v5222_v48 = vpop.f32.mrb[52].mxu1 }
 0x447   :  { %v5375_v43 = vmax.f32 %v4260_v10, %v5222_v48  ;;  %v4262_v47 = vpop.f32.mrb[53].mxu0  ;;  %v5224_v19 = vpop.f32.mrb[53].mxu1 }
 0x448   :  { %v5376_v54 = vmax.f32 %v4262_v47, %v5224_v19  ;;  %v4264_v18 = vpop.f32.mrb[54].mxu0  ;;  %v5226_v7 = vpop.f32.mrb[54].mxu1 }
 0x449   :  { %v5377_v51 = vmax.f32 %v4264_v18, %v5226_v7  ;;  %v4266_v3 = vpop.f32.mrb[55].mxu0  ;;  %v5228_v4 = vpop.f32.mrb[55].mxu1 }
 0x44a   :  { %v5378_v0 = vmax.f32 %v4266_v3, %v5228_v4 }
 0x44b   :  { %v22223_v57 = vpack.c.bf16 %v5377_v51, %v5375_v43  ;;  %6302 = vmatmul.mubr.bf16.gmra.mrb[160].mxu0 %v22187_v33  ;;  %6615 = vmatmul.mubr.bf16.gmra.mrb[160].mxu1 %v22187_v33 }
 0x44c   :  { %v5463_v58 = vpack.c.bf16 %v5378_v0, %v5376_v54  ;;  %15811 = vmatprep.mubr.msk.bf16.mxu0 %vm5404_vm2, %v22227_v34  ;;  %15839 = vmatprep.mubr.msk.bf16.mxu1 %vm5404_vm2, %v22227_v34 }
 0x44d   :  { %5518 = vst [vmem:[#allocation3 + $0x190] sm:$0xff] %v22223_v57  ;;  %v22239_v41 = vld [vmem:[#allocation3 + $0x188] sm:$0xff] }
 0x44e   :  { %5519 = vst.msk [vmem:[#allocation3 + $0x198] sm:$0xff] %vm5404_vm2, %v5463_v58  ;;  %v4270_v22 = vpop.f32.mrb[56].mxu0  ;;  %v5232_v45 = vpop.f32.mrb[56].mxu1 }
 0x44f   :  { %v5379_v15 = vmax.f32 %v4270_v22, %v5232_v45  ;;  %v4272_v2 = vpop.f32.mrb[57].mxu0  ;;  %v5234_v56 = vpop.f32.mrb[57].mxu1 }
 0x450   :  { %v5380_v12 = vmax.f32 %v4272_v2, %v5234_v56  ;;  %v4274_v14 = vpop.f32.mrb[58].mxu0  ;;  %v5236_v25 = vpop.f32.mrb[58].mxu1 }
 0x451   :  { %v5381_v28 = vmax.f32 %v4274_v14, %v5236_v25  ;;  %v4276_v24 = vpop.f32.mrb[59].mxu0  ;;  %v5238_v39 = vpop.f32.mrb[59].mxu1 }
 0x452   :  { %v5382_v60 = vmax.f32 %v4276_v24, %v5238_v39 }
 0x453   :  { %v22235_v50 = vpack.c.bf16 %v5381_v28, %v5379_v15  ;;  %6312 = vmatmul.mubr.bf16.gmra.mrb[164].mxu0 %v22199_v61  ;;  %6625 = vmatmul.mubr.bf16.gmra.mrb[164].mxu1 %v22199_v61 }
 0x454   :  { %v5465_v63 = vpack.c.bf16 %v5382_v60, %v5380_v12  ;;  %15812 = vmatprep.mubr.msk.bf16.mxu0 %vm5404_vm2, %v22239_v41  ;;  %15840 = vmatprep.mubr.msk.bf16.mxu1 %vm5404_vm2, %v22239_v41 }
 0x455   :  { %5520 = vst [vmem:[#allocation3 + $0x1a0] sm:$0xff] %v22235_v50  ;;  %v22251_v43 = vld [vmem:[#allocation3 + $0x198] sm:$0xff] }
 0x456   :  { %5521 = vst.msk [vmem:[#allocation3 + $0x1a8] sm:$0xff] %vm5404_vm2, %v5465_v63  ;;  %v4280_v49 = vpop.f32.mrb[60].mxu0  ;;  %v5242_v9 = vpop.f32.mrb[60].mxu1 }
 0x457   :  { %v5383_v29 = vmax.f32 %v4280_v49, %v5242_v9  ;;  %v4282_v17 = vpop.f32.mrb[61].mxu0  ;;  %v5244_v46 = vpop.f32.mrb[61].mxu1 }
 0x458   :  { %v5384_v44 = vmax.f32 %v4282_v17, %v5244_v46  ;;  %v4284_v37 = vpop.f32.mrb[62].mxu0  ;;  %v5246_v13 = vpop.f32.mrb[62].mxu1 }
 0x459   :  { %v5385_v8 = vmax.f32 %v4284_v37, %v5246_v13  ;;  %v4286_v11 = vpop.f32.mrb[63].mxu0  ;;  %v5248_v52 = vpop.f32.mrb[63].mxu1 }
 0x45a   :  { %v5386_v10 = vmax.f32 %v4286_v11, %v5248_v52 }
 0x45b   :  { %v22247_v48 = vpack.c.bf16 %v5385_v8, %v5383_v29  ;;  %6322 = vmatmul.mubr.bf16.gmra.mrb[168].mxu0 %v22211_v36  ;;  %6635 = vmatmul.mubr.bf16.gmra.mrb[168].mxu1 %v22211_v36 }
 0x45c   :  { %v5467_v47 = vpack.c.bf16 %v5386_v10, %v5384_v44  ;;  %15813 = vmatprep.mubr.msk.bf16.mxu0 %vm5404_vm2, %v22251_v43  ;;  %15841 = vmatprep.mubr.msk.bf16.mxu1 %vm5404_vm2, %v22251_v43 }
 0x45d   :  { %5522 = vst [vmem:[#allocation3 + $0x1b0] sm:$0xff] %v22247_v48  ;;  %v22263_v56 = vld [vmem:[#allocation3 + $0x1a8] sm:$0xff] }
 0x45e   :  { %5523 = vst.msk [vmem:[#allocation3 + $0x1b8] sm:$0xff] %vm5404_vm2, %v5467_v47  ;;  %v4290_v19 = vpop.f32.mrb[64].mxu0  ;;  %v5252_v54 = vpop.f32.mrb[64].mxu1 }
 0x45f   :  { %v5387_v18 = vmax.f32 %v4290_v19, %v5252_v54  ;;  %v4292_v7 = vpop.f32.mrb[65].mxu0  ;;  %v5254_v51 = vpop.f32.mrb[65].mxu1 }
 0x460   :  { %v5388_v3 = vmax.f32 %v4292_v7, %v5254_v51  ;;  %v4294_v4 = vpop.f32.mrb[66].mxu0  ;;  %v5256_v0 = vpop.f32.mrb[66].mxu1 }
 0x461   :  { %v5389_v58 = vmax.f32 %v4294_v4, %v5256_v0  ;;  %v4296_v22 = vpop.f32.mrb[67].mxu0  ;;  %v5258_v45 = vpop.f32.mrb[67].mxu1 }
 0x462   :  { %v5390_v15 = vmax.f32 %v4296_v22, %v5258_v45  ;;  %v18695_v45 = vld [vmem:[%s24994_s3 + $0x38c] ss:$16 sps:$4 sm:$0xff]  }
 0x463   :  { %v22259_v2 = vpack.c.bf16 %v5389_v58, %v5387_v18  ;;  %6332 = vmatmul.mubr.bf16.gmra.mrb[172].mxu0 %v22223_v57  ;;  %6645 = vmatmul.mubr.bf16.gmra.mrb[172].mxu1 %v22223_v57 }
 0x464   :  { %v5469_v12 = vpack.c.bf16 %v5390_v15, %v5388_v3  ;;  %15814 = vmatprep.mubr.msk.bf16.mxu0 %vm5404_vm2, %v22263_v56  ;;  %15842 = vmatprep.mubr.msk.bf16.mxu1 %vm5404_vm2, %v22263_v56 }
 0x465   :  { %5524 = vst [vmem:[#allocation3 + $0x1c0] sm:$0xff] %v22259_v2  ;;  %v22273_v37 = vld [vmem:[#allocation3 + $0x1b8] sm:$0xff]  ;;  %8397 = vmatprep.subr.bf16.mxu1 %v18695_v45  ;;  %v18681_v45 = vld [vmem:[%s24994_s3 + $0x400] ss:$16 sps:$4 sm:$0xff]  }
 0x466   :  { %5525 = vst.msk [vmem:[#allocation3 + $0x1c8] sm:$0xff] %vm5404_vm2, %v5469_v12  ;;  %v4300_v14 = vpop.f32.mrb[68].mxu0  ;;  %v5262_v25 = vpop.f32.mrb[68].mxu1 }
 0x467   :  { %v5391_v28 = vmax.f32 %v4300_v14, %v5262_v25  ;;  %v4302_v24 = vpop.f32.mrb[69].mxu0  ;;  %v5264_v39 = vpop.f32.mrb[69].mxu1 }
 0x468   :  { %v5392_v60 = vmax.f32 %v4302_v24, %v5264_v39  ;;  %v4304_v63 = vpop.f32.mrb[70].mxu0  ;;  %v5266_v49 = vpop.f32.mrb[70].mxu1 }
 0x469   :  { %v5393_v9 = vmax.f32 %v4304_v63, %v5266_v49  ;;  %v4306_v29 = vpop.f32.mrb[71].mxu0  ;;  %v5268_v17 = vpop.f32.mrb[71].mxu1 }
 0x46a   :  { %v5394_v46 = vmax.f32 %v4306_v29, %v5268_v17 }
 0x46b   :  { %v5470_v44 = vpack.c.bf16 %v5393_v9, %v5391_v28  ;;  %6342 = vmatmul.mubr.bf16.gmra.mrb[176].mxu0 %v22235_v50  ;;  %6655 = vmatmul.mubr.bf16.gmra.mrb[176].mxu1 %v22235_v50 }
 0x46c   :  { %v5471_v13 = vpack.c.bf16 %v5394_v46, %v5392_v60  ;;  %15815 = vmatprep.mubr.msk.bf16.mxu0 %vm5404_vm2, %v22273_v37  ;;  %15843 = vmatprep.mubr.msk.bf16.mxu1 %vm5404_vm2, %v22273_v37 }
 0x46d   :  { %5526 = vst [vmem:[#allocation3 + $0x1d0] sm:$0xff] %v5470_v44  ;;  %v5645_v58 = vld [vmem:[#allocation3 + $0x1c8] sm:$0xff] }
 0x46e   :  { %5527 = vst.msk [vmem:[#allocation3 + $0x1d8] sm:$0xff] %vm5404_vm2, %v5471_v13  ;;  %v4310_v8 = vpop.f32.mrb[72].mxu0  ;;  %v5272_v11 = vpop.f32.mrb[72].mxu1 }
 0x46f   :  { %v5395_v52 = vmax.f32 %v4310_v8, %v5272_v11  ;;  %v4312_v10 = vpop.f32.mrb[73].mxu0  ;;  %v5274_v47 = vpop.f32.mrb[73].mxu1  ;;  %v5533_v8 = vld [vmem:[#allocation3 + $0x8] sm:$0xff]  ;;  %v5535_v11 = vld [vmem:[#allocation3 + $0x18] sm:$0xff] }
 0x470   :  { %v5396_v19 = vmax.f32 %v4312_v10, %v5274_v47  ;;  %v4314_v54 = vpop.f32.mrb[74].mxu0  ;;  %v5276_v18 = vpop.f32.mrb[74].mxu1  ;;  %v18693_v10 = vld [vmem:[%s24994_s3 + $0x388] ss:$16 sps:$4 sm:$0xff]   ;;  %v19188_v47 = vld [vmem:[#allocation3] sm:$0xff] }
 0x471   :  { %v5397_v7 = vmax.f32 %v4314_v54, %v5276_v18  ;;  %v4316_v51 = vpop.f32.mrb[75].mxu0  ;;  %v5278_v3 = vpop.f32.mrb[75].mxu1  ;;  %v18677_v54 = vld [vmem:[%s24994_s3 + $0x3c4] ss:$16 sps:$4 sm:$0xff]   ;;  %v18699_v18 = vld [vmem:[%s24994_s3 + $0x3a8] ss:$16 sps:$4 sm:$0xff]  }
 0x472   :  { %v5398_v4 = vmax.f32 %v4316_v51, %v5278_v3  ;;  %v18680_v51 = vld [vmem:[%s24994_s3 + $0x3e4] ss:$16 sps:$4 sm:$0xff]   ;;  %v19189_v3 = vld [vmem:[#allocation3 + $0x28] sm:$0xff] }
 0x473   :  { %v5472_v0 = vpack.c.bf16 %v5397_v7, %v5395_v52  ;;  %6352 = vmatmul.mubr.bf16.gmra.mrb[180].mxu0 %v22247_v48  ;;  %6665 = vmatmul.mubr.bf16.gmra.mrb[180].mxu1 %v22247_v48  ;;  %v18674_v52 = vld [vmem:[%s24994_s3 + $0x3a4] ss:$16 sps:$4 sm:$0xff]   ;;  %v18675_v7 = vld [vmem:[%s24994_s3 + $0x3c0] ss:$16 sps:$4 sm:$0xff]  }
 0x474   :  { %v5473_v22 = vpack.c.bf16 %v5398_v4, %v5396_v19  ;;  %15816 = vmatprep.mubr.msk.bf16.mxu0 %vm5404_vm2, %v5645_v58  ;;  %15844 = vmatprep.mubr.msk.bf16.mxu1 %vm5404_vm2, %v5645_v58  ;;  %v18672_v19 = vld [vmem:[%s24994_s3 + $0x3a0] ss:$16 sps:$4 sm:$0xff]   ;;  %v18705_v4 = vld [vmem:[%s24994_s3 + $0x3c8] ss:$16 sps:$4 sm:$0xff]   ;;  %v18707_v58 = vld [vmem:[%s24994_s3 + $0x3cc] ss:$16 sps:$4 sm:$0xff]  }
 0x475   :  { %5528 = vst [vmem:[#allocation3 + $0x1e0] sm:$0xff] %v5472_v0  ;;  %v5647_v46 = vld [vmem:[#allocation3 + $0x1d8] sm:$0xff]  ;;  %v18678_v0 = vld [vmem:[%s24994_s3 + $0x3e0] ss:$16 sps:$4 sm:$0xff]  }
 0x476   :  { %5529 = vst.msk [vmem:[#allocation3 + $0x1e8] sm:$0xff] %vm5404_vm2, %v5473_v22  ;;  %v4320_v15 = vpop.f32.mrb[76].mxu0  ;;  %v5282_v12 = vpop.f32.mrb[76].mxu1  ;;  %v18683_v22 = vld [vmem:[%s24994_s3 + $0x404] ss:$16 sps:$4 sm:$0xff]  }
 0x477   :  { %v5399_v14 = vmax.f32 %v4320_v15, %v5282_v12  ;;  %v4322_v25 = vpop.f32.mrb[77].mxu0  ;;  %v5284_v28 = vpop.f32.mrb[77].mxu1  ;;  %v18686_v15 = vld [vmem:[%s24994_s3 + $0x424] ss:$16 sps:$4 sm:$0xff]   ;;  %v19190_v12 = vld [vmem:[#allocation3 + $0x38] sm:$0xff] }
 0x478   :  { %v5400_v24 = vmax.f32 %v4322_v25, %v5284_v28  ;;  %v4324_v39 = vpop.f32.mrb[78].mxu0  ;;  %v5286_v60 = vpop.f32.mrb[78].mxu1  ;;  %v18689_v25 = vld [vmem:[%s24994_s3 + $0x444] ss:$16 sps:$4 sm:$0xff]   ;;  %v18687_v28 = vld [vmem:[%s24994_s3 + $0x440] ss:$16 sps:$4 sm:$0xff]  }
 0x479   :  { %v5401_v63 = vmax.f32 %v4324_v39, %v5286_v60  ;;  %v4326_v49 = vpop.f32.mrb[79].mxu0  ;;  %v5288_v9 = vpop.f32.mrb[79].mxu1  ;;  %v19191_v39 = vld [vmem:[#allocation3 + $0x48] sm:$0xff] }
 0x47a   :  { %v5402_v29 = vmax.f32 %v4326_v49, %v5288_v9  ;;  %v18711_v60 = vld [vmem:[%s24994_s3 + $0x3e8] ss:$16 sps:$4 sm:$0xff]   ;;  %v18713_v49 = vld [vmem:[%s24994_s3 + $0x3ec] ss:$16 sps:$4 sm:$0xff]   ;;  %v18698_v9 = vld [vmem:[%s24994_s3 + $0x484] ss:$16 sps:$4 sm:$0xff]  }
 0x47b   :  { %v5474_v17 = vpack.c.bf16 %v5401_v63, %v5399_v14  ;;  %6362 = vmatmul.mubr.bf16.gmra.mrb[184].mxu0 %v22259_v2  ;;  %6675 = vmatmul.mubr.bf16.gmra.mrb[184].mxu1 %v22259_v2  ;;  %v18669_v2 = vld [vmem:[%s24994_s3 + $0x380] ss:$16 sps:$4 sm:$0xff]  }
 0x47c   :  { %v5475_v13 = vpack.c.bf16 %v5402_v29, %v5400_v24  ;;  %15817 = vmatprep.mubr.msk.bf16.mxu0 %vm5404_vm2, %v5647_v46  ;;  %15845 = vmatprep.mubr.msk.bf16.mxu1 %vm5404_vm2, %v5647_v46  ;;  %v18684_v14 = vld [vmem:[%s24994_s3 + $0x420] ss:$16 sps:$4 sm:$0xff]   ;;  %v18692_v24 = vld [vmem:[%s24994_s3 + $0x464] ss:$16 sps:$4 sm:$0xff]  }
 0x47d   :  { %5530 = vst [vmem:[#allocation3 + $0x1f0] sm:$0xff] %v5474_v17  ;;  %v18690_v63 = vld [vmem:[%s24994_s3 + $0x460] ss:$16 sps:$4 sm:$0xff]   ;;  %v18704_v17 = vld [vmem:[%s24994_s3 + $0x4a4] ss:$16 sps:$4 sm:$0xff]  }
 0x47e   :  { %5531 = vst.msk [vmem:[#allocation3 + $0x1f8] sm:$0xff] %vm5404_vm2, %v5475_v13  ;;  %v18696_v29 = vld [vmem:[%s24994_s3 + $0x480] ss:$16 sps:$4 sm:$0xff]   ;;  %v19193_v13 = vld [vmem:[#allocation3 + $0x58] sm:$0xff] }
 0x47f   :  { %v19192_v46 = vld [vmem:[#allocation3 + $0x40] sm:$0xff] }
 0x483   :  { %6372 = vmatmul.mubr.bf16.gmra.mrb[188].mxu0 %v5470_v44  ;;  %6685 = vmatmul.mubr.bf16.gmra.mrb[188].mxu1 %v5470_v44  ;;  %v18701_v44 = vld [vmem:[%s24994_s3 + $0x3ac] ss:$16 sps:$4 sm:$0xff]  }
 0x484   :  { %15902 = vmatprep.mubr.msk.bf16.mxu0 %vm5404_vm2, %v5533_v8  ;;  %15930 = vmatprep.mubr.msk.bf16.mxu1 %vm5404_vm2, %v5533_v8  ;;  %v18702_v8 = vld [vmem:[%s24994_s3 + $0x4a0] ss:$16 sps:$4 sm:$0xff]  }
 0x48b   :  { %7014 = vmatmul.mubr.bf16.vlgmr.msra.gmra.mrb[80].mxu0 %v19188_v47  ;;  %7327 = vmatmul.mubr.bf16.vlgmr.msra.gmra.mrb[80].mxu1 %v19188_v47 }
 0x48c   :  { %8085 = vmatpush1.bf16.msra.mxu0 %v18669_v2  ;;  %15903 = vmatprep.mubr.msk.bf16.mxu0 %vm5404_vm2, %v5535_v11  ;;  %v18710_v2 = vld [vmem:[%s24994_s3 + $0x4c4] ss:$16 sps:$4 sm:$0xff]  }
 0x48d   :  { %15931 = vmatprep.mubr.msk.bf16.mxu1 %vm5404_vm2, %v5535_v11  ;;  %8086 = vmatprep.subr.bf16.mxu0 %v18674_v52  ;;  %v18708_v11 = vld [vmem:[%s24994_s3 + $0x4c0] ss:$16 sps:$4 sm:$0xff]  }
 0x48e   :  { %8398 = vmatpush1.bf16.msra.mxu1 %v18693_v10  ;;  %v19194_v52 = vld [vmem:[#allocation3 + $0x50] sm:$0xff]  ;;  %v19195_v10 = vld [vmem:[#allocation3 + $0x68] sm:$0xff] }
 0x48f   :  { %8399 = vmatprep.subr.bf16.mxu1 %v18701_v44  ;;  %v18717_v44 = vld [vmem:[%s24994_s3 + $0x408] ss:$16 sps:$4 sm:$0xff]  }
 0x490   :  { %8087 = vmatpush1.bf16.msra.mxu0 %v18672_v19  ;;  %v18714_v19 = vld [vmem:[%s24994_s3 + $0x4e0] ss:$16 sps:$4 sm:$0xff]  }
 0x491   :  { %8088 = vmatprep.subr.bf16.mxu0 %v18677_v54  ;;  %v18719_v54 = vld [vmem:[%s24994_s3 + $0x40c] ss:$16 sps:$4 sm:$0xff]  }
 0x492   :  { %8400 = vmatpush1.bf16.msra.mxu1 %v18699_v18  ;;  %v19196_v18 = vld [vmem:[#allocation3 + $0x60] sm:$0xff] }
 0x493   :  { %7024 = vmatmul.mubr.bf16.gmra.mrb[84].mxu0 %v19188_v47  ;;  %7337 = vmatmul.mubr.bf16.gmra.mrb[84].mxu1 %v19188_v47 }
 0x494   :  { %15904 = vmatprep.mubr.msk.bf16.mxu0 %vm5404_vm2, %v19189_v3  ;;  %15932 = vmatprep.mubr.msk.bf16.mxu1 %vm5404_vm2, %v19189_v3  ;;  %v19199_v3 = vld [vmem:[#allocation3 + $0x88] sm:$0xff] }
 0x495   :  { %8089 = vmatpush1.bf16.msra.mxu0 %v18675_v7  ;;  %8401 = vmatprep.subr.bf16.mxu1 %v18707_v58  ;;  %v19197_v7 = vld [vmem:[#allocation3 + $0x78] sm:$0xff]  ;;  %v18723_v58 = vld [vmem:[%s24994_s3 + $0x500] ss:$16 sps:$4 sm:$0xff]  }
 0x496   :  { %8090 = vmatprep.subr.bf16.mxu0 %v18680_v51  ;;  %8402 = vmatpush1.bf16.msra.mxu1 %v18705_v4  ;;  %v19198_v51 = vld [vmem:[#allocation3 + $0x70] sm:$0xff]  ;;  %v18720_v4 = vld [vmem:[%s24994_s3 + $0x428] ss:$16 sps:$4 sm:$0xff]  }
 0x497   :  { %8403 = vmatprep.subr.bf16.mxu1 %v18713_v49  ;;  %v18737_v49 = vld [vmem:[%s24994_s3 + $0x4ac] ss:$16 sps:$4 sm:$0xff]  }
 0x499   :  { %8091 = vmatpush1.bf16.msra.mxu0 %v18678_v0  ;;  %v18722_v0 = vld [vmem:[%s24994_s3 + $0x42c] ss:$16 sps:$4 sm:$0xff]  }
 0x49a   :  { %8092 = vmatprep.subr.bf16.mxu0 %v18683_v22  ;;  %8404 = vmatpush1.bf16.msra.mxu1 %v18711_v60  ;;  %v18725_v22 = vld [vmem:[%s24994_s3 + $0x504] ss:$16 sps:$4 sm:$0xff]   ;;  %v18734_v60 = vld [vmem:[%s24994_s3 + $0x48c] ss:$16 sps:$4 sm:$0xff]  }
 0x49b   :  { %7034 = vmatmul.mubr.bf16.gmra.mrb[88].mxu0 %v19188_v47  ;;  %7347 = vmatmul.mubr.bf16.gmra.mrb[88].mxu1 %v19188_v47 }
 0x49c   :  { %15905 = vmatprep.mubr.msk.bf16.mxu0 %vm5404_vm2, %v19190_v12  ;;  %15933 = vmatprep.mubr.msk.bf16.mxu1 %vm5404_vm2, %v19190_v12  ;;  %v18728_v12 = vld [vmem:[%s24994_s3 + $0x44c] ss:$16 sps:$4 sm:$0xff]  }
 0x49d   :  { %8093 = vmatpush1.bf16.msra.mxu0 %v18681_v45  ;;  %8405 = vmatprep.subr.bf16.mxu1 %v18719_v54  ;;  %v19200_v45 = vld [vmem:[#allocation3 + $0x80] sm:$0xff]  ;;  %v18752_v54 = vld [vmem:[%s24994_s3 + $0x52c] ss:$16 sps:$4 sm:$0xff]  }
 0x49e   :  { %8094 = vmatprep.subr.bf16.mxu0 %v18686_v15  ;;  %8406 = vmatpush1.bf16.msra.mxu1 %v18717_v44  ;;  %v18726_v15 = vld [vmem:[%s24994_s3 + $0x448] ss:$16 sps:$4 sm:$0xff]   ;;  %v18749_v44 = vld [vmem:[%s24994_s3 + $0x50c] ss:$16 sps:$4 sm:$0xff]  }
 0x49f   :  { %8407 = vmatprep.subr.bf16.mxu1 %v18722_v0  ;;  %v19211_v0 = vld [vmem:[#allocation3 + $0xe0] sm:$0xff] }
 0x4a1   :  { %8095 = vmatpush1.bf16.msra.mxu0 %v18684_v14  ;;  %v19201_v14 = vld [vmem:[#allocation3 + $0x98] sm:$0xff] }
 0x4a2   :  { %8096 = vmatprep.subr.bf16.mxu0 %v18689_v25  ;;  %8408 = vmatpush1.bf16.msra.mxu1 %v18720_v4  ;;  %v18731_v25 = vld [vmem:[%s24994_s3 + $0x46c] ss:$16 sps:$4 sm:$0xff]   ;;  %v19210_v4 = vld [vmem:[#allocation3 + $0xd0] sm:$0xff] }
 0x4a3   :  { %7044 = vmatmul.mubr.bf16.gmra.mrb[92].mxu0 %v19188_v47  ;;  %7357 = vmatmul.mubr.bf16.gmra.mrb[92].mxu1 %v19188_v47  ;;  %v18716_v47 = vld [vmem:[%s24994_s3 + $0x4e4] ss:$16 sps:$4 sm:$0xff]  }
 0x4a4   :  { %15906 = vmatprep.mubr.msk.bf16.mxu0 %vm5404_vm2, %v19191_v39  ;;  %15934 = vmatprep.mubr.msk.bf16.mxu1 %vm5404_vm2, %v19191_v39  ;;  %v18732_v39 = vld [vmem:[%s24994_s3 + $0x488] ss:$16 sps:$4 sm:$0xff]  }
 0x4a5   :  { %8097 = vmatpush1.bf16.msra.mxu0 %v18687_v28  ;;  %8409 = vmatprep.subr.bf16.mxu1 %v18728_v12  ;;  %v18729_v28 = vld [vmem:[%s24994_s3 + $0x468] ss:$16 sps:$4 sm:$0xff]  }
 0x4a6   :  { %8098 = vmatprep.subr.bf16.mxu0 %v18692_v24  ;;  %8410 = vmatpush1.bf16.msra.mxu1 %v18726_v15  ;;  %v19202_v24 = vld [vmem:[#allocation3 + $0x90] sm:$0xff]  ;;  %v22650_v15 = vld [vmem:[#allocation3 + $0x88] sm:$0xff] }
 0x4a7   :  { %8411 = vmatprep.subr.bf16.mxu1 %v18731_v25  ;;  %v18795_v12 = vld [vmem:[%s24994_s3 + $0x5a8] ss:$16 sps:$4 sm:$0xff]   ;;  %v18797_v25 = vld [vmem:[%s24994_s3 + $0x5ac] ss:$16 sps:$4 sm:$0xff]  }
 0x4a9   :  { %8099 = vmatpush1.bf16.msra.mxu0 %v18690_v63  ;;  %v19203_v63 = vld [vmem:[#allocation3 + $0xa8] sm:$0xff] }
 0x4aa   :  { %8100 = vmatprep.subr.bf16.mxu0 %v18698_v9  ;;  %8412 = vmatpush1.bf16.msra.mxu1 %v18729_v28  ;;  %v18738_v9 = vld [vmem:[%s24994_s3 + $0x520] ss:$16 sps:$4 sm:$0xff]   ;;  %v18782_v28 = vld [vmem:[%s24994_s3 + $0x644] ss:$16 sps:$4 sm:$0xff]  }
 0x4ab   :  { %7054 = vmatmul.mubr.bf16.gmra.mrb[96].mxu0 %v19192_v46  ;;  %7367 = vmatmul.mubr.bf16.gmra.mrb[96].mxu1 %v19192_v46  ;;  %v19204_v46 = vld [vmem:[#allocation3 + $0xa0] sm:$0xff] }
 0x4ac   :  { %15907 = vmatprep.mubr.msk.bf16.mxu0 %vm5404_vm2, %v19193_v13  ;;  %15935 = vmatprep.mubr.msk.bf16.mxu1 %vm5404_vm2, %v19193_v13  ;;  %v18741_v13 = vld [vmem:[%s24994_s3 + $0x4c8] ss:$16 sps:$4 sm:$0xff]  }
 0x4ad   :  { %8101 = vmatpush1.bf16.msra.mxu0 %v18696_v29  ;;  %8413 = vmatprep.subr.bf16.mxu1 %v18734_v60  ;;  %v18740_v29 = vld [vmem:[%s24994_s3 + $0x524] ss:$16 sps:$4 sm:$0xff]  }
 0x4ae   :  { %8102 = vmatprep.subr.bf16.mxu0 %v18704_v17  ;;  %8414 = vmatpush1.bf16.msra.mxu1 %v18732_v39  ;;  %v18735_v17 = vld [vmem:[%s24994_s3 + $0x4a8] ss:$16 sps:$4 sm:$0xff]   ;;  %v22671_v39 = vld [vmem:[#allocation3 + $0x80] sm:$0xff] }
 0x4af   :  { %8415 = vmatprep.subr.bf16.mxu1 %v18737_v49  ;;  %v18788_v60 = vld [vmem:[%s24994_s3 + $0x664] ss:$16 sps:$4 sm:$0xff]   ;;  %v18786_v49 = vld [vmem:[%s24994_s3 + $0x660] ss:$16 sps:$4 sm:$0xff]  }
 0x4b1   :  { %8103 = vmatpush1.bf16.msra.mxu0 %v18702_v8  ;;  %v18743_v8 = vld [vmem:[%s24994_s3 + $0x4cc] ss:$16 sps:$4 sm:$0xff]  }
 0x4b2   :  { %8104 = vmatprep.subr.bf16.mxu0 %v18710_v2  ;;  %8416 = vmatpush1.bf16.msra.mxu1 %v18735_v17  ;;  %v19205_v2 = vld [vmem:[#allocation3 + $0xb8] sm:$0xff]  ;;  %v22693_v17 = vld [vmem:[#allocation3 + $0x90] sm:$0xff] }
 0x4b3   :  { %7064 = vmatmul.mubr.bf16.gmra.mrb[100].mxu0 %v19194_v52  ;;  %7377 = vmatmul.mubr.bf16.gmra.mrb[100].mxu1 %v19194_v52  ;;  %v18744_v52 = vld [vmem:[%s24994_s3 + $0x4e8] ss:$16 sps:$4 sm:$0xff]  }
 0x4b4   :  { %15908 = vmatprep.mubr.msk.bf16.mxu0 %vm5404_vm2, %v19195_v10  ;;  %15936 = vmatprep.mubr.msk.bf16.mxu1 %vm5404_vm2, %v19195_v10  ;;  %v19206_v10 = vld [vmem:[#allocation3 + $0xb0] sm:$0xff] }
 0x4b5   :  { %8105 = vmatpush1.bf16.msra.mxu0 %v18708_v11  ;;  %v18746_v11 = vld [vmem:[%s24994_s3 + $0x4ec] ss:$16 sps:$4 sm:$0xff]   ;;  %8417 = vmatprep.subr.bf16.mxu1 %v18743_v8  ;;  %v18801_v8 = vld [vmem:[%s24994_s3 + $0x5c8] ss:$16 sps:$4 sm:$0xff]  }
 0x4b6   :  { %8106 = vmatprep.subr.bf16.mxu0 %v18716_v47  ;;  %8418 = vmatpush1.bf16.msra.mxu1 %v18741_v13  ;;  %v18747_v47 = vld [vmem:[%s24994_s3 + $0x508] ss:$16 sps:$4 sm:$0xff]   ;;  %v18800_v13 = vld [vmem:[%s24994_s3 + $0x6a4] ss:$16 sps:$4 sm:$0xff]  }
 0x4b7   :  { %8419 = vmatprep.subr.bf16.mxu1 %v18746_v11  ;;  %v18803_v11 = vld [vmem:[%s24994_s3 + $0x5cc] ss:$16 sps:$4 sm:$0xff]  }
 0x4b9   :  { %8107 = vmatpush1.bf16.msra.mxu0 %v18714_v19  ;;  %v19207_v19 = vld [vmem:[#allocation3 + $0xc8] sm:$0xff] }
 0x4ba   :  { %8108 = vmatprep.subr.bf16.mxu0 %v18725_v22  ;;  %8420 = vmatpush1.bf16.msra.mxu1 %v18744_v52  ;;  %v22643_v22 = vld [vmem:[#allocation3 + $0x70] sm:$0xff]  ;;  %v22715_v52 = vld [vmem:[#allocation3 + $0xa0] sm:$0xff] }
 0x4bb   :  { %7074 = vmatmul.mubr.bf16.gmra.mrb[104].mxu0 %v19196_v18  ;;  %7387 = vmatmul.mubr.bf16.gmra.mrb[104].mxu1 %v19196_v18  ;;  %v18755_v18 = vld [vmem:[%s24994_s3 + $0x544] ss:$16 sps:$4 sm:$0xff]  }
 0x4bc   :  { %15909 = vmatprep.mubr.msk.bf16.mxu0 %vm5404_vm2, %v19197_v7  ;;  %15937 = vmatprep.mubr.msk.bf16.mxu1 %vm5404_vm2, %v19197_v7  ;;  %v18750_v7 = vld [vmem:[%s24994_s3 + $0x528] ss:$16 sps:$4 sm:$0xff]  }
 0x4bd   :  { %8109 = vmatpush1.bf16.msra.mxu0 %v18723_v58  ;;  %8421 = vmatprep.subr.bf16.mxu1 %v18749_v44  ;;  %v19212_v58 = vld [vmem:[#allocation3 + $0xf0] sm:$0xff]  ;;  %v22729_v44 = vld [vmem:[#allocation3 + $0xc8] sm:$0xff] }
 0x4be   :  { %8110 = vmatprep.subr.bf16.mxu0 %v18740_v29  ;;  %8422 = vmatpush1.bf16.msra.mxu1 %v18747_v47  ;;  %v18792_v29 = vld [vmem:[%s24994_s3 + $0x680] ss:$16 sps:$4 sm:$0xff]  }
 0x4bf   :  { %8423 = vmatprep.subr.bf16.mxu1 %v18752_v54  ;;  %v22725_v47 = vld [vmem:[#allocation3 + $0xb0] sm:$0xff]  ;;  %v18806_v54 = vld [vmem:[%s24994_s3 + $0x5ec] ss:$16 sps:$4 sm:$0xff]  }
 0x4c1   :  { %8111 = vmatpush1.bf16.msra.mxu0 %v18738_v9  ;;  %v18794_v9 = vld [vmem:[%s24994_s3 + $0x684] ss:$16 sps:$4 sm:$0xff]  }
 0x4c2   :  { %9411 = vmatprep.subr.bf16.mxu0 %v18755_v18  ;;  %8424 = vmatpush1.bf16.msra.mxu1 %v18750_v7  ;;  %v18807_v18 = vld [vmem:[%s24994_s3 + $0x6c0] ss:$16 sps:$4 sm:$0xff]   ;;  %v18809_v7 = vld [vmem:[%s24994_s3 + $0x6c4] ss:$16 sps:$4 sm:$0xff]  }
 0x4c3   :  { %7084 = vmatmul.mubr.bf16.gmra.mrb[108].mxu0 %v19198_v51  ;;  %7397 = vmatmul.mubr.bf16.gmra.mrb[108].mxu1 %v19198_v51  ;;  %v19208_v51 = vld [vmem:[#allocation3 + $0xc0] sm:$0xff] }
 0x4c4   :  { %15910 = vmatprep.mubr.msk.bf16.mxu0 %vm5404_vm2, %v19199_v3  ;;  %15938 = vmatprep.mubr.msk.bf16.mxu1 %vm5404_vm2, %v19199_v3  ;;  %v19209_v3 = vld [vmem:[#allocation3 + $0xd8] sm:$0xff] }
 0x4cb   :  { %7094 = vmatmul.mubr.bf16.gmra.mrb[112].mxu0 %v19200_v45  ;;  %7407 = vmatmul.mubr.bf16.gmra.mrb[112].mxu1 %v19200_v45  ;;  %v18776_v45 = vld [vmem:[%s24994_s3 + $0x624] ss:$16 sps:$4 sm:$0xff]  }
 0x4cc   :  { %15911 = vmatprep.mubr.msk.bf16.mxu0 %vm5404_vm2, %v19201_v14  ;;  %15939 = vmatprep.mubr.msk.bf16.mxu1 %vm5404_vm2, %v19201_v14  ;;  %v18774_v14 = vld [vmem:[%s24994_s3 + $0x620] ss:$16 sps:$4 sm:$0xff]  }
 0x4d3   :  { %7104 = vmatmul.mubr.bf16.gmra.mrb[116].mxu0 %v19202_v24  ;;  %7417 = vmatmul.mubr.bf16.gmra.mrb[116].mxu1 %v19202_v24  ;;  %v18780_v24 = vld [vmem:[%s24994_s3 + $0x640] ss:$16 sps:$4 sm:$0xff]  }
 0x4d4   :  { %15912 = vmatprep.mubr.msk.bf16.mxu0 %vm5404_vm2, %v19203_v63  ;;  %15940 = vmatprep.mubr.msk.bf16.mxu1 %vm5404_vm2, %v19203_v63  ;;  %v22678_v63 = vld [vmem:[#allocation3 + $0x98] sm:$0xff] }
 0x4db   :  { %7114 = vmatmul.mubr.bf16.gmra.mrb[120].mxu0 %v19204_v46  ;;  %7427 = vmatmul.mubr.bf16.gmra.mrb[120].mxu1 %v19204_v46  ;;  %v22697_v46 = vld [vmem:[#allocation3 + $0xa8] sm:$0xff] }
 0x4dc   :  { %15913 = vmatprep.mubr.msk.bf16.mxu0 %vm5404_vm2, %v19205_v2  ;;  %15941 = vmatprep.mubr.msk.bf16.mxu1 %vm5404_vm2, %v19205_v2  ;;  %v18798_v2 = vld [vmem:[%s24994_s3 + $0x6a0] ss:$16 sps:$4 sm:$0xff]  }
 0x4e3   :  { %7124 = vmatmul.mubr.bf16.gmra.mrb[124].mxu0 %v19206_v10  ;;  %7437 = vmatmul.mubr.bf16.gmra.mrb[124].mxu1 %v19206_v10  ;;  %v22719_v10 = vld [vmem:[#allocation3 + $0xb8] sm:$0xff] }
 0x4e4   :  { %15914 = vmatprep.mubr.msk.bf16.mxu0 %vm5404_vm2, %v19207_v19  ;;  %15942 = vmatprep.mubr.msk.bf16.mxu1 %vm5404_vm2, %v19207_v19  ;;  %v18804_v19 = vld [vmem:[%s24994_s3 + $0x5e8] ss:$16 sps:$4 sm:$0xff]  }
 0x4eb   :  { %7134 = vmatmul.mubr.bf16.gmra.mrb[128].mxu0 %v19208_v51  ;;  %7447 = vmatmul.mubr.bf16.gmra.mrb[128].mxu1 %v19208_v51  ;;  %v22747_v51 = vld [vmem:[#allocation3 + $0xc0] sm:$0xff] }
 0x4ec   :  { %15915 = vmatprep.mubr.msk.bf16.mxu0 %vm5404_vm2, %v19209_v3  ;;  %15943 = vmatprep.mubr.msk.bf16.mxu1 %vm5404_vm2, %v19209_v3  ;;  %v22751_v3 = vld [vmem:[#allocation3 + $0xd8] sm:$0xff] }
 0x4f3   :  { %7144 = vmatmul.mubr.bf16.gmra.mrb[132].mxu0 %v19210_v4  ;;  %7457 = vmatmul.mubr.bf16.gmra.mrb[132].mxu1 %v19210_v4  ;;  %v18810_v4 = vld [vmem:[%s24994_s3 + $0x608] ss:$16 sps:$4 sm:$0xff]  }
 0x4f4   :  { %15916 = vmatprep.mubr.msk.bf16.mxu0 %vm5404_vm2, %v22104_v53  ;;  %15944 = vmatprep.mubr.msk.bf16.mxu1 %vm5404_vm2, %v22104_v53  ;;  %v7608_v53 = vld [vmem:[#allocation3 + $0x48] sm:$0xff] }
 0x4fb   :  { %7154 = vmatmul.mubr.bf16.gmra.mrb[136].mxu0 %v19211_v0  ;;  %7467 = vmatmul.mubr.bf16.gmra.mrb[136].mxu1 %v19211_v0  ;;  %v18812_v0 = vld [vmem:[%s24994_s3 + $0x60c] ss:$16 sps:$4 sm:$0xff]  }
 0x4fc   :  { %15917 = vmatprep.mubr.msk.bf16.mxu0 %vm5404_vm2, %v22131_v5  ;;  %15945 = vmatprep.mubr.msk.bf16.mxu1 %vm5404_vm2, %v22131_v5  ;;  %v18758_v5 = vld [vmem:[%s24994_s3 + $0x564] ss:$16 sps:$4 sm:$0xff]  }
 0x503   :  { %7164 = vmatmul.mubr.bf16.gmra.mrb[140].mxu0 %v19212_v58  ;;  %7477 = vmatmul.mubr.bf16.gmra.mrb[140].mxu1 %v19212_v58  ;;  %v18815_v58 = vld [vmem:[%s24994_s3 + $0x62c] ss:$16 sps:$4 sm:$0xff]  }
 0x504   :  { %15918 = vmatprep.mubr.msk.bf16.mxu0 %vm5404_vm2, %v22143_v38  ;;  %15946 = vmatprep.mubr.msk.bf16.mxu1 %vm5404_vm2, %v22143_v38  ;;  %v18777_v38 = vld [vmem:[%s24994_s3 + $0x548] ss:$16 sps:$4 sm:$0xff]  }
 0x50b   :  { %7174 = vmatmul.mubr.bf16.gmra.mrb[144].mxu0 %v22100_v30  ;;  %7487 = vmatmul.mubr.bf16.gmra.mrb[144].mxu1 %v22100_v30  ;;  %v18779_v30 = vld [vmem:[%s24994_s3 + $0x54c] ss:$16 sps:$4 sm:$0xff]  }
 0x50c   :  { %15919 = vmatprep.mubr.msk.bf16.mxu0 %vm5404_vm2, %v22155_v35  ;;  %15947 = vmatprep.mubr.msk.bf16.mxu1 %vm5404_vm2, %v22155_v35  ;;  %v18785_v35 = vld [vmem:[%s24994_s3 + $0x56c] ss:$16 sps:$4 sm:$0xff]  }
 0x50d   :  { %9724 = vmatprep.subr.bf16.mxu1 %v18779_v30  ;;  %v18813_v30 = vld [vmem:[%s24994_s3 + $0x628] ss:$16 sps:$4 sm:$0xff]  }
 0x513   :  { %7184 = vmatmul.mubr.bf16.gmra.mrb[148].mxu0 %v22127_v59  ;;  %7497 = vmatmul.mubr.bf16.gmra.mrb[148].mxu1 %v22127_v59  ;;  %v18753_v59 = vld [vmem:[%s24994_s3 + $0x540] ss:$16 sps:$4 sm:$0xff]  }
 0x514   :  { %15920 = vmatprep.mubr.msk.bf16.mxu0 %vm5404_vm2, %v22167_v55  ;;  %15948 = vmatprep.mubr.msk.bf16.mxu1 %vm5404_vm2, %v22167_v55  ;;  %v18761_v55 = vld [vmem:[%s24994_s3 + $0x584] ss:$16 sps:$4 sm:$0xff]  }
 0x51b   :  { %7194 = vmatmul.mubr.bf16.gmra.mrb[152].mxu0 %v22139_v31  ;;  %7507 = vmatmul.mubr.bf16.gmra.mrb[152].mxu1 %v22139_v31  ;;  %v7607_v31 = vld [vmem:[#allocation3 + $0x40] sm:$0xff] }
 0x51c   :  { %15921 = vmatprep.mubr.msk.bf16.mxu0 %vm5404_vm2, %v22179_v23  ;;  %15949 = vmatprep.mubr.msk.bf16.mxu1 %vm5404_vm2, %v22179_v23  ;;  %v18759_v23 = vld [vmem:[%s24994_s3 + $0x580] ss:$16 sps:$4 sm:$0xff]  }
 0x523   :  { %7204 = vmatmul.mubr.bf16.gmra.mrb[156].mxu0 %v22151_v62  ;;  %7517 = vmatmul.mubr.bf16.gmra.mrb[156].mxu1 %v22151_v62  ;;  %v7610_v62 = vld [vmem:[#allocation3 + $0x58] sm:$0xff] }
 0x524   :  { %15922 = vmatprep.mubr.msk.bf16.mxu0 %vm5404_vm2, %v22191_v32  ;;  %15950 = vmatprep.mubr.msk.bf16.mxu1 %vm5404_vm2, %v22191_v32  ;;  %v18764_v32 = vld [vmem:[%s24994_s3 + $0x5a4] ss:$16 sps:$4 sm:$0xff]  }
 0x52b   :  { %7214 = vmatmul.mubr.bf16.gmra.mrb[160].mxu0 %v22163_v1  ;;  %7527 = vmatmul.mubr.bf16.gmra.mrb[160].mxu1 %v22163_v1  ;;  %v18756_v1 = vld [vmem:[%s24994_s3 + $0x560] ss:$16 sps:$4 sm:$0xff]  }
 0x52c   :  { %15923 = vmatprep.mubr.msk.bf16.mxu0 %vm5404_vm2, %v22203_v6  ;;  %15951 = vmatprep.mubr.msk.bf16.mxu1 %vm5404_vm2, %v22203_v6  ;;  %v18789_v6 = vld [vmem:[%s24994_s3 + $0x588] ss:$16 sps:$4 sm:$0xff]  }
 0x533   :  { %7224 = vmatmul.mubr.bf16.gmra.mrb[164].mxu0 %v22175_v40  ;;  %7537 = vmatmul.mubr.bf16.gmra.mrb[164].mxu1 %v22175_v40  ;;  %v18783_v40 = vld [vmem:[%s24994_s3 + $0x568] ss:$16 sps:$4 sm:$0xff]  }
 0x534   :  { %15924 = vmatprep.mubr.msk.bf16.mxu0 %vm5404_vm2, %v22215_v42  ;;  %15952 = vmatprep.mubr.msk.bf16.mxu1 %vm5404_vm2, %v22215_v42  ;;  %v18791_v42 = vld [vmem:[%s24994_s3 + $0x58c] ss:$16 sps:$4 sm:$0xff]  }
 0x53b   :  { %7234 = vmatmul.mubr.bf16.gmra.mrb[168].mxu0 %v22187_v33  ;;  %7547 = vmatmul.mubr.bf16.gmra.mrb[168].mxu1 %v22187_v33  ;;  %v7609_v33 = vld [vmem:[#allocation3 + $0x50] sm:$0xff] }
 0x53c   :  { %15925 = vmatprep.mubr.msk.bf16.mxu0 %vm5404_vm2, %v22227_v34  ;;  %15953 = vmatprep.mubr.msk.bf16.mxu1 %vm5404_vm2, %v22227_v34  ;;  %v18765_v34 = vld [vmem:[%s24994_s3 + $0x5c0] ss:$16 sps:$4 sm:$0xff]  }
 0x543   :  { %7244 = vmatmul.mubr.bf16.gmra.mrb[172].mxu0 %v22199_v61  ;;  %7557 = vmatmul.mubr.bf16.gmra.mrb[172].mxu1 %v22199_v61  ;;  %v22600_v61 = vld [vmem:[#allocation3 + $0x68] sm:$0xff] }
 0x544   :  { %15926 = vmatprep.mubr.msk.bf16.mxu0 %vm5404_vm2, %v22239_v41  ;;  %15954 = vmatprep.mubr.msk.bf16.mxu1 %vm5404_vm2, %v22239_v41  ;;  %v18770_v41 = vld [vmem:[%s24994_s3 + $0x5e4] ss:$16 sps:$4 sm:$0xff]  }
 0x54b   :  { %7254 = vmatmul.mubr.bf16.gmra.mrb[176].mxu0 %v22211_v36  ;;  %7567 = vmatmul.mubr.bf16.gmra.mrb[176].mxu1 %v22211_v36  ;;  %v18762_v36 = vld [vmem:[%s24994_s3 + $0x5a0] ss:$16 sps:$4 sm:$0xff]  }
 0x54c   :  { %15927 = vmatprep.mubr.msk.bf16.mxu0 %vm5404_vm2, %v22251_v43  ;;  %15955 = vmatprep.mubr.msk.bf16.mxu1 %vm5404_vm2, %v22251_v43  ;;  %v18768_v43 = vld [vmem:[%s24994_s3 + $0x5e0] ss:$16 sps:$4 sm:$0xff]  }
 0x553   :  { %7264 = vmatmul.mubr.bf16.gmra.mrb[180].mxu0 %v22223_v57  ;;  %7577 = vmatmul.mubr.bf16.gmra.mrb[180].mxu1 %v22223_v57  ;;  %v18767_v57 = vld [vmem:[%s24994_s3 + $0x5c4] ss:$16 sps:$4 sm:$0xff]  }
 0x554   :  { %15928 = vmatprep.mubr.msk.bf16.mxu0 %vm5404_vm2, %v22263_v56  ;;  %15956 = vmatprep.mubr.msk.bf16.mxu1 %vm5404_vm2, %v22263_v56  ;;  %v18773_v56 = vld [vmem:[%s24994_s3 + $0x604] ss:$16 sps:$4 sm:$0xff]  }
 0x55b   :  { %7274 = vmatmul.mubr.bf16.gmra.mrb[184].mxu0 %v22235_v50  ;;  %7587 = vmatmul.mubr.bf16.gmra.mrb[184].mxu1 %v22235_v50  ;;  %v22621_v50 = vld [vmem:[#allocation3 + $0x60] sm:$0xff] }
 0x55c   :  { %15929 = vmatprep.mubr.msk.bf16.mxu0 %vm5404_vm2, %v22273_v37  ;;  %15957 = vmatprep.mubr.msk.bf16.mxu1 %vm5404_vm2, %v22273_v37  ;;  %v18771_v37 = vld [vmem:[%s24994_s3 + $0x600] ss:$16 sps:$4 sm:$0xff]  }
 0x563   :  { %7284 = vmatmul.mubr.bf16.gmra.mrb[188].mxu0 %v22247_v48  ;;  %7597 = vmatmul.mubr.bf16.gmra.mrb[188].mxu1 %v22247_v48  ;;  %v22628_v48 = vld [vmem:[#allocation3 + $0x78] sm:$0xff] }
 0x564   :  { %16070 = vmatprep.mubr.msk.bf16.mxu0 %vm5404_vm2, %v7608_v53  ;;  %16098 = vmatprep.mubr.msk.bf16.mxu1 %vm5404_vm2, %v7608_v53  ;;  %v22769_v53 = vld [vmem:[#allocation3 + $0xd0] sm:$0xff] }
 0x56b   :  { %8117 = vmatmul.mubr.bf16.vlgmr.msra.gmra.mrb[80].mxu0 %v7607_v31  ;;  %8430 = vmatmul.mubr.bf16.vlgmr.msra.gmra.mrb[80].mxu1 %v7607_v31  ;;  %v18818_v31 = vld [vmem:[%s24994_s3 + $0x64c] ss:$16 sps:$4 sm:$0xff]  }
 0x56c   :  { %9412 = vmatpush1.bf16.msra.mxu0 %v18753_v59  ;;  %16071 = vmatprep.mubr.msk.bf16.mxu0 %vm5404_vm2, %v7610_v62  ;;  %v22773_v59 = vld [vmem:[#allocation3 + $0xe8] sm:$0xff] }
 0x56d   :  { %16099 = vmatprep.mubr.msk.bf16.mxu1 %vm5404_vm2, %v7610_v62  ;;  %9413 = vmatprep.subr.bf16.mxu0 %v18758_v5  ;;  %v18816_v5 = vld [vmem:[%s24994_s3 + $0x648] ss:$16 sps:$4 sm:$0xff]   ;;  %v18822_v62 = vld [vmem:[%s24994_s3 + $0x6e0] ss:$16 sps:$4 sm:$0xff]  }
 0x56e   :  { %9725 = vmatpush1.bf16.msra.mxu1 %v18777_v38  ;;  %v18821_v38 = vld [vmem:[%s24994_s3 + $0x66c] ss:$16 sps:$4 sm:$0xff]  }
 0x56f   :  { %9726 = vmatprep.subr.bf16.mxu1 %v18785_v35  ;;  %v18824_v35 = vld [vmem:[%s24994_s3 + $0x6e4] ss:$16 sps:$4 sm:$0xff]  }
 0x570   :  { %9414 = vmatpush1.bf16.msra.mxu0 %v18756_v1  ;;  %v18819_v1 = vld [vmem:[%s24994_s3 + $0x668] ss:$16 sps:$4 sm:$0xff]  }
 0x571   :  { %9415 = vmatprep.subr.bf16.mxu0 %v18761_v55  ;;  %v22797_v55 = vld [vmem:[#allocation3 + $0xe0] sm:$0xff] }
 0x572   :  { %9727 = vmatpush1.bf16.msra.mxu1 %v18783_v40  ;;  %v22801_v40 = vld [vmem:[#allocation3 + $0xf8] sm:$0xff] }
 0x573   :  { %8127 = vmatmul.mubr.bf16.gmra.mrb[84].mxu0 %v7609_v33  ;;  %8440 = vmatmul.mubr.bf16.gmra.mrb[84].mxu1 %v7609_v33  ;;  %v18827_v33 = vld [vmem:[%s24994_s3 + $0x68c] ss:$16 sps:$4 sm:$0xff]  }
 0x574   :  { %16072 = vmatprep.mubr.msk.bf16.mxu0 %vm5404_vm2, %v22600_v61  ;;  %16100 = vmatprep.mubr.msk.bf16.mxu1 %vm5404_vm2, %v22600_v61 }
 0x575   :  { %9416 = vmatpush1.bf16.msra.mxu0 %v18759_v23  ;;  %9728 = vmatprep.subr.bf16.mxu1 %v18791_v42  ;;  %v18825_v23 = vld [vmem:[%s24994_s3 + $0x688] ss:$16 sps:$4 sm:$0xff]  }
 0x576   :  { %9417 = vmatprep.subr.bf16.mxu0 %v18764_v32  ;;  %9729 = vmatpush1.bf16.msra.mxu1 %v18789_v6  ;;  %v18830_v32 = vld [vmem:[%s24994_s3 + $0x6ac] ss:$16 sps:$4 sm:$0xff]   ;;  %v18828_v6 = vld [vmem:[%s24994_s3 + $0x6a8] ss:$16 sps:$4 sm:$0xff]  }
 0x577   :  { %9730 = vmatprep.subr.bf16.mxu1 %v18797_v25  ;;  %v22823_v42 = vld [vmem:[#allocation3 + $0x108] sm:$0xff]  ;;  %v22864_v25 = vld [vmem:[#allocation3 + $0x120] sm:$0xff] }
 0x579   :  { %9418 = vmatpush1.bf16.msra.mxu0 %v18762_v36  ;;  %v22819_v36 = vld [vmem:[#allocation3 + $0xf0] sm:$0xff] }
 0x57a   :  { %9419 = vmatprep.subr.bf16.mxu0 %v18767_v57  ;;  %9731 = vmatpush1.bf16.msra.mxu1 %v18795_v12  ;;  %v18831_v57 = vld [vmem:[%s24994_s3 + $0x6c8] ss:$16 sps:$4 sm:$0xff]   ;;  %v22854_v12 = vld [vmem:[#allocation3 + $0x110] sm:$0xff] }
 0x57b   :  { %8137 = vmatmul.mubr.bf16.gmra.mrb[88].mxu0 %v22621_v50  ;;  %8450 = vmatmul.mubr.bf16.gmra.mrb[88].mxu1 %v22621_v50 }
 0x57c   :  { %16073 = vmatprep.mubr.msk.bf16.mxu0 %vm5404_vm2, %v22628_v48  ;;  %16101 = vmatprep.mubr.msk.bf16.mxu1 %vm5404_vm2, %v22628_v48 }
 0x57d   :  { %9420 = vmatpush1.bf16.msra.mxu0 %v18765_v34  ;;  %9732 = vmatprep.subr.bf16.mxu1 %v18803_v11  ;;  %v18833_v34 = vld [vmem:[%s24994_s3 + $0x6cc] ss:$16 sps:$4 sm:$0xff]   ;;  %v22914_v11 = vld [vmem:[#allocation3 + $0x170] sm:$0xff] }
 0x57e   :  { %9421 = vmatprep.subr.bf16.mxu0 %v18770_v41  ;;  %9733 = vmatpush1.bf16.msra.mxu1 %v18801_v8  ;;  %v18836_v41 = vld [vmem:[%s24994_s3 + $0x6ec] ss:$16 sps:$4 sm:$0xff]   ;;  %v22904_v8 = vld [vmem:[#allocation3 + $0x160] sm:$0xff] }
 0x57f   :  { %9734 = vmatprep.subr.bf16.mxu1 %v18806_v54  ;;  %v22924_v54 = vld [vmem:[#allocation3 + $0x180] sm:$0xff] }
 0x581   :  { %9422 = vmatpush1.bf16.msra.mxu0 %v18768_v43  ;;  %v18839_v43 = vld [vmem:[%s24994_s3 + $0x704] ss:$16 sps:$4 sm:$0xff]  }
 0x582   :  { %9423 = vmatprep.subr.bf16.mxu0 %v18773_v56  ;;  %9735 = vmatpush1.bf16.msra.mxu1 %v18804_v19  ;;  %v18834_v56 = vld [vmem:[%s24994_s3 + $0x6e8] ss:$16 sps:$4 sm:$0xff]  }
 0x583   :  { %8147 = vmatmul.mubr.bf16.gmra.mrb[92].mxu0 %v22643_v22  ;;  %8460 = vmatmul.mubr.bf16.gmra.mrb[92].mxu1 %v22643_v22  ;;  %v22918_v19 = vld [vmem:[#allocation3 + $0x188] sm:$0xff] }
 0x584   :  { %16074 = vmatprep.mubr.msk.bf16.mxu0 %vm5404_vm2, %v22650_v15  ;;  %16102 = vmatprep.mubr.msk.bf16.mxu1 %vm5404_vm2, %v22650_v15 }
 0x585   :  { %9424 = vmatpush1.bf16.msra.mxu0 %v18771_v37  ;;  %9736 = vmatprep.subr.bf16.mxu1 %v18812_v0  ;;  %v22844_v37 = vld [vmem:[#allocation3 + $0x100] sm:$0xff] }
 0x586   :  { %9425 = vmatprep.subr.bf16.mxu0 %v18776_v45  ;;  %9737 = vmatpush1.bf16.msra.mxu1 %v18810_v4  ;;  %v22848_v45 = vld [vmem:[#allocation3 + $0x118] sm:$0xff]  ;;  %v22938_v4 = vld [vmem:[#allocation3 + $0x1a8] sm:$0xff]  ;;  %v22944_v0 = vld [vmem:[#allocation3 + $0x1a0] sm:$0xff] }
 0x587   :  { %9738 = vmatprep.subr.bf16.mxu1 %v18815_v58  ;;  %v22948_v58 = vld [vmem:[#allocation3 + $0x1b8] sm:$0xff] }
 0x589   :  { %9426 = vmatpush1.bf16.msra.mxu0 %v18774_v14  ;;  %v22858_v14 = vld [vmem:[#allocation3 + $0x128] sm:$0xff] }
 0x58a   :  { %9427 = vmatprep.subr.bf16.mxu0 %v18782_v28  ;;  %9739 = vmatpush1.bf16.msra.mxu1 %v18813_v30  ;;  %v22868_v28 = vld [vmem:[#allocation3 + $0x138] sm:$0xff]  ;;  %v22954_v30 = vld [vmem:[#allocation3 + $0x1b0] sm:$0xff] }
 0x58b   :  { %8157 = vmatmul.mubr.bf16.gmra.mrb[96].mxu0 %v22671_v39  ;;  %8470 = vmatmul.mubr.bf16.gmra.mrb[96].mxu1 %v22671_v39 }
 0x58c   :  { %16075 = vmatprep.mubr.msk.bf16.mxu0 %vm5404_vm2, %v22678_v63  ;;  %16103 = vmatprep.mubr.msk.bf16.mxu1 %vm5404_vm2, %v22678_v63 }
 0x58d   :  { %9428 = vmatpush1.bf16.msra.mxu0 %v18780_v24  ;;  %9740 = vmatprep.subr.bf16.mxu1 %v18818_v31  ;;  %v22874_v24 = vld [vmem:[#allocation3 + $0x130] sm:$0xff]  ;;  %v22964_v31 = vld [vmem:[#allocation3 + $0x1c0] sm:$0xff] }
 0x58e   :  { %9429 = vmatprep.subr.bf16.mxu0 %v18788_v60  ;;  %9741 = vmatpush1.bf16.msra.mxu1 %v18816_v5  ;;  %v22878_v60 = vld [vmem:[#allocation3 + $0x148] sm:$0xff] }
 0x58f   :  { %9742 = vmatprep.subr.bf16.mxu1 %v18821_v38  ;;  %v22958_v5 = vld [vmem:[#allocation3 + $0x1c8] sm:$0xff]  ;;  %v22968_v38 = vld [vmem:[#allocation3 + $0x1d8] sm:$0xff] }
 0x591   :  { %9430 = vmatpush1.bf16.msra.mxu0 %v18786_v49  ;;  %v22884_v49 = vld [vmem:[#allocation3 + $0x140] sm:$0xff] }
 0x592   :  { %9431 = vmatprep.subr.bf16.mxu0 %v18794_v9  ;;  %9743 = vmatpush1.bf16.msra.mxu1 %v18819_v1  ;;  %v22888_v9 = vld [vmem:[#allocation3 + $0x158] sm:$0xff] }
 0x593   :  { %8167 = vmatmul.mubr.bf16.gmra.mrb[100].mxu0 %v22693_v17  ;;  %8480 = vmatmul.mubr.bf16.gmra.mrb[100].mxu1 %v22693_v17  ;;  %v18863_v1 = vld [vmem:[%s24994_s3 + $0x70c] ss:$16 sps:$4 sm:$0xff]  }
 0x594   :  { %16076 = vmatprep.mubr.msk.bf16.mxu0 %vm5404_vm2, %v22697_v46  ;;  %16104 = vmatprep.mubr.msk.bf16.mxu1 %vm5404_vm2, %v22697_v46 }
 0x595   :  { %9432 = vmatpush1.bf16.msra.mxu0 %v18792_v29  ;;  %9744 = vmatprep.subr.bf16.mxu1 %v18827_v33  ;;  %v22894_v29 = vld [vmem:[#allocation3 + $0x150] sm:$0xff]  ;;  %v22991_v33 = vld [vmem:[#allocation3 + $0x1f8] sm:$0xff] }
 0x596   :  { %9433 = vmatprep.subr.bf16.mxu0 %v18800_v13  ;;  %9745 = vmatpush1.bf16.msra.mxu1 %v18825_v23  ;;  %v22898_v13 = vld [vmem:[#allocation3 + $0x168] sm:$0xff]  ;;  %v22987_v23 = vld [vmem:[#allocation3 + $0x1e0] sm:$0xff] }
 0x597   :  { %9746 = vmatprep.subr.bf16.mxu1 %v18830_v32  ;;  %v22997_v32 = vld [vmem:[#allocation3 + $0x1f0] sm:$0xff] }
 0x599   :  { %9434 = vmatpush1.bf16.msra.mxu0 %v18798_v2  ;;  %v22908_v2 = vld [vmem:[#allocation3 + $0x178] sm:$0xff] }
 0x59a   :  { %9435 = vmatprep.subr.bf16.mxu0 %v18809_v7  ;;  %9747 = vmatpush1.bf16.msra.mxu1 %v18828_v6  ;;  %v22934_v7 = vld [vmem:[#allocation3 + $0x190] sm:$0xff] }
 0x59b   :  { %8177 = vmatmul.mubr.bf16.gmra.mrb[104].mxu0 %v22715_v52  ;;  %8490 = vmatmul.mubr.bf16.gmra.mrb[104].mxu1 %v22715_v52  ;;  %v18837_v6 = vld [vmem:[%s24994_s3 + $0x700] ss:$16 sps:$4 sm:$0xff]  }
 0x59c   :  { %16077 = vmatprep.mubr.msk.bf16.mxu0 %vm5404_vm2, %v22719_v10  ;;  %16105 = vmatprep.mubr.msk.bf16.mxu1 %vm5404_vm2, %v22719_v10 }
 0x59d   :  { %9436 = vmatpush1.bf16.msra.mxu0 %v18807_v18  ;;  %9748 = vmatprep.subr.bf16.mxu1 %v18833_v34  ;;  %v22928_v18 = vld [vmem:[#allocation3 + $0x198] sm:$0xff] }
 0x59e   :  { %9437 = vmatprep.subr.bf16.mxu0 %v18824_v35  ;;  %9749 = vmatpush1.bf16.msra.mxu1 %v18831_v57  ;;  %v22978_v35 = vld [vmem:[#allocation3 + $0x1e8] sm:$0xff]  ;;  %v18842_v57 = vld [vmem:[%s24994_s3 + $0x724] ss:$16 sps:$4 sm:$0xff]  }
 0x59f   :  { %9750 = vmatprep.subr.bf16.mxu1 %v18836_v41  ;;  %v18861_v34 = vld [vmem:[%s24994_s3 + $0x708] ss:$16 sps:$4 sm:$0xff]   ;;  %v18840_v41 = vld [vmem:[%s24994_s3 + $0x720] ss:$16 sps:$4 sm:$0xff]  }
 0x5a1   :  { %9438 = vmatpush1.bf16.msra.mxu0 %v18822_v62  ;;  %v22974_v62 = vld [vmem:[#allocation3 + $0x1d0] sm:$0xff] }
 0x5a2   :  { %10738 = vmatprep.subr.bf16.mxu0 %v18839_v43  ;;  %9751 = vmatpush1.bf16.msra.mxu1 %v18834_v56  ;;  %v18867_v43 = vld [vmem:[%s24994_s3 + $0x728] ss:$16 sps:$4 sm:$0xff]   ;;  %v18843_v56 = vld [vmem:[%s24994_s3 + $0x740] ss:$16 sps:$4 sm:$0xff]  }
 0x5a3   :  { %8187 = vmatmul.mubr.bf16.gmra.mrb[108].mxu0 %v22725_v47  ;;  %8500 = vmatmul.mubr.bf16.gmra.mrb[108].mxu1 %v22725_v47 }
 0x5a4   :  { %16078 = vmatprep.mubr.msk.bf16.mxu0 %vm5404_vm2, %v22729_v44  ;;  %16106 = vmatprep.mubr.msk.bf16.mxu1 %vm5404_vm2, %v22729_v44 }
 0x5a5   :  { %11051 = vmatprep.subr.bf16.mxu1 %v18863_v1  ;;  %v18873_v1 = vld [vmem:[%s24994_s3 + $0x748] ss:$16 sps:$4 sm:$0xff]  }
 0x5ab   :  { %8197 = vmatmul.mubr.bf16.gmra.mrb[112].mxu0 %v22747_v51  ;;  %8510 = vmatmul.mubr.bf16.gmra.mrb[112].mxu1 %v22747_v51 }
 0x5ac   :  { %16079 = vmatprep.mubr.msk.bf16.mxu0 %vm5404_vm2, %v22751_v3  ;;  %16107 = vmatprep.mubr.msk.bf16.mxu1 %vm5404_vm2, %v22751_v3 }
 0x5b3   :  { %8207 = vmatmul.mubr.bf16.gmra.mrb[116].mxu0 %v22769_v53  ;;  %8520 = vmatmul.mubr.bf16.gmra.mrb[116].mxu1 %v22769_v53 }
 0x5b4   :  { %16080 = vmatprep.mubr.msk.bf16.mxu0 %vm5404_vm2, %v22773_v59  ;;  %16108 = vmatprep.mubr.msk.bf16.mxu1 %vm5404_vm2, %v22773_v59 }
 0x5bb   :  { %8217 = vmatmul.mubr.bf16.gmra.mrb[120].mxu0 %v22797_v55  ;;  %8530 = vmatmul.mubr.bf16.gmra.mrb[120].mxu1 %v22797_v55 }
 0x5bc   :  { %16081 = vmatprep.mubr.msk.bf16.mxu0 %vm5404_vm2, %v22801_v40  ;;  %16109 = vmatprep.mubr.msk.bf16.mxu1 %vm5404_vm2, %v22801_v40 }
 0x5c3   :  { %8227 = vmatmul.mubr.bf16.gmra.mrb[124].mxu0 %v22819_v36  ;;  %8540 = vmatmul.mubr.bf16.gmra.mrb[124].mxu1 %v22819_v36 }
 0x5c4   :  { %16082 = vmatprep.mubr.msk.bf16.mxu0 %vm5404_vm2, %v22823_v42  ;;  %16110 = vmatprep.mubr.msk.bf16.mxu1 %vm5404_vm2, %v22823_v42 }
 0x5cb   :  { %8237 = vmatmul.mubr.bf16.gmra.mrb[128].mxu0 %v22844_v37  ;;  %8550 = vmatmul.mubr.bf16.gmra.mrb[128].mxu1 %v22844_v37 }
 0x5cc   :  { %16083 = vmatprep.mubr.msk.bf16.mxu0 %vm5404_vm2, %v22848_v45  ;;  %16111 = vmatprep.mubr.msk.bf16.mxu1 %vm5404_vm2, %v22848_v45 }
 0x5d3   :  { %8247 = vmatmul.mubr.bf16.gmra.mrb[132].mxu0 %v22854_v12  ;;  %8560 = vmatmul.mubr.bf16.gmra.mrb[132].mxu1 %v22854_v12 }
 0x5d4   :  { %16084 = vmatprep.mubr.msk.bf16.mxu0 %vm5404_vm2, %v22858_v14  ;;  %16112 = vmatprep.mubr.msk.bf16.mxu1 %vm5404_vm2, %v22858_v14 }
 0x5db   :  { %8257 = vmatmul.mubr.bf16.gmra.mrb[136].mxu0 %v22864_v25  ;;  %8570 = vmatmul.mubr.bf16.gmra.mrb[136].mxu1 %v22864_v25 }
 0x5dc   :  { %16085 = vmatprep.mubr.msk.bf16.mxu0 %vm5404_vm2, %v22868_v28  ;;  %16113 = vmatprep.mubr.msk.bf16.mxu1 %vm5404_vm2, %v22868_v28 }
 0x5e3   :  { %8267 = vmatmul.mubr.bf16.gmra.mrb[140].mxu0 %v22874_v24  ;;  %8580 = vmatmul.mubr.bf16.gmra.mrb[140].mxu1 %v22874_v24 }
 0x5e4   :  { %16086 = vmatprep.mubr.msk.bf16.mxu0 %vm5404_vm2, %v22878_v60  ;;  %16114 = vmatprep.mubr.msk.bf16.mxu1 %vm5404_vm2, %v22878_v60 }
 0x5eb   :  { %8277 = vmatmul.mubr.bf16.gmra.mrb[144].mxu0 %v22884_v49  ;;  %8590 = vmatmul.mubr.bf16.gmra.mrb[144].mxu1 %v22884_v49 }
 0x5ec   :  { %16087 = vmatprep.mubr.msk.bf16.mxu0 %vm5404_vm2, %v22888_v9  ;;  %16115 = vmatprep.mubr.msk.bf16.mxu1 %vm5404_vm2, %v22888_v9 }
 0x5f3   :  { %8287 = vmatmul.mubr.bf16.gmra.mrb[148].mxu0 %v22894_v29  ;;  %8600 = vmatmul.mubr.bf16.gmra.mrb[148].mxu1 %v22894_v29 }
 0x5f4   :  { %16088 = vmatprep.mubr.msk.bf16.mxu0 %vm5404_vm2, %v22898_v13  ;;  %16116 = vmatprep.mubr.msk.bf16.mxu1 %vm5404_vm2, %v22898_v13 }
 0x5fb   :  { %8297 = vmatmul.mubr.bf16.gmra.mrb[152].mxu0 %v22904_v8  ;;  %8610 = vmatmul.mubr.bf16.gmra.mrb[152].mxu1 %v22904_v8 }
 0x5fc   :  { %16089 = vmatprep.mubr.msk.bf16.mxu0 %vm5404_vm2, %v22908_v2  ;;  %16117 = vmatprep.mubr.msk.bf16.mxu1 %vm5404_vm2, %v22908_v2 }
 0x603   :  { %8307 = vmatmul.mubr.bf16.gmra.mrb[156].mxu0 %v22914_v11  ;;  %8620 = vmatmul.mubr.bf16.gmra.mrb[156].mxu1 %v22914_v11 }
 0x604   :  { %16090 = vmatprep.mubr.msk.bf16.mxu0 %vm5404_vm2, %v22918_v19  ;;  %16118 = vmatprep.mubr.msk.bf16.mxu1 %vm5404_vm2, %v22918_v19 }
 0x60b   :  { %8317 = vmatmul.mubr.bf16.gmra.mrb[160].mxu0 %v22924_v54  ;;  %8630 = vmatmul.mubr.bf16.gmra.mrb[160].mxu1 %v22924_v54 }
 0x60c   :  { %16091 = vmatprep.mubr.msk.bf16.mxu0 %vm5404_vm2, %v22928_v18  ;;  %16119 = vmatprep.mubr.msk.bf16.mxu1 %vm5404_vm2, %v22928_v18 }
 0x613   :  { %8327 = vmatmul.mubr.bf16.gmra.mrb[164].mxu0 %v22934_v7  ;;  %8640 = vmatmul.mubr.bf16.gmra.mrb[164].mxu1 %v22934_v7 }
 0x614   :  { %16092 = vmatprep.mubr.msk.bf16.mxu0 %vm5404_vm2, %v22938_v4  ;;  %16120 = vmatprep.mubr.msk.bf16.mxu1 %vm5404_vm2, %v22938_v4 }
 0x61b   :  { %8337 = vmatmul.mubr.bf16.gmra.mrb[168].mxu0 %v22944_v0  ;;  %8650 = vmatmul.mubr.bf16.gmra.mrb[168].mxu1 %v22944_v0 }
 0x61c   :  { %16093 = vmatprep.mubr.msk.bf16.mxu0 %vm5404_vm2, %v22948_v58  ;;  %16121 = vmatprep.mubr.msk.bf16.mxu1 %vm5404_vm2, %v22948_v58 }
 0x623   :  { %8347 = vmatmul.mubr.bf16.gmra.mrb[172].mxu0 %v22954_v30  ;;  %8660 = vmatmul.mubr.bf16.gmra.mrb[172].mxu1 %v22954_v30 }
 0x624   :  { %16094 = vmatprep.mubr.msk.bf16.mxu0 %vm5404_vm2, %v22958_v5  ;;  %16122 = vmatprep.mubr.msk.bf16.mxu1 %vm5404_vm2, %v22958_v5 }
 0x62b   :  { %8357 = vmatmul.mubr.bf16.gmra.mrb[176].mxu0 %v22964_v31  ;;  %8670 = vmatmul.mubr.bf16.gmra.mrb[176].mxu1 %v22964_v31 }
 0x62c   :  { %16095 = vmatprep.mubr.msk.bf16.mxu0 %vm5404_vm2, %v22968_v38  ;;  %16123 = vmatprep.mubr.msk.bf16.mxu1 %vm5404_vm2, %v22968_v38 }
 0x633   :  { %8367 = vmatmul.mubr.bf16.gmra.mrb[180].mxu0 %v22974_v62  ;;  %8680 = vmatmul.mubr.bf16.gmra.mrb[180].mxu1 %v22974_v62 }
 0x634   :  { %16096 = vmatprep.mubr.msk.bf16.mxu0 %vm5404_vm2, %v22978_v35  ;;  %16124 = vmatprep.mubr.msk.bf16.mxu1 %vm5404_vm2, %v22978_v35 }
 0x63b   :  { %8377 = vmatmul.mubr.bf16.gmra.mrb[184].mxu0 %v22987_v23  ;;  %8690 = vmatmul.mubr.bf16.gmra.mrb[184].mxu1 %v22987_v23 }
 0x63c   :  { %16097 = vmatprep.mubr.msk.bf16.mxu0 %vm5404_vm2, %v22991_v33  ;;  %16125 = vmatprep.mubr.msk.bf16.mxu1 %vm5404_vm2, %v22991_v33 }
 0x643   :  { %8387 = vmatmul.mubr.bf16.gmra.mrb[188].mxu0 %v22997_v32  ;;  %8700 = vmatmul.mubr.bf16.gmra.mrb[188].mxu1 %v22997_v32 }
 0x644   :  { %16238 = vmatprep.mubr.msk.bf16.mxu0 %vm5404_vm2, %v22600_v61  ;;  %16266 = vmatprep.mubr.msk.bf16.mxu1 %vm5404_vm2, %v22600_v61  ;;  %v18869_v61 = vld [vmem:[%s24994_s3 + $0x72c] ss:$16 sps:$4 sm:$0xff]  }
 0x64b   :  { %9444 = vmatmul.mubr.bf16.vlgmr.msra.gmra.mrb[80].mxu0 %v22621_v50  ;;  %9757 = vmatmul.mubr.bf16.vlgmr.msra.gmra.mrb[80].mxu1 %v22621_v50  ;;  %v18845_v50 = vld [vmem:[%s24994_s3 + $0x744] ss:$16 sps:$4 sm:$0xff]  }
 0x64c   :  { %10739 = vmatpush1.bf16.msra.mxu0 %v18837_v6  ;;  %16239 = vmatprep.mubr.msk.bf16.mxu0 %vm5404_vm2, %v22628_v48  ;;  %v18846_v6 = vld [vmem:[%s24994_s3 + $0x760] ss:$16 sps:$4 sm:$0xff]  }
 0x64d   :  { %16267 = vmatprep.mubr.msk.bf16.mxu1 %vm5404_vm2, %v22628_v48  ;;  %10740 = vmatprep.subr.bf16.mxu0 %v18842_v57  ;;  %v18848_v48 = vld [vmem:[%s24994_s3 + $0x764] ss:$16 sps:$4 sm:$0xff]   ;;  %v18875_v57 = vld [vmem:[%s24994_s3 + $0x74c] ss:$16 sps:$4 sm:$0xff]  }
 0x64e   :  { %11052 = vmatpush1.bf16.msra.mxu1 %v18861_v34  ;;  %v18854_v34 = vld [vmem:[%s24994_s3 + $0x7a4] ss:$16 sps:$4 sm:$0xff]  }
 0x64f   :  { %11053 = vmatprep.subr.bf16.mxu1 %v18869_v61  ;;  %v18852_v61 = vld [vmem:[%s24994_s3 + $0x7a0] ss:$16 sps:$4 sm:$0xff]  }
 0x650   :  { %10741 = vmatpush1.bf16.msra.mxu0 %v18840_v41  ;;  %v18857_v41 = vld [vmem:[%s24994_s3 + $0x7c4] ss:$16 sps:$4 sm:$0xff]  }
 0x651   :  { %10742 = vmatprep.subr.bf16.mxu0 %v18845_v50  ;;  %v18879_v50 = vld [vmem:[%s24994_s3 + $0x768] ss:$16 sps:$4 sm:$0xff]  }
 0x652   :  { %11054 = vmatpush1.bf16.msra.mxu1 %v18867_v43  ;;  %v18858_v43 = vld [vmem:[%s24994_s3 + $0x7e0] ss:$16 sps:$4 sm:$0xff]  }
 0x653   :  { %9454 = vmatmul.mubr.bf16.gmra.mrb[84].mxu0 %v22643_v22  ;;  %9767 = vmatmul.mubr.bf16.gmra.mrb[84].mxu1 %v22643_v22  ;;  %v18851_v22 = vld [vmem:[%s24994_s3 + $0x784] ss:$16 sps:$4 sm:$0xff]  }
 0x654   :  { %16240 = vmatprep.mubr.msk.bf16.mxu0 %vm5404_vm2, %v22650_v15  ;;  %16268 = vmatprep.mubr.msk.bf16.mxu1 %vm5404_vm2, %v22650_v15  ;;  %v18849_v15 = vld [vmem:[%s24994_s3 + $0x780] ss:$16 sps:$4 sm:$0xff]  }
 0x655   :  { %10743 = vmatpush1.bf16.msra.mxu0 %v18843_v56  ;;  %11055 = vmatprep.subr.bf16.mxu1 %v18875_v57  ;;  %v18881_v56 = vld [vmem:[%s24994_s3 + $0x76c] ss:$16 sps:$4 sm:$0xff]   ;;  %v18885_v57 = vld [vmem:[%s24994_s3 + $0x788] ss:$16 sps:$4 sm:$0xff]  }
 0x656   :  { %10744 = vmatprep.subr.bf16.mxu0 %v18848_v48  ;;  %11056 = vmatpush1.bf16.msra.mxu1 %v18873_v1  ;;  %v18872_v48 = vld [vmem:[%s24994_s3 + $0x824] ss:$16 sps:$4 sm:$0xff]   ;;  %v18870_v1 = vld [vmem:[%s24994_s3 + $0x820] ss:$16 sps:$4 sm:$0xff]  }
 0x657   :  { %11057 = vmatprep.subr.bf16.mxu1 %v18881_v56  ;;  %v18917_v56 = vld [vmem:[%s24994_s3 + $0x88c] ss:$16 sps:$4 sm:$0xff]  }
 0x659   :  { %10745 = vmatpush1.bf16.msra.mxu0 %v18846_v6  ;;  %v18878_v6 = vld [vmem:[%s24994_s3 + $0x844] ss:$16 sps:$4 sm:$0xff]  }
 0x65a   :  { %10746 = vmatprep.subr.bf16.mxu0 %v18851_v22  ;;  %11058 = vmatpush1.bf16.msra.mxu1 %v18879_v50  ;;  %v18882_v22 = vld [vmem:[%s24994_s3 + $0x860] ss:$16 sps:$4 sm:$0xff]   ;;  %v18911_v50 = vld [vmem:[%s24994_s3 + $0x84c] ss:$16 sps:$4 sm:$0xff]  }
 0x65b   :  { %9464 = vmatmul.mubr.bf16.gmra.mrb[88].mxu0 %v22671_v39  ;;  %9777 = vmatmul.mubr.bf16.gmra.mrb[88].mxu1 %v22671_v39  ;;  %v18855_v39 = vld [vmem:[%s24994_s3 + $0x7c0] ss:$16 sps:$4 sm:$0xff]  }
 0x65c   :  { %16241 = vmatprep.mubr.msk.bf16.mxu0 %vm5404_vm2, %v22678_v63  ;;  %16269 = vmatprep.mubr.msk.bf16.mxu1 %vm5404_vm2, %v22678_v63  ;;  %v18860_v63 = vld [vmem:[%s24994_s3 + $0x7e4] ss:$16 sps:$4 sm:$0xff]  }
 0x65d   :  { %10747 = vmatpush1.bf16.msra.mxu0 %v18849_v15  ;;  %v18896_v15 = vld [vmem:[%s24994_s3 + $0x7cc] ss:$16 sps:$4 sm:$0xff]  }
 0x65e   :  { %10748 = vmatprep.subr.bf16.mxu0 %v18854_v34  ;;  %v18899_v34 = vld [vmem:[%s24994_s3 + $0x7ec] ss:$16 sps:$4 sm:$0xff]  }
 0x661   :  { %10749 = vmatpush1.bf16.msra.mxu0 %v18852_v61  ;;  %v18902_v61 = vld [vmem:[%s24994_s3 + $0x80c] ss:$16 sps:$4 sm:$0xff]  }
 0x662   :  { %10750 = vmatprep.subr.bf16.mxu0 %v18857_v41  ;;  %v18905_v41 = vld [vmem:[%s24994_s3 + $0x82c] ss:$16 sps:$4 sm:$0xff]  }
 0x663   :  { %9474 = vmatmul.mubr.bf16.gmra.mrb[92].mxu0 %v22693_v17  ;;  %9787 = vmatmul.mubr.bf16.gmra.mrb[92].mxu1 %v22693_v17  ;;  %v18866_v17 = vld [vmem:[%s24994_s3 + $0x804] ss:$16 sps:$4 sm:$0xff]  }
 0x664   :  { %16242 = vmatprep.mubr.msk.bf16.mxu0 %vm5404_vm2, %v22697_v46  ;;  %16270 = vmatprep.mubr.msk.bf16.mxu1 %vm5404_vm2, %v22697_v46  ;;  %v18864_v46 = vld [vmem:[%s24994_s3 + $0x800] ss:$16 sps:$4 sm:$0xff]  }
 0x665   :  { %10751 = vmatpush1.bf16.msra.mxu0 %v18855_v39  ;;  %v18908_v39 = vld [vmem:[%s24994_s3 + $0x8a4] ss:$16 sps:$4 sm:$0xff]  }
 0x666   :  { %10752 = vmatprep.subr.bf16.mxu0 %v18860_v63  ;;  %v18903_v63 = vld [vmem:[%s24994_s3 + $0x828] ss:$16 sps:$4 sm:$0xff]  }
 0x669   :  { %10753 = vmatpush1.bf16.msra.mxu0 %v18858_v43  ;;  %v18914_v43 = vld [vmem:[%s24994_s3 + $0x86c] ss:$16 sps:$4 sm:$0xff]  }
 0x66a   :  { %10754 = vmatprep.subr.bf16.mxu0 %v18866_v17  ;;  %v18920_v17 = vld [vmem:[%s24994_s3 + $0x8ac] ss:$16 sps:$4 sm:$0xff]  }
 0x66b   :  { %9484 = vmatmul.mubr.bf16.gmra.mrb[96].mxu0 %v22715_v52  ;;  %9797 = vmatmul.mubr.bf16.gmra.mrb[96].mxu1 %v22715_v52  ;;  %v18876_v52 = vld [vmem:[%s24994_s3 + $0x840] ss:$16 sps:$4 sm:$0xff]  }
 0x66c   :  { %16243 = vmatprep.mubr.msk.bf16.mxu0 %vm5404_vm2, %v22719_v10  ;;  %16271 = vmatprep.mubr.msk.bf16.mxu1 %vm5404_vm2, %v22719_v10  ;;  %v18884_v10 = vld [vmem:[%s24994_s3 + $0x864] ss:$16 sps:$4 sm:$0xff]  }
 0x66d   :  { %10755 = vmatpush1.bf16.msra.mxu0 %v18864_v46  ;;  %v18942_v46 = vld [vmem:[%s24996_s8 + $0x30] ss:$8 sps:$4 sm:$0xff]  }
 0x66e   :  { %10756 = vmatprep.subr.bf16.mxu0 %v18872_v48  ;;  %v18944_v48 = vld [vmem:[%s24996_s8 + $0x34] ss:$8 sps:$4 sm:$0xff]  }
 0x671   :  { %10757 = vmatpush1.bf16.msra.mxu0 %v18870_v1  ;;  %v10271_v1 = vld [vmem:[#allocation3 + $0xd0] sm:$0xff] }
 0x672   :  { %10758 = vmatprep.subr.bf16.mxu0 %v18878_v6  ;;  %v10274_v6 = vld [vmem:[#allocation3 + $0xe8] sm:$0xff] }
 0x673   :  { %9494 = vmatmul.mubr.bf16.gmra.mrb[100].mxu0 %v22725_v47  ;;  %9807 = vmatmul.mubr.bf16.gmra.mrb[100].mxu1 %v22725_v47  ;;  %v18887_v47 = vld [vmem:[%s24994_s3 + $0x78c] ss:$16 sps:$4 sm:$0xff]  }
 0x674   :  { %16244 = vmatprep.mubr.msk.bf16.mxu0 %vm5404_vm2, %v22729_v44  ;;  %16272 = vmatprep.mubr.msk.bf16.mxu1 %vm5404_vm2, %v22729_v44  ;;  %v18888_v44 = vld [vmem:[%s24994_s3 + $0x7a8] ss:$16 sps:$4 sm:$0xff]  }
 0x675   :  { %10759 = vmatpush1.bf16.msra.mxu0 %v18876_v52  ;;  %11059 = vmatprep.subr.bf16.mxu1 %v18887_v47  ;;  %v18945_v52 = vld [vmem:[%s24995_s7 + $0x40] ss:$8 sps:$4 sm:$0xff]  }
 0x676   :  { %10760 = vmatprep.subr.bf16.mxu0 %v18884_v10  ;;  %11060 = vmatpush1.bf16.msra.mxu1 %v18885_v57  ;;  %v18947_v10 = vld [vmem:[%s24995_s7 + $0x44] ss:$8 sps:$4 sm:$0xff]   ;;  %v18948_v57 = vld [vmem:[%s24996_s8 + $0x40] ss:$8 sps:$4 sm:$0xff]  }
 0x677   :  { %v10273_v47 = vld [vmem:[#allocation3 + $0xe0] sm:$0xff] }
 0x679   :  { %10761 = vmatpush1.bf16.msra.mxu0 %v18882_v22  ;;  %v18950_v22 = vld [vmem:[%s24996_s8 + $0x44] ss:$8 sps:$4 sm:$0xff]  }
 0x67b   :  { %9504 = vmatmul.mubr.bf16.gmra.mrb[104].mxu0 %v22747_v51  ;;  %9817 = vmatmul.mubr.bf16.gmra.mrb[104].mxu1 %v22747_v51  ;;  %v18890_v51 = vld [vmem:[%s24994_s3 + $0x7ac] ss:$16 sps:$4 sm:$0xff]  }
 0x67c   :  { %16245 = vmatprep.mubr.msk.bf16.mxu0 %vm5404_vm2, %v22751_v3  ;;  %16273 = vmatprep.mubr.msk.bf16.mxu1 %vm5404_vm2, %v22751_v3  ;;  %v18891_v3 = vld [vmem:[%s24994_s3 + $0x880] ss:$16 sps:$4 sm:$0xff]  }
 0x67d   :  { %11061 = vmatprep.subr.bf16.mxu1 %v18890_v51  ;;  %v10275_v51 = vld [vmem:[#allocation3 + $0xf0] sm:$0xff] }
 0x67e   :  { %11062 = vmatpush1.bf16.msra.mxu1 %v18888_v44  ;;  %v10276_v44 = vld [vmem:[#allocation3 + $0xf8] sm:$0xff] }
 0x67f   :  { %11063 = vmatprep.subr.bf16.mxu1 %v18896_v15  ;;  %v18954_v15 = vld [vmem:[%s24996_s8 + $0x50] ss:$8 sps:$4 sm:$0xff]  }
 0x683   :  { %9514 = vmatmul.mubr.bf16.gmra.mrb[108].mxu0 %v22769_v53  ;;  %9827 = vmatmul.mubr.bf16.gmra.mrb[108].mxu1 %v22769_v53  ;;  %v18893_v53 = vld [vmem:[%s24994_s3 + $0x884] ss:$16 sps:$4 sm:$0xff]  }
 0x684   :  { %16246 = vmatprep.mubr.msk.bf16.mxu0 %vm5404_vm2, %v22773_v59  ;;  %16274 = vmatprep.mubr.msk.bf16.mxu1 %vm5404_vm2, %v22773_v59  ;;  %v18894_v59 = vld [vmem:[%s24994_s3 + $0x7c8] ss:$16 sps:$4 sm:$0xff]  }
 0x685   :  { %10762 = vmatprep.subr.bf16.mxu0 %v18893_v53  ;;  %11064 = vmatpush1.bf16.msra.mxu1 %v18894_v59  ;;  %v18951_v53 = vld [vmem:[%s24995_s7 + $0x50] ss:$8 sps:$4 sm:$0xff]   ;;  %v18953_v59 = vld [vmem:[%s24995_s7 + $0x54] ss:$8 sps:$4 sm:$0xff]  }
 0x686   :  { %10763 = vmatpush1.bf16.msra.mxu0 %v18891_v3  ;;  %11065 = vmatprep.subr.bf16.mxu1 %v18899_v34  ;;  %v10278_v3 = vld [vmem:[#allocation3 + $0x108] sm:$0xff]  ;;  %v18956_v34 = vld [vmem:[%s24996_s8 + $0x54] ss:$8 sps:$4 sm:$0xff]  }
 0x687   :  { %10764 = vmatprep.subr.bf16.mxu0 %v18908_v39  ;;  %v18959_v39 = vld [vmem:[%s24995_s7 + $0x64] ss:$8 sps:$4 sm:$0xff]  }
 0x68b   :  { %9524 = vmatmul.mubr.bf16.gmra.mrb[112].mxu0 %v22797_v55  ;;  %9837 = vmatmul.mubr.bf16.gmra.mrb[112].mxu1 %v22797_v55  ;;  %v18897_v55 = vld [vmem:[%s24994_s3 + $0x7e8] ss:$16 sps:$4 sm:$0xff]  }
 0x68c   :  { %16247 = vmatprep.mubr.msk.bf16.mxu0 %vm5404_vm2, %v22801_v40  ;;  %16275 = vmatprep.mubr.msk.bf16.mxu1 %vm5404_vm2, %v22801_v40  ;;  %v18900_v40 = vld [vmem:[%s24994_s3 + $0x808] ss:$16 sps:$4 sm:$0xff]  }
 0x68d   :  { %11066 = vmatpush1.bf16.msra.mxu1 %v18897_v55  ;;  %v10277_v55 = vld [vmem:[#allocation3 + $0x100] sm:$0xff] }
 0x68e   :  { %11067 = vmatprep.subr.bf16.mxu1 %v18902_v61  ;;  %v10279_v61 = vld [vmem:[#allocation3 + $0x110] sm:$0xff] }
 0x691   :  { %11068 = vmatpush1.bf16.msra.mxu1 %v18900_v40  ;;  %v10280_v40 = vld [vmem:[#allocation3 + $0x118] sm:$0xff] }
 0x692   :  { %11069 = vmatprep.subr.bf16.mxu1 %v18905_v41  ;;  %v10282_v41 = vld [vmem:[#allocation3 + $0x128] sm:$0xff] }
 0x693   :  { %9534 = vmatmul.mubr.bf16.gmra.mrb[116].mxu0 %v22819_v36  ;;  %9847 = vmatmul.mubr.bf16.gmra.mrb[116].mxu1 %v22819_v36  ;;  %v18906_v36 = vld [vmem:[%s24994_s3 + $0x8a0] ss:$16 sps:$4 sm:$0xff]  }
 0x694   :  { %16248 = vmatprep.mubr.msk.bf16.mxu0 %vm5404_vm2, %v22823_v42  ;;  %16276 = vmatprep.mubr.msk.bf16.mxu1 %vm5404_vm2, %v22823_v42  ;;  %v18909_v42 = vld [vmem:[%s24994_s3 + $0x848] ss:$16 sps:$4 sm:$0xff]  }
 0x695   :  { %10765 = vmatpush1.bf16.msra.mxu0 %v18906_v36  ;;  %11070 = vmatpush1.bf16.msra.mxu1 %v18903_v63  ;;  %v18957_v36 = vld [vmem:[%s24995_s7 + $0x60] ss:$8 sps:$4 sm:$0xff]  }
 0x696   :  { %11071 = vmatprep.subr.bf16.mxu1 %v18911_v50  ;;  %v18960_v63 = vld [vmem:[%s24996_s8 + $0x60] ss:$8 sps:$4 sm:$0xff]  }
 0x697   :  { %v10281_v50 = vld [vmem:[#allocation3 + $0x120] sm:$0xff] }
 0x699   :  { %11072 = vmatpush1.bf16.msra.mxu1 %v18909_v42  ;;  %v18962_v42 = vld [vmem:[%s24996_s8 + $0x64] ss:$8 sps:$4 sm:$0xff]  }
 0x69a   :  { %11073 = vmatprep.subr.bf16.mxu1 %v18914_v43  ;;  %v10284_v43 = vld [vmem:[#allocation3 + $0x138] sm:$0xff] }
 0x69b   :  { %9544 = vmatmul.mubr.bf16.gmra.mrb[120].mxu0 %v22844_v37  ;;  %9857 = vmatmul.mubr.bf16.gmra.mrb[120].mxu1 %v22844_v37  ;;  %v18912_v37 = vld [vmem:[%s24994_s3 + $0x868] ss:$16 sps:$4 sm:$0xff]  }
 0x69c   :  { %16249 = vmatprep.mubr.msk.bf16.mxu0 %vm5404_vm2, %v22848_v45  ;;  %16277 = vmatprep.mubr.msk.bf16.mxu1 %vm5404_vm2, %v22848_v45  ;;  %v18915_v45 = vld [vmem:[%s24994_s3 + $0x888] ss:$16 sps:$4 sm:$0xff]  }
 0x69d   :  { %11074 = vmatpush1.bf16.msra.mxu1 %v18912_v37  ;;  %v18965_v37 = vld [vmem:[%s24995_s7 + $0x74] ss:$8 sps:$4 sm:$0xff]  }
 0x69e   :  { %11075 = vmatprep.subr.bf16.mxu1 %v18917_v56  ;;  %v18963_v56 = vld [vmem:[%s24995_s7 + $0x70] ss:$8 sps:$4 sm:$0xff]  }
 0x6a1   :  { %11076 = vmatpush1.bf16.msra.mxu1 %v18915_v45  ;;  %v18968_v45 = vld [vmem:[%s24996_s8 + $0x74] ss:$8 sps:$4 sm:$0xff]  }
 0x6a2   :  { %11077 = vmatprep.subr.bf16.mxu1 %v18920_v17  ;;  %v18966_v17 = vld [vmem:[%s24996_s8 + $0x70] ss:$8 sps:$4 sm:$0xff]  }
 0x6a3   :  { %9554 = vmatmul.mubr.bf16.gmra.mrb[124].mxu0 %v22854_v12  ;;  %9867 = vmatmul.mubr.bf16.gmra.mrb[124].mxu1 %v22854_v12  ;;  %v18918_v12 = vld [vmem:[%s24994_s3 + $0x8a8] ss:$16 sps:$4 sm:$0xff]  }
 0x6a4   :  { %16250 = vmatprep.mubr.msk.bf16.mxu0 %vm5404_vm2, %v22858_v14  ;;  %16278 = vmatprep.mubr.msk.bf16.mxu1 %vm5404_vm2, %v22858_v14  ;;  %v23317_v14 = vld [vmem:[#allocation3 + $0x208] sm:$0xff] }
 0x6a5   :  { %11078 = vmatpush1.bf16.msra.mxu1 %v18918_v12  ;;  %v18971_v12 = vld [vmem:[%s24995_s7 + $0x84] ss:$8 sps:$4 sm:$0xff]  }
 0x6ab   :  { %9564 = vmatmul.mubr.bf16.gmra.mrb[128].mxu0 %v22864_v25  ;;  %9877 = vmatmul.mubr.bf16.gmra.mrb[128].mxu1 %v22864_v25  ;;  %v23325_v25 = vld [vmem:[#allocation3 + $0x218] sm:$0xff] }
 0x6ac   :  { %16251 = vmatprep.mubr.msk.bf16.mxu0 %vm5404_vm2, %v22868_v28  ;;  %16279 = vmatprep.mubr.msk.bf16.mxu1 %vm5404_vm2, %v22868_v28  ;;  %v23327_v28 = vld [vmem:[#allocation3] sm:$0xff] }
 0x6b3   :  { %9574 = vmatmul.mubr.bf16.gmra.mrb[132].mxu0 %v22874_v24  ;;  %9887 = vmatmul.mubr.bf16.gmra.mrb[132].mxu1 %v22874_v24  ;;  %v18923_v24 = vld [vmem:[%s24995_s7 + $0x4] ss:$8 sps:$4 sm:$0xff]  }
 0x6b4   :  { %16252 = vmatprep.mubr.msk.bf16.mxu0 %vm5404_vm2, %v22878_v60  ;;  %16280 = vmatprep.mubr.msk.bf16.mxu1 %vm5404_vm2, %v22878_v60  ;;  %v18926_v60 = vld [vmem:[%s24996_s8 + $0x4] ss:$8 sps:$4 sm:$0xff]  }
 0x6b5   :  { %12716 = vmatprep.subr.bf16.mxu0 %v18923_v24  ;;  %13398 = vmatprep.subr.bf16.mxu1 %v18926_v60  ;;  %v18974_v24 = vld [vmem:[%s24996_s8 + $0x84] ss:$8 sps:$4 sm:$0xff]   ;;  %v18969_v60 = vld [vmem:[%s24995_s7 + $0x80] ss:$8 sps:$4 sm:$0xff]  }
 0x6bb   :  { %9584 = vmatmul.mubr.bf16.gmra.mrb[136].mxu0 %v22884_v49  ;;  %9897 = vmatmul.mubr.bf16.gmra.mrb[136].mxu1 %v22884_v49  ;;  %v10262_v49 = vld [vmem:[#allocation3 + $0x88] sm:$0xff] }
 0x6bc   :  { %16253 = vmatprep.mubr.msk.bf16.mxu0 %vm5404_vm2, %v22888_v9  ;;  %16281 = vmatprep.mubr.msk.bf16.mxu1 %vm5404_vm2, %v22888_v9  ;;  %v18921_v9 = vld [vmem:[%s24995_s7] ss:$8 sps:$4 sm:$0xff]  }
 0x6c3   :  { %9594 = vmatmul.mubr.bf16.gmra.mrb[140].mxu0 %v22894_v29  ;;  %9907 = vmatmul.mubr.bf16.gmra.mrb[140].mxu1 %v22894_v29  ;;  %v18924_v29 = vld [vmem:[%s24996_s8] ss:$8 sps:$4 sm:$0xff]  }
 0x6c4   :  { %16254 = vmatprep.mubr.msk.bf16.mxu0 %vm5404_vm2, %v22898_v13  ;;  %16282 = vmatprep.mubr.msk.bf16.mxu1 %vm5404_vm2, %v22898_v13  ;;  %v10261_v13 = vld [vmem:[#allocation3 + $0x80] sm:$0xff] }
 0x6cb   :  { %9604 = vmatmul.mubr.bf16.gmra.mrb[144].mxu0 %v22904_v8  ;;  %9917 = vmatmul.mubr.bf16.gmra.mrb[144].mxu1 %v22904_v8  ;;  %v10264_v8 = vld [vmem:[#allocation3 + $0x98] sm:$0xff] }
 0x6cc   :  { %16255 = vmatprep.mubr.msk.bf16.mxu0 %vm5404_vm2, %v22908_v2  ;;  %16283 = vmatprep.mubr.msk.bf16.mxu1 %vm5404_vm2, %v22908_v2  ;;  %v18927_v2 = vld [vmem:[%s24995_s7 + $0x10] ss:$8 sps:$4 sm:$0xff]  }
 0x6d3   :  { %9614 = vmatmul.mubr.bf16.gmra.mrb[148].mxu0 %v22914_v11  ;;  %9927 = vmatmul.mubr.bf16.gmra.mrb[148].mxu1 %v22914_v11  ;;  %v18929_v11 = vld [vmem:[%s24995_s7 + $0x14] ss:$8 sps:$4 sm:$0xff]  }
 0x6d4   :  { %16256 = vmatprep.mubr.msk.bf16.mxu0 %vm5404_vm2, %v22918_v19  ;;  %16284 = vmatprep.mubr.msk.bf16.mxu1 %vm5404_vm2, %v22918_v19  ;;  %v18930_v19 = vld [vmem:[%s24996_s8 + $0x10] ss:$8 sps:$4 sm:$0xff]  }
 0x6db   :  { %9624 = vmatmul.mubr.bf16.gmra.mrb[152].mxu0 %v22924_v54  ;;  %9937 = vmatmul.mubr.bf16.gmra.mrb[152].mxu1 %v22924_v54  ;;  %v18932_v54 = vld [vmem:[%s24996_s8 + $0x14] ss:$8 sps:$4 sm:$0xff]  }
 0x6dc   :  { %16257 = vmatprep.mubr.msk.bf16.mxu0 %vm5404_vm2, %v22928_v18  ;;  %16285 = vmatprep.mubr.msk.bf16.mxu1 %vm5404_vm2, %v22928_v18  ;;  %v10263_v18 = vld [vmem:[#allocation3 + $0x90] sm:$0xff] }
 0x6e3   :  { %9634 = vmatmul.mubr.bf16.gmra.mrb[156].mxu0 %v22934_v7  ;;  %9947 = vmatmul.mubr.bf16.gmra.mrb[156].mxu1 %v22934_v7  ;;  %v10266_v7 = vld [vmem:[#allocation3 + $0xa8] sm:$0xff] }
 0x6e4   :  { %16258 = vmatprep.mubr.msk.bf16.mxu0 %vm5404_vm2, %v22938_v4  ;;  %16286 = vmatprep.mubr.msk.bf16.mxu1 %vm5404_vm2, %v22938_v4  ;;  %v10265_v4 = vld [vmem:[#allocation3 + $0xa0] sm:$0xff] }
 0x6eb   :  { %9644 = vmatmul.mubr.bf16.gmra.mrb[160].mxu0 %v22944_v0  ;;  %9957 = vmatmul.mubr.bf16.gmra.mrb[160].mxu1 %v22944_v0  ;;  %v10268_v0 = vld [vmem:[#allocation3 + $0xb8] sm:$0xff] }
 0x6ec   :  { %16259 = vmatprep.mubr.msk.bf16.mxu0 %vm5404_vm2, %v22948_v58  ;;  %16287 = vmatprep.mubr.msk.bf16.mxu1 %vm5404_vm2, %v22948_v58  ;;  %v18933_v58 = vld [vmem:[%s24995_s7 + $0x20] ss:$8 sps:$4 sm:$0xff]  }
 0x6f3   :  { %9654 = vmatmul.mubr.bf16.gmra.mrb[164].mxu0 %v22954_v30  ;;  %9967 = vmatmul.mubr.bf16.gmra.mrb[164].mxu1 %v22954_v30  ;;  %v18935_v30 = vld [vmem:[%s24995_s7 + $0x24] ss:$8 sps:$4 sm:$0xff]  }
 0x6f4   :  { %16260 = vmatprep.mubr.msk.bf16.mxu0 %vm5404_vm2, %v22958_v5  ;;  %16288 = vmatprep.mubr.msk.bf16.mxu1 %vm5404_vm2, %v22958_v5  ;;  %v18936_v5 = vld [vmem:[%s24996_s8 + $0x20] ss:$8 sps:$4 sm:$0xff]  }
 0x6fb   :  { %9664 = vmatmul.mubr.bf16.gmra.mrb[168].mxu0 %v22964_v31  ;;  %9977 = vmatmul.mubr.bf16.gmra.mrb[168].mxu1 %v22964_v31  ;;  %v18938_v31 = vld [vmem:[%s24996_s8 + $0x24] ss:$8 sps:$4 sm:$0xff]  }
 0x6fc   :  { %16261 = vmatprep.mubr.msk.bf16.mxu0 %vm5404_vm2, %v22968_v38  ;;  %16289 = vmatprep.mubr.msk.bf16.mxu1 %vm5404_vm2, %v22968_v38  ;;  %v10267_v38 = vld [vmem:[#allocation3 + $0xb0] sm:$0xff] }
 0x703   :  { %9674 = vmatmul.mubr.bf16.gmra.mrb[172].mxu0 %v22974_v62  ;;  %9987 = vmatmul.mubr.bf16.gmra.mrb[172].mxu1 %v22974_v62  ;;  %v10270_v62 = vld [vmem:[#allocation3 + $0xc8] sm:$0xff] }
 0x704   :  { %16262 = vmatprep.mubr.msk.bf16.mxu0 %vm5404_vm2, %v22978_v35  ;;  %16290 = vmatprep.mubr.msk.bf16.mxu1 %vm5404_vm2, %v22978_v35  ;;  %v10269_v35 = vld [vmem:[#allocation3 + $0xc0] sm:$0xff] }
 0x70b   :  { %9684 = vmatmul.mubr.bf16.gmra.mrb[176].mxu0 %v22987_v23  ;;  %9997 = vmatmul.mubr.bf16.gmra.mrb[176].mxu1 %v22987_v23  ;;  %v10272_v23 = vld [vmem:[#allocation3 + $0xd8] sm:$0xff] }
 0x70c   :  { %16263 = vmatprep.mubr.msk.bf16.mxu0 %vm5404_vm2, %v22991_v33  ;;  %16291 = vmatprep.mubr.msk.bf16.mxu1 %vm5404_vm2, %v22991_v33  ;;  %v18939_v33 = vld [vmem:[%s24995_s7 + $0x30] ss:$8 sps:$4 sm:$0xff]  }
 0x713   :  { %9694 = vmatmul.mubr.bf16.gmra.mrb[180].mxu0 %v22997_v32  ;;  %10007 = vmatmul.mubr.bf16.gmra.mrb[180].mxu1 %v22997_v32  ;;  %v18941_v32 = vld [vmem:[%s24995_s7 + $0x34] ss:$8 sps:$4 sm:$0xff]  }
 0x714   :  { %16264 = vmatprep.mubr.msk.bf16.mxu0 %vm5404_vm2, %v23317_v14  ;;  %16292 = vmatprep.mubr.msk.bf16.mxu1 %vm5404_vm2, %v23317_v14 }
 0x71b   :  { %9704 = vmatmul.mubr.bf16.gmra.mrb[184].mxu0 %v23327_v28  ;;  %10017 = vmatmul.mubr.bf16.gmra.mrb[184].mxu1 %v23327_v28 }
 0x71c   :  { %16265 = vmatprep.mubr.msk.bf16.mxu0 %vm5404_vm2, %v23325_v25  ;;  %16293 = vmatprep.mubr.msk.bf16.mxu1 %vm5404_vm2, %v23325_v25 }
 0x723   :  { %9714 = vmatmul.mubr.bf16.gmra.mrb[188].mxu0 %v23327_v28  ;;  %10027 = vmatmul.mubr.bf16.gmra.mrb[188].mxu1 %v23327_v28 }
 0x724   :  { %16406 = vmatprep.mubr.msk.bf16.mxu0 %vm5404_vm2, %v10262_v49  ;;  %16434 = vmatprep.mubr.msk.bf16.mxu1 %vm5404_vm2, %v10262_v49  ;;  %v18972_v49 = vld [vmem:[%s24996_s8 + $0x80] ss:$8 sps:$4 sm:$0xff]  }
 0x72b   :  { %10771 = vmatmul.mubr.bf16.vlgmr.msra.gmra.mrb[80].mxu0 %v10261_v13  ;;  %11084 = vmatmul.mubr.bf16.vlgmr.msra.gmra.mrb[80].mxu1 %v10261_v13  ;;  %v18977_v13 = vld [vmem:[%s24995_s7 + $0x94] ss:$8 sps:$4 sm:$0xff]  }
 0x72c   :  { %16407 = vmatprep.mubr.msk.bf16.mxu0 %vm5404_vm2, %v10264_v8  ;;  %16435 = vmatprep.mubr.msk.bf16.mxu1 %vm5404_vm2, %v10264_v8  ;;  %v18980_v8 = vld [vmem:[%s24996_s8 + $0x94] ss:$8 sps:$4 sm:$0xff]  }
 0x72d   :  { %12717 = vmatpush1.bf16.msra.mxu0 %v18921_v9  ;;  %13399 = vmatpush1.bf16.msra.mxu1 %v18924_v29  ;;  %v10283_v9 = vld [vmem:[#allocation3 + $0x130] sm:$0xff]  ;;  %v10286_v29 = vld [vmem:[#allocation3 + $0x148] sm:$0xff] }
 0x72e   :  { %12718 = vmatprep.subr.bf16.mxu0 %v18929_v11  ;;  %13400 = vmatprep.subr.bf16.mxu1 %v18932_v54  ;;  %v18978_v11 = vld [vmem:[%s24996_s8 + $0x90] ss:$8 sps:$4 sm:$0xff]   ;;  %v18986_v54 = vld [vmem:[%s24996_s8 + $0xa4] ss:$8 sps:$4 sm:$0xff]  }
 0x731   :  { %12719 = vmatpush1.bf16.msra.mxu0 %v18927_v2  ;;  %13401 = vmatpush1.bf16.msra.mxu1 %v18930_v19  ;;  %v18975_v2 = vld [vmem:[%s24995_s7 + $0x90] ss:$8 sps:$4 sm:$0xff]   ;;  %v18983_v19 = vld [vmem:[%s24995_s7 + $0xa4] ss:$8 sps:$4 sm:$0xff]  }
 0x732   :  { %12720 = vmatprep.subr.bf16.mxu0 %v18935_v30  ;;  %13402 = vmatprep.subr.bf16.mxu1 %v18938_v31  ;;  %v18992_v30 = vld [vmem:[%s24996_s8 + $0xb4] ss:$8 sps:$4 sm:$0xff]   ;;  %v18990_v31 = vld [vmem:[%s24996_s8 + $0xb0] ss:$8 sps:$4 sm:$0xff]  }
 0x733   :  { %10781 = vmatmul.mubr.bf16.gmra.mrb[84].mxu0 %v10263_v18  ;;  %11094 = vmatmul.mubr.bf16.gmra.mrb[84].mxu1 %v10263_v18  ;;  %v18981_v18 = vld [vmem:[%s24995_s7 + $0xa0] ss:$8 sps:$4 sm:$0xff]  }
 0x734   :  { %16408 = vmatprep.mubr.msk.bf16.mxu0 %vm5404_vm2, %v10266_v7  ;;  %16436 = vmatprep.mubr.msk.bf16.mxu1 %vm5404_vm2, %v10266_v7  ;;  %v18984_v7 = vld [vmem:[%s24996_s8 + $0xa0] ss:$8 sps:$4 sm:$0xff]  }
 0x735   :  { %12721 = vmatpush1.bf16.msra.mxu0 %v18933_v58  ;;  %13403 = vmatpush1.bf16.msra.mxu1 %v18936_v5  ;;  %v18989_v58 = vld [vmem:[%s24995_s7 + $0xb4] ss:$8 sps:$4 sm:$0xff]   ;;  %v18987_v5 = vld [vmem:[%s24995_s7 + $0xb0] ss:$8 sps:$4 sm:$0xff]  }
 0x736   :  { %12722 = vmatprep.subr.bf16.mxu0 %v18941_v32  ;;  %13404 = vmatprep.subr.bf16.mxu1 %v18944_v48  ;;  %v10290_v32 = vld [vmem:[#allocation3 + $0x168] sm:$0xff]  ;;  %v19004_v48 = vld [vmem:[%s24996_s8 + $0xd4] ss:$8 sps:$4 sm:$0xff]  }
 0x739   :  { %12723 = vmatpush1.bf16.msra.mxu0 %v18939_v33  ;;  %13405 = vmatpush1.bf16.msra.mxu1 %v18942_v46  ;;  %v10287_v33 = vld [vmem:[#allocation3 + $0x150] sm:$0xff] }
 0x73a   :  { %12724 = vmatprep.subr.bf16.mxu0 %v18947_v10  ;;  %13406 = vmatprep.subr.bf16.mxu1 %v18950_v22  ;;  %v19001_v46 = vld [vmem:[%s24995_s7 + $0xd4] ss:$8 sps:$4 sm:$0xff]   ;;  %v19010_v10 = vld [vmem:[%s24996_s8 + $0xe4] ss:$8 sps:$4 sm:$0xff]   ;;  %v19008_v22 = vld [vmem:[%s24996_s8 + $0xe0] ss:$8 sps:$4 sm:$0xff]  }
 0x73b   :  { %10791 = vmatmul.mubr.bf16.gmra.mrb[88].mxu0 %v10265_v4  ;;  %11104 = vmatmul.mubr.bf16.gmra.mrb[88].mxu1 %v10265_v4  ;;  %v10285_v4 = vld [vmem:[#allocation3 + $0x140] sm:$0xff] }
 0x73c   :  { %16409 = vmatprep.mubr.msk.bf16.mxu0 %vm5404_vm2, %v10268_v0  ;;  %16437 = vmatprep.mubr.msk.bf16.mxu1 %vm5404_vm2, %v10268_v0  ;;  %v10288_v0 = vld [vmem:[#allocation3 + $0x158] sm:$0xff] }
 0x73d   :  { %12725 = vmatpush1.bf16.msra.mxu0 %v18945_v52  ;;  %13407 = vmatpush1.bf16.msra.mxu1 %v18948_v57  ;;  %v19007_v52 = vld [vmem:[%s24995_s7 + $0xe4] ss:$8 sps:$4 sm:$0xff]   ;;  %v19005_v57 = vld [vmem:[%s24995_s7 + $0xe0] ss:$8 sps:$4 sm:$0xff]  }
 0x73e   :  { %12726 = vmatprep.subr.bf16.mxu0 %v18953_v59  ;;  %13408 = vmatprep.subr.bf16.mxu1 %v18956_v34  ;;  %v19014_v59 = vld [vmem:[%s24996_s8 + $0xf0] ss:$8 sps:$4 sm:$0xff]   ;;  %v10294_v34 = vld [vmem:[#allocation3 + $0x188] sm:$0xff] }
 0x741   :  { %12727 = vmatpush1.bf16.msra.mxu0 %v18951_v53  ;;  %13409 = vmatpush1.bf16.msra.mxu1 %v18954_v15  ;;  %v19011_v53 = vld [vmem:[%s24995_s7 + $0xf0] ss:$8 sps:$4 sm:$0xff]  }
 0x742   :  { %12728 = vmatprep.subr.bf16.mxu0 %v18959_v39  ;;  %13410 = vmatprep.subr.bf16.mxu1 %v18962_v42  ;;  %v10291_v15 = vld [vmem:[#allocation3 + $0x170] sm:$0xff]  ;;  %v10300_v39 = vld [vmem:[#allocation3 + $0x1b8] sm:$0xff]  ;;  %v10302_v42 = vld [vmem:[#allocation3 + $0x1c8] sm:$0xff] }
 0x743   :  { %10801 = vmatmul.mubr.bf16.gmra.mrb[92].mxu0 %v10267_v38  ;;  %11114 = vmatmul.mubr.bf16.gmra.mrb[92].mxu1 %v10267_v38  ;;  %v18995_v38 = vld [vmem:[%s24995_s7 + $0xc4] ss:$8 sps:$4 sm:$0xff]  }
 0x744   :  { %16410 = vmatprep.mubr.msk.bf16.mxu0 %vm5404_vm2, %v10270_v62  ;;  %16438 = vmatprep.mubr.msk.bf16.mxu1 %vm5404_vm2, %v10270_v62  ;;  %v18998_v62 = vld [vmem:[%s24996_s8 + $0xc4] ss:$8 sps:$4 sm:$0xff]  }
 0x745   :  { %12729 = vmatpush1.bf16.msra.mxu0 %v18957_v36  ;;  %13411 = vmatpush1.bf16.msra.mxu1 %v18960_v63  ;;  %v10297_v36 = vld [vmem:[#allocation3 + $0x1a0] sm:$0xff]  ;;  %v10299_v63 = vld [vmem:[#allocation3 + $0x1b0] sm:$0xff] }
 0x746   :  { %12730 = vmatprep.subr.bf16.mxu0 %v18965_v37  ;;  %13412 = vmatprep.subr.bf16.mxu1 %v18968_v45  ;;  %v10303_v37 = vld [vmem:[#allocation3 + $0x1d0] sm:$0xff]  ;;  %v10306_v45 = vld [vmem:[#allocation3 + $0x1e8] sm:$0xff] }
 0x749   :  { %12731 = vmatpush1.bf16.msra.mxu0 %v18963_v56  ;;  %13413 = vmatpush1.bf16.msra.mxu1 %v18966_v17  ;;  %v10305_v56 = vld [vmem:[#allocation3 + $0x1e0] sm:$0xff]  ;;  %v10308_v17 = vld [vmem:[#allocation3 + $0x1f8] sm:$0xff] }
 0x74a   :  { %12732 = vmatprep.subr.bf16.mxu0 %v18971_v12  ;;  %13414 = vmatprep.subr.bf16.mxu1 %v18974_v24  ;;  %v10307_v12 = vld [vmem:[#allocation3 + $0x1f0] sm:$0xff]  ;;  %v10314_v24 = vld [vmem:[#allocation3 + $0x228] sm:$0xff] }
 0x74b   :  { %10811 = vmatmul.mubr.bf16.gmra.mrb[96].mxu0 %v10269_v35  ;;  %11124 = vmatmul.mubr.bf16.gmra.mrb[96].mxu1 %v10269_v35  ;;  %v18993_v35 = vld [vmem:[%s24995_s7 + $0xc0] ss:$8 sps:$4 sm:$0xff]  }
 0x74c   :  { %16411 = vmatprep.mubr.msk.bf16.mxu0 %vm5404_vm2, %v10272_v23  ;;  %16439 = vmatprep.mubr.msk.bf16.mxu1 %vm5404_vm2, %v10272_v23  ;;  %v18996_v23 = vld [vmem:[%s24996_s8 + $0xc0] ss:$8 sps:$4 sm:$0xff]  }
 0x74d   :  { %12733 = vmatpush1.bf16.msra.mxu0 %v18969_v60  ;;  %13415 = vmatpush1.bf16.msra.mxu1 %v18972_v49 }
 0x74e   :  { %12734 = vmatprep.subr.bf16.mxu0 %v18977_v13  ;;  %13416 = vmatprep.subr.bf16.mxu1 %v18980_v8  ;;  %v11588_v8 = vld [vmem:[%s24997_s4] sm:$0xf] }
 0x751   :  { %12735 = vmatpush1.bf16.msra.mxu0 %v18975_v2  ;;  %13417 = vmatpush1.bf16.msra.mxu1 %v18978_v11 }
 0x752   :  { %12736 = vmatprep.subr.bf16.mxu0 %v18983_v19  ;;  %13418 = vmatprep.subr.bf16.mxu1 %v18986_v54  ;;  %v23602_v19 = vrot.slane %v11588_v8, %v197_v20  ;;  %v23606_v54 = vrot.slane %v11588_v8, %v205_v26  ;;  %v19022_v20 = vld [vmem:[%s24996_s8 + $0x104] ss:$8 sps:$4 sm:$0xff]  }
 0x753   :  { %10821 = vmatmul.mubr.bf16.gmra.mrb[100].mxu0 %v10271_v1  ;;  %11134 = vmatmul.mubr.bf16.gmra.mrb[100].mxu1 %v10271_v1  ;;  %v18999_v1 = vld [vmem:[%s24995_s7 + $0xd0] ss:$8 sps:$4 sm:$0xff]  }
 0x754   :  { %16412 = vmatprep.mubr.msk.bf16.mxu0 %vm5404_vm2, %v10274_v6  ;;  %16440 = vmatprep.mubr.msk.bf16.mxu1 %vm5404_vm2, %v10274_v6  ;;  %v19002_v6 = vld [vmem:[%s24996_s8 + $0xd0] ss:$8 sps:$4 sm:$0xff]  }
 0x755   :  { %12737 = vmatpush1.bf16.msra.mxu0 %v18981_v18  ;;  %13419 = vmatpush1.bf16.msra.mxu1 %v18984_v7  ;;  %v23610_v18 = vrot.slane %v11588_v8, %v201_v21  ;;  %v23614_v7 = vrot.slane %v11588_v8, %v209_v27 }
 0x756   :  { %12738 = vmatprep.subr.bf16.mxu0 %v18989_v58  ;;  %13420 = vmatprep.subr.bf16.mxu1 %v18992_v30 }
 0x759   :  { %12739 = vmatpush1.bf16.msra.mxu0 %v18987_v5  ;;  %13421 = vmatpush1.bf16.msra.mxu1 %v18990_v31 }
 0x75a   :  { %12740 = vmatprep.subr.bf16.mxu0 %v18995_v38  ;;  %13422 = vmatprep.subr.bf16.mxu1 %v18998_v62 }
 0x75b   :  { %10831 = vmatmul.mubr.bf16.gmra.mrb[104].mxu0 %v10273_v47  ;;  %11144 = vmatmul.mubr.bf16.gmra.mrb[104].mxu1 %v10273_v47  ;;  %v10289_v47 = vld [vmem:[#allocation3 + $0x160] sm:$0xff] }
 0x75c   :  { %16413 = vmatprep.mubr.msk.bf16.mxu0 %vm5404_vm2, %v10276_v44  ;;  %16441 = vmatprep.mubr.msk.bf16.mxu1 %vm5404_vm2, %v10276_v44  ;;  %v10292_v44 = vld [vmem:[#allocation3 + $0x178] sm:$0xff] }
 0x75d   :  { %12741 = vmatpush1.bf16.msra.mxu0 %v18993_v35  ;;  %13423 = vmatpush1.bf16.msra.mxu1 %v18996_v23 }
 0x75e   :  { %12742 = vmatprep.subr.bf16.mxu0 %v19001_v46  ;;  %13424 = vmatprep.subr.bf16.mxu1 %v19004_v48 }
 0x761   :  { %12743 = vmatpush1.bf16.msra.mxu0 %v18999_v1  ;;  %13425 = vmatpush1.bf16.msra.mxu1 %v19002_v6 }
 0x762   :  { %12744 = vmatprep.subr.bf16.mxu0 %v19007_v52  ;;  %13426 = vmatprep.subr.bf16.mxu1 %v19010_v10 }
 0x763   :  { %10841 = vmatmul.mubr.bf16.gmra.mrb[108].mxu0 %v10275_v51  ;;  %11154 = vmatmul.mubr.bf16.gmra.mrb[108].mxu1 %v10275_v51  ;;  %v19013_v51 = vld [vmem:[%s24995_s7 + $0xf4] ss:$8 sps:$4 sm:$0xff]  }
 0x764   :  { %16414 = vmatprep.mubr.msk.bf16.mxu0 %vm5404_vm2, %v10278_v3  ;;  %16442 = vmatprep.mubr.msk.bf16.mxu1 %vm5404_vm2, %v10278_v3  ;;  %v19016_v3 = vld [vmem:[%s24996_s8 + $0xf4] ss:$8 sps:$4 sm:$0xff]  }
 0x765   :  { %12745 = vmatpush1.bf16.msra.mxu0 %v19005_v57  ;;  %13427 = vmatpush1.bf16.msra.mxu1 %v19008_v22 }
 0x766   :  { %12746 = vmatprep.subr.bf16.mxu0 %v19013_v51  ;;  %13428 = vmatprep.subr.bf16.mxu1 %v19016_v3 }
 0x769   :  { %12747 = vmatpush1.bf16.msra.mxu0 %v19011_v53  ;;  %13429 = vmatpush1.bf16.msra.mxu1 %v19014_v59 }
 0x76a   :  { %13571 = vmatprep.subr.bf16.mxu1 %v19022_v20 }
 0x76b   :  { %10851 = vmatmul.mubr.bf16.gmra.mrb[112].mxu0 %v10277_v55  ;;  %11164 = vmatmul.mubr.bf16.gmra.mrb[112].mxu1 %v10277_v55  ;;  %v10293_v55 = vld [vmem:[#allocation3 + $0x180] sm:$0xff] }
 0x76c   :  { %16415 = vmatprep.mubr.msk.bf16.mxu0 %vm5404_vm2, %v10280_v40  ;;  %16443 = vmatprep.mubr.msk.bf16.mxu1 %vm5404_vm2, %v10280_v40  ;;  %v10296_v40 = vld [vmem:[#allocation3 + $0x198] sm:$0xff] }
 0x773   :  { %10861 = vmatmul.mubr.bf16.gmra.mrb[116].mxu0 %v10279_v61  ;;  %11174 = vmatmul.mubr.bf16.gmra.mrb[116].mxu1 %v10279_v61  ;;  %v10295_v61 = vld [vmem:[#allocation3 + $0x190] sm:$0xff] }
 0x774   :  { %16416 = vmatprep.mubr.msk.bf16.mxu0 %vm5404_vm2, %v10282_v41  ;;  %16444 = vmatprep.mubr.msk.bf16.mxu1 %vm5404_vm2, %v10282_v41  ;;  %v10298_v41 = vld [vmem:[#allocation3 + $0x1a8] sm:$0xff] }
 0x77b   :  { %10871 = vmatmul.mubr.bf16.gmra.mrb[120].mxu0 %v10281_v50  ;;  %11184 = vmatmul.mubr.bf16.gmra.mrb[120].mxu1 %v10281_v50  ;;  %v10301_v50 = vld [vmem:[#allocation3 + $0x1c0] sm:$0xff] }
 0x77c   :  { %16417 = vmatprep.mubr.msk.bf16.mxu0 %vm5404_vm2, %v10284_v43  ;;  %16445 = vmatprep.mubr.msk.bf16.mxu1 %vm5404_vm2, %v10284_v43  ;;  %v10304_v43 = vld [vmem:[#allocation3 + $0x1d8] sm:$0xff] }
 0x783   :  { %10881 = vmatmul.mubr.bf16.gmra.mrb[124].mxu0 %v10283_v9  ;;  %11194 = vmatmul.mubr.bf16.gmra.mrb[124].mxu1 %v10283_v9 }
 0x784   :  { %16418 = vmatprep.mubr.msk.bf16.mxu0 %vm5404_vm2, %v10286_v29  ;;  %16446 = vmatprep.mubr.msk.bf16.mxu1 %vm5404_vm2, %v10286_v29 }
 0x78b   :  { %10891 = vmatmul.mubr.bf16.gmra.mrb[128].mxu0 %v10285_v4  ;;  %11204 = vmatmul.mubr.bf16.gmra.mrb[128].mxu1 %v10285_v4 }
 0x78c   :  { %16419 = vmatprep.mubr.msk.bf16.mxu0 %vm5404_vm2, %v10288_v0  ;;  %16447 = vmatprep.mubr.msk.bf16.mxu1 %vm5404_vm2, %v10288_v0 }
 0x793   :  { %10901 = vmatmul.mubr.bf16.gmra.mrb[132].mxu0 %v10287_v33  ;;  %11214 = vmatmul.mubr.bf16.gmra.mrb[132].mxu1 %v10287_v33 }
 0x794   :  { %16420 = vmatprep.mubr.msk.bf16.mxu0 %vm5404_vm2, %v10290_v32  ;;  %16448 = vmatprep.mubr.msk.bf16.mxu1 %vm5404_vm2, %v10290_v32 }
 0x79b   :  { %10911 = vmatmul.mubr.bf16.gmra.mrb[136].mxu0 %v10289_v47  ;;  %11224 = vmatmul.mubr.bf16.gmra.mrb[136].mxu1 %v10289_v47 }
 0x79c   :  { %16421 = vmatprep.mubr.msk.bf16.mxu0 %vm5404_vm2, %v10292_v44  ;;  %16449 = vmatprep.mubr.msk.bf16.mxu1 %vm5404_vm2, %v10292_v44 }
 0x7a3   :  { %10921 = vmatmul.mubr.bf16.gmra.mrb[140].mxu0 %v10291_v15  ;;  %11234 = vmatmul.mubr.bf16.gmra.mrb[140].mxu1 %v10291_v15 }
 0x7a4   :  { %16422 = vmatprep.mubr.msk.bf16.mxu0 %vm5404_vm2, %v10294_v34  ;;  %16450 = vmatprep.mubr.msk.bf16.mxu1 %vm5404_vm2, %v10294_v34 }
 0x7ab   :  { %10931 = vmatmul.mubr.bf16.gmra.mrb[144].mxu0 %v10293_v55  ;;  %11244 = vmatmul.mubr.bf16.gmra.mrb[144].mxu1 %v10293_v55 }
 0x7ac   :  { %16423 = vmatprep.mubr.msk.bf16.mxu0 %vm5404_vm2, %v10296_v40  ;;  %16451 = vmatprep.mubr.msk.bf16.mxu1 %vm5404_vm2, %v10296_v40 }
 0x7b3   :  { %10941 = vmatmul.mubr.bf16.gmra.mrb[148].mxu0 %v10295_v61  ;;  %11254 = vmatmul.mubr.bf16.gmra.mrb[148].mxu1 %v10295_v61 }
 0x7b4   :  { %16424 = vmatprep.mubr.msk.bf16.mxu0 %vm5404_vm2, %v10298_v41  ;;  %16452 = vmatprep.mubr.msk.bf16.mxu1 %vm5404_vm2, %v10298_v41 }
 0x7bb   :  { %10951 = vmatmul.mubr.bf16.gmra.mrb[152].mxu0 %v10297_v36  ;;  %11264 = vmatmul.mubr.bf16.gmra.mrb[152].mxu1 %v10297_v36 }
 0x7bc   :  { %16425 = vmatprep.mubr.msk.bf16.mxu0 %vm5404_vm2, %v10300_v39  ;;  %16453 = vmatprep.mubr.msk.bf16.mxu1 %vm5404_vm2, %v10300_v39 }
 0x7c3   :  { %10961 = vmatmul.mubr.bf16.gmra.mrb[156].mxu0 %v10299_v63  ;;  %11274 = vmatmul.mubr.bf16.gmra.mrb[156].mxu1 %v10299_v63 }
 0x7c4   :  { %16426 = vmatprep.mubr.msk.bf16.mxu0 %vm5404_vm2, %v10302_v42  ;;  %16454 = vmatprep.mubr.msk.bf16.mxu1 %vm5404_vm2, %v10302_v42 }
 0x7cb   :  { %10971 = vmatmul.mubr.bf16.gmra.mrb[160].mxu0 %v10301_v50  ;;  %11284 = vmatmul.mubr.bf16.gmra.mrb[160].mxu1 %v10301_v50 }
 0x7cc   :  { %16427 = vmatprep.mubr.msk.bf16.mxu0 %vm5404_vm2, %v10304_v43  ;;  %16455 = vmatprep.mubr.msk.bf16.mxu1 %vm5404_vm2, %v10304_v43 }
 0x7d3   :  { %10981 = vmatmul.mubr.bf16.gmra.mrb[164].mxu0 %v10303_v37  ;;  %11294 = vmatmul.mubr.bf16.gmra.mrb[164].mxu1 %v10303_v37 }
 0x7d4   :  { %16428 = vmatprep.mubr.msk.bf16.mxu0 %vm5404_vm2, %v10306_v45  ;;  %16456 = vmatprep.mubr.msk.bf16.mxu1 %vm5404_vm2, %v10306_v45 }
 0x7db   :  { %10991 = vmatmul.mubr.bf16.gmra.mrb[168].mxu0 %v10305_v56  ;;  %11304 = vmatmul.mubr.bf16.gmra.mrb[168].mxu1 %v10305_v56 }
 0x7dc   :  { %16429 = vmatprep.mubr.msk.bf16.mxu0 %vm5404_vm2, %v10308_v17  ;;  %16457 = vmatprep.mubr.msk.bf16.mxu1 %vm5404_vm2, %v10308_v17 }
 0x7e3   :  { %11001 = vmatmul.mubr.bf16.gmra.mrb[172].mxu0 %v10307_v12  ;;  %11314 = vmatmul.mubr.bf16.gmra.mrb[172].mxu1 %v10307_v12 }
 0x7e4   :  { %16430 = vmatprep.mubr.msk.bf16.mxu0 %vm5404_vm2, %v23317_v14  ;;  %16458 = vmatprep.mubr.msk.bf16.mxu1 %vm5404_vm2, %v23317_v14  ;;  %v10316_v14 = vld [vmem:[#allocation3 + $0x238] sm:$0xff] }
 0x7eb   :  { %11011 = vmatmul.mubr.bf16.gmra.mrb[176].mxu0 %v23327_v28  ;;  %11324 = vmatmul.mubr.bf16.gmra.mrb[176].mxu1 %v23327_v28 }
 0x7ec   :  { %16431 = vmatprep.mubr.msk.bf16.mxu0 %vm5404_vm2, %v23325_v25  ;;  %16459 = vmatprep.mubr.msk.bf16.mxu1 %vm5404_vm2, %v23325_v25 }
 0x7f3   :  { %11021 = vmatmul.mubr.bf16.gmra.mrb[180].mxu0 %v23327_v28  ;;  %11334 = vmatmul.mubr.bf16.gmra.mrb[180].mxu1 %v23327_v28 }
 0x7f4   :  { %16432 = vmatprep.mubr.msk.bf16.mxu0 %vm5404_vm2, %v10314_v24  ;;  %16460 = vmatprep.mubr.msk.bf16.mxu1 %vm5404_vm2, %v10314_v24 }
 0x7fb   :  { %11031 = vmatmul.mubr.bf16.gmra.mrb[184].mxu0 %v23327_v28  ;;  %11344 = vmatmul.mubr.bf16.gmra.mrb[184].mxu1 %v23327_v28 }
 0x7fc   :  { %16433 = vmatprep.mubr.msk.bf16.mxu0 %vm5404_vm2, %v10316_v14  ;;  %16461 = vmatprep.mubr.msk.bf16.mxu1 %vm5404_vm2, %v10316_v14 }
 0x7fe   :  { %v10772_v60 = vpop.f32.mrb[80].mxu0  ;;  %v11085_v25 = vpop.f32.mrb[80].mxu1 }
 0x7ff   :  { %v10774_v49 = vpop.f32.mrb[81].mxu0  ;;  %v11087_v9 = vpop.f32.mrb[81].mxu1  ;;  %v11610_v21 = vadd.f32 %v23602_v19, %v10772_v60  ;;  %v11612_v16 = vadd.f32 %v23606_v54, %v11085_v25 }
 0x800   :  { %v10776_v29 = vpop.f32.mrb[82].mxu0  ;;  %v11089_v13 = vpop.f32.mrb[82].mxu1  ;;  %v11611_v27 = vadd.f32 %v23610_v18, %v10774_v49  ;;  %v11613_v30 = vadd.f32 %v23614_v7, %v11087_v9 }
 0x801   :  { %v10778_v2 = vpop.f32.mrb[83].mxu0  ;;  %v11091_v11 = vpop.f32.mrb[83].mxu1  ;;  %v11614_v38 = vadd.f32 %v23602_v19, %v10776_v29  ;;  %v11616_v62 = vadd.f32 %v23606_v54, %v11089_v13  ;;  %v11834_v52 = vmax.f32 %v11610_v21, 0.0  ;;  %v11836_v10 = vmax.f32 %v11612_v16, 0.0 }
 0x802   :  { %v11615_v35 = vadd.f32 %v23610_v18, %v10778_v2  ;;  %v11617_v23 = vadd.f32 %v23614_v7, %v11091_v11  ;;  %v11835_v57 = vmax.f32 %v11611_v27, 0.0  ;;  %v11837_v22 = vmax.f32 %v11613_v30, 0.0 }
 0x803   :  { %11041 = vmatmul.mubr.bf16.gmra.mrb[188].mxu0 %v23327_v28  ;;  %11354 = vmatmul.mubr.bf16.gmra.mrb[188].mxu1 %v23327_v28  ;;  %v19019_v28 = vld [vmem:[%s24995_s7 + $0x104] ss:$8 sps:$4 sm:$0xff]   ;;  %v11838_v47 = vmax.f32 %v11614_v38, 0.0  ;;  %v11840_v44 = vmax.f32 %v11616_v62, 0.0 }
 0x804   :  { %12889 = vmatprep.subr.bf16.mxu0 %v19019_v28  ;;  %v11839_v51 = vmax.f32 %v11615_v35, 0.0  ;;  %v11841_v3 = vmax.f32 %v11617_v23, 0.0 }
 0x806   :  { %v10782_v4 = vpop.f32.mrb[84].mxu0  ;;  %v11095_v0 = vpop.f32.mrb[84].mxu1 }
 0x807   :  { %v10784_v26 = vpop.f32.mrb[85].mxu0  ;;  %v11097_v58 = vpop.f32.mrb[85].mxu1  ;;  %v23631_v46 = vadd.f32 %v23602_v19, %v10782_v4  ;;  %v23634_v48 = vadd.f32 %v23606_v54, %v11095_v0 }
 0x808   :  { %v10786_v5 = vpop.f32.mrb[86].mxu0  ;;  %v11099_v31 = vpop.f32.mrb[86].mxu1  ;;  %v23637_v1 = vadd.f32 %v23610_v18, %v10784_v26  ;;  %v23640_v6 = vadd.f32 %v23614_v7, %v11097_v58 }
 0x809   :  { %v10788_v33 = vpop.f32.mrb[87].mxu0  ;;  %v11101_v32 = vpop.f32.mrb[87].mxu1  ;;  %v11842_v53 = vmax.f32 %v23631_v46, 0.0  ;;  %v11844_v59 = vmax.f32 %v23634_v48, 0.0  ;;  %v23645_v15 = vadd.f32 %v23602_v19, %v10786_v5  ;;  %v23648_v34 = vadd.f32 %v23606_v54, %v11099_v31  ;;  %v19023_v46 = vld [vmem:[%s24995_s7 + $0x110] ss:$8 sps:$4 sm:$0xff]  }
 0x80a   :  { %v11843_v61 = vmax.f32 %v23637_v1, 0.0  ;;  %v11845_v41 = vmax.f32 %v23640_v6, 0.0  ;;  %v23655_v50 = vadd.f32 %v23610_v18, %v10788_v33  ;;  %v23658_v43 = vadd.f32 %v23614_v7, %v11101_v32  ;;  %v19031_v1 = vld [vmem:[%s24995_s7 + $0x124] ss:$8 sps:$4 sm:$0xff]  }
 0x80b   :  { %v11846_v21 = vmax.f32 %v23645_v15, 0.0  ;;  %v11848_v16 = vmax.f32 %v23648_v34, 0.0 }
 0x80c   :  { %v11847_v5 = vmax.f32 %v23655_v50, 0.0  ;;  %v11849_v31 = vmax.f32 %v23658_v43, 0.0 }
 0x80e   :  { %v10792_v55 = vpop.f32.mrb[88].mxu0  ;;  %v11105_v40 = vpop.f32.mrb[88].mxu1 }
 0x80f   :  { %v11626_v36 = vadd.f32 %v23602_v19, %v10792_v55  ;;  %v11628_v39 = vadd.f32 %v23606_v54, %v11105_v40  ;;  %v10794_v63 = vpop.f32.mrb[89].mxu0  ;;  %v11107_v42 = vpop.f32.mrb[89].mxu1  ;;  %v19020_v40 = vld [vmem:[%s24996_s8 + $0x100] ss:$8 sps:$4 sm:$0xff]  }
 0x810   :  { %v11627_v37 = vadd.f32 %v23610_v18, %v10794_v63  ;;  %v11629_v45 = vadd.f32 %v23614_v7, %v11107_v42  ;;  %v10796_v56 = vpop.f32.mrb[90].mxu0  ;;  %v11109_v17 = vpop.f32.mrb[90].mxu1 }
 0x811   :  { %v11850_v12 = vmax.f32 %v11626_v36, 0.0  ;;  %v11852_v24 = vmax.f32 %v11628_v39, 0.0  ;;  %v11630_v14 = vadd.f32 %v23602_v19, %v10796_v56  ;;  %v11632_v60 = vadd.f32 %v23606_v54, %v11109_v17  ;;  %v10798_v25 = vpop.f32.mrb[91].mxu0  ;;  %v11111_v49 = vpop.f32.mrb[91].mxu1  ;;  %v19025_v36 = vld [vmem:[%s24995_s7 + $0x114] ss:$8 sps:$4 sm:$0xff]  }
 0x812   :  { %v11851_v9 = vmax.f32 %v11627_v37, 0.0  ;;  %v11853_v29 = vmax.f32 %v11629_v45, 0.0  ;;  %v11631_v13 = vadd.f32 %v23610_v18, %v10798_v25  ;;  %v11633_v8 = vadd.f32 %v23614_v7, %v11111_v49  ;;  %v19028_v45 = vld [vmem:[%s24996_s8 + $0x114] ss:$8 sps:$4 sm:$0xff]  }
 0x813   :  { %v12058_v2 = vmax.f32 %v11834_v52, %v11850_v12  ;;  %v12060_v11 = vmax.f32 %v11836_v10, %v11852_v24  ;;  %v11854_v28 = vmax.f32 %v11630_v14, 0.0  ;;  %v11856_v20 = vmax.f32 %v11632_v60, 0.0 }
 0x814   :  { %v12059_v4 = vmax.f32 %v11835_v57, %v11851_v9  ;;  %v12061_v0 = vmax.f32 %v11837_v22, %v11853_v29  ;;  %v11855_v26 = vmax.f32 %v11631_v13, 0.0  ;;  %v11857_v58 = vmax.f32 %v11633_v8, 0.0 }
 0x815   :  { %v12062_v27 = vmax.f32 %v11838_v47, %v11854_v28  ;;  %v12064_v30 = vmax.f32 %v11840_v44, %v11856_v20  ;;  %v19017_v47 = vld [vmem:[%s24995_s7 + $0x100] ss:$8 sps:$4 sm:$0xff]  }
 0x816   :  { %v12063_v38 = vmax.f32 %v11839_v51, %v11855_v26  ;;  %v12065_v62 = vmax.f32 %v11841_v3, %v11857_v58  ;;  %v10802_v35 = vpop.f32.mrb[92].mxu0  ;;  %v11115_v23 = vpop.f32.mrb[92].mxu1 }
 0x817   :  { %v12074_v33 = vpack.c.bf16 %v12062_v27, %v12058_v2  ;;  %v12076_v32 = vpack.c.bf16 %v12064_v30, %v12060_v11  ;;  %v11634_v52 = vadd.f32 %v23602_v19, %v10802_v35  ;;  %v11636_v10 = vadd.f32 %v23606_v54, %v11115_v23  ;;  %v10804_v57 = vpop.f32.mrb[93].mxu0  ;;  %v11117_v22 = vpop.f32.mrb[93].mxu1  ;;  %v19034_v27 = vld [vmem:[%s24996_s8 + $0x124] ss:$8 sps:$4 sm:$0xff]   ;;  %v19035_v35 = vld [vmem:[%s24995_s7 + $0x130] ss:$8 sps:$4 sm:$0xff]  }
 0x818   :  { %v12075_v44 = vpack.c.bf16 %v12063_v38, %v12059_v4  ;;  %v12077_v15 = vpack.c.bf16 %v12065_v62, %v12061_v0  ;;  %v11635_v34 = vadd.f32 %v23610_v18, %v10804_v57  ;;  %v11637_v51 = vadd.f32 %v23614_v7, %v11117_v22  ;;  %v10806_v3 = vpop.f32.mrb[94].mxu0  ;;  %v11119_v55 = vpop.f32.mrb[94].mxu1  ;;  %v19037_v38 = vld [vmem:[%s24995_s7 + $0x134] ss:$8 sps:$4 sm:$0xff]   ;;  %v19038_v23 = vld [vmem:[%s24996_s8 + $0x130] ss:$8 sps:$4 sm:$0xff]  }
 0x819   :  { %12084 = vst [vmem:[#allocation4 + $0x10] sm:$0xff] %v12076_v32  ;;  %v11858_v39 = vmax.f32 %v11634_v52, 0.0  ;;  %v11860_v63 = vmax.f32 %v11636_v10, 0.0  ;;  %v11638_v42 = vadd.f32 %v23602_v19, %v10806_v3  ;;  %v11640_v50 = vadd.f32 %v23606_v54, %v11119_v55  ;;  %v10808_v43 = vpop.f32.mrb[95].mxu0  ;;  %v11121_v37 = vpop.f32.mrb[95].mxu1 }
 0x81a   :  { %12085 = vst.msk [vmem:[#allocation4 + $0x18] sm:$0xff] %vm2749_vm1, %v12077_v15  ;;  %v11859_v56 = vmax.f32 %v11635_v34, 0.0  ;;  %v11861_v17 = vmax.f32 %v11637_v51, 0.0  ;;  %v11639_v12 = vadd.f32 %v23610_v18, %v10808_v43  ;;  %v11641_v24 = vadd.f32 %v23614_v7, %v11121_v37  ;;  %12748 = vmatprep.mubr.bf16.mxu0 %v12075_v44  ;;  %13430 = vmatprep.mubr.bf16.mxu1 %v12075_v44  ;;  %v19040_v62 = vld [vmem:[%s24996_s8 + $0x134] ss:$8 sps:$4 sm:$0xff]  }
 0x81b   :  { %v12066_v14 = vmax.f32 %v11842_v53, %v11858_v39  ;;  %v12068_v60 = vmax.f32 %v11844_v59, %v11860_v63  ;;  %v11862_v25 = vmax.f32 %v11638_v42, 0.0  ;;  %v11864_v49 = vmax.f32 %v11640_v50, 0.0  ;;  %12749 = vmatmul.mubr.bf16.vlgmr.msra.gmra.mrb[192].mxu0 %v12074_v33  ;;  %13431 = vmatmul.mubr.bf16.vlgmr.msra.gmra.mrb[192].mxu1 %v12074_v33  ;;  %v19026_v59 = vld [vmem:[%s24996_s8 + $0x110] ss:$8 sps:$4 sm:$0xff]  }
 0x81c   :  { %v12067_v9 = vmax.f32 %v11843_v61, %v11859_v56  ;;  %v12069_v29 = vmax.f32 %v11845_v41, %v11861_v17  ;;  %v11863_v13 = vmax.f32 %v11639_v12, 0.0  ;;  %v11865_v8 = vmax.f32 %v11641_v24, 0.0  ;;  %12890 = vmatpush1.bf16.msra.mxu0 %v19017_v47  ;;  %13572 = vmatpush1.bf16.msra.mxu1 %v19020_v40  ;;  %v19041_v56 = vld [vmem:[%s24995_s7 + $0x140] ss:$8 sps:$4 sm:$0xff]   ;;  %v19043_v17 = vld [vmem:[%s24995_s7 + $0x144] ss:$8 sps:$4 sm:$0xff]  }
 0x81d   :  { %v12070_v48 = vmax.f32 %v11846_v21, %v11862_v25  ;;  %v12072_v53 = vmax.f32 %v11848_v16, %v11864_v49  ;;  %12891 = vmatprep.subr.bf16.mxu0 %v19025_v36  ;;  %13573 = vmatprep.subr.bf16.mxu1 %v19028_v45  ;;  %v19029_v16 = vld [vmem:[%s24995_s7 + $0x120] ss:$8 sps:$4 sm:$0xff]  }
 0x81e   :  { %v12071_v6 = vmax.f32 %v11847_v5, %v11863_v13  ;;  %v12073_v61 = vmax.f32 %v11849_v31, %v11865_v8  ;;  %v10812_v41 = vpop.f32.mrb[96].mxu0  ;;  %v11125_v2 = vpop.f32.mrb[96].mxu1  ;;  %v19032_v31 = vld [vmem:[%s24996_s8 + $0x120] ss:$8 sps:$4 sm:$0xff]  }
 0x81f   :  { %v12078_v11 = vpack.c.bf16 %v12070_v48, %v12066_v14  ;;  %v12080_v28 = vpack.c.bf16 %v12072_v53, %v12068_v60  ;;  %v10814_v20 = vpop.f32.mrb[97].mxu0  ;;  %v11127_v4 = vpop.f32.mrb[97].mxu1  ;;  %v23731_v52 = vadd.f32 %v23602_v19, %v10812_v41  ;;  %v23734_v10 = vadd.f32 %v23606_v54, %v11125_v2  ;;  %v19044_v14 = vld [vmem:[%s24996_s8 + $0x140] ss:$8 sps:$4 sm:$0xff]   ;;  %v19046_v60 = vld [vmem:[%s24996_s8 + $0x144] ss:$8 sps:$4 sm:$0xff]  }
 0x820   :  { %v12079_v0 = vpack.c.bf16 %v12071_v6, %v12067_v9  ;;  %v12081_v26 = vpack.c.bf16 %v12073_v61, %v12069_v29  ;;  %v10816_v58 = vpop.f32.mrb[98].mxu0  ;;  %v11129_v21 = vpop.f32.mrb[98].mxu1  ;;  %12892 = vmatpush1.bf16.msra.mxu0 %v19023_v46  ;;  %13574 = vmatpush1.bf16.msra.mxu1 %v19026_v59  ;;  %v23737_v47 = vadd.f32 %v23610_v18, %v10814_v20 }
 0x821   :  { %12088 = vst [vmem:[#allocation4 + $0x30] sm:$0xff] %v12080_v28  ;;  %v10818_v30 = vpop.f32.mrb[99].mxu0  ;;  %v11131_v5 = vpop.f32.mrb[99].mxu1  ;;  %12893 = vmatprep.subr.bf16.mxu0 %v19031_v1  ;;  %13575 = vmatprep.subr.bf16.mxu1 %v19034_v27  ;;  %v23740_v44 = vadd.f32 %v23614_v7, %v11127_v4  ;;  %v23743_v51 = vadd.f32 %v23602_v19, %v10816_v58  ;;  %v11866_v50 = vmax.f32 %v23731_v52, 0.0  ;;  %v11868_v43 = vmax.f32 %v23734_v10, 0.0 }
 0x822   :  { %12089 = vst.msk [vmem:[#allocation4 + $0x38] sm:$0xff] %vm2749_vm1, %v12081_v26  ;;  %12758 = vmatprep.mubr.bf16.mxu0 %v12079_v0  ;;  %13440 = vmatprep.mubr.bf16.mxu1 %v12079_v0  ;;  %v23746_v3 = vadd.f32 %v23606_v54, %v11129_v21  ;;  %v23749_v55 = vadd.f32 %v23610_v18, %v10818_v30  ;;  %v11867_v12 = vmax.f32 %v23737_v47, 0.0 }
 0x823   :  { %12759 = vmatmul.mubr.bf16.gmra.mrb[196].mxu0 %v12078_v11  ;;  %13441 = vmatmul.mubr.bf16.gmra.mrb[196].mxu1 %v12078_v11  ;;  %v23752_v40 = vadd.f32 %v23614_v7, %v11131_v5  ;;  %v11869_v24 = vmax.f32 %v23740_v44, 0.0  ;;  %v11870_v25 = vmax.f32 %v23743_v51, 0.0 }
 0x824   :  { %12894 = vmatpush1.bf16.msra.mxu0 %v19029_v16  ;;  %13576 = vmatpush1.bf16.msra.mxu1 %v19032_v31  ;;  %v11872_v49 = vmax.f32 %v23746_v3, 0.0  ;;  %v11871_v9 = vmax.f32 %v23749_v55, 0.0 }
 0x825   :  { %12895 = vmatprep.subr.bf16.mxu0 %v19037_v38  ;;  %13577 = vmatprep.subr.bf16.mxu1 %v19040_v62  ;;  %v11873_v29 = vmax.f32 %v23752_v40, 0.0 }
 0x826   :  { %v10822_v33 = vpop.f32.mrb[100].mxu0  ;;  %v11135_v32 = vpop.f32.mrb[100].mxu1 }
 0x827   :  { %v10824_v57 = vpop.f32.mrb[101].mxu0  ;;  %v11137_v22 = vpop.f32.mrb[101].mxu1  ;;  %v23755_v63 = vadd.f32 %v23602_v19, %v10822_v33  ;;  %v23758_v42 = vadd.f32 %v23606_v54, %v11135_v32 }
 0x828   :  { %v10826_v15 = vpop.f32.mrb[102].mxu0  ;;  %v11139_v34 = vpop.f32.mrb[102].mxu1  ;;  %12896 = vmatpush1.bf16.msra.mxu0 %v19035_v35  ;;  %13578 = vmatpush1.bf16.msra.mxu1 %v19038_v23  ;;  %v23763_v37 = vadd.f32 %v23610_v18, %v10824_v57  ;;  %v23766_v45 = vadd.f32 %v23614_v7, %v11137_v22 }
 0x829   :  { %v10828_v36 = vpop.f32.mrb[103].mxu0  ;;  %v11141_v39 = vpop.f32.mrb[103].mxu1  ;;  %12897 = vmatprep.subr.bf16.mxu0 %v19043_v17  ;;  %v11874_v13 = vmax.f32 %v23755_v63, 0.0  ;;  %v11876_v8 = vmax.f32 %v23758_v42, 0.0  ;;  %v23789_v46 = vadd.f32 %v23602_v19, %v10826_v15  ;;  %v23792_v48 = vadd.f32 %v23606_v54, %v11139_v34  ;;  %13579 = vmatprep.subr.bf16.mxu1 %v19046_v60 }
 0x82a   :  { %v11875_v1 = vmax.f32 %v23763_v37, 0.0  ;;  %v11877_v6 = vmax.f32 %v23766_v45, 0.0  ;;  %v23799_v28 = vadd.f32 %v23610_v18, %v10828_v36  ;;  %v23802_v20 = vadd.f32 %v23614_v7, %v11141_v39 }
 0x82b   :  { %v11878_v15 = vmax.f32 %v23789_v46, 0.0  ;;  %v11880_v34 = vmax.f32 %v23792_v48, 0.0 }
 0x82c   :  { %12898 = vmatpush1.bf16.msra.mxu0 %v19041_v56  ;;  %13580 = vmatpush1.bf16.msra.mxu1 %v19044_v14  ;;  %v11879_v55 = vmax.f32 %v23799_v28, 0.0  ;;  %v11881_v40 = vmax.f32 %v23802_v20, 0.0 }
 0x82e   :  { %v10832_v53 = vpop.f32.mrb[104].mxu0  ;;  %v11145_v59 = vpop.f32.mrb[104].mxu1 }
 0x82f   :  { %v11658_v61 = vadd.f32 %v23602_v19, %v10832_v53  ;;  %v11660_v41 = vadd.f32 %v23606_v54, %v11145_v59  ;;  %v10834_v2 = vpop.f32.mrb[105].mxu0  ;;  %v11147_v11 = vpop.f32.mrb[105].mxu1 }
 0x830   :  { %v11659_v4 = vadd.f32 %v23610_v18, %v10834_v2  ;;  %v11661_v0 = vadd.f32 %v23614_v7, %v11147_v11  ;;  %v10836_v26 = vpop.f32.mrb[106].mxu0  ;;  %v11149_v58 = vpop.f32.mrb[106].mxu1 }
 0x831   :  { %v11882_v21 = vmax.f32 %v11658_v61, 0.0  ;;  %v11884_v16 = vmax.f32 %v11660_v41, 0.0  ;;  %v11662_v27 = vadd.f32 %v23602_v19, %v10836_v26  ;;  %v11664_v30 = vadd.f32 %v23606_v54, %v11149_v58  ;;  %v10838_v5 = vpop.f32.mrb[107].mxu0  ;;  %v11151_v31 = vpop.f32.mrb[107].mxu1  ;;  %v19047_v26 = vld [vmem:[%s24995_s7 + $0x150] ss:$8 sps:$4 sm:$0xff]  }
 0x832   :  { %v11883_v38 = vmax.f32 %v11659_v4, 0.0  ;;  %v11885_v62 = vmax.f32 %v11661_v0, 0.0  ;;  %v11663_v35 = vadd.f32 %v23610_v18, %v10838_v5  ;;  %v11665_v23 = vadd.f32 %v23614_v7, %v11151_v31  ;;  %v19049_v58 = vld [vmem:[%s24995_s7 + $0x154] ss:$8 sps:$4 sm:$0xff]   ;;  %v19050_v5 = vld [vmem:[%s24996_s8 + $0x150] ss:$8 sps:$4 sm:$0xff]  }
 0x833   :  { %v12090_v33 = vmax.f32 %v11866_v50, %v11882_v21  ;;  %v12092_v32 = vmax.f32 %v11868_v43, %v11884_v16  ;;  %v11886_v52 = vmax.f32 %v11662_v27, 0.0  ;;  %v11888_v10 = vmax.f32 %v11664_v30, 0.0  ;;  %v19052_v31 = vld [vmem:[%s24996_s8 + $0x154] ss:$8 sps:$4 sm:$0xff]   ;;  %12899 = vmatprep.subr.bf16.mxu0 %v19049_v58 }
 0x834   :  { %v12091_v57 = vmax.f32 %v11867_v12, %v11883_v38  ;;  %v12093_v22 = vmax.f32 %v11869_v24, %v11885_v62  ;;  %v11887_v47 = vmax.f32 %v11663_v35, 0.0  ;;  %v11889_v44 = vmax.f32 %v11665_v23, 0.0  ;;  %13581 = vmatprep.subr.bf16.mxu1 %v19052_v31  ;;  %12900 = vmatpush1.bf16.msra.mxu0 %v19047_v26  ;;  %v19070_v31 = vld [vmem:[%s24996_s8 + $0x184] ss:$8 sps:$4 sm:$0xff]  }
 0x835   :  { %v12094_v51 = vmax.f32 %v11870_v25, %v11886_v52  ;;  %v12096_v3 = vmax.f32 %v11872_v49, %v11888_v10  ;;  %13582 = vmatpush1.bf16.msra.mxu1 %v19050_v5  ;;  %v19068_v5 = vld [vmem:[%s24996_s8 + $0x180] ss:$8 sps:$4 sm:$0xff]  }
 0x836   :  { %v12095_v36 = vmax.f32 %v11871_v9, %v11887_v47  ;;  %v12097_v39 = vmax.f32 %v11873_v29, %v11889_v44  ;;  %v10842_v50 = vpop.f32.mrb[108].mxu0  ;;  %v11155_v43 = vpop.f32.mrb[108].mxu1 }
 0x837   :  { %v12106_v56 = vpack.c.bf16 %v12094_v51, %v12090_v33  ;;  %v12108_v17 = vpack.c.bf16 %v12096_v3, %v12092_v32  ;;  %v11666_v12 = vadd.f32 %v23602_v19, %v10842_v50  ;;  %v11668_v24 = vadd.f32 %v23606_v54, %v11155_v43  ;;  %v10844_v14 = vpop.f32.mrb[109].mxu0  ;;  %v11157_v60 = vpop.f32.mrb[109].mxu1  ;;  %v19056_v51 = vld [vmem:[%s24996_s8 + $0x160] ss:$8 sps:$4 sm:$0xff]   ;;  %v19058_v3 = vld [vmem:[%s24996_s8 + $0x164] ss:$8 sps:$4 sm:$0xff]  }
 0x838   :  { %v12107_v46 = vpack.c.bf16 %v12095_v36, %v12091_v57  ;;  %v12109_v48 = vpack.c.bf16 %v12097_v39, %v12093_v22  ;;  %v11667_v25 = vadd.f32 %v23610_v18, %v10844_v14  ;;  %v11669_v49 = vadd.f32 %v23614_v7, %v11157_v60  ;;  %v10846_v53 = vpop.f32.mrb[110].mxu0  ;;  %v11159_v59 = vpop.f32.mrb[110].mxu1  ;;  %13583 = vmatprep.subr.bf16.mxu1 %v19058_v3  ;;  %v19064_v36 = vld [vmem:[%s24996_s8 + $0x174] ss:$8 sps:$4 sm:$0xff]  }
 0x839   :  { %12116 = vst [vmem:[#allocation4 + $0x50] sm:$0xff] %v12108_v17  ;;  %v11890_v9 = vmax.f32 %v11666_v12, 0.0  ;;  %v11892_v29 = vmax.f32 %v11668_v24, 0.0  ;;  %v11670_v61 = vadd.f32 %v23602_v19, %v10846_v53  ;;  %v11672_v41 = vadd.f32 %v23606_v54, %v11159_v59  ;;  %v10848_v2 = vpop.f32.mrb[111].mxu0  ;;  %v11161_v11 = vpop.f32.mrb[111].mxu1  ;;  %13584 = vmatpush1.bf16.msra.mxu1 %v19056_v51 }
 0x83a   :  { %12117 = vst.msk [vmem:[#allocation4 + $0x58] sm:$0xff] %vm2749_vm1, %v12109_v48  ;;  %v11891_v28 = vmax.f32 %v11667_v25, 0.0  ;;  %v11893_v20 = vmax.f32 %v11669_v49, 0.0  ;;  %v11671_v4 = vadd.f32 %v23610_v18, %v10848_v2  ;;  %v11673_v0 = vadd.f32 %v23614_v7, %v11161_v11  ;;  %12768 = vmatprep.mubr.bf16.mxu0 %v12107_v46  ;;  %13450 = vmatprep.mubr.bf16.mxu1 %v12107_v46  ;;  %v19062_v17 = vld [vmem:[%s24996_s8 + $0x170] ss:$8 sps:$4 sm:$0xff]  }
 0x83b   :  { %v12098_v21 = vmax.f32 %v11874_v13, %v11890_v9  ;;  %v12100_v16 = vmax.f32 %v11876_v8, %v11892_v29  ;;  %v11894_v27 = vmax.f32 %v11670_v61, 0.0  ;;  %v11896_v30 = vmax.f32 %v11672_v41, 0.0  ;;  %12769 = vmatmul.mubr.bf16.gmra.mrb[200].mxu0 %v12106_v56  ;;  %13451 = vmatmul.mubr.bf16.gmra.mrb[200].mxu1 %v12106_v56 }
 0x83c   :  { %v12099_v38 = vmax.f32 %v11875_v1, %v11891_v28  ;;  %v12101_v63 = vmax.f32 %v11877_v6, %v11893_v20  ;;  %v11895_v42 = vmax.f32 %v11671_v4, 0.0  ;;  %v11897_v13 = vmax.f32 %v11673_v0, 0.0  ;;  %13585 = vmatprep.subr.bf16.mxu1 %v19064_v36 }
 0x83d   :  { %v12102_v8 = vmax.f32 %v11878_v15, %v11894_v27  ;;  %v12104_v62 = vmax.f32 %v11880_v34, %v11896_v30  ;;  %v19053_v15 = vld [vmem:[%s24995_s7 + $0x160] ss:$8 sps:$4 sm:$0xff]   ;;  %v19055_v34 = vld [vmem:[%s24995_s7 + $0x164] ss:$8 sps:$4 sm:$0xff]   ;;  %13586 = vmatpush1.bf16.msra.mxu1 %v19062_v17 }
 0x83e   :  { %v12103_v35 = vmax.f32 %v11879_v55, %v11895_v42  ;;  %v12105_v23 = vmax.f32 %v11881_v40, %v11897_v13  ;;  %v10852_v33 = vpop.f32.mrb[112].mxu0  ;;  %v11165_v32 = vpop.f32.mrb[112].mxu1  ;;  %12901 = vmatprep.subr.bf16.mxu0 %v19055_v34  ;;  %v19061_v55 = vld [vmem:[%s24995_s7 + $0x174] ss:$8 sps:$4 sm:$0xff]   ;;  %v19059_v40 = vld [vmem:[%s24995_s7 + $0x170] ss:$8 sps:$4 sm:$0xff]   ;;  %13587 = vmatprep.subr.bf16.mxu1 %v19070_v31 }
 0x83f   :  { %v12110_v52 = vpack.c.bf16 %v12102_v8, %v12098_v21  ;;  %v12112_v10 = vpack.c.bf16 %v12104_v62, %v12100_v16  ;;  %v10854_v57 = vpop.f32.mrb[113].mxu0  ;;  %v11167_v37 = vpop.f32.mrb[113].mxu1  ;;  %12902 = vmatpush1.bf16.msra.mxu0 %v19053_v15  ;;  %v23866_v39 = vadd.f32 %v23602_v19, %v10852_v33  ;;  %v23869_v50 = vadd.f32 %v23606_v54, %v11165_v32  ;;  %v19065_v21 = vld [vmem:[%s24995_s7 + $0x180] ss:$8 sps:$4 sm:$0xff]   ;;  %v19067_v16 = vld [vmem:[%s24995_s7 + $0x184] ss:$8 sps:$4 sm:$0xff]  }
 0x840   :  { %v12111_v1 = vpack.c.bf16 %v12103_v35, %v12099_v38  ;;  %v12113_v22 = vpack.c.bf16 %v12105_v23, %v12101_v63  ;;  %v10856_v45 = vpop.f32.mrb[114].mxu0  ;;  %v11169_v6 = vpop.f32.mrb[114].mxu1  ;;  %12903 = vmatprep.subr.bf16.mxu0 %v19061_v55  ;;  %v23875_v12 = vadd.f32 %v23610_v18, %v10854_v57  ;;  %v23878_v24 = vadd.f32 %v23614_v7, %v11167_v37 }
 0x841   :  { %12120 = vst [vmem:[#allocation4 + $0x70] sm:$0xff] %v12112_v10  ;;  %v10858_v47 = vpop.f32.mrb[115].mxu0  ;;  %v11171_v44 = vpop.f32.mrb[115].mxu1  ;;  %v23881_v46 = vadd.f32 %v23602_v19, %v10856_v45  ;;  %v23884_v48 = vadd.f32 %v23606_v54, %v11169_v6  ;;  %v11898_v61 = vmax.f32 %v23866_v39, 0.0  ;;  %v11900_v41 = vmax.f32 %v23869_v50, 0.0  ;;  %13588 = vmatpush1.bf16.msra.mxu1 %v19068_v5 }
 0x842   :  { %12121 = vst.msk [vmem:[#allocation4 + $0x78] sm:$0xff] %vm2749_vm1, %v12113_v22  ;;  %12778 = vmatprep.mubr.bf16.mxu0 %v12111_v1  ;;  %13460 = vmatprep.mubr.bf16.mxu1 %v12111_v1  ;;  %v23887_v53 = vadd.f32 %v23610_v18, %v10858_v47  ;;  %v23890_v59 = vadd.f32 %v23614_v7, %v11171_v44  ;;  %v11899_v28 = vmax.f32 %v23875_v12, 0.0  ;;  %v11901_v20 = vmax.f32 %v23878_v24, 0.0 }
 0x843   :  { %12779 = vmatmul.mubr.bf16.gmra.mrb[204].mxu0 %v12110_v52  ;;  %13461 = vmatmul.mubr.bf16.gmra.mrb[204].mxu1 %v12110_v52  ;;  %v11902_v26 = vmax.f32 %v23881_v46, 0.0  ;;  %v11904_v58 = vmax.f32 %v23884_v48, 0.0 }
 0x844   :  { %12904 = vmatpush1.bf16.msra.mxu0 %v19059_v40  ;;  %v11903_v27 = vmax.f32 %v23887_v53, 0.0  ;;  %v11905_v30 = vmax.f32 %v23890_v59, 0.0 }
 0x845   :  { %12905 = vmatprep.subr.bf16.mxu0 %v19067_v16 }
 0x846   :  { %v10862_v43 = vpop.f32.mrb[116].mxu0  ;;  %v11175_v56 = vpop.f32.mrb[116].mxu1 }
 0x847   :  { %v10864_v14 = vpop.f32.mrb[117].mxu0  ;;  %v11177_v60 = vpop.f32.mrb[117].mxu1  ;;  %v23895_v2 = vadd.f32 %v23602_v19, %v10862_v43  ;;  %v23898_v11 = vadd.f32 %v23606_v54, %v11175_v56 }
 0x848   :  { %v10866_v25 = vpop.f32.mrb[118].mxu0  ;;  %v11179_v49 = vpop.f32.mrb[118].mxu1  ;;  %v23903_v4 = vadd.f32 %v23610_v18, %v10864_v14  ;;  %v23906_v0 = vadd.f32 %v23614_v7, %v11177_v60  ;;  %12906 = vmatpush1.bf16.msra.mxu0 %v19065_v21 }
 0x849   :  { %v10868_v9 = vpop.f32.mrb[119].mxu0  ;;  %v11181_v29 = vpop.f32.mrb[119].mxu1  ;;  %v11906_v38 = vmax.f32 %v23895_v2, 0.0  ;;  %v11908_v63 = vmax.f32 %v23898_v11, 0.0  ;;  %v23927_v42 = vadd.f32 %v23602_v19, %v10866_v25  ;;  %v23930_v13 = vadd.f32 %v23606_v54, %v11179_v49 }
 0x84a   :  { %v11907_v35 = vmax.f32 %v23903_v4, 0.0  ;;  %v11909_v23 = vmax.f32 %v23906_v0, 0.0  ;;  %v23937_v57 = vadd.f32 %v23610_v18, %v10868_v9  ;;  %v23940_v37 = vadd.f32 %v23614_v7, %v11181_v29 }
 0x84b   :  { %v11910_v46 = vmax.f32 %v23927_v42, 0.0  ;;  %v11912_v48 = vmax.f32 %v23930_v13, 0.0 }
 0x84c   :  { %v11911_v53 = vmax.f32 %v23937_v57, 0.0  ;;  %v11913_v59 = vmax.f32 %v23940_v37, 0.0 }
 0x84e   :  { %v10872_v8 = vpop.f32.mrb[120].mxu0  ;;  %v11185_v62 = vpop.f32.mrb[120].mxu1 }
 0x84f   :  { %v11690_v33 = vadd.f32 %v23602_v19, %v10872_v8  ;;  %v11692_v32 = vadd.f32 %v23606_v54, %v11185_v62  ;;  %v10874_v52 = vpop.f32.mrb[121].mxu0  ;;  %v11187_v10 = vpop.f32.mrb[121].mxu1 }
 0x850   :  { %v11691_v1 = vadd.f32 %v23610_v18, %v10874_v52  ;;  %v11693_v22 = vadd.f32 %v23614_v7, %v11187_v10  ;;  %v10876_v45 = vpop.f32.mrb[122].mxu0  ;;  %v11189_v6 = vpop.f32.mrb[122].mxu1 }
 0x851   :  { %v11914_v47 = vmax.f32 %v11690_v33, 0.0  ;;  %v11916_v44 = vmax.f32 %v11692_v32, 0.0  ;;  %v11694_v15 = vadd.f32 %v23602_v19, %v10876_v45  ;;  %v11696_v34 = vadd.f32 %v23606_v54, %v11189_v6  ;;  %v10878_v51 = vpop.f32.mrb[123].mxu0  ;;  %v11191_v3 = vpop.f32.mrb[123].mxu1 }
 0x852   :  { %v11915_v55 = vmax.f32 %v11691_v1, 0.0  ;;  %v11917_v40 = vmax.f32 %v11693_v22, 0.0  ;;  %v11695_v36 = vadd.f32 %v23610_v18, %v10878_v51  ;;  %v11697_v39 = vadd.f32 %v23614_v7, %v11191_v3  ;;  %v19076_v3 = vld [vmem:[%s24996_s8 + $0x194] ss:$8 sps:$4 sm:$0xff]  }
 0x853   :  { %v12122_v50 = vmax.f32 %v11898_v61, %v11914_v47  ;;  %v12124_v43 = vmax.f32 %v11900_v41, %v11916_v44  ;;  %v11918_v56 = vmax.f32 %v11694_v15, 0.0  ;;  %v11920_v17 = vmax.f32 %v11696_v34, 0.0  ;;  %v19071_v15 = vld [vmem:[%s24995_s7 + $0x190] ss:$8 sps:$4 sm:$0xff]   ;;  %v19073_v34 = vld [vmem:[%s24995_s7 + $0x194] ss:$8 sps:$4 sm:$0xff]   ;;  %13589 = vmatprep.subr.bf16.mxu1 %v19076_v3 }
 0x854   :  { %v12123_v12 = vmax.f32 %v11899_v28, %v11915_v55  ;;  %v12125_v24 = vmax.f32 %v11901_v20, %v11917_v40  ;;  %v11919_v14 = vmax.f32 %v11695_v36, 0.0  ;;  %v11921_v60 = vmax.f32 %v11697_v39, 0.0  ;;  %12907 = vmatprep.subr.bf16.mxu0 %v19073_v34 }
 0x855   :  { %v12126_v25 = vmax.f32 %v11902_v26, %v11918_v56  ;;  %v12128_v49 = vmax.f32 %v11904_v58, %v11920_v17  ;;  %12908 = vmatpush1.bf16.msra.mxu0 %v19071_v15 }
 0x856   :  { %v12127_v9 = vmax.f32 %v11903_v27, %v11919_v14  ;;  %v12129_v29 = vmax.f32 %v11905_v30, %v11921_v60  ;;  %v10882_v61 = vpop.f32.mrb[124].mxu0  ;;  %v11195_v41 = vpop.f32.mrb[124].mxu1 }
 0x857   :  { %v12138_v21 = vpack.c.bf16 %v12126_v25, %v12122_v50  ;;  %v12140_v16 = vpack.c.bf16 %v12128_v49, %v12124_v43  ;;  %v11698_v28 = vadd.f32 %v23602_v19, %v10882_v61  ;;  %v11700_v20 = vadd.f32 %v23606_v54, %v11195_v41  ;;  %v10884_v5 = vpop.f32.mrb[125].mxu0  ;;  %v11197_v31 = vpop.f32.mrb[125].mxu1  ;;  %v19080_v25 = vld [vmem:[%s24996_s8 + $0x1a0] ss:$8 sps:$4 sm:$0xff]   ;;  %v19082_v49 = vld [vmem:[%s24996_s8 + $0x1a4] ss:$8 sps:$4 sm:$0xff]  }
 0x858   :  { %v12139_v42 = vpack.c.bf16 %v12127_v9, %v12123_v12  ;;  %v12141_v13 = vpack.c.bf16 %v12129_v29, %v12125_v24  ;;  %v11699_v26 = vadd.f32 %v23610_v18, %v10884_v5  ;;  %v11701_v58 = vadd.f32 %v23614_v7, %v11197_v31  ;;  %v10886_v8 = vpop.f32.mrb[126].mxu0  ;;  %v11199_v62 = vpop.f32.mrb[126].mxu1  ;;  %v19088_v9 = vld [vmem:[%s24996_s8 + $0x1b4] ss:$8 sps:$4 sm:$0xff]   ;;  %v19086_v41 = vld [vmem:[%s24996_s8 + $0x1b0] ss:$8 sps:$4 sm:$0xff]  }
 0x859   :  { %12148 = vst [vmem:[#allocation4 + $0x90] sm:$0xff] %v12140_v16  ;;  %v11922_v27 = vmax.f32 %v11698_v28, 0.0  ;;  %v11924_v30 = vmax.f32 %v11700_v20, 0.0  ;;  %v11702_v33 = vadd.f32 %v23602_v19, %v10886_v8  ;;  %v11704_v32 = vadd.f32 %v23606_v54, %v11199_v62  ;;  %v10888_v52 = vpop.f32.mrb[127].mxu0  ;;  %v11201_v10 = vpop.f32.mrb[127].mxu1 }
 0x85a   :  { %12149 = vst.msk [vmem:[#allocation4 + $0x98] sm:$0xff] %vm2749_vm1, %v12141_v13  ;;  %v11923_v57 = vmax.f32 %v11699_v26, 0.0  ;;  %v11925_v37 = vmax.f32 %v11701_v58, 0.0  ;;  %v11703_v1 = vadd.f32 %v23610_v18, %v10888_v52  ;;  %v11705_v22 = vadd.f32 %v23614_v7, %v11201_v10  ;;  %12788 = vmatprep.mubr.bf16.mxu0 %v12139_v42  ;;  %13470 = vmatprep.mubr.bf16.mxu1 %v12139_v42 }
 0x85b   :  { %v12130_v45 = vmax.f32 %v11906_v38, %v11922_v27  ;;  %v12132_v6 = vmax.f32 %v11908_v63, %v11924_v30  ;;  %v11926_v47 = vmax.f32 %v11702_v33, 0.0  ;;  %v11928_v44 = vmax.f32 %v11704_v32, 0.0  ;;  %12789 = vmatmul.mubr.bf16.gmra.mrb[208].mxu0 %v12138_v21  ;;  %13471 = vmatmul.mubr.bf16.gmra.mrb[208].mxu1 %v12138_v21  ;;  %v19074_v63 = vld [vmem:[%s24996_s8 + $0x190] ss:$8 sps:$4 sm:$0xff]  }
 0x85c   :  { %v12131_v51 = vmax.f32 %v11907_v35, %v11923_v57  ;;  %v12133_v2 = vmax.f32 %v11909_v23, %v11925_v37  ;;  %v11927_v11 = vmax.f32 %v11703_v1, 0.0  ;;  %v11929_v38 = vmax.f32 %v11705_v22, 0.0  ;;  %13590 = vmatpush1.bf16.msra.mxu1 %v19074_v63 }
 0x85d   :  { %v12134_v55 = vmax.f32 %v11910_v46, %v11926_v47  ;;  %v12136_v40 = vmax.f32 %v11912_v48, %v11928_v44  ;;  %v19077_v46 = vld [vmem:[%s24995_s7 + $0x1a0] ss:$8 sps:$4 sm:$0xff]   ;;  %v19079_v48 = vld [vmem:[%s24995_s7 + $0x1a4] ss:$8 sps:$4 sm:$0xff]   ;;  %13591 = vmatprep.subr.bf16.mxu1 %v19082_v49 }
 0x85e   :  { %v12135_v36 = vmax.f32 %v11911_v53, %v11927_v11  ;;  %v12137_v39 = vmax.f32 %v11913_v59, %v11929_v38  ;;  %v10892_v4 = vpop.f32.mrb[128].mxu0  ;;  %v11205_v35 = vpop.f32.mrb[128].mxu1  ;;  %12909 = vmatprep.subr.bf16.mxu0 %v19079_v48  ;;  %v19085_v53 = vld [vmem:[%s24995_s7 + $0x1b4] ss:$8 sps:$4 sm:$0xff]   ;;  %v19083_v59 = vld [vmem:[%s24995_s7 + $0x1b0] ss:$8 sps:$4 sm:$0xff]  }
 0x85f   :  { %v12142_v0 = vpack.c.bf16 %v12134_v55, %v12130_v45  ;;  %v12144_v23 = vpack.c.bf16 %v12136_v40, %v12132_v6  ;;  %v10894_v50 = vpop.f32.mrb[129].mxu0  ;;  %v11207_v43 = vpop.f32.mrb[129].mxu1  ;;  %12910 = vmatpush1.bf16.msra.mxu0 %v19077_v46  ;;  %v11706_v28 = vadd.f32 %v23602_v19, %v10892_v4  ;;  %v11708_v20 = vadd.f32 %v23606_v54, %v11205_v35 }
 0x860   :  { %v12143_v56 = vpack.c.bf16 %v12135_v36, %v12131_v51  ;;  %v12145_v17 = vpack.c.bf16 %v12137_v39, %v12133_v2  ;;  %v10896_v12 = vpop.f32.mrb[130].mxu0  ;;  %v11209_v24 = vpop.f32.mrb[130].mxu1  ;;  %13592 = vmatpush1.bf16.msra.mxu1 %v19080_v25  ;;  %12911 = vmatprep.subr.bf16.mxu0 %v19085_v53  ;;  %v11707_v5 = vadd.f32 %v23610_v18, %v10894_v50 }
 0x861   :  { %12152 = vst [vmem:[#allocation4 + $0xb0] sm:$0xff] %v12144_v23  ;;  %v10898_v14 = vpop.f32.mrb[131].mxu0  ;;  %v11211_v60 = vpop.f32.mrb[131].mxu1  ;;  %13593 = vmatprep.subr.bf16.mxu1 %v19088_v9  ;;  %v11709_v31 = vadd.f32 %v23614_v7, %v11207_v43  ;;  %v11710_v26 = vadd.f32 %v23602_v19, %v10896_v12  ;;  %v11712_v58 = vadd.f32 %v23606_v54, %v11209_v24  ;;  %v11930_v57 = vmax.f32 %v11706_v28, 0.0 }
 0x862   :  { %12153 = vst.msk [vmem:[#allocation4 + $0xb8] sm:$0xff] %vm2749_vm1, %v12145_v17  ;;  %12798 = vmatprep.mubr.bf16.mxu0 %v12143_v56  ;;  %13480 = vmatprep.mubr.bf16.mxu1 %v12143_v56  ;;  %v11711_v8 = vadd.f32 %v23610_v18, %v10898_v14  ;;  %v11713_v62 = vadd.f32 %v23614_v7, %v11211_v60  ;;  %v11932_v37 = vmax.f32 %v11708_v20, 0.0  ;;  %v11931_v1 = vmax.f32 %v11707_v5, 0.0 }
 0x863   :  { %12799 = vmatmul.mubr.bf16.gmra.mrb[212].mxu0 %v12142_v0  ;;  %13481 = vmatmul.mubr.bf16.gmra.mrb[212].mxu1 %v12142_v0  ;;  %v11933_v22 = vmax.f32 %v11709_v31, 0.0  ;;  %v11934_v45 = vmax.f32 %v11710_v26, 0.0  ;;  %v11936_v6 = vmax.f32 %v11712_v58, 0.0 }
 0x864   :  { %12912 = vmatpush1.bf16.msra.mxu0 %v19083_v59  ;;  %13594 = vmatpush1.bf16.msra.mxu1 %v19086_v41  ;;  %v11935_v47 = vmax.f32 %v11711_v8, 0.0  ;;  %v11937_v44 = vmax.f32 %v11713_v62, 0.0 }
 0x866   :  { %v10902_v29 = vpop.f32.mrb[132].mxu0  ;;  %v11215_v61 = vpop.f32.mrb[132].mxu1 }
 0x867   :  { %v10904_v21 = vpop.f32.mrb[133].mxu0  ;;  %v11217_v16 = vpop.f32.mrb[133].mxu1  ;;  %v24015_v33 = vadd.f32 %v23602_v19, %v10902_v29  ;;  %v24018_v32 = vadd.f32 %v23606_v54, %v11215_v61 }
 0x868   :  { %v10906_v42 = vpop.f32.mrb[134].mxu0  ;;  %v11219_v13 = vpop.f32.mrb[134].mxu1  ;;  %v24021_v52 = vadd.f32 %v23610_v18, %v10904_v21  ;;  %v24024_v10 = vadd.f32 %v23614_v7, %v11217_v16 }
 0x869   :  { %v10908_v27 = vpop.f32.mrb[135].mxu0  ;;  %v11221_v30 = vpop.f32.mrb[135].mxu1  ;;  %v11938_v15 = vmax.f32 %v24015_v33, 0.0  ;;  %v11940_v34 = vmax.f32 %v24018_v32, 0.0  ;;  %v24029_v51 = vadd.f32 %v23602_v19, %v10906_v42  ;;  %v24032_v2 = vadd.f32 %v23606_v54, %v11219_v13 }
 0x86a   :  { %v11939_v63 = vmax.f32 %v24021_v52, 0.0  ;;  %v11941_v3 = vmax.f32 %v24024_v10, 0.0  ;;  %v24039_v4 = vadd.f32 %v23610_v18, %v10908_v27  ;;  %v24042_v35 = vadd.f32 %v23614_v7, %v11221_v30 }
 0x86b   :  { %v11942_v28 = vmax.f32 %v24029_v51, 0.0  ;;  %v11944_v20 = vmax.f32 %v24032_v2, 0.0 }
 0x86c   :  { %v11943_v42 = vmax.f32 %v24039_v4, 0.0  ;;  %v11945_v13 = vmax.f32 %v24042_v35, 0.0 }
 0x86e   :  { %v10912_v11 = vpop.f32.mrb[136].mxu0  ;;  %v11225_v38 = vpop.f32.mrb[136].mxu1 }
 0x86f   :  { %v11722_v55 = vadd.f32 %v23602_v19, %v10912_v11  ;;  %v11724_v40 = vadd.f32 %v23606_v54, %v11225_v38  ;;  %v10914_v36 = vpop.f32.mrb[137].mxu0  ;;  %v11227_v39 = vpop.f32.mrb[137].mxu1 }
 0x870   :  { %v11723_v0 = vadd.f32 %v23610_v18, %v10914_v36  ;;  %v11725_v23 = vadd.f32 %v23614_v7, %v11227_v39  ;;  %v10916_v50 = vpop.f32.mrb[138].mxu0  ;;  %v11229_v43 = vpop.f32.mrb[138].mxu1 }
 0x871   :  { %v11946_v56 = vmax.f32 %v11722_v55, 0.0  ;;  %v11948_v17 = vmax.f32 %v11724_v40, 0.0  ;;  %v11726_v12 = vadd.f32 %v23602_v19, %v10916_v50  ;;  %v11728_v24 = vadd.f32 %v23606_v54, %v11229_v43  ;;  %v10918_v14 = vpop.f32.mrb[139].mxu0  ;;  %v11231_v60 = vpop.f32.mrb[139].mxu1 }
 0x872   :  { %v11947_v46 = vmax.f32 %v11723_v0, 0.0  ;;  %v11949_v48 = vmax.f32 %v11725_v23, 0.0  ;;  %v11727_v25 = vadd.f32 %v23610_v18, %v10918_v14  ;;  %v11729_v49 = vadd.f32 %v23614_v7, %v11231_v60 }
 0x873   :  { %v12154_v53 = vmax.f32 %v11930_v57, %v11946_v56  ;;  %v12156_v59 = vmax.f32 %v11932_v37, %v11948_v17  ;;  %v11950_v9 = vmax.f32 %v11726_v12, 0.0  ;;  %v11952_v29 = vmax.f32 %v11728_v24, 0.0 }
 0x874   :  { %v12155_v61 = vmax.f32 %v11931_v1, %v11947_v46  ;;  %v12157_v41 = vmax.f32 %v11933_v22, %v11949_v48  ;;  %v11951_v21 = vmax.f32 %v11727_v25, 0.0  ;;  %v11953_v16 = vmax.f32 %v11729_v49, 0.0 }
 0x875   :  { %v12158_v5 = vmax.f32 %v11934_v45, %v11950_v9  ;;  %v12160_v31 = vmax.f32 %v11936_v6, %v11952_v29 }
 0x876   :  { %v12159_v26 = vmax.f32 %v11935_v47, %v11951_v21  ;;  %v12161_v58 = vmax.f32 %v11937_v44, %v11953_v16  ;;  %v10922_v8 = vpop.f32.mrb[140].mxu0  ;;  %v11235_v62 = vpop.f32.mrb[140].mxu1 }
 0x877   :  { %v12170_v27 = vpack.c.bf16 %v12158_v5, %v12154_v53  ;;  %v12172_v30 = vpack.c.bf16 %v12160_v31, %v12156_v59  ;;  %v11730_v57 = vadd.f32 %v23602_v19, %v10922_v8  ;;  %v11732_v37 = vadd.f32 %v23606_v54, %v11235_v62  ;;  %v10924_v1 = vpop.f32.mrb[141].mxu0  ;;  %v11237_v22 = vpop.f32.mrb[141].mxu1 }
 0x878   :  { %v12171_v51 = vpack.c.bf16 %v12159_v26, %v12155_v61  ;;  %v12173_v2 = vpack.c.bf16 %v12161_v58, %v12157_v41  ;;  %v11731_v45 = vadd.f32 %v23610_v18, %v10924_v1  ;;  %v11733_v6 = vadd.f32 %v23614_v7, %v11237_v22  ;;  %v10926_v11 = vpop.f32.mrb[142].mxu0  ;;  %v11239_v38 = vpop.f32.mrb[142].mxu1 }
 0x879   :  { %12180 = vst [vmem:[#allocation4 + $0xd0] sm:$0xff] %v12172_v30  ;;  %v11954_v47 = vmax.f32 %v11730_v57, 0.0  ;;  %v11956_v44 = vmax.f32 %v11732_v37, 0.0  ;;  %v11734_v55 = vadd.f32 %v23602_v19, %v10926_v11  ;;  %v11736_v40 = vadd.f32 %v23606_v54, %v11239_v38  ;;  %v10928_v36 = vpop.f32.mrb[143].mxu0  ;;  %v11241_v39 = vpop.f32.mrb[143].mxu1 }
 0x87a   :  { %12181 = vst.msk [vmem:[#allocation4 + $0xd8] sm:$0xff] %vm2749_vm1, %v12173_v2  ;;  %v11955_v4 = vmax.f32 %v11731_v45, 0.0  ;;  %v11957_v35 = vmax.f32 %v11733_v6, 0.0  ;;  %v11735_v0 = vadd.f32 %v23610_v18, %v10928_v36  ;;  %v11737_v23 = vadd.f32 %v23614_v7, %v11241_v39  ;;  %12808 = vmatprep.mubr.bf16.mxu0 %v12171_v51  ;;  %13490 = vmatprep.mubr.bf16.mxu1 %v12171_v51 }
 0x87b   :  { %v12162_v50 = vmax.f32 %v11938_v15, %v11954_v47  ;;  %v12164_v43 = vmax.f32 %v11940_v34, %v11956_v44  ;;  %v11958_v56 = vmax.f32 %v11734_v55, 0.0  ;;  %v11960_v17 = vmax.f32 %v11736_v40, 0.0  ;;  %12809 = vmatmul.mubr.bf16.gmra.mrb[216].mxu0 %v12170_v27  ;;  %13491 = vmatmul.mubr.bf16.gmra.mrb[216].mxu1 %v12170_v27 }
 0x87c   :  { %v12163_v12 = vmax.f32 %v11939_v63, %v11955_v4  ;;  %v12165_v24 = vmax.f32 %v11941_v3, %v11957_v35  ;;  %v11959_v14 = vmax.f32 %v11735_v0, 0.0  ;;  %v11961_v60 = vmax.f32 %v11737_v23, 0.0 }
 0x87d   :  { %v12166_v46 = vmax.f32 %v11942_v28, %v11958_v56  ;;  %v12168_v48 = vmax.f32 %v11944_v20, %v11960_v17 }
 0x87e   :  { %v12167_v25 = vmax.f32 %v11943_v42, %v11959_v14  ;;  %v12169_v33 = vmax.f32 %v11945_v13, %v11961_v60  ;;  %v10932_v15 = vpop.f32.mrb[144].mxu0  ;;  %v11245_v49 = vpop.f32.mrb[144].mxu1 }
 0x87f   :  { %v12174_v32 = vpack.c.bf16 %v12166_v46, %v12162_v50  ;;  %v12176_v34 = vpack.c.bf16 %v12168_v48, %v12164_v43  ;;  %v10934_v53 = vpop.f32.mrb[145].mxu0  ;;  %v11247_v59 = vpop.f32.mrb[145].mxu1  ;;  %v11738_v28 = vadd.f32 %v23602_v19, %v10932_v15  ;;  %v11740_v20 = vadd.f32 %v23606_v54, %v11245_v49 }
 0x880   :  { %v12175_v9 = vpack.c.bf16 %v12167_v25, %v12163_v12  ;;  %v12177_v29 = vpack.c.bf16 %v12169_v33, %v12165_v24  ;;  %v10936_v61 = vpop.f32.mrb[146].mxu0  ;;  %v11249_v52 = vpop.f32.mrb[146].mxu1  ;;  %v11739_v5 = vadd.f32 %v23610_v18, %v10934_v53  ;;  %v11741_v31 = vadd.f32 %v23614_v7, %v11247_v59 }
 0x881   :  { %12184 = vst [vmem:[#allocation4 + $0xf0] sm:$0xff] %v12176_v34  ;;  %v10938_v63 = vpop.f32.mrb[147].mxu0  ;;  %v11251_v10 = vpop.f32.mrb[147].mxu1  ;;  %v11742_v26 = vadd.f32 %v23602_v19, %v10936_v61  ;;  %v11744_v58 = vadd.f32 %v23606_v54, %v11249_v52  ;;  %v11962_v51 = vmax.f32 %v11738_v28, 0.0  ;;  %v11964_v2 = vmax.f32 %v11740_v20, 0.0 }
 0x882   :  { %12185 = vst.msk [vmem:[#allocation4 + $0xf8] sm:$0xff] %vm2749_vm1, %v12177_v29  ;;  %12818 = vmatprep.mubr.bf16.mxu0 %v12175_v9  ;;  %13500 = vmatprep.mubr.bf16.mxu1 %v12175_v9  ;;  %v11743_v8 = vadd.f32 %v23610_v18, %v10938_v63  ;;  %v11745_v62 = vadd.f32 %v23614_v7, %v11251_v10  ;;  %v11963_v45 = vmax.f32 %v11739_v5, 0.0  ;;  %v11965_v6 = vmax.f32 %v11741_v31, 0.0 }
 0x883   :  { %12819 = vmatmul.mubr.bf16.gmra.mrb[220].mxu0 %v12174_v32  ;;  %13501 = vmatmul.mubr.bf16.gmra.mrb[220].mxu1 %v12174_v32  ;;  %v11966_v11 = vmax.f32 %v11742_v26, 0.0  ;;  %v11968_v38 = vmax.f32 %v11744_v58, 0.0 }
 0x884   :  { %v11967_v47 = vmax.f32 %v11743_v8, 0.0  ;;  %v11969_v44 = vmax.f32 %v11745_v62, 0.0 }
 0x886   :  { %v10942_v3 = vpop.f32.mrb[148].mxu0  ;;  %v11255_v41 = vpop.f32.mrb[148].mxu1 }
 0x887   :  { %v10944_v21 = vpop.f32.mrb[149].mxu0  ;;  %v11257_v16 = vpop.f32.mrb[149].mxu1  ;;  %v24081_v57 = vadd.f32 %v23602_v19, %v10942_v3  ;;  %v24084_v37 = vadd.f32 %v23606_v54, %v11255_v41 }
 0x888   :  { %v10946_v42 = vpop.f32.mrb[150].mxu0  ;;  %v11259_v13 = vpop.f32.mrb[150].mxu1  ;;  %v24087_v1 = vadd.f32 %v23610_v18, %v10944_v21  ;;  %v24090_v22 = vadd.f32 %v23614_v7, %v11257_v16 }
 0x889   :  { %v10948_v27 = vpop.f32.mrb[151].mxu0  ;;  %v11261_v30 = vpop.f32.mrb[151].mxu1  ;;  %v11970_v55 = vmax.f32 %v24081_v57, 0.0  ;;  %v11972_v40 = vmax.f32 %v24084_v37, 0.0  ;;  %v24095_v36 = vadd.f32 %v23602_v19, %v10946_v42  ;;  %v24098_v39 = vadd.f32 %v23606_v54, %v11259_v13 }
 0x88a   :  { %v11971_v0 = vmax.f32 %v24087_v1, 0.0  ;;  %v11973_v23 = vmax.f32 %v24090_v22, 0.0  ;;  %v24105_v12 = vadd.f32 %v23610_v18, %v10948_v27  ;;  %v24108_v24 = vadd.f32 %v23614_v7, %v11261_v30 }
 0x88b   :  { %v11974_v28 = vmax.f32 %v24095_v36, 0.0  ;;  %v11976_v20 = vmax.f32 %v24098_v39, 0.0 }
 0x88c   :  { %v11975_v42 = vmax.f32 %v24105_v12, 0.0  ;;  %v11977_v13 = vmax.f32 %v24108_v24, 0.0 }
 0x88e   :  { %v10952_v4 = vpop.f32.mrb[152].mxu0  ;;  %v11265_v35 = vpop.f32.mrb[152].mxu1 }
 0x88f   :  { %v11754_v50 = vadd.f32 %v23602_v19, %v10952_v4  ;;  %v11756_v43 = vadd.f32 %v23606_v54, %v11265_v35  ;;  %v10954_v56 = vpop.f32.mrb[153].mxu0  ;;  %v11267_v17 = vpop.f32.mrb[153].mxu1 }
 0x890   :  { %v11755_v14 = vadd.f32 %v23610_v18, %v10954_v56  ;;  %v11757_v60 = vadd.f32 %v23614_v7, %v11267_v17  ;;  %v10956_v46 = vpop.f32.mrb[154].mxu0  ;;  %v11269_v48 = vpop.f32.mrb[154].mxu1 }
 0x891   :  { %v11978_v25 = vmax.f32 %v11754_v50, 0.0  ;;  %v11980_v33 = vmax.f32 %v11756_v43, 0.0  ;;  %v11758_v15 = vadd.f32 %v23602_v19, %v10956_v46  ;;  %v11760_v49 = vadd.f32 %v23606_v54, %v11269_v48  ;;  %v10958_v32 = vpop.f32.mrb[155].mxu0  ;;  %v11271_v34 = vpop.f32.mrb[155].mxu1 }
 0x892   :  { %v11979_v53 = vmax.f32 %v11755_v14, 0.0  ;;  %v11981_v59 = vmax.f32 %v11757_v60, 0.0  ;;  %v11759_v9 = vadd.f32 %v23610_v18, %v10958_v32  ;;  %v11761_v29 = vadd.f32 %v23614_v7, %v11271_v34 }
 0x893   :  { %v12186_v61 = vmax.f32 %v11962_v51, %v11978_v25  ;;  %v12188_v52 = vmax.f32 %v11964_v2, %v11980_v33  ;;  %v11982_v63 = vmax.f32 %v11758_v15, 0.0  ;;  %v11984_v10 = vmax.f32 %v11760_v49, 0.0 }
 0x894   :  { %v12187_v3 = vmax.f32 %v11963_v45, %v11979_v53  ;;  %v12189_v41 = vmax.f32 %v11965_v6, %v11981_v59  ;;  %v11983_v21 = vmax.f32 %v11759_v9, 0.0  ;;  %v11985_v16 = vmax.f32 %v11761_v29, 0.0 }
 0x895   :  { %v12190_v5 = vmax.f32 %v11966_v11, %v11982_v63  ;;  %v12192_v31 = vmax.f32 %v11968_v38, %v11984_v10 }
 0x896   :  { %v12191_v26 = vmax.f32 %v11967_v47, %v11983_v21  ;;  %v12193_v58 = vmax.f32 %v11969_v44, %v11985_v16  ;;  %v10962_v8 = vpop.f32.mrb[156].mxu0  ;;  %v11275_v62 = vpop.f32.mrb[156].mxu1 }
 0x897   :  { %v12202_v27 = vpack.c.bf16 %v12190_v5, %v12186_v61  ;;  %v12204_v30 = vpack.c.bf16 %v12192_v31, %v12188_v52  ;;  %v11762_v51 = vadd.f32 %v23602_v19, %v10962_v8  ;;  %v11764_v2 = vadd.f32 %v23606_v54, %v11275_v62  ;;  %v10964_v45 = vpop.f32.mrb[157].mxu0  ;;  %v11277_v6 = vpop.f32.mrb[157].mxu1 }
 0x898   :  { %v12203_v36 = vpack.c.bf16 %v12191_v26, %v12187_v3  ;;  %v12205_v39 = vpack.c.bf16 %v12193_v58, %v12189_v41  ;;  %v11763_v11 = vadd.f32 %v23610_v18, %v10964_v45  ;;  %v11765_v38 = vadd.f32 %v23614_v7, %v11277_v6  ;;  %v10966_v4 = vpop.f32.mrb[158].mxu0  ;;  %v11279_v35 = vpop.f32.mrb[158].mxu1 }
 0x899   :  { %12212 = vst [vmem:[#allocation4 + $0x110] sm:$0xff] %v12204_v30  ;;  %v11986_v47 = vmax.f32 %v11762_v51, 0.0  ;;  %v11988_v44 = vmax.f32 %v11764_v2, 0.0  ;;  %v11766_v50 = vadd.f32 %v23602_v19, %v10966_v4  ;;  %v11768_v43 = vadd.f32 %v23606_v54, %v11279_v35  ;;  %v10968_v56 = vpop.f32.mrb[159].mxu0  ;;  %v11281_v17 = vpop.f32.mrb[159].mxu1 }
 0x89a   :  { %12213 = vst.msk [vmem:[#allocation4 + $0x118] sm:$0xff] %vm2749_vm1, %v12205_v39  ;;  %v11987_v12 = vmax.f32 %v11763_v11, 0.0  ;;  %v11989_v24 = vmax.f32 %v11765_v38, 0.0  ;;  %v11767_v14 = vadd.f32 %v23610_v18, %v10968_v56  ;;  %v11769_v60 = vadd.f32 %v23614_v7, %v11281_v17  ;;  %12828 = vmatprep.mubr.bf16.mxu0 %v12203_v36  ;;  %13510 = vmatprep.mubr.bf16.mxu1 %v12203_v36 }
 0x89b   :  { %v12194_v46 = vmax.f32 %v11970_v55, %v11986_v47  ;;  %v12196_v48 = vmax.f32 %v11972_v40, %v11988_v44  ;;  %v11990_v25 = vmax.f32 %v11766_v50, 0.0  ;;  %v11992_v33 = vmax.f32 %v11768_v43, 0.0  ;;  %12829 = vmatmul.mubr.bf16.gmra.mrb[224].mxu0 %v12202_v27  ;;  %13511 = vmatmul.mubr.bf16.gmra.mrb[224].mxu1 %v12202_v27 }
 0x89c   :  { %v12195_v15 = vmax.f32 %v11971_v0, %v11987_v12  ;;  %v12197_v49 = vmax.f32 %v11973_v23, %v11989_v24  ;;  %v11991_v32 = vmax.f32 %v11767_v14, 0.0  ;;  %v11993_v34 = vmax.f32 %v11769_v60, 0.0 }
 0x89d   :  { %v12198_v53 = vmax.f32 %v11974_v28, %v11990_v25  ;;  %v12200_v59 = vmax.f32 %v11976_v20, %v11992_v33 }
 0x89e   :  { %v12199_v9 = vmax.f32 %v11975_v42, %v11991_v32  ;;  %v12201_v57 = vmax.f32 %v11977_v13, %v11993_v34  ;;  %v10972_v55 = vpop.f32.mrb[160].mxu0  ;;  %v11285_v29 = vpop.f32.mrb[160].mxu1 }
 0x89f   :  { %v12206_v37 = vpack.c.bf16 %v12198_v53, %v12194_v46  ;;  %v24137_v40 = vpack.c.bf16 %v12200_v59, %v12196_v48  ;;  %v10974_v61 = vpop.f32.mrb[161].mxu0  ;;  %v11287_v52 = vpop.f32.mrb[161].mxu1  ;;  %v11770_v28 = vadd.f32 %v23602_v19, %v10972_v55  ;;  %v11772_v20 = vadd.f32 %v23606_v54, %v11285_v29 }
 0x8a0   :  { %v12207_v63 = vpack.c.bf16 %v12199_v9, %v12195_v15  ;;  %v12209_v10 = vpack.c.bf16 %v12201_v57, %v12197_v49  ;;  %v10976_v1 = vpop.f32.mrb[162].mxu0  ;;  %v11289_v0 = vpop.f32.mrb[162].mxu1  ;;  %v11771_v5 = vadd.f32 %v23610_v18, %v10974_v61  ;;  %v11773_v31 = vadd.f32 %v23614_v7, %v11287_v52 }
 0x8a1   :  { %v10978_v3 = vpop.f32.mrb[163].mxu0  ;;  %v11291_v22 = vpop.f32.mrb[163].mxu1  ;;  %v11774_v26 = vadd.f32 %v23602_v19, %v10976_v1  ;;  %v11776_v58 = vadd.f32 %v23606_v54, %v11289_v0  ;;  %v11994_v36 = vmax.f32 %v11770_v28, 0.0  ;;  %v11996_v39 = vmax.f32 %v11772_v20, 0.0 }
 0x8a2   :  { %12217 = vst.msk [vmem:[#allocation4 + $0x138] sm:$0xff] %vm2749_vm1, %v12209_v10  ;;  %12838 = vmatprep.mubr.bf16.mxu0 %v12207_v63  ;;  %13520 = vmatprep.mubr.bf16.mxu1 %v12207_v63  ;;  %v11775_v8 = vadd.f32 %v23610_v18, %v10978_v3  ;;  %v11777_v62 = vadd.f32 %v23614_v7, %v11291_v22  ;;  %v11995_v11 = vmax.f32 %v11771_v5, 0.0  ;;  %v11997_v38 = vmax.f32 %v11773_v31, 0.0 }
 0x8a3   :  { %12839 = vmatmul.mubr.bf16.gmra.mrb[228].mxu0 %v12206_v37  ;;  %13521 = vmatmul.mubr.bf16.gmra.mrb[228].mxu1 %v12206_v37  ;;  %v11998_v4 = vmax.f32 %v11774_v26, 0.0  ;;  %v12000_v35 = vmax.f32 %v11776_v58, 0.0 }
 0x8a4   :  { %v11999_v47 = vmax.f32 %v11775_v8, 0.0  ;;  %v12001_v44 = vmax.f32 %v11777_v62, 0.0 }
 0x8a6   :  { %v10982_v23 = vpop.f32.mrb[164].mxu0  ;;  %v11295_v41 = vpop.f32.mrb[164].mxu1 }
 0x8a7   :  { %v10984_v21 = vpop.f32.mrb[165].mxu0  ;;  %v11297_v16 = vpop.f32.mrb[165].mxu1  ;;  %v24149_v51 = vadd.f32 %v23602_v19, %v10982_v23  ;;  %v24152_v2 = vadd.f32 %v23606_v54, %v11295_v41 }
 0x8a8   :  { %v10986_v42 = vpop.f32.mrb[166].mxu0  ;;  %v11299_v13 = vpop.f32.mrb[166].mxu1  ;;  %v24155_v45 = vadd.f32 %v23610_v18, %v10984_v21  ;;  %v24158_v6 = vadd.f32 %v23614_v7, %v11297_v16 }
 0x8a9   :  { %v10988_v27 = vpop.f32.mrb[167].mxu0  ;;  %v11301_v30 = vpop.f32.mrb[167].mxu1  ;;  %v12002_v50 = vmax.f32 %v24149_v51, 0.0  ;;  %v12004_v43 = vmax.f32 %v24152_v2, 0.0  ;;  %v24163_v56 = vadd.f32 %v23602_v19, %v10986_v42  ;;  %v24166_v17 = vadd.f32 %v23606_v54, %v11299_v13 }
 0x8aa   :  { %v12003_v14 = vmax.f32 %v24155_v45, 0.0  ;;  %v12005_v60 = vmax.f32 %v24158_v6, 0.0  ;;  %v24173_v15 = vadd.f32 %v23610_v18, %v10988_v27  ;;  %v24176_v49 = vadd.f32 %v23614_v7, %v11301_v30 }
 0x8ab   :  { %v12006_v20 = vmax.f32 %v24163_v56, 0.0  ;;  %v12008_v5 = vmax.f32 %v24166_v17, 0.0 }
 0x8ac   :  { %v12007_v13 = vmax.f32 %v24173_v15, 0.0  ;;  %v12009_v26 = vmax.f32 %v24176_v49, 0.0 }
 0x8ae   :  { %v10992_v12 = vpop.f32.mrb[168].mxu0  ;;  %v11305_v24 = vpop.f32.mrb[168].mxu1 }
 0x8af   :  { %v11786_v46 = vadd.f32 %v23602_v19, %v10992_v12  ;;  %v11788_v48 = vadd.f32 %v23606_v54, %v11305_v24  ;;  %v10994_v25 = vpop.f32.mrb[169].mxu0  ;;  %v11307_v33 = vpop.f32.mrb[169].mxu1 }
 0x8b0   :  { %v11787_v32 = vadd.f32 %v23610_v18, %v10994_v25  ;;  %v11789_v34 = vadd.f32 %v23614_v7, %v11307_v33  ;;  %v10996_v53 = vpop.f32.mrb[170].mxu0  ;;  %v11309_v59 = vpop.f32.mrb[170].mxu1 }
 0x8b1   :  { %v12010_v9 = vmax.f32 %v11786_v46, 0.0  ;;  %v12012_v57 = vmax.f32 %v11788_v48, 0.0  ;;  %v11790_v55 = vadd.f32 %v23602_v19, %v10996_v53  ;;  %v11792_v29 = vadd.f32 %v23606_v54, %v11309_v59  ;;  %v10998_v37 = vpop.f32.mrb[171].mxu0  ;;  %v11311_v61 = vpop.f32.mrb[171].mxu1 }
 0x8b2   :  { %v12011_v52 = vmax.f32 %v11787_v32, 0.0  ;;  %v12013_v63 = vmax.f32 %v11789_v34, 0.0  ;;  %v11791_v10 = vadd.f32 %v23610_v18, %v10998_v37  ;;  %v11793_v1 = vadd.f32 %v23614_v7, %v11311_v61 }
 0x8b3   :  { %v12218_v0 = vmax.f32 %v11994_v36, %v12010_v9  ;;  %v12220_v3 = vmax.f32 %v11996_v39, %v12012_v57  ;;  %v12014_v22 = vmax.f32 %v11790_v55, 0.0  ;;  %v12016_v23 = vmax.f32 %v11792_v29, 0.0 }
 0x8b4   :  { %v12219_v41 = vmax.f32 %v11995_v11, %v12011_v52  ;;  %v12221_v21 = vmax.f32 %v11997_v38, %v12013_v63  ;;  %v12015_v16 = vmax.f32 %v11791_v10, 0.0  ;;  %v12017_v28 = vmax.f32 %v11793_v1, 0.0 }
 0x8b5   :  { %v12222_v31 = vmax.f32 %v11998_v4, %v12014_v22  ;;  %v12224_v42 = vmax.f32 %v12000_v35, %v12016_v23 }
 0x8b6   :  { %v12223_v58 = vmax.f32 %v11999_v47, %v12015_v16  ;;  %v12225_v8 = vmax.f32 %v12001_v44, %v12017_v28  ;;  %v11002_v62 = vpop.f32.mrb[172].mxu0  ;;  %v11315_v27 = vpop.f32.mrb[172].mxu1 }
 0x8b7   :  { %v12234_v30 = vpack.c.bf16 %v12222_v31, %v12218_v0  ;;  %v24188_v36 = vpack.c.bf16 %v12224_v42, %v12220_v3  ;;  %v11794_v39 = vadd.f32 %v23602_v19, %v11002_v62  ;;  %v11796_v11 = vadd.f32 %v23606_v54, %v11315_v27  ;;  %v11004_v38 = vpop.f32.mrb[173].mxu0  ;;  %v11317_v56 = vpop.f32.mrb[173].mxu1 }
 0x8b8   :  { %v12235_v17 = vpack.c.bf16 %v12223_v58, %v12219_v41  ;;  %v12237_v4 = vpack.c.bf16 %v12225_v8, %v12221_v21  ;;  %v11795_v35 = vadd.f32 %v23610_v18, %v11004_v38  ;;  %v11797_v12 = vadd.f32 %v23614_v7, %v11317_v56  ;;  %v11006_v24 = vpop.f32.mrb[174].mxu0  ;;  %v11319_v47 = vpop.f32.mrb[174].mxu1 }
 0x8b9   :  { %v12018_v44 = vmax.f32 %v11794_v39, 0.0  ;;  %v12020_v46 = vmax.f32 %v11796_v11, 0.0  ;;  %v11798_v48 = vadd.f32 %v23602_v19, %v11006_v24  ;;  %v11800_v25 = vadd.f32 %v23606_v54, %v11319_v47  ;;  %v11008_v33 = vpop.f32.mrb[175].mxu0  ;;  %v11321_v15 = vpop.f32.mrb[175].mxu1 }
 0x8ba   :  { %12245 = vst.msk [vmem:[#allocation4 + $0x158] sm:$0xff] %vm2749_vm1, %v12237_v4  ;;  %v12019_v49 = vmax.f32 %v11795_v35, 0.0  ;;  %v12021_v32 = vmax.f32 %v11797_v12, 0.0  ;;  %v11799_v34 = vadd.f32 %v23610_v18, %v11008_v33  ;;  %v11801_v53 = vadd.f32 %v23614_v7, %v11321_v15  ;;  %12848 = vmatprep.mubr.bf16.mxu0 %v12235_v17  ;;  %13530 = vmatprep.mubr.bf16.mxu1 %v12235_v17 }
 0x8bb   :  { %v12226_v59 = vmax.f32 %v12002_v50, %v12018_v44  ;;  %v12228_v9 = vmax.f32 %v12004_v43, %v12020_v46  ;;  %v12022_v57 = vmax.f32 %v11798_v48, 0.0  ;;  %v12024_v55 = vmax.f32 %v11800_v25, 0.0  ;;  %12849 = vmatmul.mubr.bf16.gmra.mrb[232].mxu0 %v12234_v30  ;;  %13531 = vmatmul.mubr.bf16.gmra.mrb[232].mxu1 %v12234_v30 }
 0x8bc   :  { %v12227_v29 = vmax.f32 %v12003_v14, %v12019_v49  ;;  %v12229_v37 = vmax.f32 %v12005_v60, %v12021_v32  ;;  %v12023_v61 = vmax.f32 %v11799_v34, 0.0  ;;  %v12025_v52 = vmax.f32 %v11801_v53, 0.0 }
 0x8bd   :  { %v12230_v63 = vmax.f32 %v12006_v20, %v12022_v57  ;;  %v12232_v10 = vmax.f32 %v12008_v5, %v12024_v55 }
 0x8be   :  { %v12231_v1 = vmax.f32 %v12007_v13, %v12023_v61  ;;  %v12233_v51 = vmax.f32 %v12009_v26, %v12025_v52  ;;  %v11012_v50 = vpop.f32.mrb[176].mxu0  ;;  %v11325_v0 = vpop.f32.mrb[176].mxu1 }
 0x8bf   :  { %v12238_v2 = vpack.c.bf16 %v12230_v63, %v12226_v59  ;;  %v24207_v43 = vpack.c.bf16 %v12232_v10, %v12228_v9  ;;  %v11014_v3 = vpop.f32.mrb[177].mxu0  ;;  %v11327_v22 = vpop.f32.mrb[177].mxu1  ;;  %v11802_v5 = vadd.f32 %v23602_v19, %v11012_v50  ;;  %v11804_v31 = vadd.f32 %v23606_v54, %v11325_v0 }
 0x8c0   :  { %v12239_v23 = vpack.c.bf16 %v12231_v1, %v12227_v29  ;;  %v12241_v41 = vpack.c.bf16 %v12233_v51, %v12229_v37  ;;  %v11016_v45 = vpop.f32.mrb[178].mxu0  ;;  %v11329_v14 = vpop.f32.mrb[178].mxu1  ;;  %v11803_v42 = vadd.f32 %v23610_v18, %v11014_v3  ;;  %v11805_v13 = vadd.f32 %v23614_v7, %v11327_v22 }
 0x8c1   :  { %v11018_v21 = vpop.f32.mrb[179].mxu0  ;;  %v11331_v6 = vpop.f32.mrb[179].mxu1  ;;  %v11806_v8 = vadd.f32 %v23602_v19, %v11016_v45  ;;  %v11808_v62 = vadd.f32 %v23606_v54, %v11329_v14  ;;  %v12026_v35 = vmax.f32 %v11802_v5, 0.0  ;;  %v12028_v12 = vmax.f32 %v11804_v31, 0.0 }
 0x8c2   :  { %12249 = vst.msk [vmem:[#allocation4 + $0x178] sm:$0xff] %vm2749_vm1, %v12241_v41  ;;  %12858 = vmatprep.mubr.bf16.mxu0 %v12239_v23  ;;  %13540 = vmatprep.mubr.bf16.mxu1 %v12239_v23  ;;  %v11807_v27 = vadd.f32 %v23610_v18, %v11018_v21  ;;  %v11809_v30 = vadd.f32 %v23614_v7, %v11331_v6  ;;  %v12027_v24 = vmax.f32 %v11803_v42, 0.0  ;;  %v12029_v47 = vmax.f32 %v11805_v13, 0.0 }
 0x8c3   :  { %12859 = vmatmul.mubr.bf16.gmra.mrb[236].mxu0 %v12238_v2  ;;  %13541 = vmatmul.mubr.bf16.gmra.mrb[236].mxu1 %v12238_v2  ;;  %v12030_v44 = vmax.f32 %v11806_v8, 0.0  ;;  %v12032_v46 = vmax.f32 %v11808_v62, 0.0 }
 0x8c4   :  { %v12031_v48 = vmax.f32 %v11807_v27, 0.0  ;;  %v12033_v25 = vmax.f32 %v11809_v30, 0.0 }
 0x8c6   :  { %v11022_v60 = vpop.f32.mrb[180].mxu0  ;;  %v11335_v16 = vpop.f32.mrb[180].mxu1 }
 0x8c7   :  { %v11024_v28 = vpop.f32.mrb[181].mxu0  ;;  %v11337_v20 = vpop.f32.mrb[181].mxu1  ;;  %v24219_v38 = vadd.f32 %v23602_v19, %v11022_v60  ;;  %v24222_v56 = vadd.f32 %v23606_v54, %v11335_v16 }
 0x8c8   :  { %v11026_v26 = vpop.f32.mrb[182].mxu0  ;;  %v11339_v58 = vpop.f32.mrb[182].mxu1  ;;  %v24225_v17 = vadd.f32 %v23610_v18, %v11024_v28  ;;  %v24228_v4 = vadd.f32 %v23614_v7, %v11337_v20 }
 0x8c9   :  { %v11028_v39 = vpop.f32.mrb[183].mxu0  ;;  %v11341_v11 = vpop.f32.mrb[183].mxu1  ;;  %v12034_v33 = vmax.f32 %v24219_v38, 0.0  ;;  %v12036_v15 = vmax.f32 %v24222_v56, 0.0  ;;  %v24233_v49 = vadd.f32 %v23602_v19, %v11026_v26  ;;  %v24236_v32 = vadd.f32 %v23606_v54, %v11339_v58 }
 0x8ca   :  { %v12035_v59 = vmax.f32 %v24225_v17, 0.0  ;;  %v12037_v9 = vmax.f32 %v24228_v4, 0.0  ;;  %v24243_v61 = vadd.f32 %v23610_v18, %v11028_v39  ;;  %v24246_v52 = vadd.f32 %v23614_v7, %v11341_v11  ;;  %v12285_v17 = vld [vmem:[#allocation4 + $0x18] sm:$0xff]  ;;  %v12284_v4 = vld [vmem:[#allocation4 + $0x10] sm:$0xff] }
 0x8cb   :  { %v12038_v13 = vmax.f32 %v24233_v49, 0.0  ;;  %v12040_v26 = vmax.f32 %v24236_v32, 0.0 }
 0x8cc   :  { %v12039_v62 = vmax.f32 %v24243_v61, 0.0  ;;  %v12041_v27 = vmax.f32 %v24246_v52, 0.0 }
 0x8ce   :  { %v11032_v34 = vpop.f32.mrb[184].mxu0  ;;  %v11345_v53 = vpop.f32.mrb[184].mxu1 }
 0x8cf   :  { %v11818_v57 = vadd.f32 %v23602_v19, %v11032_v34  ;;  %v11820_v55 = vadd.f32 %v23606_v54, %v11345_v53  ;;  %v11034_v29 = vpop.f32.mrb[185].mxu0  ;;  %v11347_v37 = vpop.f32.mrb[185].mxu1 }
 0x8d0   :  { %v11819_v63 = vadd.f32 %v23610_v18, %v11034_v29  ;;  %v11821_v10 = vadd.f32 %v23614_v7, %v11347_v37  ;;  %v11036_v1 = vpop.f32.mrb[186].mxu0  ;;  %v11349_v51 = vpop.f32.mrb[186].mxu1 }
 0x8d1   :  { %v12042_v50 = vmax.f32 %v11818_v57, 0.0  ;;  %v12044_v0 = vmax.f32 %v11820_v55, 0.0  ;;  %v11822_v2 = vadd.f32 %v23602_v19, %v11036_v1  ;;  %v11824_v3 = vadd.f32 %v23606_v54, %v11349_v51  ;;  %v11038_v22 = vpop.f32.mrb[187].mxu0  ;;  %v11351_v23 = vpop.f32.mrb[187].mxu1 }
 0x8d2   :  { %v12043_v41 = vmax.f32 %v11819_v63, 0.0  ;;  %v12045_v45 = vmax.f32 %v11821_v10, 0.0  ;;  %v11823_v14 = vadd.f32 %v23610_v18, %v11038_v22  ;;  %v11825_v21 = vadd.f32 %v23614_v7, %v11351_v23 }
 0x8d3   :  { %v12250_v6 = vmax.f32 %v12026_v35, %v12042_v50  ;;  %v12252_v60 = vmax.f32 %v12028_v12, %v12044_v0  ;;  %v12046_v16 = vmax.f32 %v11822_v2, 0.0  ;;  %v12048_v28 = vmax.f32 %v11824_v3, 0.0 }
 0x8d4   :  { %v12251_v20 = vmax.f32 %v12027_v24, %v12043_v41  ;;  %v12253_v5 = vmax.f32 %v12029_v47, %v12045_v45  ;;  %v12047_v31 = vmax.f32 %v11823_v14, 0.0  ;;  %v12049_v42 = vmax.f32 %v11825_v21, 0.0  ;;  %v12293_v21 = vld [vmem:[#allocation4 + $0x58] sm:$0xff] }
 0x8d5   :  { %v12254_v58 = vmax.f32 %v12030_v44, %v12046_v16  ;;  %v12256_v8 = vmax.f32 %v12032_v46, %v12048_v28  ;;  %v12296_v16 = vld [vmem:[#allocation4 + $0x70] sm:$0xff]  ;;  %v12301_v28 = vld [vmem:[#allocation4 + $0x98] sm:$0xff] }
 0x8d6   :  { %v12255_v30 = vmax.f32 %v12031_v48, %v12047_v31  ;;  %v12257_v39 = vmax.f32 %v12033_v25, %v12049_v42  ;;  %v11042_v11 = vpop.f32.mrb[188].mxu0  ;;  %v11355_v35 = vpop.f32.mrb[188].mxu1  ;;  %v12304_v31 = vld [vmem:[#allocation4 + $0xb0] sm:$0xff]  ;;  %v12309_v42 = vld [vmem:[#allocation4 + $0xd8] sm:$0xff] }
 0x8d7   :  { %v12266_v12 = vpack.c.bf16 %v12254_v58, %v12250_v6  ;;  %v24258_v34 = vpack.c.bf16 %v12256_v8, %v12252_v60  ;;  %v11826_v24 = vadd.f32 %v23602_v19, %v11042_v11  ;;  %v11828_v47 = vadd.f32 %v23606_v54, %v11355_v35  ;;  %v11044_v49 = vpop.f32.mrb[189].mxu0  ;;  %v11357_v53 = vpop.f32.mrb[189].mxu1  ;;  %v12292_v6 = vld [vmem:[#allocation4 + $0x50] sm:$0xff]  ;;  %v12297_v60 = vld [vmem:[#allocation4 + $0x78] sm:$0xff]  ;;  %v19091_v35 = vld [vmem:[%s24998_s9 + $0xc0] sm:$0xff]  }
 0x8d8   :  { %v12267_v32 = vpack.c.bf16 %v12255_v30, %v12251_v20  ;;  %v12269_v44 = vpack.c.bf16 %v12257_v39, %v12253_v5  ;;  %v11827_v46 = vadd.f32 %v23610_v18, %v11044_v49  ;;  %v11829_v57 = vadd.f32 %v23614_v7, %v11357_v53  ;;  %v11046_v55 = vpop.f32.mrb[190].mxu0  ;;  %v11359_v48 = vpop.f32.mrb[190].mxu1  ;;  %v12300_v20 = vld [vmem:[#allocation4 + $0x90] sm:$0xff]  ;;  %v12305_v5 = vld [vmem:[#allocation4 + $0xb8] sm:$0xff]  ;;  %16731 = vmatprep.subr.bf16.mxu1 %v19091_v35  ;;  %v19096_v49 = vld [vmem:[%s24998_s9 + $0x88] sm:$0xff]  }
 0x8d9   :  { %v12050_v25 = vmax.f32 %v11826_v24, 0.0  ;;  %v12052_v29 = vmax.f32 %v11828_v47, 0.0  ;;  %v11830_v37 = vadd.f32 %v23602_v19, %v11046_v55  ;;  %v11832_v61 = vadd.f32 %v23606_v54, %v11359_v48  ;;  %v11048_v52 = vpop.f32.mrb[191].mxu0  ;;  %v11361_v63 = vpop.f32.mrb[191].mxu1  ;;  %v12312_v58 = vld [vmem:[#allocation4 + $0xf0] sm:$0xff]  ;;  %v12317_v8 = vld [vmem:[#allocation4 + $0x118] sm:$0xff] }
 0x8da   :  { %12277 = vst.msk [vmem:[#allocation4 + $0x198] sm:$0xff] %vm2749_vm1, %v12269_v44  ;;  %v12051_v10 = vmax.f32 %v11827_v46, 0.0  ;;  %v12053_v1 = vmax.f32 %v11829_v57, 0.0  ;;  %v11831_v51 = vadd.f32 %v23610_v18, %v11048_v52  ;;  %v11833_v50 = vadd.f32 %v23614_v7, %v11361_v63  ;;  %12868 = vmatprep.mubr.bf16.mxu0 %v12267_v32  ;;  %13550 = vmatprep.mubr.bf16.mxu1 %v12267_v32  ;;  %v12325_v30 = vld [vmem:[#allocation4 + $0x158] sm:$0xff]  ;;  %v19094_v24 = vld [vmem:[%s24998_s9 + $0x8] sm:$0xff]   ;;  %v19097_v53 = vld [vmem:[%s24998_s9 + $0x50] sm:$0xff]  }
 0x8db   :  { %v12258_v0 = vmax.f32 %v12034_v33, %v12050_v25  ;;  %v12260_v19 = vmax.f32 %v12036_v15, %v12052_v29  ;;  %v12054_v2 = vmax.f32 %v11830_v37, 0.0  ;;  %v12056_v54 = vmax.f32 %v11832_v61, 0.0  ;;  %12869 = vmatmul.mubr.bf16.gmra.mrb[240].mxu0 %v12266_v12  ;;  %13551 = vmatmul.mubr.bf16.gmra.mrb[240].mxu1 %v12266_v12  ;;  %v12329_v39 = vld [vmem:[#allocation4 + $0x178] sm:$0xff]  ;;  %v19092_v12 = vld [vmem:[%s24998_s9 + $0x80] sm:$0xff]   ;;  %v19095_v47 = vld [vmem:[%s24998_s9 + $0xc8] sm:$0xff]  }
 0x8dc   :  { %v12259_v3 = vmax.f32 %v12035_v59, %v12051_v10  ;;  %v12261_v18 = vmax.f32 %v12037_v9, %v12053_v1  ;;  %v12055_v22 = vmax.f32 %v11831_v51, 0.0  ;;  %v12057_v7 = vmax.f32 %v11833_v50, 0.0  ;;  %v12289_v59 = vld [vmem:[#allocation4 + $0x38] sm:$0xff]  ;;  %v12288_v9 = vld [vmem:[#allocation4 + $0x30] sm:$0xff]  ;;  %v19105_v29 = vld [vmem:[%s24998_s9 + $0x60] sm:$0xff]  }
 0x8dd   :  { %v12262_v23 = vmax.f32 %v12038_v13, %v12054_v2  ;;  %v12264_v41 = vmax.f32 %v12040_v26, %v12056_v54  ;;  %v12308_v13 = vld [vmem:[#allocation4 + $0xd0] sm:$0xff]  ;;  %v12313_v26 = vld [vmem:[#allocation4 + $0xf8] sm:$0xff]  ;;  %v19106_v37 = vld [vmem:[%s24998_s9 + $0x20] sm:$0xff]  }
 0x8de   :  { %v12263_v45 = vmax.f32 %v12039_v62, %v12055_v22  ;;  %v12265_v38 = vmax.f32 %v12041_v27, %v12057_v7  ;;  %v12316_v62 = vld [vmem:[#allocation4 + $0x110] sm:$0xff]  ;;  %v12321_v27 = vld [vmem:[#allocation4 + $0x138] sm:$0xff]  ;;  %v19107_v61 = vld [vmem:[%s24998_s9 + $0xe0] sm:$0xff]  }
 0x8df   :  { %v12270_v33 = vpack.c.bf16 %v12262_v23, %v12258_v0  ;;  %v24277_v14 = vpack.c.bf16 %v12264_v41, %v12260_v19  ;;  %v19098_v32 = vld [vmem:[%s24998_s9 + $0x10] sm:$0xff]   ;;  %v19101_v57 = vld [vmem:[%s24998_s9 + $0x58] sm:$0xff]   ;;  %v19108_v52 = vld [vmem:[%s24998_s9 + $0xa0] sm:$0xff]  }
 0x8e0   :  { %v12271_v56 = vpack.c.bf16 %v12263_v45, %v12259_v3  ;;  %v12273_v15 = vpack.c.bf16 %v12265_v38, %v12261_v18  ;;  %v19099_v44 = vld [vmem:[%s24998_s9 + $0xd0] sm:$0xff]   ;;  %v19102_v55 = vld [vmem:[%s24998_s9 + $0x18] sm:$0xff]   ;;  %v19109_v63 = vld [vmem:[%s24998_s9 + $0x68] sm:$0xff]  }
 0x8e1   :  { %v12333_v11 = vld [vmem:[#allocation4 + $0x198] sm:$0xff]  ;;  %v19100_v46 = vld [vmem:[%s24998_s9 + $0x90] sm:$0xff]   ;;  %v19110_v10 = vld [vmem:[%s24998_s9 + $0x28] sm:$0xff]  }
 0x8e2   :  { %12281 = vst.msk [vmem:[#allocation4 + $0x1b8] sm:$0xff] %vm2749_vm1, %v12273_v15  ;;  %12878 = vmatprep.mubr.bf16.mxu0 %v12271_v56  ;;  %13560 = vmatprep.mubr.bf16.mxu1 %v12271_v56  ;;  %v19103_v48 = vld [vmem:[%s24998_s9 + $0xd8] sm:$0xff]   ;;  %v19111_v1 = vld [vmem:[%s24998_s9 + $0xe8] sm:$0xff]   ;;  %v19113_v50 = vld [vmem:[%s24998_s9 + $0x70] sm:$0xff]  }
 0x8e3   :  { %12879 = vmatmul.mubr.bf16.gmra.mrb[244].mxu0 %v12270_v33  ;;  %13561 = vmatmul.mubr.bf16.gmra.mrb[244].mxu1 %v12270_v33  ;;  %v19104_v25 = vld [vmem:[%s24998_s9 + $0x98] sm:$0xff]   ;;  %v19112_v51 = vld [vmem:[%s24998_s9 + $0xa8] sm:$0xff]   ;;  %v19114_v0 = vld [vmem:[%s24998_s9 + $0x30] sm:$0xff]  }
 0x8e4   :  { %16518 = vmatprep.mubr.msk.bf16.mxu0 %vm2749_vm1, %v12285_v17  ;;  %16588 = vmatprep.mubr.msk.bf16.mxu1 %vm2749_vm1, %v12285_v17  ;;  %v19115_v19 = vld [vmem:[%s24998_s9 + $0xf0] sm:$0xff]  }
 0x8e5   :  { %v19116_v2 = vld [vmem:[%s24998_s9 + $0xb0] sm:$0xff]  }
 0x8eb   :  { %12922 = vmatmul.mubr.bf16.vlgmr.msra.gmra.mrb[192].mxu0 %v12284_v4  ;;  %13604 = vmatmul.mubr.bf16.vlgmr.msra.gmra.mrb[192].mxu1 %v12284_v4 }
 0x8ec   :  { %16519 = vmatprep.mubr.msk.bf16.mxu0 %vm2749_vm1, %v12289_v59  ;;  %16589 = vmatprep.mubr.msk.bf16.mxu1 %vm2749_vm1, %v12289_v59 }
 0x8ed   :  { %16732 = vmatpush3.bf16.msra.mxu1 %v19092_v12 }
 0x8ee   :  { %16733 = vmatprep.subr.bf16.mxu1 %v19095_v47 }
 0x8f1   :  { %16734 = vmatpush3.bf16.msra.mxu1 %v19096_v49 }
 0x8f2   :  { %16735 = vmatprep.subr.bf16.mxu1 %v19099_v44 }
 0x8f3   :  { %12932 = vmatmul.mubr.bf16.gmra.mrb[196].mxu0 %v12288_v9  ;;  %13614 = vmatmul.mubr.bf16.gmra.mrb[196].mxu1 %v12288_v9 }
 0x8f4   :  { %16520 = vmatprep.mubr.msk.bf16.mxu0 %vm2749_vm1, %v12293_v21  ;;  %16590 = vmatprep.mubr.msk.bf16.mxu1 %vm2749_vm1, %v12293_v21 }
 0x8f5   :  { %16736 = vmatpush3.bf16.msra.mxu1 %v19100_v46 }
 0x8f6   :  { %16737 = vmatprep.subr.bf16.mxu1 %v19103_v48 }
 0x8f9   :  { %16738 = vmatpush3.bf16.msra.mxu1 %v19104_v25 }
 0x8fa   :  { %16739 = vmatprep.subr.bf16.mxu1 %v19107_v61  ;;  %v19126_v61 = vld [vmem:[%s24998_s9 + $0x1c0] sm:$0xff]  }
 0x8fb   :  { %12942 = vmatmul.mubr.bf16.gmra.mrb[200].mxu0 %v12292_v6  ;;  %13624 = vmatmul.mubr.bf16.gmra.mrb[200].mxu1 %v12292_v6 }
 0x8fc   :  { %16521 = vmatprep.mubr.msk.bf16.mxu0 %vm2749_vm1, %v12297_v60  ;;  %16591 = vmatprep.mubr.msk.bf16.mxu1 %vm2749_vm1, %v12297_v60 }
 0x8fd   :  { %16740 = vmatpush3.bf16.msra.mxu1 %v19108_v52 }
 0x8fe   :  { %16741 = vmatprep.subr.bf16.mxu1 %v19111_v1 }
 0x901   :  { %16742 = vmatpush3.bf16.msra.mxu1 %v19112_v51 }
 0x902   :  { %16743 = vmatprep.subr.bf16.mxu1 %v19115_v19 }
 0x903   :  { %12952 = vmatmul.mubr.bf16.gmra.mrb[204].mxu0 %v12296_v16  ;;  %13634 = vmatmul.mubr.bf16.gmra.mrb[204].mxu1 %v12296_v16 }
 0x904   :  { %16522 = vmatprep.mubr.msk.bf16.mxu0 %vm2749_vm1, %v12301_v28  ;;  %16592 = vmatprep.mubr.msk.bf16.mxu1 %vm2749_vm1, %v12301_v28 }
 0x905   :  { %16744 = vmatpush3.bf16.msra.mxu1 %v19116_v2 }
 0x90b   :  { %12962 = vmatmul.mubr.bf16.gmra.mrb[208].mxu0 %v12300_v20  ;;  %13644 = vmatmul.mubr.bf16.gmra.mrb[208].mxu1 %v12300_v20 }
 0x90c   :  { %16523 = vmatprep.mubr.msk.bf16.mxu0 %vm2749_vm1, %v12305_v5  ;;  %16593 = vmatprep.mubr.msk.bf16.mxu1 %vm2749_vm1, %v12305_v5 }
 0x913   :  { %12972 = vmatmul.mubr.bf16.gmra.mrb[212].mxu0 %v12304_v31  ;;  %13654 = vmatmul.mubr.bf16.gmra.mrb[212].mxu1 %v12304_v31  ;;  %v19117_v31 = vld [vmem:[%s24998_s9 + $0x78] sm:$0xff]  }
 0x914   :  { %16524 = vmatprep.mubr.msk.bf16.mxu0 %vm2749_vm1, %v12309_v42  ;;  %16594 = vmatprep.mubr.msk.bf16.mxu1 %vm2749_vm1, %v12309_v42 }
 0x91b   :  { %12982 = vmatmul.mubr.bf16.gmra.mrb[216].mxu0 %v12308_v13  ;;  %13664 = vmatmul.mubr.bf16.gmra.mrb[216].mxu1 %v12308_v13  ;;  %v19118_v13 = vld [vmem:[%s24998_s9 + $0x38] sm:$0xff]  }
 0x91c   :  { %16525 = vmatprep.mubr.msk.bf16.mxu0 %vm2749_vm1, %v12313_v26  ;;  %16595 = vmatprep.mubr.msk.bf16.mxu1 %vm2749_vm1, %v12313_v26 }
 0x923   :  { %12992 = vmatmul.mubr.bf16.gmra.mrb[220].mxu0 %v12312_v58  ;;  %13674 = vmatmul.mubr.bf16.gmra.mrb[220].mxu1 %v12312_v58  ;;  %v19119_v58 = vld [vmem:[%s24998_s9 + $0xf8] sm:$0xff]  }
 0x924   :  { %16526 = vmatprep.mubr.msk.bf16.mxu0 %vm2749_vm1, %v12317_v8  ;;  %16596 = vmatprep.mubr.msk.bf16.mxu1 %vm2749_vm1, %v12317_v8  ;;  %v19120_v8 = vld [vmem:[%s24998_s9 + $0xb8] sm:$0xff]  }
 0x925   :  { %16745 = vmatprep.subr.bf16.mxu1 %v19119_v58 }
 0x926   :  { %16746 = vmatpush3.bf16.msra.mxu1 %v19120_v8 }
 0x927   :  { %16787 = vmatprep.subr.bf16.mxu1 %v19126_v61 }
 0x92b   :  { %13002 = vmatmul.mubr.bf16.gmra.mrb[224].mxu0 %v12316_v62  ;;  %13684 = vmatmul.mubr.bf16.gmra.mrb[224].mxu1 %v12316_v62  ;;  %v19121_v62 = vld [vmem:[%s24998_s9 + $0x140] sm:$0xff]  }
 0x92c   :  { %16527 = vmatprep.mubr.msk.bf16.mxu0 %vm2749_vm1, %v12321_v27  ;;  %16597 = vmatprep.mubr.msk.bf16.mxu1 %vm2749_vm1, %v12321_v27 }
 0x933   :  { %13012 = vmatmul.mubr.bf16.gmra.mrb[228].mxu0 %v24137_v40  ;;  %13694 = vmatmul.mubr.bf16.gmra.mrb[228].mxu1 %v24137_v40  ;;  %v12337_v40 = vld [vmem:[#allocation4 + $0x1b8] sm:$0xff] }
 0x934   :  { %16528 = vmatprep.mubr.msk.bf16.mxu0 %vm2749_vm1, %v12325_v30  ;;  %16598 = vmatprep.mubr.msk.bf16.mxu1 %vm2749_vm1, %v12325_v30 }
 0x93b   :  { %13022 = vmatmul.mubr.bf16.gmra.mrb[232].mxu0 %v24188_v36  ;;  %13704 = vmatmul.mubr.bf16.gmra.mrb[232].mxu1 %v24188_v36  ;;  %v19089_v36 = vld [vmem:[%s24998_s9 + $0x40] sm:$0xff]  }
 0x93c   :  { %16529 = vmatprep.mubr.msk.bf16.mxu0 %vm2749_vm1, %v12329_v39  ;;  %16599 = vmatprep.mubr.msk.bf16.mxu1 %vm2749_vm1, %v12329_v39 }
 0x93d   :  { %16703 = vmatprep.subr.bf16.mxu0 %v19089_v36 }
 0x943   :  { %13032 = vmatmul.mubr.bf16.gmra.mrb[236].mxu0 %v24207_v43  ;;  %13714 = vmatmul.mubr.bf16.gmra.mrb[236].mxu1 %v24207_v43  ;;  %v19090_v43 = vld [vmem:[%s24998_s9] sm:$0xff]  }
 0x944   :  { %16530 = vmatprep.mubr.msk.bf16.mxu0 %vm2749_vm1, %v12333_v11  ;;  %16600 = vmatprep.mubr.msk.bf16.mxu1 %vm2749_vm1, %v12333_v11 }
 0x945   :  { %16704 = vmatpush3.bf16.msra.mxu0 %v19090_v43 }
 0x94b   :  { %13042 = vmatmul.mubr.bf16.gmra.mrb[240].mxu0 %v24258_v34  ;;  %13724 = vmatmul.mubr.bf16.gmra.mrb[240].mxu1 %v24258_v34  ;;  %v19093_v34 = vld [vmem:[%s24998_s9 + $0x48] sm:$0xff]  }
 0x94c   :  { %16531 = vmatprep.mubr.msk.bf16.mxu0 %vm2749_vm1, %v12337_v40  ;;  %16601 = vmatprep.mubr.msk.bf16.mxu1 %vm2749_vm1, %v12337_v40 }
 0x94d   :  { %16705 = vmatprep.subr.bf16.mxu0 %v19093_v34 }
 0x94e   :  { %16706 = vmatpush3.bf16.msra.mxu0 %v19094_v24 }
 0x94f   :  { %16707 = vmatprep.subr.bf16.mxu0 %v19097_v53 }
 0x952   :  { %16708 = vmatpush3.bf16.msra.mxu0 %v19098_v32 }
 0x953   :  { %13052 = vmatmul.mubr.bf16.gmra.mrb[244].mxu0 %v24277_v14  ;;  %13734 = vmatmul.mubr.bf16.gmra.mrb[244].mxu1 %v24277_v14 }
 0x954   :  { %16709 = vmatprep.subr.bf16.mxu0 %v19101_v57 }
 0x956   :  { %16710 = vmatpush3.bf16.msra.mxu0 %v19102_v55 }
 0x957   :  { %16711 = vmatprep.subr.bf16.mxu0 %v19105_v29 }
 0x95a   :  { %16712 = vmatpush3.bf16.msra.mxu0 %v19106_v37 }
 0x95b   :  { %16713 = vmatprep.subr.bf16.mxu0 %v19109_v63 }
 0x95e   :  { %16714 = vmatpush3.bf16.msra.mxu0 %v19110_v10 }
 0x95f   :  { %16715 = vmatprep.subr.bf16.mxu0 %v19113_v50 }
 0x962   :  { %16716 = vmatpush3.bf16.msra.mxu0 %v19114_v0 }
 0x963   :  { %16717 = vmatprep.subr.bf16.mxu0 %v19117_v31 }
 0x966   :  { %16718 = vmatpush3.bf16.msra.mxu0 %v19118_v13 }
 0x967   :  { %16759 = vmatprep.subr.bf16.mxu0 %v19121_v62 }
 0x9be   :  { %v12923_v54 = vpop.f32.mrb[192].mxu0  ;;  %v13605_v3 = vpop.f32.mrb[192].mxu1 }
 0x9bf   :  { %v24402_v18 = vmax.f32 %v12923_v54, %v13605_v3  ;;  %v24404_v22 = vpop.f32.mrb[193].mxu0  ;;  %v24406_v7 = vpop.f32.mrb[193].mxu1 }
 0x9c0   :  { %v13745_v23 = vmax.f32 %v24404_v22, %v24406_v7  ;;  %v12927_v41 = vpop.f32.mrb[194].mxu0  ;;  %v13609_v45 = vpop.f32.mrb[194].mxu1 }
 0x9c1   :  { %14016 = vst [vmem:[%s24999_s11] sm:$0xff] %v24402_v18  ;;  %v24414_v38 = vmax.f32 %v12927_v41, %v13609_v45  ;;  %v24416_v33 = vpop.f32.mrb[195].mxu0  ;;  %v24418_v14 = vpop.f32.mrb[195].mxu1 }
 0x9c2   :  { %v13747_v56 = vmax.f32 %v24416_v33, %v24418_v14  ;;  %v19123_v33 = vld [vmem:[%s24998_s9 + $0x148] sm:$0xff]  }
 0x9c3   :  { %14029 = vst [vmem:[%s24999_s11 + $0x68] sm:$0xff] %v24414_v38  ;;  %v14068_v15 = vpack.c.bf16 %v24414_v38, %v24402_v18  ;;  %v19124_v14 = vld [vmem:[%s24998_s9 + $0x108] sm:$0xff]   ;;  %v19129_v18 = vld [vmem:[%s24998_s9 + $0x158] sm:$0xff]  }
 0x9c6   :  { %v12933_v17 = vpop.f32.mrb[196].mxu0  ;;  %v13615_v4 = vpop.f32.mrb[196].mxu1 }
 0x9c7   :  { %v24428_v59 = vmax.f32 %v12933_v17, %v13615_v4  ;;  %v24430_v9 = vpop.f32.mrb[197].mxu0  ;;  %v24432_v21 = vpop.f32.mrb[197].mxu1 }
 0x9c8   :  { %v13749_v6 = vmax.f32 %v24430_v9, %v24432_v21  ;;  %v12937_v60 = vpop.f32.mrb[198].mxu0  ;;  %v13619_v16 = vpop.f32.mrb[198].mxu1  ;;  %v19137_v21 = vld [vmem:[%s24998_s9 + $0x168] sm:$0xff]  }
 0x9c9   :  { %14042 = vst [vmem:[%s24999_s11 + $0xd0] sm:$0xff] %v24428_v59  ;;  %v24440_v28 = vmax.f32 %v12937_v60, %v13619_v16  ;;  %v24442_v20 = vpop.f32.mrb[199].mxu0  ;;  %v24444_v5 = vpop.f32.mrb[199].mxu1 }
 0x9ca   :  { %v13751_v42 = vmax.f32 %v24442_v20, %v24444_v5  ;;  %v19134_v5 = vld [vmem:[%s24998_s9 + $0x1d0] sm:$0xff]  }
 0x9cb   :  { %14055 = vst [vmem:[%s24999_s11 + $0x138] sm:$0xff] %v24440_v28  ;;  %v14081_v26 = vpack.c.bf16 %v24440_v28, %v24428_v59  ;;  %v19138_v59 = vld [vmem:[%s24998_s9 + $0x1d8] sm:$0xff]  }
 0x9ce   :  { %v12943_v27 = vpop.f32.mrb[200].mxu0  ;;  %v13625_v30 = vpop.f32.mrb[200].mxu1 }
 0x9cf   :  { %v13752_v39 = vmax.f32 %v12943_v27, %v13625_v30  ;;  %v12945_v11 = vpop.f32.mrb[201].mxu0  ;;  %v13627_v40 = vpop.f32.mrb[201].mxu1 }
 0x9d0   :  { %v13753_v36 = vmax.f32 %v12945_v11, %v13627_v40  ;;  %v12947_v43 = vpop.f32.mrb[202].mxu0  ;;  %v13629_v35 = vpop.f32.mrb[202].mxu1 }
 0x9d1   :  { %v13754_v12 = vmax.f32 %v12947_v43, %v13629_v35  ;;  %v13631_v34 = vpop.f32.mrb[203].mxu1  ;;  %13808 = vrot.lane.b32.xlu0 %v13752_v39, %s19215_s19  ;;  %v12949_v24 = vpop.f32.mrb[203].mxu0 }
 0x9d2   :  { %v13755_v47 = vmax.f32 %v12949_v24, %v13631_v34  ;;  %13810 = vrot.lane.b32.xlu1 %v13753_v36, %s19215_s19 }
 0x9d5   :  { %13812 = vrot.lane.b32.xlu0 %v13754_v12, %s19215_s19 }
 0x9d6   :  { %v13635_v49 = vpop.f32.mrb[204].mxu1  ;;  %13814 = vrot.lane.b32.xlu1 %v13755_v47, %s19215_s19  ;;  %v12953_v53 = vpop.f32.mrb[204].mxu0 }
 0x9d7   :  { %v13756_v32 = vmax.f32 %v12953_v53, %v13635_v49  ;;  %v12955_v44 = vpop.f32.mrb[205].mxu0  ;;  %v13637_v46 = vpop.f32.mrb[205].mxu1 }
 0x9d8   :  { %v13757_v57 = vmax.f32 %v12955_v44, %v13637_v46  ;;  %v12957_v55 = vpop.f32.mrb[206].mxu0  ;;  %v13639_v48 = vpop.f32.mrb[206].mxu1 }
 0x9d9   :  { %v13758_v25 = vmax.f32 %v12957_v55, %v13639_v48  ;;  %v12959_v29 = vpop.f32.mrb[207].mxu0  ;;  %v13641_v37 = vpop.f32.mrb[207].mxu1 }
 0x9da   :  { %v13759_v52 = vmax.f32 %v12959_v29, %v13641_v37 }
 0x9de   :  { %v12963_v63 = vpop.f32.mrb[208].mxu0  ;;  %v13645_v10 = vpop.f32.mrb[208].mxu1 }
 0x9df   :  { %v13760_v1 = vmax.f32 %v12963_v63, %v13645_v10  ;;  %v12965_v51 = vpop.f32.mrb[209].mxu0  ;;  %v13647_v50 = vpop.f32.mrb[209].mxu1 }
 0x9e0   :  { %v13761_v0 = vmax.f32 %v12965_v51, %v13647_v50  ;;  %v12967_v19 = vpop.f32.mrb[210].mxu0  ;;  %v13649_v2 = vpop.f32.mrb[210].mxu1 }
 0x9e1   :  { %v13762_v54 = vmax.f32 %v12967_v19, %v13649_v2  ;;  %v13651_v3 = vpop.f32.mrb[211].mxu1  ;;  %13848 = vrot.lane.b32.xlu0 %v13760_v1, %s19216_s20  ;;  %v12969_v41 = vpop.f32.mrb[211].mxu0 }
 0x9e2   :  { %v13763_v45 = vmax.f32 %v12969_v41, %v13651_v3 }
 0x9e3   :  { %13852 = vrot.lane.b32.xlu1 %v13762_v54, %s19216_s20 }
 0x9e5   :  { %13816 = vrot.lane.b32.xlu0 %v13756_v32, %s19215_s19 }
 0x9e6   :  { %v12973_v17 = vpop.f32.mrb[212].mxu0  ;;  %v13655_v4 = vpop.f32.mrb[212].mxu1 }
 0x9e7   :  { %v13764_v60 = vmax.f32 %v12973_v17, %v13655_v4  ;;  %v13657_v16 = vpop.f32.mrb[213].mxu1  ;;  %13820 = vrot.lane.b32.xlu1 %v13758_v25, %s19215_s19  ;;  %v12975_v31 = vpop.f32.mrb[213].mxu0 }
 0x9e8   :  { %v13765_v13 = vmax.f32 %v12975_v31, %v13657_v16  ;;  %v12977_v58 = vpop.f32.mrb[214].mxu0  ;;  %v13659_v8 = vpop.f32.mrb[214].mxu1 }
 0x9e9   :  { %v13766_v62 = vmax.f32 %v12977_v58, %v13659_v8  ;;  %v13661_v27 = vpop.f32.mrb[215].mxu1  ;;  %13818 = vrot.lane.b32.xlu0 %v13757_v57, %s19215_s19  ;;  %v12979_v30 = vpop.f32.mrb[215].mxu0 }
 0x9ea   :  { %v13767_v39 = vmax.f32 %v12979_v30, %v13661_v27 }
 0x9eb   :  { %13822 = vrot.lane.b32.xlu1 %v13759_v52, %s19215_s19 }
 0x9ed   :  { %13850 = vrot.lane.b32.xlu0 %v13761_v0, %s19216_s20 }
 0x9ee   :  { %v12983_v11 = vpop.f32.mrb[216].mxu0  ;;  %v13665_v40 = vpop.f32.mrb[216].mxu1 }
 0x9ef   :  { %v13768_v36 = vmax.f32 %v12983_v11, %v13665_v40  ;;  %v13667_v43 = vpop.f32.mrb[217].mxu1  ;;  %13854 = vrot.lane.b32.xlu1 %v13763_v45, %s19216_s20  ;;  %v12985_v35 = vpop.f32.mrb[217].mxu0 }
 0x9f0   :  { %v13769_v12 = vmax.f32 %v12985_v35, %v13667_v43  ;;  %v12987_v34 = vpop.f32.mrb[218].mxu0  ;;  %v13669_v24 = vpop.f32.mrb[218].mxu1 }
 0x9f1   :  { %v13770_v47 = vmax.f32 %v12987_v34, %v13669_v24  ;;  %v13671_v49 = vpop.f32.mrb[219].mxu1  ;;  %13856 = vrot.lane.b32.xlu0 %v13764_v60, %s19216_s20  ;;  %v12989_v53 = vpop.f32.mrb[219].mxu0 }
 0x9f2   :  { %v13771_v32 = vmax.f32 %v12989_v53, %v13671_v49 }
 0x9f3   :  { %13860 = vrot.lane.b32.xlu1 %v13766_v62, %s19216_s20 }
 0x9f5   :  { %13858 = vrot.lane.b32.xlu0 %v13765_v13, %s19216_s20 }
 0x9f6   :  { %v12993_v44 = vpop.f32.mrb[220].mxu0  ;;  %v13675_v46 = vpop.f32.mrb[220].mxu1 }
 0x9f7   :  { %v13772_v57 = vmax.f32 %v12993_v44, %v13675_v46  ;;  %v13677_v55 = vpop.f32.mrb[221].mxu1  ;;  %13862 = vrot.lane.b32.xlu1 %v13767_v39, %s19216_s20  ;;  %v12995_v48 = vpop.f32.mrb[221].mxu0 }
 0x9f8   :  { %v13773_v25 = vmax.f32 %v12995_v48, %v13677_v55  ;;  %v12997_v29 = vpop.f32.mrb[222].mxu0  ;;  %v13679_v37 = vpop.f32.mrb[222].mxu1 }
 0x9f9   :  { %v13774_v61 = vmax.f32 %v12997_v29, %v13679_v37  ;;  %v13681_v52 = vpop.f32.mrb[223].mxu1  ;;  %13888 = vrot.lane.b32.xlu0 %v13768_v36, %s19217_s21  ;;  %v12999_v63 = vpop.f32.mrb[223].mxu0 }
 0x9fa   :  { %v13775_v10 = vmax.f32 %v12999_v63, %v13681_v52 }
 0x9fb   :  { %13892 = vrot.lane.b32.xlu1 %v13770_v47, %s19217_s21 }
 0x9fd   :  { %13890 = vrot.lane.b32.xlu0 %v13769_v12, %s19217_s21 }
 0x9fe   :  { %v13003_v1 = vpop.f32.mrb[224].mxu0  ;;  %v13685_v51 = vpop.f32.mrb[224].mxu1 }
 0x9ff   :  { %v24488_v50 = vmax.f32 %v13003_v1, %v13685_v51  ;;  %v24490_v0 = vpop.f32.mrb[225].mxu1  ;;  %13894 = vrot.lane.b32.xlu1 %v13771_v32, %s19217_s21  ;;  %v24492_v19 = vpop.f32.mrb[225].mxu0 }
 0xa00   :  { %v13777_v2 = vmax.f32 %v24492_v19, %v24490_v0  ;;  %v13007_v54 = vpop.f32.mrb[226].mxu0  ;;  %v13689_v3 = vpop.f32.mrb[226].mxu1  ;;  %v19176_v0 = vld [vmem:[%s24998_s9 + $0x2e0] sm:$0xff]  }
 0xa01   :  { %14023 = vst [vmem:[%s24999_s11 + $0x38] sm:$0xff] %v24488_v50  ;;  %v24500_v41 = vmax.f32 %v13007_v54, %v13689_v3  ;;  %v24502_v45 = vpop.f32.mrb[227].mxu1  ;;  %13896 = vrot.lane.b32.xlu0 %v13772_v57, %s19217_s21  ;;  %v24504_v17 = vpop.f32.mrb[227].mxu0 }
 0xa02   :  { %v13779_v4 = vmax.f32 %v24504_v17, %v24502_v45  ;;  %v19178_v45 = vld [vmem:[%s24998_s9 + $0x2a0] sm:$0xff]  }
 0xa03   :  { %14036 = vst [vmem:[%s24999_s11 + $0xa0] sm:$0xff] %v24500_v41  ;;  %v14075_v60 = vpack.c.bf16 %v24500_v41, %v24488_v50  ;;  %13900 = vrot.lane.b32.xlu1 %v13774_v61, %s19217_s21 }
 0xa05   :  { %13898 = vrot.lane.b32.xlu0 %v13773_v25, %s19217_s21 }
 0xa06   :  { %v13013_v16 = vpop.f32.mrb[228].mxu0  ;;  %v13695_v31 = vpop.f32.mrb[228].mxu1 }
 0xa07   :  { %v24514_v13 = vmax.f32 %v13013_v16, %v13695_v31  ;;  %v24516_v58 = vpop.f32.mrb[229].mxu1  ;;  %13902 = vrot.lane.b32.xlu1 %v13775_v10, %s19217_s21  ;;  %v24518_v8 = vpop.f32.mrb[229].mxu0 }
 0xa08   :  { %v13781_v62 = vmax.f32 %v24518_v8, %v24516_v58  ;;  %v13017_v27 = vpop.f32.mrb[230].mxu0  ;;  %v13699_v30 = vpop.f32.mrb[230].mxu1  ;;  %v19180_v58 = vld [vmem:[%s24998_s9 + $0x2a8] sm:$0xff]   ;;  %v19181_v8 = vld [vmem:[%s24998_s9 + $0x2f0] sm:$0xff]  }
 0xa09   :  { %14049 = vst [vmem:[%s24999_s11 + $0x108] sm:$0xff] %v24514_v13  ;;  %v24526_v39 = vmax.f32 %v13017_v27, %v13699_v30  ;;  %v24528_v11 = vpop.f32.mrb[231].mxu0  ;;  %v24530_v40 = vpop.f32.mrb[231].mxu1 }
 0xa0a   :  { %v13783_v36 = vmax.f32 %v24528_v11, %v24530_v40  ;;  %v19182_v11 = vld [vmem:[%s24998_s9 + $0x2b0] sm:$0xff]  }
 0xa0b   :  { %14062 = vst [vmem:[%s24999_s11 + $0x170] sm:$0xff] %v24526_v39  ;;  %v14088_v43 = vpack.c.bf16 %v24526_v39, %v24514_v13  ;;  %v19168_v13 = vld [vmem:[%s24998_s9 + $0x2d0] sm:$0xff]   ;;  %v19165_v39 = vld [vmem:[%s24998_s9 + $0x220] sm:$0xff]  }
 0xa0e   :  { %v13023_v35 = vpop.f32.mrb[232].mxu0  ;;  %v13705_v12 = vpop.f32.mrb[232].mxu1 }
 0xa0f   :  { %v13784_v34 = vmax.f32 %v13023_v35, %v13705_v12  ;;  %v13025_v24 = vpop.f32.mrb[233].mxu0  ;;  %v13707_v47 = vpop.f32.mrb[233].mxu1 }
 0xa10   :  { %v13785_v49 = vmax.f32 %v13025_v24, %v13707_v47  ;;  %v13027_v53 = vpop.f32.mrb[234].mxu0  ;;  %v13709_v32 = vpop.f32.mrb[234].mxu1 }
 0xa11   :  { %v13786_v44 = vmax.f32 %v13027_v53, %v13709_v32  ;;  %v13711_v46 = vpop.f32.mrb[235].mxu1  ;;  %13924 = vrot.lane.b32.xlu0 %v13784_v34, %s19215_s19  ;;  %v13029_v57 = vpop.f32.mrb[235].mxu0 }
 0xa12   :  { %v13787_v55 = vmax.f32 %v13029_v57, %v13711_v46  ;;  %13926 = vrot.lane.b32.xlu1 %v13785_v49, %s19215_s19 }
 0xa15   :  { %13928 = vrot.lane.b32.xlu0 %v13786_v44, %s19215_s19 }
 0xa16   :  { %v13715_v48 = vpop.f32.mrb[236].mxu1  ;;  %13930 = vrot.lane.b32.xlu1 %v13787_v55, %s19215_s19  ;;  %v13033_v25 = vpop.f32.mrb[236].mxu0 }
 0xa17   :  { %v13788_v29 = vmax.f32 %v13033_v25, %v13715_v48  ;;  %v13035_v37 = vpop.f32.mrb[237].mxu0  ;;  %v13717_v61 = vpop.f32.mrb[237].mxu1 }
 0xa18   :  { %v13789_v52 = vmax.f32 %v13035_v37, %v13717_v61  ;;  %v13037_v63 = vpop.f32.mrb[238].mxu0  ;;  %v13719_v10 = vpop.f32.mrb[238].mxu1 }
 0xa19   :  { %v13790_v1 = vmax.f32 %v13037_v63, %v13719_v10  ;;  %v13721_v51 = vpop.f32.mrb[239].mxu1  ;;  %13932 = vrot.lane.b32.xlu0 %v13788_v29, %s19215_s19  ;;  %v13039_v54 = vpop.f32.mrb[239].mxu0 }
 0xa1a   :  { %v13791_v3 = vmax.f32 %v13039_v54, %v13721_v51  ;;  %13934 = vrot.lane.b32.xlu1 %v13789_v52, %s19215_s19 }
 0xa1d   :  { %13936 = vrot.lane.b32.xlu0 %v13790_v1, %s19215_s19 }
 0xa1e   :  { %v13725_v16 = vpop.f32.mrb[240].mxu1  ;;  %13938 = vrot.lane.b32.xlu1 %v13791_v3, %s19215_s19  ;;  %v13043_v31 = vpop.f32.mrb[240].mxu0 }
 0xa1f   :  { %v13792_v27 = vmax.f32 %v13043_v31, %v13725_v16  ;;  %v13045_v30 = vpop.f32.mrb[241].mxu0  ;;  %v13727_v35 = vpop.f32.mrb[241].mxu1 }
 0xa20   :  { %v13793_v12 = vmax.f32 %v13045_v30, %v13727_v35  ;;  %v13047_v34 = vpop.f32.mrb[242].mxu0  ;;  %v13729_v24 = vpop.f32.mrb[242].mxu1  ;;  %v19127_v30 = vld [vmem:[%s24998_s9 + $0x110] sm:$0xff]  }
 0xa21   :  { %v13794_v47 = vmax.f32 %v13047_v34, %v13729_v24  ;;  %v13731_v49 = vpop.f32.mrb[243].mxu1  ;;  %13964 = vrot.lane.b32.xlu0 %v13792_v27, %s19216_s20  ;;  %v13049_v53 = vpop.f32.mrb[243].mxu0  ;;  %v19122_v27 = vld [vmem:[%s24998_s9 + $0x100] sm:$0xff]  }
 0xa22   :  { %v13795_v32 = vmax.f32 %v13049_v53, %v13731_v49  ;;  %13966 = vrot.lane.b32.xlu1 %v13793_v12, %s19216_s20  ;;  %v19131_v12 = vld [vmem:[%s24998_s9 + $0x118] sm:$0xff]   ;;  %v19133_v24 = vld [vmem:[%s24998_s9 + $0x160] sm:$0xff]  }
 0xa23   :  { %v19128_v53 = vld [vmem:[%s24998_s9 + $0x180] sm:$0xff]  }
 0xa25   :  { %13968 = vrot.lane.b32.xlu0 %v13794_v47, %s19216_s20 }
 0xa26   :  { %v13735_v44 = vpop.f32.mrb[244].mxu1  ;;  %13970 = vrot.lane.b32.xlu1 %v13795_v32, %s19216_s20  ;;  %v13053_v46 = vpop.f32.mrb[244].mxu0 }
 0xa27   :  { %v13796_v57 = vmax.f32 %v13053_v46, %v13735_v44  ;;  %v13055_v55 = vpop.f32.mrb[245].mxu0  ;;  %v13737_v48 = vpop.f32.mrb[245].mxu1  ;;  %v19130_v46 = vld [vmem:[%s24998_s9 + $0x1c8] sm:$0xff]  }
 0xa28   :  { %v13797_v25 = vmax.f32 %v13055_v55, %v13737_v48  ;;  %v13057_v29 = vpop.f32.mrb[246].mxu0  ;;  %v13739_v37 = vpop.f32.mrb[246].mxu1  ;;  %v19135_v55 = vld [vmem:[%s24998_s9 + $0x120] sm:$0xff]  }
 0xa29   :  { %v13798_v61 = vmax.f32 %v13057_v29, %v13739_v37  ;;  %v13741_v52 = vpop.f32.mrb[247].mxu1  ;;  %13972 = vrot.lane.b32.xlu0 %v13796_v57, %s19216_s20  ;;  %v13059_v63 = vpop.f32.mrb[247].mxu0  ;;  %v19139_v29 = vld [vmem:[%s24998_s9 + $0x128] sm:$0xff]  }
 0xa2a   :  { %v13799_v10 = vmax.f32 %v13059_v63, %v13741_v52  ;;  %13974 = vrot.lane.b32.xlu1 %v13797_v25, %s19216_s20  ;;  %v19132_v25 = vld [vmem:[%s24998_s9 + $0x188] sm:$0xff]   ;;  %v19136_v63 = vld [vmem:[%s24998_s9 + $0x190] sm:$0xff]  }
 0xa2d   :  { %13976 = vrot.lane.b32.xlu0 %v13798_v61, %s19216_s20  ;;  %v19141_v61 = vld [vmem:[%s24998_s9 + $0x170] sm:$0xff]  }
 0xa2e   :  { %13978 = vrot.lane.b32.xlu1 %v13799_v10, %s19216_s20 }
 0xa43   :  { %v13809_v1 = vpop.permute.xlu0 %13808 }
 0xa44   :  { %v13996_v51 = vsel %vm5404_vm2, %v13745_v23, %v13809_v1  ;;  %v13811_v54 = vpop.permute.xlu1 %13810 }
 0xa45   :  { %14017 = vst [vmem:[%s24999_s11 + $0x8] sm:$0xff] %v13996_v51  ;;  %v13824_v3 = vsel %vm5404_vm2, %v13809_v1, %v13811_v54 }
 0xa46   :  { %14018 = vst [vmem:[%s24999_s11 + $0x10] sm:$0xff] %v13824_v3 }
 0xa47   :  { %v13813_v16 = vpop.permute.xlu0 %13812 }
 0xa48   :  { %v13997_v31 = vsel %vm5404_vm2, %v13747_v56, %v13813_v16  ;;  %v13815_v22 = vpop.permute.xlu1 %13814  ;;  %v19125_v56 = vld [vmem:[%s24998_s9 + $0x150] sm:$0xff]  }
 0xa49   :  { %14030 = vst [vmem:[%s24999_s11 + $0x70] sm:$0xff] %v13997_v31  ;;  %v14069_v7 = vpack.c.bf16 %v13997_v31, %v13996_v51  ;;  %v13825_v23 = vsel %vm5404_vm2, %v13813_v16, %v13815_v22  ;;  %v19145_v51 = vld [vmem:[%s24998_s9 + $0x178] sm:$0xff]   ;;  %v19142_v31 = vld [vmem:[%s24998_s9 + $0x1e0] sm:$0xff]  }
 0xa4a   :  { %14031 = vst [vmem:[%s24999_s11 + $0x78] sm:$0xff] %v13825_v23  ;;  %v14070_v32 = vpack.c.bf16 %v13825_v23, %v13824_v3  ;;  %v19140_v3 = vld [vmem:[%s24998_s9 + $0x198] sm:$0xff]  }
 0xa4b   :  { %14923 = vmatprep.mubr.bf16.mxu0 %v14069_v7  ;;  %v19147_v7 = vld [vmem:[%s24998_s9 + $0x138] sm:$0xff]  }
 0xa4c   :  { %14924 = vmatmul.mubr.bf16.vlgmr.msra.gmra.mrb[248].mxu0 %v14068_v15 }
 0xa4d   :  { %16760 = vmatpush3.bf16.msra.mxu0 %v19122_v27  ;;  %v19150_v27 = vld [vmem:[%s24998_s9 + $0x240] sm:$0xff]  }
 0xa4e   :  { %16761 = vmatprep.subr.bf16.mxu0 %v19123_v33 }
 0xa51   :  { %16762 = vmatpush3.bf16.msra.mxu0 %v19124_v14 }
 0xa52   :  { %16763 = vmatprep.subr.bf16.mxu0 %v19125_v56  ;;  %v19144_v56 = vld [vmem:[%s24998_s9 + $0x1a0] sm:$0xff]  }
 0xa53   :  { %v13849_v38 = vpop.permute.xlu0 %13848 }
 0xa54   :  { %v14000_v15 = vsel %vm2749_vm1, %v13811_v54, %v13849_v38 }
 0xa55   :  { %14019 = vst [vmem:[%s24999_s11 + $0x18] sm:$0xff] %v14000_v15  ;;  %v13853_v35 = vpop.permute.xlu1 %13852  ;;  %16764 = vmatpush3.bf16.msra.mxu0 %v19127_v30 }
 0xa56   :  { %v14001_v34 = vsel %vm2749_vm1, %v13815_v22, %v13853_v35  ;;  %16765 = vmatprep.subr.bf16.mxu0 %v19129_v18 }
 0xa57   :  { %14032 = vst [vmem:[%s24999_s11 + $0x80] sm:$0xff] %v14001_v34  ;;  %v14071_v47 = vpack.c.bf16 %v14001_v34, %v14000_v15  ;;  %v13817_v49 = vpop.permute.xlu0 %13816  ;;  %v19148_v34 = vld [vmem:[%s24998_s9 + $0x1a8] sm:$0xff]  }
 0xa58   :  { %v13998_v44 = vsel %vm5404_vm2, %v13749_v6, %v13817_v49 }
 0xa59   :  { %14043 = vst [vmem:[%s24999_s11 + $0xd8] sm:$0xff] %v13998_v44  ;;  %14972 = vmatprep.mubr.bf16.mxu1 %v14071_v47  ;;  %v13821_v57 = vpop.permute.xlu1 %13820  ;;  %16766 = vmatpush3.bf16.msra.mxu0 %v19131_v12  ;;  %v19149_v47 = vld [vmem:[%s24998_s9 + $0x1f0] sm:$0xff]  }
 0xa5a   :  { %v13999_v9 = vsel %vm5404_vm2, %v13751_v42, %v13821_v57  ;;  %14973 = vmatmul.mubr.bf16.vlgmr.msra.gmra.mrb[248].mxu1 %v14070_v32  ;;  %16767 = vmatprep.subr.bf16.mxu0 %v19133_v24  ;;  %v19152_v32 = vld [vmem:[%s24998_s9 + $0x200] sm:$0xff]  }
 0xa5b   :  { %14056 = vst [vmem:[%s24999_s11 + $0x140] sm:$0xff] %v13999_v9  ;;  %v14082_v6 = vpack.c.bf16 %v13999_v9, %v13998_v44  ;;  %16788 = vmatpush3.bf16.msra.mxu1 %v19128_v53  ;;  %v13819_v48 = vpop.permute.xlu0 %13818 }
 0xa5c   :  { %v13826_v20 = vsel %vm5404_vm2, %v13817_v49, %v13819_v48  ;;  %16789 = vmatprep.subr.bf16.mxu1 %v19130_v46 }
 0xa5d   :  { %14044 = vst [vmem:[%s24999_s11 + $0xe0] sm:$0xff] %v13826_v20  ;;  %14931 = vmatprep.mubr.bf16.mxu0 %v14082_v6  ;;  %v13823_v42 = vpop.permute.xlu1 %13822  ;;  %16768 = vmatpush3.bf16.msra.mxu0 %v19135_v55  ;;  %v19154_v55 = vld [vmem:[%s24998_s9 + $0x248] sm:$0xff]  }
 0xa5e   :  { %v13827_v37 = vsel %vm5404_vm2, %v13821_v57, %v13823_v42  ;;  %14932 = vmatmul.mubr.bf16.gmra.mrb[252].mxu0 %v14081_v26  ;;  %16769 = vmatprep.subr.bf16.mxu0 %v19137_v21  ;;  %v19143_v26 = vld [vmem:[%s24998_s9 + $0x130] sm:$0xff]   ;;  %v19153_v57 = vld [vmem:[%s24998_s9 + $0x1f8] sm:$0xff]  }
 0xa5f   :  { %14057 = vst [vmem:[%s24999_s11 + $0x148] sm:$0xff] %v13827_v37  ;;  %16790 = vmatpush3.bf16.msra.mxu1 %v19132_v25  ;;  %v13851_v52 = vpop.permute.xlu0 %13850  ;;  %v14083_v30 = vpack.c.bf16 %v13827_v37, %v13826_v20  ;;  %v19156_v25 = vld [vmem:[%s24998_s9 + $0x208] sm:$0xff]  }
 0xa60   :  { %v24666_v10 = vsel %vm2749_vm1, %v13849_v38, %v13851_v52  ;;  %16791 = vmatprep.subr.bf16.mxu1 %v19134_v5  ;;  %v19146_v38 = vld [vmem:[%s24998_s9 + $0x1e8] sm:$0xff]   ;;  %v19157_v5 = vld [vmem:[%s24998_s9 + $0x250] sm:$0xff]  }
 0xa61   :  { %14020 = vst [vmem:[%s24999_s11 + $0x20] sm:$0xff] %v24666_v10  ;;  %v13855_v28 = vpop.permute.xlu1 %13854  ;;  %16770 = vmatpush3.bf16.msra.mxu0 %v19139_v29 }
 0xa62   :  { %v13865_v1 = vsel %vm2749_vm1, %v13853_v35, %v13855_v28  ;;  %16771 = vmatprep.subr.bf16.mxu0 %v19141_v61 }
 0xa63   :  { %14033 = vst [vmem:[%s24999_s11 + $0x88] sm:$0xff] %v13865_v1  ;;  %16792 = vmatpush3.bf16.msra.mxu1 %v19136_v63  ;;  %v13857_v54 = vpop.permute.xlu0 %13856  ;;  %v14072_v44 = vpack.c.bf16 %v13865_v1, %v24666_v10  ;;  %v19158_v63 = vld [vmem:[%s24998_s9 + $0x210] sm:$0xff]   ;;  %v19162_v1 = vld [vmem:[%s24998_s9 + $0x280] sm:$0xff]  }
 0xa64   :  { %v14002_v16 = vsel %vm2749_vm1, %v13819_v48, %v13857_v54  ;;  %16793 = vmatprep.subr.bf16.mxu1 %v19138_v59  ;;  %v19155_v48 = vld [vmem:[%s24998_s9 + $0x1b8] sm:$0xff]  }
 0xa65   :  { %14045 = vst [vmem:[%s24999_s11 + $0xe8] sm:$0xff] %v14002_v16  ;;  %v13861_v22 = vpop.permute.xlu1 %13860  ;;  %16772 = vmatpush3.bf16.msra.mxu0 %v19143_v26  ;;  %v19159_v26 = vld [vmem:[%s24998_s9 + $0x258] sm:$0xff]  }
 0xa66   :  { %v14003_v23 = vsel %vm2749_vm1, %v13823_v42, %v13861_v22  ;;  %16773 = vmatprep.subr.bf16.mxu0 %v19145_v51  ;;  %v19160_v42 = vld [vmem:[%s24998_s9 + $0x2c0] sm:$0xff]  }
 0xa67   :  { %14058 = vst [vmem:[%s24999_s11 + $0x150] sm:$0xff] %v14003_v23  ;;  %v14084_v33 = vpack.c.bf16 %v14003_v23, %v14002_v16  ;;  %16794 = vmatpush3.bf16.msra.mxu1 %v19140_v3  ;;  %v13859_v14 = vpop.permute.xlu0 %13858  ;;  %v19161_v16 = vld [vmem:[%s24998_s9 + $0x218] sm:$0xff]   ;;  %v19170_v23 = vld [vmem:[%s24998_s9 + $0x290] sm:$0xff]  }
 0xa68   :  { %v24709_v18 = vsel %vm2749_vm1, %v13857_v54, %v13859_v14  ;;  %16795 = vmatprep.subr.bf16.mxu1 %v19142_v31  ;;  %v19164_v54 = vld [vmem:[%s24998_s9 + $0x2c8] sm:$0xff]   ;;  %v19163_v31 = vld [vmem:[%s24998_s9 + $0x260] sm:$0xff]  }
 0xa69   :  { %14046 = vst [vmem:[%s24999_s11 + $0xf0] sm:$0xff] %v24709_v18  ;;  %14980 = vmatprep.mubr.bf16.mxu1 %v14084_v33  ;;  %v13863_v15 = vpop.permute.xlu1 %13862  ;;  %16774 = vmatpush3.bf16.msra.mxu0 %v19147_v7  ;;  %v19167_v7 = vld [vmem:[%s24998_s9 + $0x268] sm:$0xff]  }
 0xa6a   :  { %v24719_v35 = vsel %vm2749_vm1, %v13861_v22, %v13863_v15  ;;  %14981 = vmatmul.mubr.bf16.gmra.mrb[252].mxu1 %v14083_v30  ;;  %16815 = vmatprep.subr.bf16.mxu0 %v19150_v27  ;;  %v19166_v22 = vld [vmem:[%s24998_s9 + $0x288] sm:$0xff]   ;;  %v19172_v27 = vld [vmem:[%s24998_s9 + $0x2d8] sm:$0xff]  }
 0xa6b   :  { %14059 = vst [vmem:[%s24999_s11 + $0x158] sm:$0xff] %v24719_v35  ;;  %16796 = vmatpush3.bf16.msra.mxu1 %v19144_v56  ;;  %v13889_v12 = vpop.permute.xlu0 %13888  ;;  %15070 = vmatprep.mubr.bf16.mxu1 %v14075_v60  ;;  %v19151_v60 = vld [vmem:[%s24998_s9 + $0x1b0] sm:$0xff]   ;;  %v14085_v10 = vpack.c.bf16 %v24719_v35, %v24709_v18 }
 0xa6c   :  { %v14004_v24 = vsel %vm919_vm0, %v13851_v52, %v13889_v12  ;;  %16797 = vmatprep.subr.bf16.mxu1 %v19146_v38  ;;  %v19171_v18 = vld [vmem:[%s24998_s9 + $0x270] sm:$0xff]   ;;  %v19174_v38 = vld [vmem:[%s24998_s9 + $0x298] sm:$0xff]  }
 0xa6d   :  { %14021 = vst [vmem:[%s24999_s11 + $0x28] sm:$0xff] %v14004_v24  ;;  %v13893_v49 = vpop.permute.xlu1 %13892 }
 0xa6e   :  { %v14005_v53 = vsel %vm919_vm0, %v13855_v28, %v13893_v49 }
 0xa6f   :  { %14034 = vst [vmem:[%s24999_s11 + $0x90] sm:$0xff] %v14005_v53  ;;  %v14073_v50 = vpack.c.bf16 %v14005_v53, %v14004_v24  ;;  %16798 = vmatpush3.bf16.msra.mxu1 %v19148_v34  ;;  %v13891_v41 = vpop.permute.xlu0 %13890  ;;  %v19175_v34 = vld [vmem:[%s24998_s9 + $0x278] sm:$0xff]  }
 0xa70   :  { %v13904_v46 = vsel %vm919_vm0, %v13889_v12, %v13891_v41  ;;  %16799 = vmatprep.subr.bf16.mxu1 %v19149_v47  ;;  %v19177_v53 = vld [vmem:[%s24998_s9 + $0x238] sm:$0xff]  }
 0xa71   :  { %14022 = vst [vmem:[%s24999_s11 + $0x30] sm:$0xff] %v13904_v46  ;;  %15021 = vmatprep.mubr.bf16.mxu0 %v14073_v50  ;;  %v13895_v9 = vpop.permute.xlu1 %13894 }
 0xa72   :  { %v13905_v21 = vsel %vm919_vm0, %v13893_v49, %v13895_v9  ;;  %15022 = vmatmul.mubr.bf16.vlgmr.msra.gmra.mrb[0].mxu0 %v14072_v44 }
 0xa73   :  { %14035 = vst [vmem:[%s24999_s11 + $0x98] sm:$0xff] %v13905_v21  ;;  %16800 = vmatpush3.bf16.msra.mxu1 %v19151_v60  ;;  %16816 = vmatpush3.bf16.msra.mxu0 %v19152_v32  ;;  %v13897_v6 = vpop.permute.xlu0 %13896  ;;  %v14074_v59 = vpack.c.bf16 %v13905_v21, %v13904_v46  ;;  %v19183_v60 = vld [vmem:[%s24998_s9 + $0x300] sm:$0xff]  }
 0xa74   :  { %v14006_v20 = vsel %vm919_vm0, %v13859_v14, %v13897_v6  ;;  %16801 = vmatprep.subr.bf16.mxu1 %v19153_v57  ;;  %16817 = vmatprep.subr.bf16.mxu0 %v19154_v55  ;;  %v19169_v14 = vld [vmem:[%s24998_s9 + $0x228] sm:$0xff]  }
 0xa75   :  { %14047 = vst [vmem:[%s24999_s11 + $0xf8] sm:$0xff] %v14006_v20  ;;  %v13901_v29 = vpop.permute.xlu1 %13900  ;;  %v19186_v57 = vld [vmem:[%s24998_s9 + $0x308] sm:$0xff]  }
 0xa76   :  { %v14007_v37 = vsel %vm919_vm0, %v13863_v15, %v13901_v29 }
 0xa77   :  { %14060 = vst [vmem:[%s24999_s11 + $0x160] sm:$0xff] %v14007_v37  ;;  %v14086_v61 = vpack.c.bf16 %v14007_v37, %v14006_v20  ;;  %16802 = vmatpush3.bf16.msra.mxu1 %v19155_v48  ;;  %16818 = vmatpush3.bf16.msra.mxu0 %v19156_v25  ;;  %v13899_v52 = vpop.permute.xlu0 %13898  ;;  %v19185_v20 = vld [vmem:[%s24998_s9 + $0x2b8] sm:$0xff]  }
 0xa78   :  { %v13906_v28 = vsel %vm919_vm0, %v13897_v6, %v13899_v52  ;;  %16819 = vmatprep.subr.bf16.mxu0 %v19157_v5  ;;  %16843 = vmatprep.subr.bf16.mxu1 %v19160_v42 }
 0xa79   :  { %14048 = vst [vmem:[%s24999_s11 + $0x100] sm:$0xff] %v13906_v28  ;;  %15029 = vmatprep.mubr.bf16.mxu0 %v14086_v61  ;;  %v13903_v51 = vpop.permute.xlu1 %13902 }
 0xa7a   :  { %v13907_v3 = vsel %vm919_vm0, %v13901_v29, %v13903_v51  ;;  %15071 = vmatmul.mubr.bf16.vlgmr.msra.gmra.mrb[0].mxu1 %v14074_v59  ;;  %15030 = vmatmul.mubr.bf16.gmra.mrb[4].mxu0 %v14085_v10 }
 0xa7b   :  { %14061 = vst [vmem:[%s24999_s11 + $0x168] sm:$0xff] %v13907_v3  ;;  %15078 = vmatprep.mubr.bf16.mxu1 %v14088_v43  ;;  %16820 = vmatpush3.bf16.msra.mxu0 %v19158_v63  ;;  %v14087_v43 = vpack.c.bf16 %v13907_v3, %v13906_v28 }
 0xa7c   :  { %16821 = vmatprep.subr.bf16.mxu0 %v19159_v26  ;;  %16844 = vmatpush3.bf16.msra.mxu1 %v19162_v1 }
 0xa7d   :  { %16845 = vmatprep.subr.bf16.mxu1 %v19164_v54 }
 0xa7f   :  { %16822 = vmatpush3.bf16.msra.mxu0 %v19161_v16 }
 0xa80   :  { %16823 = vmatprep.subr.bf16.mxu0 %v19163_v31  ;;  %16846 = vmatpush3.bf16.msra.mxu1 %v19166_v22 }
 0xa81   :  { %16847 = vmatprep.subr.bf16.mxu1 %v19168_v13 }
 0xa82   :  { %15079 = vmatmul.mubr.bf16.gmra.mrb[4].mxu1 %v14087_v43 }
 0xa83   :  { %16824 = vmatpush3.bf16.msra.mxu0 %v19165_v39  ;;  %v13925_v33 = vpop.permute.xlu0 %13924 }
 0xa84   :  { %v14008_v56 = vsel %vm5404_vm2, %v13777_v2, %v13925_v33  ;;  %v13927_v30 = vpop.permute.xlu1 %13926  ;;  %16825 = vmatprep.subr.bf16.mxu0 %v19167_v7  ;;  %16848 = vmatpush3.bf16.msra.mxu1 %v19170_v23  ;;  %v19173_v2 = vld [vmem:[%s24998_s9 + $0x230] sm:$0xff]  }
 0xa85   :  { %14024 = vst [vmem:[%s24999_s11 + $0x40] sm:$0xff] %v14008_v56  ;;  %v13940_v15 = vsel %vm5404_vm2, %v13925_v33, %v13927_v30  ;;  %16849 = vmatprep.subr.bf16.mxu1 %v19172_v27  ;;  %v16602_v33 = vld [vmem:[%s25000_s10] ss:$0 sm:$0xff] }
 0xa86   :  { %14025 = vst [vmem:[%s24999_s11 + $0x48] sm:$0xff] %v13940_v15 }
 0xa87   :  { %16826 = vmatpush3.bf16.msra.mxu0 %v19169_v14  ;;  %v13929_v19 = vpop.permute.xlu0 %13928 }
 0xa88   :  { %v14009_v35 = vsel %vm5404_vm2, %v13779_v4, %v13929_v19  ;;  %v13931_v12 = vpop.permute.xlu1 %13930  ;;  %16827 = vmatprep.subr.bf16.mxu0 %v19171_v18  ;;  %16850 = vmatpush3.bf16.msra.mxu1 %v19174_v38  ;;  %v19179_v4 = vld [vmem:[%s24998_s9 + $0x2e8] sm:$0xff]  }
 0xa89   :  { %14037 = vst [vmem:[%s24999_s11 + $0xa8] sm:$0xff] %v14009_v35  ;;  %v14076_v24 = vpack.c.bf16 %v14009_v35, %v14008_v56  ;;  %v13941_v47 = vsel %vm5404_vm2, %v13929_v19, %v13931_v12  ;;  %16851 = vmatprep.subr.bf16.mxu1 %v19176_v0 }
 0xa8a   :  { %14038 = vst [vmem:[%s24999_s11 + $0xb0] sm:$0xff] %v13941_v47  ;;  %v14077_v17 = vpack.c.bf16 %v13941_v47, %v13940_v15 }
 0xa8b   :  { %16828 = vmatpush3.bf16.msra.mxu0 %v19173_v2  ;;  %v13933_v49 = vpop.permute.xlu0 %13932 }
 0xa8c   :  { %v14010_v50 = vsel %vm5404_vm2, %v13781_v62, %v13933_v49  ;;  %15119 = vmatprep.mubr.bf16.mxu0 %v14077_v17  ;;  %v13935_v41 = vpop.permute.xlu1 %13934  ;;  %16829 = vmatprep.subr.bf16.mxu0 %v19175_v34 }
 0xa8d   :  { %14050 = vst [vmem:[%s24999_s11 + $0x110] sm:$0xff] %v14010_v50  ;;  %v13942_v32 = vsel %vm5404_vm2, %v13933_v49, %v13935_v41  ;;  %16852 = vmatpush3.bf16.msra.mxu1 %v19178_v45 }
 0xa8e   :  { %14051 = vst [vmem:[%s24999_s11 + $0x118] sm:$0xff] %v13942_v32  ;;  %16853 = vmatprep.subr.bf16.mxu1 %v19179_v4 }
 0xa8f   :  { %16830 = vmatpush3.bf16.msra.mxu0 %v19177_v53  ;;  %v13937_v62 = vpop.permute.xlu0 %13936 }
 0xa90   :  { %v14011_v44 = vsel %vm5404_vm2, %v13783_v36, %v13937_v62  ;;  %v13939_v46 = vpop.permute.xlu1 %13938  ;;  %16875 = vmatprep.subr.bf16.mxu0 %v19183_v60  ;;  %v19184_v36 = vld [vmem:[%s24998_s9 + $0x2f8] sm:$0xff]  }
 0xa91   :  { %14063 = vst [vmem:[%s24999_s11 + $0x178] sm:$0xff] %v14011_v44  ;;  %v14089_v55 = vpack.c.bf16 %v14011_v44, %v14010_v50  ;;  %v13943_v9 = vsel %vm5404_vm2, %v13937_v62, %v13939_v46  ;;  %16854 = vmatpush3.bf16.msra.mxu1 %v19180_v58 }
 0xa92   :  { %14064 = vst [vmem:[%s24999_s11 + $0x180] sm:$0xff] %v13943_v9  ;;  %v14090_v40 = vpack.c.bf16 %v13943_v9, %v13942_v32  ;;  %15120 = vmatmul.mubr.bf16.vlgmr.msra.gmra.mrb[8].mxu0 %v14076_v24  ;;  %16855 = vmatprep.subr.bf16.mxu1 %v19181_v8 }
 0xa93   :  { %v13965_v21 = vpop.permute.xlu0 %13964  ;;  %16876 = vmatpush3.bf16.msra.mxu0 %v19183_v60 }
 0xa94   :  { %v14012_v6 = vsel %vm2749_vm1, %v13927_v30, %v13965_v21  ;;  %15127 = vmatprep.mubr.bf16.mxu0 %v14090_v40  ;;  %v13967_v48 = vpop.permute.xlu1 %13966  ;;  %16877 = vmatprep.subr.bf16.mxu0 %v19186_v57 }
 0xa95   :  { %14026 = vst [vmem:[%s24999_s11 + $0x50] sm:$0xff] %v14012_v6  ;;  %v13980_v25 = vsel %vm2749_vm1, %v13965_v21, %v13967_v48  ;;  %14028 = vst.msk [vmem:[%s24999_s11 + $0x60] sm:$0xff] %vm919_vm0, %v13967_v48  ;;  %16856 = vmatpush3.bf16.msra.mxu1 %v19182_v11 }
 0xa96   :  { %14027 = vst [vmem:[%s24999_s11 + $0x58] sm:$0xff] %v13980_v25  ;;  %16857 = vmatprep.subr.bf16.mxu1 %v19184_v36 }
 0xa97   :  { %v13969_v5 = vpop.permute.xlu0 %13968  ;;  %16878 = vmatpush3.bf16.msra.mxu0 %v19186_v57 }
 0xa98   :  { %v14013_v42 = vsel %vm2749_vm1, %v13931_v12, %v13969_v5  ;;  %v13971_v29 = vpop.permute.xlu1 %13970 }
 0xa99   :  { %14039 = vst [vmem:[%s24999_s11 + $0xb8] sm:$0xff] %v14013_v42  ;;  %v13981_v37 = vsel %vm2749_vm1, %v13969_v5, %v13971_v29  ;;  %14041 = vst.msk [vmem:[%s24999_s11 + $0xc8] sm:$0xff] %vm919_vm0, %v13971_v29  ;;  %v14080_v61 = vpack.c.bf16 %v13971_v29, %v13967_v48  ;;  %16858 = vmatpush3.bf16.msra.mxu1 %v19185_v20  ;;  %v14078_v63 = vpack.c.bf16 %v14013_v42, %v14012_v6 }
 0xa9a   :  { %14040 = vst [vmem:[%s24999_s11 + $0xc0] sm:$0xff] %v13981_v37  ;;  %15128 = vmatmul.mubr.bf16.gmra.mrb[12].mxu0 %v14089_v55  ;;  %v14079_v52 = vpack.c.bf16 %v13981_v37, %v13980_v25 }
 0xa9b   :  { %16879 = vmatprep.mubr.msk.bf16.mxu0 %vm919_vm0, %v14080_v61  ;;  %v13973_v10 = vpop.permute.xlu0 %13972 }
 0xa9c   :  { %v14014_v59 = vsel %vm2749_vm1, %v13935_v41, %v13973_v10  ;;  %15168 = vmatprep.mubr.bf16.mxu1 %v14079_v52  ;;  %v13975_v28 = vpop.permute.xlu1 %13974 }
 0xa9d   :  { %14052 = vst [vmem:[%s24999_s11 + $0x120] sm:$0xff] %v14014_v59  ;;  %v13982_v26 = vsel %vm2749_vm1, %v13973_v10, %v13975_v28  ;;  %14054 = vst.msk [vmem:[%s24999_s11 + $0x130] sm:$0xff] %vm919_vm0, %v13975_v28  ;;  %15169 = vmatmul.mubr.bf16.vlgmr.msra.gmra.mrb[8].mxu1 %v14078_v63 }
 0xa9e   :  { %14053 = vst [vmem:[%s24999_s11 + $0x128] sm:$0xff] %v13982_v26 }
 0xa9f   :  { %v13977_v1 = vpop.permute.xlu0 %13976 }
 0xaa0   :  { %v14015_v51 = vsel %vm2749_vm1, %v13939_v46, %v13977_v1  ;;  %v13979_v54 = vpop.permute.xlu1 %13978 }
 0xaa1   :  { %14065 = vst [vmem:[%s24999_s11 + $0x188] sm:$0xff] %v14015_v51  ;;  %v13983_v3 = vsel %vm2749_vm1, %v13977_v1, %v13979_v54  ;;  %14067 = vst.msk [vmem:[%s24999_s11 + $0x198] sm:$0xff] %vm919_vm0, %v13979_v54  ;;  %v14093_v16 = vpack.c.bf16 %v13979_v54, %v13975_v28  ;;  %v14091_v22 = vpack.c.bf16 %v14015_v51, %v14014_v59 }
 0xaa2   :  { %14066 = vst [vmem:[%s24999_s11 + $0x190] sm:$0xff] %v13983_v3  ;;  %v14092_v31 = vpack.c.bf16 %v13983_v3, %v13982_v26 }
 0xaa3   :  { %16880 = vmatmul.mubr.msk.bf16.vlgmr.msra.gmra.mrb[16].mxu0 %vm919_vm0, %v14093_v16 }
 0xaa4   :  { %15176 = vmatprep.mubr.bf16.mxu1 %v14092_v31 }
 0xaa5   :  { %15177 = vmatmul.mubr.bf16.gmra.mrb[12].mxu1 %v14091_v22 }
 0xb1f   :  { %v16719_v13 = vpop.f32.mrb[248].mxu0 }
 0xb20   :  { %v16720_v39 = vpop.f32.mrb[249].mxu0 }
 0xb21   :  { %v16721_v43 = vadd.f32 %v16720_v39, %v16719_v13  ;;  %v16722_v7 = vpop.f32.mrb[250].mxu0 }
 0xb22   :  { %v16723_v23 = vpop.f32.mrb[251].mxu0 }
 0xb23   :  { %v16724_v27 = vadd.f32 %v16723_v23, %v16722_v7  ;;  %v14926_v30 = vadd.f32 %v16721_v43, %v16602_v33 }
 0xb25   :  { %v14929_v0 = vadd.f32 %v16724_v27, %v16602_v33 }
 0xb2d   :  { %v16747_v14 = vpop.f32.mrb[248].mxu1 }
 0xb2e   :  { %v16748_v56 = vpop.f32.mrb[249].mxu1 }
 0xb2f   :  { %v16749_v18 = vadd.f32 %v16748_v56, %v16747_v14  ;;  %v16750_v38 = vpop.f32.mrb[250].mxu1 }
 0xb30   :  { %v16751_v15 = vpop.f32.mrb[251].mxu1 }
 0xb31   :  { %v14975_v19 = vadd.f32 %v16749_v18, %v14926_v30  ;;  %v16752_v2 = vadd.f32 %v16751_v15, %v16750_v38  ;;  %v16725_v35 = vpop.f32.mrb[252].mxu0 }
 0xb32   :  { %v16726_v12 = vpop.f32.mrb[253].mxu0 }
 0xb33   :  { %v14978_v34 = vadd.f32 %v16752_v2, %v14929_v0  ;;  %v16727_v24 = vadd.f32 %v16726_v12, %v16725_v35  ;;  %v16728_v47 = vpop.f32.mrb[254].mxu0 }
 0xb34   :  { %v16729_v45 = vpop.f32.mrb[255].mxu0 }
 0xb35   :  { %v16730_v17 = vadd.f32 %v16729_v45, %v16728_v47  ;;  %v14934_v53 = vadd.f32 %v16727_v24, %v16602_v33 }
 0xb37   :  { %v14937_v32 = vadd.f32 %v16730_v17, %v16602_v33 }
 0xb3d   :  { %v16753_v4 = vpop.f32.mrb[252].mxu1 }
 0xb3e   :  { %v16754_v49 = vpop.f32.mrb[253].mxu1 }
 0xb3f   :  { %v16755_v50 = vadd.f32 %v16754_v49, %v16753_v4  ;;  %v16756_v41 = vpop.f32.mrb[254].mxu1 }
 0xb40   :  { %v16757_v60 = vpop.f32.mrb[255].mxu1 }
 0xb41   :  { %v14983_v58 = vadd.f32 %v16755_v50, %v14934_v53  ;;  %v16758_v8 = vadd.f32 %v16757_v60, %v16756_v41 }
 0xb43   :  { %v14986_v62 = vadd.f32 %v16758_v8, %v14937_v32 }
 0xb45   :  { %v16775_v44 = vpop.f32.mrb[0].mxu0 }
 0xb46   :  { %v16776_v46 = vpop.f32.mrb[1].mxu0 }
 0xb47   :  { %v16777_v57 = vadd.f32 %v16776_v46, %v16775_v44  ;;  %v16778_v55 = vpop.f32.mrb[2].mxu0 }
 0xb48   :  { %v16779_v9 = vpop.f32.mrb[3].mxu0 }
 0xb49   :  { %v15024_v11 = vadd.f32 %v16777_v57, %v14975_v19  ;;  %v16780_v40 = vadd.f32 %v16779_v9, %v16778_v55 }
 0xb4b   :  { %v15027_v36 = vadd.f32 %v16780_v40, %v14978_v34 }
 0xb4d   :  { %v16803_v21 = vpop.f32.mrb[0].mxu1  ;;  %v16781_v6 = vpop.f32.mrb[4].mxu0 }
 0xb4e   :  { %v16804_v48 = vpop.f32.mrb[1].mxu1  ;;  %v16782_v25 = vpop.f32.mrb[5].mxu0 }
 0xb4f   :  { %v16805_v20 = vadd.f32 %v16804_v48, %v16803_v21  ;;  %v16783_v5 = vadd.f32 %v16782_v25, %v16781_v6  ;;  %v16806_v42 = vpop.f32.mrb[2].mxu1  ;;  %v16784_v29 = vpop.f32.mrb[6].mxu0 }
 0xb50   :  { %v16807_v37 = vpop.f32.mrb[3].mxu1  ;;  %v16785_v61 = vpop.f32.mrb[7].mxu0 }
 0xb51   :  { %v15073_v52 = vadd.f32 %v16805_v20, %v15024_v11  ;;  %v15032_v63 = vadd.f32 %v16783_v5, %v14983_v58  ;;  %v16808_v10 = vadd.f32 %v16807_v37, %v16806_v42  ;;  %v16786_v59 = vadd.f32 %v16785_v61, %v16784_v29 }
 0xb53   :  { %v15076_v28 = vadd.f32 %v16808_v10, %v15027_v36  ;;  %v15035_v26 = vadd.f32 %v16786_v59, %v14986_v62 }
 0xb55   :  { %v16809_v1 = vpop.f32.mrb[4].mxu1 }
 0xb56   :  { %v16810_v51 = vpop.f32.mrb[5].mxu1 }
 0xb57   :  { %v16811_v54 = vadd.f32 %v16810_v51, %v16809_v1  ;;  %v16812_v3 = vpop.f32.mrb[6].mxu1 }
 0xb58   :  { %v16813_v16 = vpop.f32.mrb[7].mxu1 }
 0xb59   :  { %v15081_v31 = vadd.f32 %v16811_v54, %v15032_v63  ;;  %v16814_v22 = vadd.f32 %v16813_v16, %v16812_v3 }
 0xb5b   :  { %v15084_v13 = vadd.f32 %v16814_v22, %v15035_v26 }
 0xb65   :  { %v16831_v39 = vpop.f32.mrb[8].mxu0 }
 0xb66   :  { %v16832_v43 = vpop.f32.mrb[9].mxu0 }
 0xb67   :  { %v16833_v7 = vadd.f32 %v16832_v43, %v16831_v39  ;;  %v16834_v23 = vpop.f32.mrb[10].mxu0 }
 0xb68   :  { %v16835_v27 = vpop.f32.mrb[11].mxu0 }
 0xb69   :  { %v15122_v33 = vadd.f32 %v16833_v7, %v15073_v52  ;;  %v16836_v14 = vadd.f32 %v16835_v27, %v16834_v23 }
 0xb6b   :  { %v15125_v56 = vadd.f32 %v16836_v14, %v15076_v28 }
 0xb6d   :  { %v16837_v30 = vpop.f32.mrb[12].mxu0 }
 0xb6e   :  { %v16838_v18 = vpop.f32.mrb[13].mxu0 }
 0xb6f   :  { %v16839_v38 = vadd.f32 %v16838_v18, %v16837_v30  ;;  %v16840_v15 = vpop.f32.mrb[14].mxu0 }
 0xb70   :  { %v16841_v0 = vpop.f32.mrb[15].mxu0  ;;  %v16859_v19 = vpop.f32.mrb[8].mxu1 }
 0xb71   :  { %v15130_v2 = vadd.f32 %v16839_v38, %v15081_v31  ;;  %v16842_v35 = vadd.f32 %v16841_v0, %v16840_v15  ;;  %v16860_v12 = vpop.f32.mrb[9].mxu1 }
 0xb72   :  { %v16861_v34 = vadd.f32 %v16860_v12, %v16859_v19  ;;  %v16862_v24 = vpop.f32.mrb[10].mxu1 }
 0xb73   :  { %v15133_v47 = vadd.f32 %v16842_v35, %v15084_v13  ;;  %v16863_v45 = vpop.f32.mrb[11].mxu1 }
 0xb74   :  { %v16864_v17 = vadd.f32 %v16863_v45, %v16862_v24  ;;  %v15171_v4 = vadd.f32 %v16861_v34, %v15122_v33 }
 0xb76   :  { %v16881_v49 = vpop.f32.mrb[16].mxu0  ;;  %v15174_v53 = vadd.f32 %v16864_v17, %v15125_v56 }
 0xb77   :  { %v15219_v50 = vpop.f32.mrb[17].mxu0 }
 0xb78   :  { %v15220_v41 = vadd.f32 %v15219_v50, %v15171_v4  ;;  %v16865_v60 = vpop.f32.mrb[12].mxu1  ;;  %v16882_v32 = vpop.f32.mrb[18].mxu0 }
 0xb79   :  { %v16866_v58 = vpop.f32.mrb[13].mxu1  ;;  %v15222_v8 = vpop.f32.mrb[19].mxu0 }
 0xb7a   :  { %15234 = vst [vmem:[%s25001_s12] sm:$0xff] %v15220_v41  ;;  %v16867_v62 = vadd.f32 %v16866_v58, %v16865_v60  ;;  %v15223_v44 = vadd.f32 %v15222_v8, %v15174_v53  ;;  %v16868_v46 = vpop.f32.mrb[14].mxu1 }
 0xb7b   :  { %v16869_v57 = vpop.f32.mrb[15].mxu1 }
 0xb7c   :  { %v15179_v55 = vadd.f32 %v16867_v62, %v15130_v2  ;;  %15235 = vst [vmem:[%s25001_s12 + $0x8] sm:$0xff] %v15223_v44  ;;  %v16870_v9 = vadd.f32 %v16869_v57, %v16868_v46 }
 0xb7e   :  { %v15228_v11 = vadd.f32 %v16881_v49, %v15179_v55  ;;  %v15182_v40 = vadd.f32 %v16870_v9, %v15133_v47 }
 0xb80   :  { %15236 = vst [vmem:[%s25001_s12 + $0x10] sm:$0xff] %v15228_v11  ;;  %v15231_v36 = vadd.f32 %v16882_v32, %v15182_v40 }
 0xb82   :  { %15237 = vst [vmem:[%s25001_s12 + $0x18] sm:$0xff] %v15231_v36 }

</bundles_post_ra>
